<compile_context>
chip_gen: v6e
topology: v6e:2x2x1
jax: 0.10.0
libtpu: 0.0.40
codegen_flags: <defaults>
</compile_context>

<pallas_src>
import functools
import math

import jax
import jax.numpy as jnp
from jax.experimental import pallas as pl
from jax.experimental.pallas import tpu as pltpu

LN_EPS = 1e-5   # TODO(synk): confirm LayerNorm eps of the reference ConformerEncoder.
BN_EPS = 1e-5   # PyTorch BatchNorm1d default.


def _round_up(x, m):
    return ((x + m - 1) // m) * m


def _layernorm(xv, g, b, eps=LN_EPS):
    """In-kernel LayerNorm on a loaded (T, D) f32 value."""
    mean = jnp.mean(xv, axis=-1, keepdims=True)
    var = jnp.mean((xv - mean) ** 2, axis=-1, keepdims=True)
    return (xv - mean) * jax.lax.rsqrt(var + eps) * g + b


# -----------------------------------------------------------------------------
# Front-end (one-time) fused matmul kernel, tiled over rows.
# -----------------------------------------------------------------------------

def linear(x, w, b, act=None, scale_out=None, tile_m=256):
    """y = scale_out * act(x @ w + b).  Row-tiled; bf16 matmul, f32 accumulation.
    Only used by the one-time Conv2dSubsampling2 front-end."""
    M, K = x.shape
    N = w.shape[1]
    tm = min(tile_m, _round_up(M, 8))
    Mp = _round_up(M, tm)
    if Mp != M:
        x = jnp.pad(x, ((0, Mp - M), (0, 0)))

    def kernel(x_ref, w_ref, b_ref, o_ref):
        y = jnp.dot(x_ref[...].astype(jnp.bfloat16), w_ref[...],
                    preferred_element_type=jnp.float32) + b_ref[...]
        if act == "relu":
            y = jnp.maximum(y, 0.0)
        if scale_out is not None:
            y = y * scale_out
        o_ref[...] = y.astype(o_ref.dtype)

    out = pl.pallas_call(
        kernel,
        out_shape=jax.ShapeDtypeStruct((Mp, N), jnp.float32),
        grid=(Mp // tm,),
        in_specs=[pl.BlockSpec((tm, K), lambda i: (i, 0)),
                  pl.BlockSpec((K, N), lambda i: (0, 0)),
                  pl.BlockSpec((1, N), lambda i: (0, 0))],
        out_specs=pl.BlockSpec((tm, N), lambda i: (i, 0)),
        compiler_params=pltpu.CompilerParams(dimension_semantics=("parallel",)),
    )(x, w, b.reshape(1, N))
    return out[:M]


# -----------------------------------------------------------------------------
# Fused per-block encoder kernel (grid over batch, "parallel").
# -----------------------------------------------------------------------------

def conformer_block(x, p_h, bp, heads):
    """One full conformer encoder block in a single Pallas kernel per batch row:
    macaron-FFN -> rel-pos MHSA -> conv module -> FFN -> final LayerNorm.
    bf16 MXU matmuls / f32 accumulation; f32 elementwise statistics."""
    B, T, D = x.shape
    H = heads
    dk = D // H
    Kc = bp["dw_w"].shape[0]
    pad = (Kc - 1) // 2
    pad_al = ((pad + 7) // 8) * 8           # 8-aligned interior offset in the scratch
    off = pad_al - pad
    Tp = T + 2 * pad_al
    tail0 = (pad_al + T) // 8 * 8           # aligned start of the trailing pad zeroing
    scale = 1.0 / math.sqrt(dk)
    f32, bf16 = jnp.float32, jnp.bfloat16

    def kernel(x_ref, p_ref,
               g_f1, b_f1, w_f1a, b_f1a, w_f1b, b_f1b,
               g_at, b_at, w_qkv, b_qkv, b_u, b_v, w_o, b_o,
               g_cv, b_cv, w_p1, b_p1, w_dw, b_dw, w_p2, b_p2,
               g_f2, b_f2, w_f2a, b_f2a, w_f2b, b_f2b, g_fin, b_fin,
               o_ref, hp_ref):

        def ffn(xv, g_r, b_r, w1_r, b1_r, w2_r, b2_r):
            y = _layernorm(xv, g_r[...], b_r[...]).astype(bf16)
            hh = jnp.dot(y, w1_r[...], preferred_element_type=f32) + b1_r[...]
            hh = hh * jax.nn.sigmoid(hh)                       # swish (f32)
            return jnp.dot(hh.astype(bf16), w2_r[...],
                           preferred_element_type=f32) + b2_r[...]

        xv = x_ref[0].astype(f32)                              # (T, D)

        # ----- macaron feed-forward: x + 0.5 * FFN(LN(x)) --------------------
        xv = xv + 0.5 * ffn(xv, g_f1, b_f1, w_f1a, b_f1a, w_f1b, b_f1b)

        # ----- relative-position multi-head self-attention -------------------
        y_at = _layernorm(xv, g_at[...], b_at[...]).astype(bf16)    # (T, D)
        dn = (((1,), (1,)), ((), ()))                               # A @ B.T

        def head_body(h, acc):
            # Per-head QKV projection: weights are stored per head, so no
            # non-128-aligned lane slicing of a (T, 3D) activation is needed.
            qkv = jnp.dot(y_at, w_qkv[h], preferred_element_type=f32) + b_qkv[h]
            q = qkv[:, :dk]                                          # f32
            k = qkv[:, dk:2 * dk].astype(bf16)
            v = qkv[:, 2 * dk:3 * dk].astype(bf16)
            q_u = (q + b_u[h]).astype(bf16)
            q_v = (q + b_v[h]).astype(bf16)
            ac = jax.lax.dot_general(q_u, k, dn, preferred_element_type=f32)
            bd = jax.lax.dot_general(q_v, p_ref[h], dn, preferred_element_type=f32)
            s = (ac + bd) * scale
            s = s - jnp.max(s, axis=-1, keepdims=True)
            e = jnp.exp(s)
            probs = e * pl.reciprocal(jnp.sum(e, axis=-1, keepdims=True),
                                      approx=True)
            o_h = jnp.dot(probs.astype(bf16), v, preferred_element_type=f32)
            # concat_h(o_h) @ W_out == sum_h o_h @ W_out[h]
            # TODO(synk): on v6e/v7x, write o_h into the lane slice of a (T, D)
            #             scratch and do one K=D output-projection matmul instead.
            return acc + jnp.dot(o_h.astype(bf16), w_o[h],
                                 preferred_element_type=f32)

        attn = jax.lax.fori_loop(0, H, head_body, jnp.zeros((T, D), f32))
        xv = xv + attn + b_o[...]

        # ----- convolution module ---------------------------------------------
        y_cv = _layernorm(xv, g_cv[...], b_cv[...]).astype(bf16)
        ag = jnp.dot(y_cv, w_p1[...], preferred_element_type=f32) + b_p1[...]
        hglu = ag[:, :D] * jax.nn.sigmoid(ag[:, D:])       # pointwise_conv1 + GLU
        # zero only the two pad regions of the scratch, then write the interior
        hp_ref[0:pad_al, :] = jnp.zeros((pad_al, D), f32)
        hp_ref[tail0:Tp, :] = jnp.zeros((Tp - tail0, D), f32)
        hp_ref[pad_al:pad_al + T, :] = hglu
        w_tap = w_dw[...]                                  # (Kc, D), eval-BN folded in
        acc = jnp.zeros((T, D), f32)
        # TODO(synk): at production T move the taps onto the XLU with pltpu.roll
        #             instead of Kc sublane-shifted VMEM loads.
        for kk in range(Kc):                               # static unroll, small Kc
            acc = acc + hp_ref[off + kk:off + kk + T, :] * w_tap[kk:kk + 1, :]
        acc = acc + b_dw[...]                    # depthwise bias + BN affine (folded)
        acc = acc * jax.nn.sigmoid(acc)          # swish
        xv = xv + jnp.dot(acc.astype(bf16), w_p2[...],
                          preferred_element_type=f32) + b_p2[...]

        # ----- feed-forward + final LayerNorm ---------------------------------
        xv = xv + 0.5 * ffn(xv, g_f2, b_f2, w_f2a, b_f2a, w_f2b, b_f2b)
        o_ref[0] = _layernorm(xv, g_fin[...], b_fin[...]).astype(o_ref.dtype)

    def cst(a):
        nd = a.ndim
        return pl.BlockSpec(a.shape, lambda i, _n=nd: (0,) * _n)

    weights = [
        bp["ln_ffm_g"], bp["ln_ffm_b"], bp["ffm_w1"], bp["ffm_b1"],
        bp["ffm_w2"], bp["ffm_b2"],
        bp["ln_mha_g"], bp["ln_mha_b"], bp["qkv_w"], bp["qkv_b"],
        bp["bias_u"], bp["bias_v"], bp["out_w"], bp["out_b"],
        bp["ln_conv_g"], bp["ln_conv_b"], bp["pw1_w"], bp["pw1_b"],
        bp["dw_w"], bp["dw_b"], bp["pw2_w"], bp["pw2_b"],
        bp["ln_ff_g"], bp["ln_ff_b"], bp["ff_w1"], bp["ff_b1"],
        bp["ff_w2"], bp["ff_b2"], bp["ln_fin_g"], bp["ln_fin_b"],
    ]
    return pl.pallas_call(
        kernel,
        out_shape=jax.ShapeDtypeStruct((B, T, D), jnp.float32),
        grid=(B,),
        in_specs=[pl.BlockSpec((1, T, D), lambda i: (i, 0, 0)), cst(p_h)]
                 + [cst(w) for w in weights],
        out_specs=pl.BlockSpec((1, T, D), lambda i: (i, 0, 0)),
        scratch_shapes=[pltpu.VMEM((Tp, D), jnp.float32)],
        compiler_params=pltpu.CompilerParams(
            dimension_semantics=("parallel",),
            vmem_limit_bytes=64 * 1024 * 1024),
    )(x, p_h, *weights)


def pos_proj_all(pos_emb, pos_w_all):
    """Project pos_emb by every block's linear_pos (bias-free) in one call."""
    NB, D, _ = pos_w_all.shape
    T = pos_emb.shape[0]

    def kernel(pe_ref, w_ref, o_ref):
        o_ref[0] = jnp.dot(pe_ref[...].astype(jnp.bfloat16), w_ref[0],
                           preferred_element_type=jnp.float32).astype(o_ref.dtype)

    return pl.pallas_call(
        kernel,
        out_shape=jax.ShapeDtypeStruct((NB, T, D), jnp.float32),
        grid=(NB,),
        in_specs=[pl.BlockSpec((T, D), lambda i: (0, 0)),
                  pl.BlockSpec((1, D, D), lambda i: (i, 0, 0))],
        out_specs=pl.BlockSpec((1, T, D), lambda i: (i, 0, 0)),
        compiler_params=pltpu.CompilerParams(dimension_semantics=("parallel",)),
    )(pos_emb, pos_w_all)


# -----------------------------------------------------------------------------
# Glue (im2col, positional encoding, parameter plumbing) — plain JAX.
# -----------------------------------------------------------------------------

def conv2d_relu_im2col(x, w, b, stride):
    """Conv2d(k=3) + ReLU via a 9-slice im2col + row-tiled Pallas matmul.
    x:(B,Cin,H,W)  w:(Cout,Cin,3,3) bf16  b:(Cout,)  ->  (B,Cout,Ho,Wo).
    TODO(synk): fuse the patch extraction into the kernel for production shapes."""
    B, Cin, H, W = x.shape
    Cout, _, kh, kw = w.shape
    Ho = (H - kh) // stride + 1
    Wo = (W - kw) // stride + 1
    patches = []
    for i in range(kh):
        for j in range(kw):
            patch = jax.lax.slice(
                x, (0, 0, i, j),
                (B, Cin, i + stride * (Ho - 1) + 1, j + stride * (Wo - 1) + 1),
                (1, 1, stride, stride))                       # (B,Cin,Ho,Wo)
            patches.append(patch)
    col = jnp.stack(patches, axis=-1)                         # (B,Cin,Ho,Wo,9)
    col = col.transpose(0, 2, 3, 1, 4).reshape(B * Ho * Wo, Cin * kh * kw)
    w2 = w.reshape(Cout, Cin * kh * kw).T                     # (Cin*9, Cout) bf16
    y = linear(col, w2, b, act="relu")                        # fused matmul + relu
    return y.reshape(B, Ho, Wo, Cout).transpose(0, 3, 1, 2)


def sinusoid_pe(T, d):
    pos = jnp.arange(T, dtype=jnp.float32)[:, None]
    div = jnp.exp(jnp.arange(0, d, 2, dtype=jnp.float32) * (-math.log(10000.0) / d))
    pe = jnp.zeros((T, d), jnp.float32)
    pe = pe.at[:, 0::2].set(jnp.sin(pos * div))
    pe = pe.at[:, 1::2].set(jnp.cos(pos * div))
    return pe


def subsampling(params, x, d_model):
    """Conv2dSubsampling2: x (B,T,F) -> (B, (T-1)//2 - 2, d_model), already
    scaled by sqrt(d_model) (RelPositionalEncoding xscale folded in)."""
    B, T, F = x.shape
    h = x[:, None, :, :]                                              # (B,1,T,F)
    h = conv2d_relu_im2col(h, params["conv1_w"], params["conv1_b"], stride=2)
    h = conv2d_relu_im2col(h, params["conv2_w"], params["conv2_b"], stride=1)
    _, C, T1, F1 = h.shape
    h = h.transpose(0, 2, 1, 3).reshape(B * T1, C * F1)
    h = linear(h, params["sub_out_w"], params["sub_out_b"],
               scale_out=math.sqrt(d_model))
    return h.reshape(B, T1, d_model)


def conformer_forward(params, feat, *, heads):
    """feat: (B, n_mels, T)  ->  (B, num_blocks*d_model, (T-1)//2 - 2)."""
    x = jnp.transpose(feat, (0, 2, 1))          # feat.transpose(1,2) -> (B,T,F)
    # lens = full length -> all masks true -> masking omitted everywhere.
    d_model = params["sub_out_w"].shape[1]
    x = subsampling(params, x, d_model)         # (B, T', d), already * sqrt(d)
    B, T1, d = x.shape
    dk = d // heads
    NB = len(params["blocks"])
    pos_emb = sinusoid_pe(T1, d)                # (T', d)
    pos_w_all = jnp.stack([bp["pos_w"] for bp in params["blocks"]], axis=0)
    p_all = pos_proj_all(pos_emb, pos_w_all)    # (NB, T', d) f32
    # per-head layout (NB, H, T', dk) in bf16 for the fused block kernel
    p_all = p_all.reshape(NB, T1, heads, dk).transpose(0, 2, 1, 3).astype(jnp.bfloat16)
    outs = []
    for i, bp in enumerate(params["blocks"]):
        x = conformer_block(x, p_all[i], bp, heads)
        outs.append(x)
    xs = jnp.concatenate(outs, axis=-1)         # conformer_cat: concat block outs
    return jnp.transpose(xs, (0, 2, 1))         # x.permute(0, 2, 1)


# -----------------------------------------------------------------------------
# Parameter initialization (math layout, f32) + kernel-layout preparation
# (bf16 weights, per-head QKV/out layouts, eval-mode BatchNorm folded into the
#  depthwise conv).  PyTorch Linear stores (out,in) and does x@W.T; we store
#  (in,out) directly, with Q|K|V and the GLU a|gate weights pre-concatenated.
# -----------------------------------------------------------------------------

def init_params(key, n_mels, d_model, num_blocks, heads, dff, cnn_kernel):
    keys = iter(jax.random.split(key, 4096))
    nrm = lambda shape, s=0.05: jax.random.normal(next(keys), shape, jnp.float32) * s
    zeros = lambda n: jnp.zeros((n,), jnp.float32)
    ones = lambda n: jnp.ones((n,), jnp.float32)
    dk = d_model // heads
    f_sub = (n_mels - 1) // 2 - 2

    p = {
        "conv1_w": nrm((d_model, 1, 3, 3)), "conv1_b": zeros(d_model),
        "conv2_w": nrm((d_model, d_model, 3, 3)), "conv2_b": zeros(d_model),
        "sub_out_w": nrm((d_model * f_sub, d_model)), "sub_out_b": zeros(d_model),
        "blocks": [],
    }
    for _ in range(num_blocks):
        bp = {
            "ln_ffm_g": ones(d_model), "ln_ffm_b": zeros(d_model),
            "ffm_w1": nrm((d_model, dff)), "ffm_b1": zeros(dff),
            "ffm_w2": nrm((dff, d_model)), "ffm_b2": zeros(d_model),
            "ln_mha_g": ones(d_model), "ln_mha_b": zeros(d_model),
            "qkv_w": nrm((d_model, 3 * d_model)), "qkv_b": zeros(3 * d_model),
            "out_w": nrm((d_model, d_model)), "out_b": zeros(d_model),
            "pos_w": nrm((d_model, d_model)),               # linear_pos: no bias
            "bias_u": nrm((heads, dk)), "bias_v": nrm((heads, dk)),
            "ln_conv_g": ones(d_model), "ln_conv_b": zeros(d_model),
            "pw1_w": nrm((d_model, 2 * d_model)), "pw1_b": zeros(2 * d_model),
            "dw_w": nrm((cnn_kernel, d_model)), "dw_b": zeros(d_model),
            "bn_rm": zeros(d_model), "bn_rv": ones(d_model),
            "bn_g": ones(d_model), "bn_b": zeros(d_model),
            "pw2_w": nrm((d_model, d_model)), "pw2_b": zeros(d_model),
            "ln_ff_g": ones(d_model), "ln_ff_b": zeros(d_model),
            "ff_w1": nrm((d_model, dff)), "ff_b1": zeros(dff),
            "ff_w2": nrm((dff, d_model)), "ff_b2": zeros(d_model),
            "ln_fin_g": ones(d_model), "ln_fin_b": zeros(d_model),
        }
        p["blocks"].append(bp)
    return p


def prepare_params(p, heads):
    """Math-layout f32 params -> kernel layout: bf16 matmul weights, per-head
    QKV / output-projection layouts, eval-mode BatchNorm folded into the
    depthwise conv, biases pre-reshaped to (1, n)."""
    bf16 = jnp.bfloat16
    r2 = lambda v: v.reshape(1, -1).astype(jnp.float32)
    D = p["sub_out_w"].shape[1]
    dk = D // heads

    def perh_cols(m):                       # (D, D) -> (H, D, dk)
        return m.reshape(D, heads, dk).transpose(1, 0, 2)

    out = {
        "conv1_w": p["conv1_w"].astype(bf16), "conv1_b": p["conv1_b"],
        "conv2_w": p["conv2_w"].astype(bf16), "conv2_b": p["conv2_b"],
        "sub_out_w": p["sub_out_w"].astype(bf16), "sub_out_b": p["sub_out_b"],
        "blocks": [],
    }
    for bp in p["blocks"]:
        q_w, k_w, v_w = jnp.split(bp["qkv_w"], 3, axis=1)
        qkv_w = jnp.concatenate([perh_cols(q_w), perh_cols(k_w), perh_cols(v_w)],
                                axis=-1).astype(bf16)               # (H, D, 3*dk)
        q_b, k_b, v_b = jnp.split(bp["qkv_b"], 3)
        qkv_b = jnp.concatenate([q_b.reshape(heads, 1, dk),
                                 k_b.reshape(heads, 1, dk),
                                 v_b.reshape(heads, 1, dk)], axis=-1)  # (H,1,3*dk)
        # fold eval-mode BatchNorm (running stats) into the depthwise conv
        bn_s = bp["bn_g"] * jax.lax.rsqrt(bp["bn_rv"] + BN_EPS)
        dw_w = bp["dw_w"] * bn_s[None, :]
        dw_b = (bp["dw_b"] - bp["bn_rm"]) * bn_s + bp["bn_b"]
        out["blocks"].append({
            "ln_ffm_g": r2(bp["ln_ffm_g"]), "ln_ffm_b": r2(bp["ln_ffm_b"]),
            "ffm_w1": bp["ffm_w1"].astype(bf16), "ffm_b1": r2(bp["ffm_b1"]),
            "ffm_w2": bp["ffm_w2"].astype(bf16), "ffm_b2": r2(bp["ffm_b2"]),
            "ln_mha_g": r2(bp["ln_mha_g"]), "ln_mha_b": r2(bp["ln_mha_b"]),
            "qkv_w": qkv_w, "qkv_b": qkv_b,
            "bias_u": bp["bias_u"].reshape(heads, 1, dk),
            "bias_v": bp["bias_v"].reshape(heads, 1, dk),
            "out_w": bp["out_w"].reshape(heads, dk, D).astype(bf16),
            "out_b": r2(bp["out_b"]),
            "pos_w": bp["pos_w"].astype(bf16),
            "ln_conv_g": r2(bp["ln_conv_g"]), "ln_conv_b": r2(bp["ln_conv_b"]),
            "pw1_w": bp["pw1_w"].astype(bf16), "pw1_b": r2(bp["pw1_b"]),
            "dw_w": dw_w, "dw_b": r2(dw_b),
            "pw2_w": bp["pw2_w"].astype(bf16), "pw2_b": r2(bp["pw2_b"]),
            "ln_ff_g": r2(bp["ln_ff_g"]), "ln_ff_b": r2(bp["ln_ff_b"]),
            "ff_w1": bp["ff_w1"].astype(bf16), "ff_b1": r2(bp["ff_b1"]),
            "ff_w2": bp["ff_w2"].astype(bf16), "ff_b2": r2(bp["ff_b2"]),
            "ln_fin_g": r2(bp["ln_fin_g"]), "ln_fin_b": r2(bp["ln_fin_b"]),
        })
    return out


if __name__ == "__main__":
    # Small shapes consistent with the module:
    B, n_mels, T = 2, 16, 32
    d_model, num_blocks, heads, dff, cnn_kernel = 32, 2, 4, 64, 15

    key = jax.random.PRNGKey(0)
    pkey, xkey = jax.random.split(key)
    raw = init_params(pkey, n_mels, d_model, num_blocks, heads, dff, cnn_kernel)
    params = prepare_params(raw, heads)
    feat = jax.random.normal(xkey, (B, n_mels, T), jnp.float32)   # (B, n_mels, T)

    fwd = jax.jit(functools.partial(conformer_forward, heads=heads))
    out = fwd(params, feat)
    jax.block_until_ready(out)

    T1 = (T - 1) // 2 - 2
    assert out.shape == (B, num_blocks * d_model, T1), out.shape
    assert bool(jnp.all(jnp.isfinite(out)))
    print("KERNEL_OK")
</pallas_src>

<mosaic_0001>
module attributes {stable_mosaic.version = 11 : i64} {
  func.func @kernel(%arg0: i32, %arg1: memref<216x9xf32, #tpu.memory_space<vmem>>, %arg2: memref<9x32xbf16, #tpu.memory_space<vmem>>, %arg3: memref<1x32xf32, #tpu.memory_space<vmem>>, %arg4: memref<216x32xf32, #tpu.memory_space<vmem>>) attributes {dimension_semantics = [#tpu.dimension_semantics<parallel>], iteration_bounds = array<i64: 1>, scalar_prefetch = 0 : i64, scratch_operands = 0 : i64, tpu.core_type = #tpu.core_type<tc>, window_params = [{transform_indices = @transform_0, window_bounds = array<i64: 216, 9>}, {pipeline_mode = #tpu.pipeline_mode<synchronous>, transform_indices = @transform_1, window_bounds = array<i64: 9, 32>}, {pipeline_mode = #tpu.pipeline_mode<synchronous>, transform_indices = @transform_2, window_bounds = array<i64: 1, 32>}, {transform_indices = @transform_3, window_bounds = array<i64: 216, 32>}]} {
    %c0 = arith.constant 0 : index
    %c0_0 = arith.constant 0 : index
    %0 = vector.load %arg1[%c0, %c0_0] : memref<216x9xf32, #tpu.memory_space<vmem>>, vector<216x9xf32>
    %1 = arith.truncf %0 : vector<216x9xf32> to vector<216x9xbf16>
    %c0_1 = arith.constant 0 : index
    %c0_2 = arith.constant 0 : index
    %2 = vector.load %arg2[%c0_1, %c0_2] : memref<9x32xbf16, #tpu.memory_space<vmem>>, vector<9x32xbf16>
    %cst = arith.constant dense<0.000000e+00> : vector<216x32xf32>
    %3 = tpu.matmul %1, %2, %cst {dimension_numbers = #tpu.dot_dimension_numbers<[1], [0], [0], [1], [0, 0, 1, 1], [], []>} : vector<216x9xbf16>, vector<9x32xbf16>, vector<216x32xf32> -> vector<216x32xf32>
    %c0_3 = arith.constant 0 : index
    %c0_4 = arith.constant 0 : index
    %4 = vector.load %arg3[%c0_3, %c0_4] : memref<1x32xf32, #tpu.memory_space<vmem>>, vector<1x32xf32>
    %5 = vector.broadcast %4 : vector<1x32xf32> to vector<216x32xf32>
    %6 = arith.addf %3, %5 : vector<216x32xf32>
    %cst_5 = arith.constant 0.000000e+00 : f32
    %7 = vector.broadcast %cst_5 : f32 to vector<216x32xf32>
    %8 = arith.maximumf %6, %7 : vector<216x32xf32>
    %c0_6 = arith.constant 0 : index
    %c0_7 = arith.constant 0 : index
    %9 = vector.load %arg4[%c0_6, %c0_7] : memref<216x32xf32, #tpu.memory_space<vmem>>, vector<216x32xf32>
    tpu.vector_store %arg4[%c0_6, %c0_7], %8 {strides = array<i32>} : memref<216x32xf32, #tpu.memory_space<vmem>>, vector<216x32xf32>,
    return
  }
  func.func @transform_0(%arg0: i32) -> (i32, i32) {
    %c0_i32 = arith.constant 0 : i32
    %c0_i32_0 = arith.constant 0 : i32
    return %arg0, %c0_i32 : i32, i32
  }
  func.func @transform_1(%arg0: i32) -> (i32, i32) {
    %c0_i32 = arith.constant 0 : i32
    %c0_i32_0 = arith.constant 0 : i32
    %c0_i32_1 = arith.constant 0 : i32
    return %c0_i32, %c0_i32_0 : i32, i32
  }
  func.func @transform_2(%arg0: i32) -> (i32, i32) {
    %c0_i32 = arith.constant 0 : i32
    %c0_i32_0 = arith.constant 0 : i32
    %c0_i32_1 = arith.constant 0 : i32
    return %c0_i32, %c0_i32_0 : i32, i32
  }
  func.func @transform_3(%arg0: i32) -> (i32, i32) {
    %c0_i32 = arith.constant 0 : i32
    %c0_i32_0 = arith.constant 0 : i32
    return %arg0, %c0_i32 : i32, i32
  }
}

module attributes {stable_mosaic.version = 11 : i64} {
  func.func @kernel(%arg0: i32, %arg1: memref<136x288xf32, #tpu.memory_space<vmem>>, %arg2: memref<288x32xbf16, #tpu.memory_space<vmem>>, %arg3: memref<1x32xf32, #tpu.memory_space<vmem>>, %arg4: memref<136x32xf32, #tpu.memory_space<vmem>>) attributes {dimension_semantics = [#tpu.dimension_semantics<parallel>], iteration_bounds = array<i64: 1>, scalar_prefetch = 0 : i64, scratch_operands = 0 : i64, tpu.core_type = #tpu.core_type<tc>, window_params = [{transform_indices = @transform_0, window_bounds = array<i64: 136, 288>}, {pipeline_mode = #tpu.pipeline_mode<synchronous>, transform_indices = @transform_1, window_bounds = array<i64: 288, 32>}, {pipeline_mode = #tpu.pipeline_mode<synchronous>, transform_indices = @transform_2, window_bounds = array<i64: 1, 32>}, {transform_indices = @transform_3, window_bounds = array<i64: 136, 32>}]} {
    %c0 = arith.constant 0 : index
    %c0_0 = arith.constant 0 : index
    %0 = vector.load %arg1[%c0, %c0_0] : memref<136x288xf32, #tpu.memory_space<vmem>>, vector<136x288xf32>
    %1 = arith.truncf %0 : vector<136x288xf32> to vector<136x288xbf16>
    %c0_1 = arith.constant 0 : index
    %c0_2 = arith.constant 0 : index
    %2 = vector.load %arg2[%c0_1, %c0_2] : memref<288x32xbf16, #tpu.memory_space<vmem>>, vector<288x32xbf16>
    %cst = arith.constant dense<0.000000e+00> : vector<136x32xf32>
    %3 = tpu.matmul %1, %2, %cst {dimension_numbers = #tpu.dot_dimension_numbers<[1], [0], [0], [1], [0, 0, 1, 1], [], []>} : vector<136x288xbf16>, vector<288x32xbf16>, vector<136x32xf32> -> vector<136x32xf32>
    %c0_3 = arith.constant 0 : index
    %c0_4 = arith.constant 0 : index
    %4 = vector.load %arg3[%c0_3, %c0_4] : memref<1x32xf32, #tpu.memory_space<vmem>>, vector<1x32xf32>
    %5 = vector.broadcast %4 : vector<1x32xf32> to vector<136x32xf32>
    %6 = arith.addf %3, %5 : vector<136x32xf32>
    %cst_5 = arith.constant 0.000000e+00 : f32
    %7 = vector.broadcast %cst_5 : f32 to vector<136x32xf32>
    %8 = arith.maximumf %6, %7 : vector<136x32xf32>
    %c0_6 = arith.constant 0 : index
    %c0_7 = arith.constant 0 : index
    %9 = vector.load %arg4[%c0_6, %c0_7] : memref<136x32xf32, #tpu.memory_space<vmem>>, vector<136x32xf32>
    tpu.vector_store %arg4[%c0_6, %c0_7], %8 {strides = array<i32>} : memref<136x32xf32, #tpu.memory_space<vmem>>, vector<136x32xf32>,
    return
  }
  func.func @transform_0(%arg0: i32) -> (i32, i32) {
    %c0_i32 = arith.constant 0 : i32
    %c0_i32_0 = arith.constant 0 : i32
    return %arg0, %c0_i32 : i32, i32
  }
  func.func @transform_1(%arg0: i32) -> (i32, i32) {
    %c0_i32 = arith.constant 0 : i32
    %c0_i32_0 = arith.constant 0 : i32
    %c0_i32_1 = arith.constant 0 : i32
    return %c0_i32, %c0_i32_0 : i32, i32
  }
  func.func @transform_2(%arg0: i32) -> (i32, i32) {
    %c0_i32 = arith.constant 0 : i32
    %c0_i32_0 = arith.constant 0 : i32
    %c0_i32_1 = arith.constant 0 : i32
    return %c0_i32, %c0_i32_0 : i32, i32
  }
  func.func @transform_3(%arg0: i32) -> (i32, i32) {
    %c0_i32 = arith.constant 0 : i32
    %c0_i32_0 = arith.constant 0 : i32
    return %arg0, %c0_i32 : i32, i32
  }
}

module attributes {stable_mosaic.version = 11 : i64} {
  func.func @kernel(%arg0: i32, %arg1: memref<32x160xf32, #tpu.memory_space<vmem>>, %arg2: memref<160x32xbf16, #tpu.memory_space<vmem>>, %arg3: memref<1x32xf32, #tpu.memory_space<vmem>>, %arg4: memref<32x32xf32, #tpu.memory_space<vmem>>) attributes {dimension_semantics = [#tpu.dimension_semantics<parallel>], iteration_bounds = array<i64: 1>, scalar_prefetch = 0 : i64, scratch_operands = 0 : i64, tpu.core_type = #tpu.core_type<tc>, window_params = [{transform_indices = @transform_0, window_bounds = array<i64: 32, 160>}, {pipeline_mode = #tpu.pipeline_mode<synchronous>, transform_indices = @transform_1, window_bounds = array<i64: 160, 32>}, {pipeline_mode = #tpu.pipeline_mode<synchronous>, transform_indices = @transform_2, window_bounds = array<i64: 1, 32>}, {transform_indices = @transform_3, window_bounds = array<i64: 32, 32>}]} {
    %c0 = arith.constant 0 : index
    %c0_0 = arith.constant 0 : index
    %0 = vector.load %arg1[%c0, %c0_0] : memref<32x160xf32, #tpu.memory_space<vmem>>, vector<32x160xf32>
    %1 = arith.truncf %0 : vector<32x160xf32> to vector<32x160xbf16>
    %c0_1 = arith.constant 0 : index
    %c0_2 = arith.constant 0 : index
    %2 = vector.load %arg2[%c0_1, %c0_2] : memref<160x32xbf16, #tpu.memory_space<vmem>>, vector<160x32xbf16>
    %cst = arith.constant dense<0.000000e+00> : vector<32x32xf32>
    %3 = tpu.matmul %1, %2, %cst {dimension_numbers = #tpu.dot_dimension_numbers<[1], [0], [0], [1], [0, 0, 1, 1], [], []>} : vector<32x160xbf16>, vector<160x32xbf16>, vector<32x32xf32> -> vector<32x32xf32>
    %c0_3 = arith.constant 0 : index
    %c0_4 = arith.constant 0 : index
    %4 = vector.load %arg3[%c0_3, %c0_4] : memref<1x32xf32, #tpu.memory_space<vmem>>, vector<1x32xf32>
    %5 = vector.broadcast %4 : vector<1x32xf32> to vector<32x32xf32>
    %6 = arith.addf %3, %5 : vector<32x32xf32>
    %cst_5 = arith.constant 5.65685415 : f32
    %7 = vector.broadcast %cst_5 : f32 to vector<32x32xf32>
    %8 = arith.mulf %6, %7 : vector<32x32xf32>
    %c0_6 = arith.constant 0 : index
    %c0_7 = arith.constant 0 : index
    %9 = vector.load %arg4[%c0_6, %c0_7] : memref<32x32xf32, #tpu.memory_space<vmem>>, vector<32x32xf32>
    tpu.vector_store %arg4[%c0_6, %c0_7], %8 {strides = array<i32>} : memref<32x32xf32, #tpu.memory_space<vmem>>, vector<32x32xf32>,
    return
  }
  func.func @transform_0(%arg0: i32) -> (i32, i32) {
    %c0_i32 = arith.constant 0 : i32
    %c0_i32_0 = arith.constant 0 : i32
    return %arg0, %c0_i32 : i32, i32
  }
  func.func @transform_1(%arg0: i32) -> (i32, i32) {
    %c0_i32 = arith.constant 0 : i32
    %c0_i32_0 = arith.constant 0 : i32
    %c0_i32_1 = arith.constant 0 : i32
    return %c0_i32, %c0_i32_0 : i32, i32
  }
  func.func @transform_2(%arg0: i32) -> (i32, i32) {
    %c0_i32 = arith.constant 0 : i32
    %c0_i32_0 = arith.constant 0 : i32
    %c0_i32_1 = arith.constant 0 : i32
    return %c0_i32, %c0_i32_0 : i32, i32
  }
  func.func @transform_3(%arg0: i32) -> (i32, i32) {
    %c0_i32 = arith.constant 0 : i32
    %c0_i32_0 = arith.constant 0 : i32
    return %arg0, %c0_i32 : i32, i32
  }
}

module attributes {stable_mosaic.version = 11 : i64} {
  func.func @kernel(%arg0: i32, %arg1: memref<13x32xf32, #tpu.memory_space<vmem>>, %arg2: memref<1x32x32xbf16, #tpu.memory_space<vmem>>, %arg3: memref<1x13x32xf32, #tpu.memory_space<vmem>>) attributes {dimension_semantics = [#tpu.dimension_semantics<parallel>], iteration_bounds = array<i64: 2>, scalar_prefetch = 0 : i64, scratch_operands = 0 : i64, tpu.core_type = #tpu.core_type<tc>, window_params = [{pipeline_mode = #tpu.pipeline_mode<synchronous>, transform_indices = @transform_0, window_bounds = array<i64: 13, 32>}, {transform_indices = @transform_1, window_bounds = array<i64: 1, 32, 32>}, {transform_indices = @transform_2, window_bounds = array<i64: 1, 13, 32>}]} {
    %c0 = arith.constant 0 : index
    %c0_0 = arith.constant 0 : index
    %0 = vector.load %arg1[%c0, %c0_0] : memref<13x32xf32, #tpu.memory_space<vmem>>, vector<13x32xf32>
    %1 = arith.truncf %0 : vector<13x32xf32> to vector<13x32xbf16>
    %c0_1 = arith.constant 0 : index
    %c0_2 = arith.constant 0 : index
    %c0_3 = arith.constant 0 : index
    %2 = vector.load %arg2[%c0_1, %c0_2, %c0_3] : memref<1x32x32xbf16, #tpu.memory_space<vmem>>, vector<1x32x32xbf16>
    %3 = vector.shape_cast %2 : vector<1x32x32xbf16> to vector<32x32xbf16>
    %cst = arith.constant dense<0.000000e+00> : vector<13x32xf32>
    %4 = tpu.matmul %1, %3, %cst {dimension_numbers = #tpu.dot_dimension_numbers<[1], [0], [0], [1], [0, 0, 1, 1], [], []>} : vector<13x32xbf16>, vector<32x32xbf16>, vector<13x32xf32> -> vector<13x32xf32>
    %c0_4 = arith.constant 0 : index
    %c0_5 = arith.constant 0 : index
    %c0_6 = arith.constant 0 : index
    %5 = vector.load %arg3[%c0_4, %c0_5, %c0_6] : memref<1x13x32xf32, #tpu.memory_space<vmem>>, vector<1x13x32xf32>
    %6 = vector.shape_cast %5 : vector<1x13x32xf32> to vector<13x32xf32>
    %7 = vector.shape_cast %4 : vector<13x32xf32> to vector<1x13x32xf32>
    tpu.vector_store %arg3[%c0_4, %c0_5, %c0_6], %7 {strides = array<i32>} : memref<1x13x32xf32, #tpu.memory_space<vmem>>, vector<1x13x32xf32>,
    return
  }
  func.func @transform_0(%arg0: i32) -> (i32, i32) {
    %c0_i32 = arith.constant 0 : i32
    %c0_i32_0 = arith.constant 0 : i32
    %c0_i32_1 = arith.constant 0 : i32
    return %c0_i32, %c0_i32_0 : i32, i32
  }
  func.func @transform_1(%arg0: i32) -> (i32, i32, i32) {
    %c0_i32 = arith.constant 0 : i32
    %c0_i32_0 = arith.constant 0 : i32
    %c0_i32_1 = arith.constant 0 : i32
    return %arg0, %c0_i32, %c0_i32_0 : i32, i32, i32
  }
  func.func @transform_2(%arg0: i32) -> (i32, i32, i32) {
    %c0_i32 = arith.constant 0 : i32
    %c0_i32_0 = arith.constant 0 : i32
    %c0_i32_1 = arith.constant 0 : i32
    return %arg0, %c0_i32, %c0_i32_0 : i32, i32, i32
  }
}

module attributes {stable_mosaic.version = 11 : i64} {
  func.func @kernel(%arg0: i32, %arg1: memref<1x13x32xf32, #tpu.memory_space<vmem>>, %arg2: memref<4x13x8xbf16, #tpu.memory_space<vmem>>, %arg3: memref<1x32xf32, #tpu.memory_space<vmem>>, %arg4: memref<1x32xf32, #tpu.memory_space<vmem>>, %arg5: memref<32x64xbf16, #tpu.memory_space<vmem>>, %arg6: memref<1x64xf32, #tpu.memory_space<vmem>>, %arg7: memref<64x32xbf16, #tpu.memory_space<vmem>>, %arg8: memref<1x32xf32, #tpu.memory_space<vmem>>, %arg9: memref<1x32xf32, #tpu.memory_space<vmem>>, %arg10: memref<1x32xf32, #tpu.memory_space<vmem>>, %arg11: memref<4x32x24xbf16, #tpu.memory_space<vmem>>, %arg12: memref<4x1x24xf32, #tpu.memory_space<vmem>>, %arg13: memref<4x1x8xf32, #tpu.memory_space<vmem>>, %arg14: memref<4x1x8xf32, #tpu.memory_space<vmem>>, %arg15: memref<4x8x32xbf16, #tpu.memory_space<vmem>>, %arg16: memref<1x32xf32, #tpu.memory_space<vmem>>, %arg17: memref<1x32xf32, #tpu.memory_space<vmem>>, %arg18: memref<1x32xf32, #tpu.memory_space<vmem>>, %arg19: memref<32x64xbf16, #tpu.memory_space<vmem>>, %arg20: memref<1x64xf32, #tpu.memory_space<vmem>>, %arg21: memref<15x32xf32, #tpu.memory_space<vmem>>, %arg22: memref<1x32xf32, #tpu.memory_space<vmem>>, %arg23: memref<32x32xbf16, #tpu.memory_space<vmem>>, %arg24: memref<1x32xf32, #tpu.memory_space<vmem>>, %arg25: memref<1x32xf32, #tpu.memory_space<vmem>>, %arg26: memref<1x32xf32, #tpu.memory_space<vmem>>, %arg27: memref<32x64xbf16, #tpu.memory_space<vmem>>, %arg28: memref<1x64xf32, #tpu.memory_space<vmem>>, %arg29: memref<64x32xbf16, #tpu.memory_space<vmem>>, %arg30: memref<1x32xf32, #tpu.memory_space<vmem>>, %arg31: memref<1x32xf32, #tpu.memory_space<vmem>>, %arg32: memref<1x32xf32, #tpu.memory_space<vmem>>, %arg33: memref<1x13x32xf32, #tpu.memory_space<vmem>>, %arg34: memref<29x32xf32, #tpu.memory_space<vmem>>) attributes {dimension_semantics = [#tpu.dimension_semantics<parallel>], iteration_bounds = array<i64: 2>, scalar_prefetch = 0 : i64, scratch_operands = 1 : i64, tpu.core_type = #tpu.core_type<tc>, window_params = [{transform_indices = @transform_0, window_bounds = array<i64: 1, 13, 32>}, {pipeline_mode = #tpu.pipeline_mode<synchronous>, transform_indices = @transform_1, window_bounds = array<i64: 4, 13, 8>}, {pipeline_mode = #tpu.pipeline_mode<synchronous>, transform_indices = @transform_2, window_bounds = array<i64: 1, 32>}, {pipeline_mode = #tpu.pipeline_mode<synchronous>, transform_indices = @transform_3, window_bounds = array<i64: 1, 32>}, {pipeline_mode = #tpu.pipeline_mode<synchronous>, transform_indices = @transform_4, window_bounds = array<i64: 32, 64>}, {pipeline_mode = #tpu.pipeline_mode<synchronous>, transform_indices = @transform_5, window_bounds = array<i64: 1, 64>}, {pipeline_mode = #tpu.pipeline_mode<synchronous>, transform_indices = @transform_6, window_bounds = array<i64: 64, 32>}, {pipeline_mode = #tpu.pipeline_mode<synchronous>, transform_indices = @transform_7, window_bounds = array<i64: 1, 32>}, {pipeline_mode = #tpu.pipeline_mode<synchronous>, transform_indices = @transform_8, window_bounds = array<i64: 1, 32>}, {pipeline_mode = #tpu.pipeline_mode<synchronous>, transform_indices = @transform_9, window_bounds = array<i64: 1, 32>}, {pipeline_mode = #tpu.pipeline_mode<synchronous>, transform_indices = @transform_10, window_bounds = array<i64: 4, 32, 24>}, {pipeline_mode = #tpu.pipeline_mode<synchronous>, transform_indices = @transform_11, window_bounds = array<i64: 4, 1, 24>}, {pipeline_mode = #tpu.pipeline_mode<synchronous>, transform_indices = @transform_12, window_bounds = array<i64: 4, 1, 8>}, {pipeline_mode = #tpu.pipeline_mode<synchronous>, transform_indices = @transform_13, window_bounds = array<i64: 4, 1, 8>}, {pipeline_mode = #tpu.pipeline_mode<synchronous>, transform_indices = @transform_14, window_bounds = array<i64: 4, 8, 32>}, {pipeline_mode = #tpu.pipeline_mode<synchronous>, transform_indices = @transform_15, window_bounds = array<i64: 1, 32>}, {pipeline_mode = #tpu.pipeline_mode<synchronous>, transform_indices = @transform_16, window_bounds = array<i64: 1, 32>}, {pipeline_mode = #tpu.pipeline_mode<synchronous>, transform_indices = @transform_17, window_bounds = array<i64: 1, 32>}, {pipeline_mode = #tpu.pipeline_mode<synchronous>, transform_indices = @transform_18, window_bounds = array<i64: 32, 64>}, {pipeline_mode = #tpu.pipeline_mode<synchronous>, transform_indices = @transform_19, window_bounds = array<i64: 1, 64>}, {pipeline_mode = #tpu.pipeline_mode<synchronous>, transform_indices = @transform_20, window_bounds = array<i64: 15, 32>}, {pipeline_mode = #tpu.pipeline_mode<synchronous>, transform_indices = @transform_21, window_bounds = array<i64: 1, 32>}, {pipeline_mode = #tpu.pipeline_mode<synchronous>, transform_indices = @transform_22, window_bounds = array<i64: 32, 32>}, {pipeline_mode = #tpu.pipeline_mode<synchronous>, transform_indices = @transform_23, window_bounds = array<i64: 1, 32>}, {pipeline_mode = #tpu.pipeline_mode<synchronous>, transform_indices = @transform_24, window_bounds = array<i64: 1, 32>}, {pipeline_mode = #tpu.pipeline_mode<synchronous>, transform_indices = @transform_25, window_bounds = array<i64: 1, 32>}, {pipeline_mode = #tpu.pipeline_mode<synchronous>, transform_indices = @transform_26, window_bounds = array<i64: 32, 64>}, {pipeline_mode = #tpu.pipeline_mode<synchronous>, transform_indices = @transform_27, window_bounds = array<i64: 1, 64>}, {pipeline_mode = #tpu.pipeline_mode<synchronous>, transform_indices = @transform_28, window_bounds = array<i64: 64, 32>}, {pipeline_mode = #tpu.pipeline_mode<synchronous>, transform_indices = @transform_29, window_bounds = array<i64: 1, 32>}, {pipeline_mode = #tpu.pipeline_mode<synchronous>, transform_indices = @transform_30, window_bounds = array<i64: 1, 32>}, {pipeline_mode = #tpu.pipeline_mode<synchronous>, transform_indices = @transform_31, window_bounds = array<i64: 1, 32>}, {transform_indices = @transform_32, window_bounds = array<i64: 1, 13, 32>}]} {
    %c0 = arith.constant 0 : index
    %c0_0 = arith.constant 0 : index
    %c0_1 = arith.constant 0 : index
    %0 = vector.load %arg1[%c0, %c0_0, %c0_1] : memref<1x13x32xf32, #tpu.memory_space<vmem>>, vector<1x13x32xf32>
    %1 = vector.shape_cast %0 : vector<1x13x32xf32> to vector<13x32xf32>
    %c0_2 = arith.constant 0 : index
    %c0_3 = arith.constant 0 : index
    %2 = vector.load %arg3[%c0_2, %c0_3] : memref<1x32xf32, #tpu.memory_space<vmem>>, vector<1x32xf32>
    %c0_4 = arith.constant 0 : index
    %c0_5 = arith.constant 0 : index
    %3 = vector.load %arg4[%c0_4, %c0_5] : memref<1x32xf32, #tpu.memory_space<vmem>>, vector<1x32xf32>
    %cst = arith.constant dense<0.000000e+00> : vector<13xf32>
    %4 = vector.multi_reduction <add>, %1, %cst [1] : vector<13x32xf32> to vector<13xf32>
    %5 = vector.shape_cast %4 : vector<13xf32> to vector<13x1xf32>
    %cst_6 = arith.constant 3.200000e+01 : f32
    %6 = vector.broadcast %cst_6 : f32 to vector<13x1xf32>
    %7 = arith.divf %5, %6 : vector<13x1xf32>
    %8 = vector.broadcast %7 : vector<13x1xf32> to vector<13x32xf32>
    %9 = arith.subf %1, %8 : vector<13x32xf32>
    %10 = arith.mulf %9, %9 : vector<13x32xf32>
    %cst_7 = arith.constant dense<0.000000e+00> : vector<13xf32>
    %11 = vector.multi_reduction <add>, %10, %cst_7 [1] : vector<13x32xf32> to vector<13xf32>
    %12 = vector.shape_cast %11 : vector<13xf32> to vector<13x1xf32>
    %cst_8 = arith.constant 3.200000e+01 : f32
    %13 = vector.broadcast %cst_8 : f32 to vector<13x1xf32>
    %14 = arith.divf %12, %13 : vector<13x1xf32>
    %15 = vector.broadcast %7 : vector<13x1xf32> to vector<13x32xf32>
    %16 = arith.subf %1, %15 : vector<13x32xf32>
    %cst_9 = arith.constant 9.99999974E-6 : f32
    %17 = vector.broadcast %cst_9 : f32 to vector<13x1xf32>
    %18 = arith.addf %14, %17 : vector<13x1xf32>
    %19 = math.rsqrt %18 : vector<13x1xf32>
    %20 = vector.broadcast %19 : vector<13x1xf32> to vector<13x32xf32>
    %21 = arith.mulf %16, %20 : vector<13x32xf32>
    %22 = vector.broadcast %2 : vector<1x32xf32> to vector<13x32xf32>
    %23 = arith.mulf %21, %22 : vector<13x32xf32>
    %24 = vector.broadcast %3 : vector<1x32xf32> to vector<13x32xf32>
    %25 = arith.addf %23, %24 : vector<13x32xf32>
    %26 = arith.truncf %25 : vector<13x32xf32> to vector<13x32xbf16>
    %c0_10 = arith.constant 0 : index
    %c0_11 = arith.constant 0 : index
    %27 = vector.load %arg5[%c0_10, %c0_11] : memref<32x64xbf16, #tpu.memory_space<vmem>>, vector<32x64xbf16>
    %cst_12 = arith.constant dense<0.000000e+00> : vector<13x64xf32>
    %28 = tpu.matmul %26, %27, %cst_12 {dimension_numbers = #tpu.dot_dimension_numbers<[1], [0], [0], [1], [0, 0, 1, 1], [], []>} : vector<13x32xbf16>, vector<32x64xbf16>, vector<13x64xf32> -> vector<13x64xf32>
    %c0_13 = arith.constant 0 : index
    %c0_14 = arith.constant 0 : index
    %29 = vector.load %arg6[%c0_13, %c0_14] : memref<1x64xf32, #tpu.memory_space<vmem>>, vector<1x64xf32>
    %30 = vector.broadcast %29 : vector<1x64xf32> to vector<13x64xf32>
    %31 = arith.addf %28, %30 : vector<13x64xf32>
    %32 = arith.negf %31 : vector<13x64xf32>
    %33 = math.exp %32 : vector<13x64xf32>
    %cst_15 = arith.constant 1.000000e+00 : f32
    %34 = vector.broadcast %cst_15 : f32 to vector<13x64xf32>
    %35 = arith.addf %34, %33 : vector<13x64xf32>
    %36 = arith.divf %34, %35 : vector<13x64xf32>
    %37 = arith.mulf %31, %36 : vector<13x64xf32>
    %38 = arith.truncf %37 : vector<13x64xf32> to vector<13x64xbf16>
    %c0_16 = arith.constant 0 : index
    %c0_17 = arith.constant 0 : index
    %39 = vector.load %arg7[%c0_16, %c0_17] : memref<64x32xbf16, #tpu.memory_space<vmem>>, vector<64x32xbf16>
    %cst_18 = arith.constant dense<0.000000e+00> : vector<13x32xf32>
    %40 = tpu.matmul %38, %39, %cst_18 {dimension_numbers = #tpu.dot_dimension_numbers<[1], [0], [0], [1], [0, 0, 1, 1], [], []>} : vector<13x64xbf16>, vector<64x32xbf16>, vector<13x32xf32> -> vector<13x32xf32>
    %c0_19 = arith.constant 0 : index
    %c0_20 = arith.constant 0 : index
    %41 = vector.load %arg8[%c0_19, %c0_20] : memref<1x32xf32, #tpu.memory_space<vmem>>, vector<1x32xf32>
    %42 = vector.broadcast %41 : vector<1x32xf32> to vector<13x32xf32>
    %43 = arith.addf %40, %42 : vector<13x32xf32>
    %cst_21 = arith.constant 5.000000e-01 : f32
    %44 = vector.broadcast %cst_21 : f32 to vector<13x32xf32>
    %45 = arith.mulf %44, %43 : vector<13x32xf32>
    %46 = arith.addf %1, %45 : vector<13x32xf32>
    %c0_22 = arith.constant 0 : index
    %c0_23 = arith.constant 0 : index
    %47 = vector.load %arg9[%c0_22, %c0_23] : memref<1x32xf32, #tpu.memory_space<vmem>>, vector<1x32xf32>
    %c0_24 = arith.constant 0 : index
    %c0_25 = arith.constant 0 : index
    %48 = vector.load %arg10[%c0_24, %c0_25] : memref<1x32xf32, #tpu.memory_space<vmem>>, vector<1x32xf32>
    %cst_26 = arith.constant dense<0.000000e+00> : vector<13xf32>
    %49 = vector.multi_reduction <add>, %46, %cst_26 [1] : vector<13x32xf32> to vector<13xf32>
    %50 = vector.shape_cast %49 : vector<13xf32> to vector<13x1xf32>
    %cst_27 = arith.constant 3.200000e+01 : f32
    %51 = vector.broadcast %cst_27 : f32 to vector<13x1xf32>
    %52 = arith.divf %50, %51 : vector<13x1xf32>
    %53 = vector.broadcast %52 : vector<13x1xf32> to vector<13x32xf32>
    %54 = arith.subf %46, %53 : vector<13x32xf32>
    %55 = arith.mulf %54, %54 : vector<13x32xf32>
    %cst_28 = arith.constant dense<0.000000e+00> : vector<13xf32>
    %56 = vector.multi_reduction <add>, %55, %cst_28 [1] : vector<13x32xf32> to vector<13xf32>
    %57 = vector.shape_cast %56 : vector<13xf32> to vector<13x1xf32>
    %cst_29 = arith.constant 3.200000e+01 : f32
    %58 = vector.broadcast %cst_29 : f32 to vector<13x1xf32>
    %59 = arith.divf %57, %58 : vector<13x1xf32>
    %60 = vector.broadcast %52 : vector<13x1xf32> to vector<13x32xf32>
    %61 = arith.subf %46, %60 : vector<13x32xf32>
    %cst_30 = arith.constant 9.99999974E-6 : f32
    %62 = vector.broadcast %cst_30 : f32 to vector<13x1xf32>
    %63 = arith.addf %59, %62 : vector<13x1xf32>
    %64 = math.rsqrt %63 : vector<13x1xf32>
    %65 = vector.broadcast %64 : vector<13x1xf32> to vector<13x32xf32>
    %66 = arith.mulf %61, %65 : vector<13x32xf32>
    %67 = vector.broadcast %47 : vector<1x32xf32> to vector<13x32xf32>
    %68 = arith.mulf %66, %67 : vector<13x32xf32>
    %69 = vector.broadcast %48 : vector<1x32xf32> to vector<13x32xf32>
    %70 = arith.addf %68, %69 : vector<13x32xf32>
    %71 = arith.truncf %70 : vector<13x32xf32> to vector<13x32xbf16>
    %cst_31 = arith.constant 0.000000e+00 : f32
    %72 = vector.broadcast %cst_31 : f32 to vector<13x32xf32>
    %c0_i32 = arith.constant 0 : i32
    %c4_i32 = arith.constant 4 : i32
    %73 = arith.addi %c0_i32, %c4_i32 : i32
    %c1_i32 = arith.constant 1 : i32
    %74 = scf.for %arg35 = %c0_i32 to %73 step %c1_i32 iter_args(%arg36 = %72) -> (vector<13x32xf32>)  : i32 {
      %287 = arith.index_cast %arg35 : i32 to index
      %c0_116 = arith.constant 0 : index
      %c0_117 = arith.constant 0 : index
      %288 = vector.load %arg11[%287, %c0_116, %c0_117] : memref<4x32x24xbf16, #tpu.memory_space<vmem>>, vector<1x32x24xbf16>
      %289 = vector.shape_cast %288 : vector<1x32x24xbf16> to vector<32x24xbf16>
      %cst_118 = arith.constant dense<0.000000e+00> : vector<13x24xf32>
      %290 = tpu.matmul %71, %289, %cst_118 {dimension_numbers = #tpu.dot_dimension_numbers<[1], [0], [0], [1], [0, 0, 1, 1], [], []>} : vector<13x32xbf16>, vector<32x24xbf16>, vector<13x24xf32> -> vector<13x24xf32>
      %291 = arith.index_cast %arg35 : i32 to index
      %c0_119 = arith.constant 0 : index
      %c0_120 = arith.constant 0 : index
      %292 = vector.load %arg12[%291, %c0_119, %c0_120] : memref<4x1x24xf32, #tpu.memory_space<vmem>>, vector<1x1x24xf32>
      %293 = vector.shape_cast %292 : vector<1x1x24xf32> to vector<1x24xf32>
      %294 = vector.broadcast %293 : vector<1x24xf32> to vector<13x24xf32>
      %295 = arith.addf %290, %294 : vector<13x24xf32>
      %296 = vector.extract_strided_slice %295 {offsets = [0, 0], sizes = [13, 8], strides = [1, 1]} : vector<13x24xf32> to vector<13x8xf32>
      %297 = vector.extract_strided_slice %295 {offsets = [0, 8], sizes = [13, 8], strides = [1, 1]} : vector<13x24xf32> to vector<13x8xf32>
      %298 = arith.truncf %297 : vector<13x8xf32> to vector<13x8xbf16>
      %299 = vector.extract_strided_slice %295 {offsets = [0, 16], sizes = [13, 8], strides = [1, 1]} : vector<13x24xf32> to vector<13x8xf32>
      %300 = arith.truncf %299 : vector<13x8xf32> to vector<13x8xbf16>
      %301 = arith.index_cast %arg35 : i32 to index
      %c0_121 = arith.constant 0 : index
      %c0_122 = arith.constant 0 : index
      %302 = vector.load %arg13[%301, %c0_121, %c0_122] : memref<4x1x8xf32, #tpu.memory_space<vmem>>, vector<1x1x8xf32>
      %303 = vector.shape_cast %302 : vector<1x1x8xf32> to vector<1x8xf32>
      %304 = vector.broadcast %303 : vector<1x8xf32> to vector<13x8xf32>
      %305 = arith.addf %296, %304 : vector<13x8xf32>
      %306 = arith.truncf %305 : vector<13x8xf32> to vector<13x8xbf16>
      %307 = arith.index_cast %arg35 : i32 to index
      %c0_123 = arith.constant 0 : index
      %c0_124 = arith.constant 0 : index
      %308 = vector.load %arg14[%307, %c0_123, %c0_124] : memref<4x1x8xf32, #tpu.memory_space<vmem>>, vector<1x1x8xf32>
      %309 = vector.shape_cast %308 : vector<1x1x8xf32> to vector<1x8xf32>
      %310 = vector.broadcast %309 : vector<1x8xf32> to vector<13x8xf32>
      %311 = arith.addf %296, %310 : vector<13x8xf32>
      %312 = arith.truncf %311 : vector<13x8xf32> to vector<13x8xbf16>
      %cst_125 = arith.constant dense<0.000000e+00> : vector<13x13xf32>
      %313 = tpu.matmul %306, %298, %cst_125 {dimension_numbers = #tpu.dot_dimension_numbers<[1], [1], [0], [0], [0, 0, 1, 0], [], []>} : vector<13x8xbf16>, vector<13x8xbf16>, vector<13x13xf32> -> vector<13x13xf32>
      %314 = arith.index_cast %arg35 : i32 to index
      %c0_126 = arith.constant 0 : index
      %c0_127 = arith.constant 0 : index
      %315 = vector.load %arg2[%314, %c0_126, %c0_127] : memref<4x13x8xbf16, #tpu.memory_space<vmem>>, vector<1x13x8xbf16>
      %316 = vector.shape_cast %315 : vector<1x13x8xbf16> to vector<13x8xbf16>
      %cst_128 = arith.constant dense<0.000000e+00> : vector<13x13xf32>
      %317 = tpu.matmul %312, %316, %cst_128 {dimension_numbers = #tpu.dot_dimension_numbers<[1], [1], [0], [0], [0, 0, 1, 0], [], []>} : vector<13x8xbf16>, vector<13x8xbf16>, vector<13x13xf32> -> vector<13x13xf32>
      %318 = arith.addf %313, %317 : vector<13x13xf32>
      %cst_129 = arith.constant 0.353553385 : f32
      %319 = vector.broadcast %cst_129 : f32 to vector<13x13xf32>
      %320 = arith.mulf %318, %319 : vector<13x13xf32>
      %cst_130 = arith.constant dense<0xFF800000> : vector<13xf32>
      %321 = vector.multi_reduction <maximumf>, %320, %cst_130 [1] : vector<13x13xf32> to vector<13xf32>
      %322 = vector.shape_cast %321 : vector<13xf32> to vector<13x1xf32>
      %323 = vector.broadcast %322 : vector<13x1xf32> to vector<13x13xf32>
      %324 = arith.subf %320, %323 : vector<13x13xf32>
      %325 = math.exp %324 : vector<13x13xf32>
      %cst_131 = arith.constant dense<0.000000e+00> : vector<13xf32>
      %326 = vector.multi_reduction <add>, %325, %cst_131 [1] : vector<13x13xf32> to vector<13xf32>
      %327 = vector.shape_cast %326 : vector<13xf32> to vector<13x1xf32>
      %328 = tpu.reciprocal %327 {approx = true} : vector<13x1xf32> -> vector<13x1xf32>
      %329 = vector.broadcast %328 : vector<13x1xf32> to vector<13x13xf32>
      %330 = arith.mulf %325, %329 : vector<13x13xf32>
      %331 = arith.truncf %330 : vector<13x13xf32> to vector<13x13xbf16>
      %cst_132 = arith.constant dense<0.000000e+00> : vector<13x8xf32>
      %332 = tpu.matmul %331, %300, %cst_132 {dimension_numbers = #tpu.dot_dimension_numbers<[1], [0], [0], [1], [0, 0, 1, 1], [], []>} : vector<13x13xbf16>, vector<13x8xbf16>, vector<13x8xf32> -> vector<13x8xf32>
      %333 = arith.truncf %332 : vector<13x8xf32> to vector<13x8xbf16>
      %334 = arith.index_cast %arg35 : i32 to index
      %c0_133 = arith.constant 0 : index
      %c0_134 = arith.constant 0 : index
      %335 = vector.load %arg15[%334, %c0_133, %c0_134] : memref<4x8x32xbf16, #tpu.memory_space<vmem>>, vector<1x8x32xbf16>
      %336 = vector.shape_cast %335 : vector<1x8x32xbf16> to vector<8x32xbf16>
      %cst_135 = arith.constant dense<0.000000e+00> : vector<13x32xf32>
      %337 = tpu.matmul %333, %336, %cst_135 {dimension_numbers = #tpu.dot_dimension_numbers<[1], [0], [0], [1], [0, 0, 1, 1], [], []>} : vector<13x8xbf16>, vector<8x32xbf16>, vector<13x32xf32> -> vector<13x32xf32>
      %338 = arith.addf %arg36, %337 : vector<13x32xf32>
      scf.yield %338 : vector<13x32xf32>
    }
    %c4_i32_32 = arith.constant 4 : i32
    %75 = arith.addf %46, %74 : vector<13x32xf32>
    %c0_33 = arith.constant 0 : index
    %c0_34 = arith.constant 0 : index
    %76 = vector.load %arg16[%c0_33, %c0_34] : memref<1x32xf32, #tpu.memory_space<vmem>>, vector<1x32xf32>
    %77 = vector.broadcast %76 : vector<1x32xf32> to vector<13x32xf32>
    %78 = arith.addf %75, %77 : vector<13x32xf32>
    %c0_35 = arith.constant 0 : index
    %c0_36 = arith.constant 0 : index
    %79 = vector.load %arg17[%c0_35, %c0_36] : memref<1x32xf32, #tpu.memory_space<vmem>>, vector<1x32xf32>
    %c0_37 = arith.constant 0 : index
    %c0_38 = arith.constant 0 : index
    %80 = vector.load %arg18[%c0_37, %c0_38] : memref<1x32xf32, #tpu.memory_space<vmem>>, vector<1x32xf32>
    %cst_39 = arith.constant dense<0.000000e+00> : vector<13xf32>
    %81 = vector.multi_reduction <add>, %78, %cst_39 [1] : vector<13x32xf32> to vector<13xf32>
    %82 = vector.shape_cast %81 : vector<13xf32> to vector<13x1xf32>
    %cst_40 = arith.constant 3.200000e+01 : f32
    %83 = vector.broadcast %cst_40 : f32 to vector<13x1xf32>
    %84 = arith.divf %82, %83 : vector<13x1xf32>
    %85 = vector.broadcast %84 : vector<13x1xf32> to vector<13x32xf32>
    %86 = arith.subf %78, %85 : vector<13x32xf32>
    %87 = arith.mulf %86, %86 : vector<13x32xf32>
    %cst_41 = arith.constant dense<0.000000e+00> : vector<13xf32>
    %88 = vector.multi_reduction <add>, %87, %cst_41 [1] : vector<13x32xf32> to vector<13xf32>
    %89 = vector.shape_cast %88 : vector<13xf32> to vector<13x1xf32>
    %cst_42 = arith.constant 3.200000e+01 : f32
    %90 = vector.broadcast %cst_42 : f32 to vector<13x1xf32>
    %91 = arith.divf %89, %90 : vector<13x1xf32>
    %92 = vector.broadcast %84 : vector<13x1xf32> to vector<13x32xf32>
    %93 = arith.subf %78, %92 : vector<13x32xf32>
    %cst_43 = arith.constant 9.99999974E-6 : f32
    %94 = vector.broadcast %cst_43 : f32 to vector<13x1xf32>
    %95 = arith.addf %91, %94 : vector<13x1xf32>
    %96 = math.rsqrt %95 : vector<13x1xf32>
    %97 = vector.broadcast %96 : vector<13x1xf32> to vector<13x32xf32>
    %98 = arith.mulf %93, %97 : vector<13x32xf32>
    %99 = vector.broadcast %79 : vector<1x32xf32> to vector<13x32xf32>
    %100 = arith.mulf %98, %99 : vector<13x32xf32>
    %101 = vector.broadcast %80 : vector<1x32xf32> to vector<13x32xf32>
    %102 = arith.addf %100, %101 : vector<13x32xf32>
    %103 = arith.truncf %102 : vector<13x32xf32> to vector<13x32xbf16>
    %c0_44 = arith.constant 0 : index
    %c0_45 = arith.constant 0 : index
    %104 = vector.load %arg19[%c0_44, %c0_45] : memref<32x64xbf16, #tpu.memory_space<vmem>>, vector<32x64xbf16>
    %cst_46 = arith.constant dense<0.000000e+00> : vector<13x64xf32>
    %105 = tpu.matmul %103, %104, %cst_46 {dimension_numbers = #tpu.dot_dimension_numbers<[1], [0], [0], [1], [0, 0, 1, 1], [], []>} : vector<13x32xbf16>, vector<32x64xbf16>, vector<13x64xf32> -> vector<13x64xf32>
    %c0_47 = arith.constant 0 : index
    %c0_48 = arith.constant 0 : index
    %106 = vector.load %arg20[%c0_47, %c0_48] : memref<1x64xf32, #tpu.memory_space<vmem>>, vector<1x64xf32>
    %107 = vector.broadcast %106 : vector<1x64xf32> to vector<13x64xf32>
    %108 = arith.addf %105, %107 : vector<13x64xf32>
    %109 = vector.extract_strided_slice %108 {offsets = [0, 0], sizes = [13, 32], strides = [1, 1]} : vector<13x64xf32> to vector<13x32xf32>
    %110 = vector.extract_strided_slice %108 {offsets = [0, 32], sizes = [13, 32], strides = [1, 1]} : vector<13x64xf32> to vector<13x32xf32>
    %111 = arith.negf %110 : vector<13x32xf32>
    %112 = math.exp %111 : vector<13x32xf32>
    %cst_49 = arith.constant 1.000000e+00 : f32
    %113 = vector.broadcast %cst_49 : f32 to vector<13x32xf32>
    %114 = arith.addf %113, %112 : vector<13x32xf32>
    %115 = arith.divf %113, %114 : vector<13x32xf32>
    %116 = arith.mulf %109, %115 : vector<13x32xf32>
    %cst_50 = arith.constant 0.000000e+00 : f32
    %117 = vector.broadcast %cst_50 : f32 to vector<8x32xf32>
    %c0_51 = arith.constant 0 : index
    %c0_52 = arith.constant 0 : index
    %118 = vector.load %arg34[%c0_51, %c0_52] : memref<29x32xf32, #tpu.memory_space<vmem>>, vector<8x32xf32>
    tpu.vector_store %arg34[%c0_51, %c0_52], %117 {strides = array<i32>} : memref<29x32xf32, #tpu.memory_space<vmem>>, vector<8x32xf32>,
    %cst_53 = arith.constant 0.000000e+00 : f32
    %119 = vector.broadcast %cst_53 : f32 to vector<13x32xf32>
    %c16 = arith.constant 16 : index
    %c0_54 = arith.constant 0 : index
    %120 = vector.load %arg34[%c16, %c0_54] : memref<29x32xf32, #tpu.memory_space<vmem>>, vector<13x32xf32>
    tpu.vector_store %arg34[%c16, %c0_54], %119 {strides = array<i32>} : memref<29x32xf32, #tpu.memory_space<vmem>>, vector<13x32xf32>,
    %c8 = arith.constant 8 : index
    %c0_55 = arith.constant 0 : index
    %121 = vector.load %arg34[%c8, %c0_55] : memref<29x32xf32, #tpu.memory_space<vmem>>, vector<13x32xf32>
    tpu.vector_store %arg34[%c8, %c0_55], %116 {strides = array<i32>} : memref<29x32xf32, #tpu.memory_space<vmem>>, vector<13x32xf32>,
    %c0_56 = arith.constant 0 : index
    %c0_57 = arith.constant 0 : index
    %122 = vector.load %arg21[%c0_56, %c0_57] : memref<15x32xf32, #tpu.memory_space<vmem>>, vector<15x32xf32>
    %cst_58 = arith.constant 0.000000e+00 : f32
    %123 = vector.broadcast %cst_58 : f32 to vector<13x32xf32>
    %c1 = arith.constant 1 : index
    %c0_59 = arith.constant 0 : index
    %124 = vector.load %arg34[%c1, %c0_59] : memref<29x32xf32, #tpu.memory_space<vmem>>, vector<13x32xf32>
    %125 = vector.extract_strided_slice %122 {offsets = [0, 0], sizes = [1, 32], strides = [1, 1]} : vector<15x32xf32> to vector<1x32xf32>
    %126 = vector.broadcast %125 : vector<1x32xf32> to vector<13x32xf32>
    %127 = arith.mulf %124, %126 : vector<13x32xf32>
    %128 = arith.addf %123, %127 : vector<13x32xf32>
    %c2 = arith.constant 2 : index
    %c0_60 = arith.constant 0 : index
    %129 = vector.load %arg34[%c2, %c0_60] : memref<29x32xf32, #tpu.memory_space<vmem>>, vector<13x32xf32>
    %130 = vector.extract_strided_slice %122 {offsets = [1, 0], sizes = [1, 32], strides = [1, 1]} : vector<15x32xf32> to vector<1x32xf32>
    %131 = vector.broadcast %130 : vector<1x32xf32> to vector<13x32xf32>
    %132 = arith.mulf %129, %131 : vector<13x32xf32>
    %133 = arith.addf %128, %132 : vector<13x32xf32>
    %c3 = arith.constant 3 : index
    %c0_61 = arith.constant 0 : index
    %134 = vector.load %arg34[%c3, %c0_61] : memref<29x32xf32, #tpu.memory_space<vmem>>, vector<13x32xf32>
    %135 = vector.extract_strided_slice %122 {offsets = [2, 0], sizes = [1, 32], strides = [1, 1]} : vector<15x32xf32> to vector<1x32xf32>
    %136 = vector.broadcast %135 : vector<1x32xf32> to vector<13x32xf32>
    %137 = arith.mulf %134, %136 : vector<13x32xf32>
    %138 = arith.addf %133, %137 : vector<13x32xf32>
    %c4 = arith.constant 4 : index
    %c0_62 = arith.constant 0 : index
    %139 = vector.load %arg34[%c4, %c0_62] : memref<29x32xf32, #tpu.memory_space<vmem>>, vector<13x32xf32>
    %140 = vector.extract_strided_slice %122 {offsets = [3, 0], sizes = [1, 32], strides = [1, 1]} : vector<15x32xf32> to vector<1x32xf32>
    %141 = vector.broadcast %140 : vector<1x32xf32> to vector<13x32xf32>
    %142 = arith.mulf %139, %141 : vector<13x32xf32>
    %143 = arith.addf %138, %142 : vector<13x32xf32>
    %c5 = arith.constant 5 : index
    %c0_63 = arith.constant 0 : index
    %144 = vector.load %arg34[%c5, %c0_63] : memref<29x32xf32, #tpu.memory_space<vmem>>, vector<13x32xf32>
    %145 = vector.extract_strided_slice %122 {offsets = [4, 0], sizes = [1, 32], strides = [1, 1]} : vector<15x32xf32> to vector<1x32xf32>
    %146 = vector.broadcast %145 : vector<1x32xf32> to vector<13x32xf32>
    %147 = arith.mulf %144, %146 : vector<13x32xf32>
    %148 = arith.addf %143, %147 : vector<13x32xf32>
    %c6 = arith.constant 6 : index
    %c0_64 = arith.constant 0 : index
    %149 = vector.load %arg34[%c6, %c0_64] : memref<29x32xf32, #tpu.memory_space<vmem>>, vector<13x32xf32>
    %150 = vector.extract_strided_slice %122 {offsets = [5, 0], sizes = [1, 32], strides = [1, 1]} : vector<15x32xf32> to vector<1x32xf32>
    %151 = vector.broadcast %150 : vector<1x32xf32> to vector<13x32xf32>
    %152 = arith.mulf %149, %151 : vector<13x32xf32>
    %153 = arith.addf %148, %152 : vector<13x32xf32>
    %c7 = arith.constant 7 : index
    %c0_65 = arith.constant 0 : index
    %154 = vector.load %arg34[%c7, %c0_65] : memref<29x32xf32, #tpu.memory_space<vmem>>, vector<13x32xf32>
    %155 = vector.extract_strided_slice %122 {offsets = [6, 0], sizes = [1, 32], strides = [1, 1]} : vector<15x32xf32> to vector<1x32xf32>
    %156 = vector.broadcast %155 : vector<1x32xf32> to vector<13x32xf32>
    %157 = arith.mulf %154, %156 : vector<13x32xf32>
    %158 = arith.addf %153, %157 : vector<13x32xf32>
    %c8_66 = arith.constant 8 : index
    %c0_67 = arith.constant 0 : index
    %159 = vector.load %arg34[%c8_66, %c0_67] : memref<29x32xf32, #tpu.memory_space<vmem>>, vector<13x32xf32>
    %160 = vector.extract_strided_slice %122 {offsets = [7, 0], sizes = [1, 32], strides = [1, 1]} : vector<15x32xf32> to vector<1x32xf32>
    %161 = vector.broadcast %160 : vector<1x32xf32> to vector<13x32xf32>
    %162 = arith.mulf %159, %161 : vector<13x32xf32>
    %163 = arith.addf %158, %162 : vector<13x32xf32>
    %c9 = arith.constant 9 : index
    %c0_68 = arith.constant 0 : index
    %164 = vector.load %arg34[%c9, %c0_68] : memref<29x32xf32, #tpu.memory_space<vmem>>, vector<13x32xf32>
    %165 = vector.extract_strided_slice %122 {offsets = [8, 0], sizes = [1, 32], strides = [1, 1]} : vector<15x32xf32> to vector<1x32xf32>
    %166 = vector.broadcast %165 : vector<1x32xf32> to vector<13x32xf32>
    %167 = arith.mulf %164, %166 : vector<13x32xf32>
    %168 = arith.addf %163, %167 : vector<13x32xf32>
    %c10 = arith.constant 10 : index
    %c0_69 = arith.constant 0 : index
    %169 = vector.load %arg34[%c10, %c0_69] : memref<29x32xf32, #tpu.memory_space<vmem>>, vector<13x32xf32>
    %170 = vector.extract_strided_slice %122 {offsets = [9, 0], sizes = [1, 32], strides = [1, 1]} : vector<15x32xf32> to vector<1x32xf32>
    %171 = vector.broadcast %170 : vector<1x32xf32> to vector<13x32xf32>
    %172 = arith.mulf %169, %171 : vector<13x32xf32>
    %173 = arith.addf %168, %172 : vector<13x32xf32>
    %c11 = arith.constant 11 : index
    %c0_70 = arith.constant 0 : index
    %174 = vector.load %arg34[%c11, %c0_70] : memref<29x32xf32, #tpu.memory_space<vmem>>, vector<13x32xf32>
    %175 = vector.extract_strided_slice %122 {offsets = [10, 0], sizes = [1, 32], strides = [1, 1]} : vector<15x32xf32> to vector<1x32xf32>
    %176 = vector.broadcast %175 : vector<1x32xf32> to vector<13x32xf32>
    %177 = arith.mulf %174, %176 : vector<13x32xf32>
    %178 = arith.addf %173, %177 : vector<13x32xf32>
    %c12 = arith.constant 12 : index
    %c0_71 = arith.constant 0 : index
    %179 = vector.load %arg34[%c12, %c0_71] : memref<29x32xf32, #tpu.memory_space<vmem>>, vector<13x32xf32>
    %180 = vector.extract_strided_slice %122 {offsets = [11, 0], sizes = [1, 32], strides = [1, 1]} : vector<15x32xf32> to vector<1x32xf32>
    %181 = vector.broadcast %180 : vector<1x32xf32> to vector<13x32xf32>
    %182 = arith.mulf %179, %181 : vector<13x32xf32>
    %183 = arith.addf %178, %182 : vector<13x32xf32>
    %c13 = arith.constant 13 : index
    %c0_72 = arith.constant 0 : index
    %184 = vector.load %arg34[%c13, %c0_72] : memref<29x32xf32, #tpu.memory_space<vmem>>, vector<13x32xf32>
    %185 = vector.extract_strided_slice %122 {offsets = [12, 0], sizes = [1, 32], strides = [1, 1]} : vector<15x32xf32> to vector<1x32xf32>
    %186 = vector.broadcast %185 : vector<1x32xf32> to vector<13x32xf32>
    %187 = arith.mulf %184, %186 : vector<13x32xf32>
    %188 = arith.addf %183, %187 : vector<13x32xf32>
    %c14 = arith.constant 14 : index
    %c0_73 = arith.constant 0 : index
    %189 = vector.load %arg34[%c14, %c0_73] : memref<29x32xf32, #tpu.memory_space<vmem>>, vector<13x32xf32>
    %190 = vector.extract_strided_slice %122 {offsets = [13, 0], sizes = [1, 32], strides = [1, 1]} : vector<15x32xf32> to vector<1x32xf32>
    %191 = vector.broadcast %190 : vector<1x32xf32> to vector<13x32xf32>
    %192 = arith.mulf %189, %191 : vector<13x32xf32>
    %193 = arith.addf %188, %192 : vector<13x32xf32>
    %c15 = arith.constant 15 : index
    %c0_74 = arith.constant 0 : index
    %194 = vector.load %arg34[%c15, %c0_74] : memref<29x32xf32, #tpu.memory_space<vmem>>, vector<13x32xf32>
    %195 = vector.extract_strided_slice %122 {offsets = [14, 0], sizes = [1, 32], strides = [1, 1]} : vector<15x32xf32> to vector<1x32xf32>
    %196 = vector.broadcast %195 : vector<1x32xf32> to vector<13x32xf32>
    %197 = arith.mulf %194, %196 : vector<13x32xf32>
    %198 = arith.addf %193, %197 : vector<13x32xf32>
    %c0_75 = arith.constant 0 : index
    %c0_76 = arith.constant 0 : index
    %199 = vector.load %arg22[%c0_75, %c0_76] : memref<1x32xf32, #tpu.memory_space<vmem>>, vector<1x32xf32>
    %200 = vector.broadcast %199 : vector<1x32xf32> to vector<13x32xf32>
    %201 = arith.addf %198, %200 : vector<13x32xf32>
    %202 = arith.negf %201 : vector<13x32xf32>
    %203 = math.exp %202 : vector<13x32xf32>
    %cst_77 = arith.constant 1.000000e+00 : f32
    %204 = vector.broadcast %cst_77 : f32 to vector<13x32xf32>
    %205 = arith.addf %204, %203 : vector<13x32xf32>
    %206 = arith.divf %204, %205 : vector<13x32xf32>
    %207 = arith.mulf %201, %206 : vector<13x32xf32>
    %208 = arith.truncf %207 : vector<13x32xf32> to vector<13x32xbf16>
    %c0_78 = arith.constant 0 : index
    %c0_79 = arith.constant 0 : index
    %209 = vector.load %arg23[%c0_78, %c0_79] : memref<32x32xbf16, #tpu.memory_space<vmem>>, vector<32x32xbf16>
    %cst_80 = arith.constant dense<0.000000e+00> : vector<13x32xf32>
    %210 = tpu.matmul %208, %209, %cst_80 {dimension_numbers = #tpu.dot_dimension_numbers<[1], [0], [0], [1], [0, 0, 1, 1], [], []>} : vector<13x32xbf16>, vector<32x32xbf16>, vector<13x32xf32> -> vector<13x32xf32>
    %211 = arith.addf %78, %210 : vector<13x32xf32>
    %c0_81 = arith.constant 0 : index
    %c0_82 = arith.constant 0 : index
    %212 = vector.load %arg24[%c0_81, %c0_82] : memref<1x32xf32, #tpu.memory_space<vmem>>, vector<1x32xf32>
    %213 = vector.broadcast %212 : vector<1x32xf32> to vector<13x32xf32>
    %214 = arith.addf %211, %213 : vector<13x32xf32>
    %c0_83 = arith.constant 0 : index
    %c0_84 = arith.constant 0 : index
    %215 = vector.load %arg25[%c0_83, %c0_84] : memref<1x32xf32, #tpu.memory_space<vmem>>, vector<1x32xf32>
    %c0_85 = arith.constant 0 : index
    %c0_86 = arith.constant 0 : index
    %216 = vector.load %arg26[%c0_85, %c0_86] : memref<1x32xf32, #tpu.memory_space<vmem>>, vector<1x32xf32>
    %cst_87 = arith.constant dense<0.000000e+00> : vector<13xf32>
    %217 = vector.multi_reduction <add>, %214, %cst_87 [1] : vector<13x32xf32> to vector<13xf32>
    %218 = vector.shape_cast %217 : vector<13xf32> to vector<13x1xf32>
    %cst_88 = arith.constant 3.200000e+01 : f32
    %219 = vector.broadcast %cst_88 : f32 to vector<13x1xf32>
    %220 = arith.divf %218, %219 : vector<13x1xf32>
    %221 = vector.broadcast %220 : vector<13x1xf32> to vector<13x32xf32>
    %222 = arith.subf %214, %221 : vector<13x32xf32>
    %223 = arith.mulf %222, %222 : vector<13x32xf32>
    %cst_89 = arith.constant dense<0.000000e+00> : vector<13xf32>
    %224 = vector.multi_reduction <add>, %223, %cst_89 [1] : vector<13x32xf32> to vector<13xf32>
    %225 = vector.shape_cast %224 : vector<13xf32> to vector<13x1xf32>
    %cst_90 = arith.constant 3.200000e+01 : f32
    %226 = vector.broadcast %cst_90 : f32 to vector<13x1xf32>
    %227 = arith.divf %225, %226 : vector<13x1xf32>
    %228 = vector.broadcast %220 : vector<13x1xf32> to vector<13x32xf32>
    %229 = arith.subf %214, %228 : vector<13x32xf32>
    %cst_91 = arith.constant 9.99999974E-6 : f32
    %230 = vector.broadcast %cst_91 : f32 to vector<13x1xf32>
    %231 = arith.addf %227, %230 : vector<13x1xf32>
    %232 = math.rsqrt %231 : vector<13x1xf32>
    %233 = vector.broadcast %232 : vector<13x1xf32> to vector<13x32xf32>
    %234 = arith.mulf %229, %233 : vector<13x32xf32>
    %235 = vector.broadcast %215 : vector<1x32xf32> to vector<13x32xf32>
    %236 = arith.mulf %234, %235 : vector<13x32xf32>
    %237 = vector.broadcast %216 : vector<1x32xf32> to vector<13x32xf32>
    %238 = arith.addf %236, %237 : vector<13x32xf32>
    %239 = arith.truncf %238 : vector<13x32xf32> to vector<13x32xbf16>
    %c0_92 = arith.constant 0 : index
    %c0_93 = arith.constant 0 : index
    %240 = vector.load %arg27[%c0_92, %c0_93] : memref<32x64xbf16, #tpu.memory_space<vmem>>, vector<32x64xbf16>
    %cst_94 = arith.constant dense<0.000000e+00> : vector<13x64xf32>
    %241 = tpu.matmul %239, %240, %cst_94 {dimension_numbers = #tpu.dot_dimension_numbers<[1], [0], [0], [1], [0, 0, 1, 1], [], []>} : vector<13x32xbf16>, vector<32x64xbf16>, vector<13x64xf32> -> vector<13x64xf32>
    %c0_95 = arith.constant 0 : index
    %c0_96 = arith.constant 0 : index
    %242 = vector.load %arg28[%c0_95, %c0_96] : memref<1x64xf32, #tpu.memory_space<vmem>>, vector<1x64xf32>
    %243 = vector.broadcast %242 : vector<1x64xf32> to vector<13x64xf32>
    %244 = arith.addf %241, %243 : vector<13x64xf32>
    %245 = arith.negf %244 : vector<13x64xf32>
    %246 = math.exp %245 : vector<13x64xf32>
    %cst_97 = arith.constant 1.000000e+00 : f32
    %247 = vector.broadcast %cst_97 : f32 to vector<13x64xf32>
    %248 = arith.addf %247, %246 : vector<13x64xf32>
    %249 = arith.divf %247, %248 : vector<13x64xf32>
    %250 = arith.mulf %244, %249 : vector<13x64xf32>
    %251 = arith.truncf %250 : vector<13x64xf32> to vector<13x64xbf16>
    %c0_98 = arith.constant 0 : index
    %c0_99 = arith.constant 0 : index
    %252 = vector.load %arg29[%c0_98, %c0_99] : memref<64x32xbf16, #tpu.memory_space<vmem>>, vector<64x32xbf16>
    %cst_100 = arith.constant dense<0.000000e+00> : vector<13x32xf32>
    %253 = tpu.matmul %251, %252, %cst_100 {dimension_numbers = #tpu.dot_dimension_numbers<[1], [0], [0], [1], [0, 0, 1, 1], [], []>} : vector<13x64xbf16>, vector<64x32xbf16>, vector<13x32xf32> -> vector<13x32xf32>
    %c0_101 = arith.constant 0 : index
    %c0_102 = arith.constant 0 : index
    %254 = vector.load %arg30[%c0_101, %c0_102] : memref<1x32xf32, #tpu.memory_space<vmem>>, vector<1x32xf32>
    %255 = vector.broadcast %254 : vector<1x32xf32> to vector<13x32xf32>
    %256 = arith.addf %253, %255 : vector<13x32xf32>
    %cst_103 = arith.constant 5.000000e-01 : f32
    %257 = vector.broadcast %cst_103 : f32 to vector<13x32xf32>
    %258 = arith.mulf %257, %256 : vector<13x32xf32>
    %259 = arith.addf %214, %258 : vector<13x32xf32>
    %c0_104 = arith.constant 0 : index
    %c0_105 = arith.constant 0 : index
    %260 = vector.load %arg31[%c0_104, %c0_105] : memref<1x32xf32, #tpu.memory_space<vmem>>, vector<1x32xf32>
    %c0_106 = arith.constant 0 : index
    %c0_107 = arith.constant 0 : index
    %261 = vector.load %arg32[%c0_106, %c0_107] : memref<1x32xf32, #tpu.memory_space<vmem>>, vector<1x32xf32>
    %cst_108 = arith.constant dense<0.000000e+00> : vector<13xf32>
    %262 = vector.multi_reduction <add>, %259, %cst_108 [1] : vector<13x32xf32> to vector<13xf32>
    %263 = vector.shape_cast %262 : vector<13xf32> to vector<13x1xf32>
    %cst_109 = arith.constant 3.200000e+01 : f32
    %264 = vector.broadcast %cst_109 : f32 to vector<13x1xf32>
    %265 = arith.divf %263, %264 : vector<13x1xf32>
    %266 = vector.broadcast %265 : vector<13x1xf32> to vector<13x32xf32>
    %267 = arith.subf %259, %266 : vector<13x32xf32>
    %268 = arith.mulf %267, %267 : vector<13x32xf32>
    %cst_110 = arith.constant dense<0.000000e+00> : vector<13xf32>
    %269 = vector.multi_reduction <add>, %268, %cst_110 [1] : vector<13x32xf32> to vector<13xf32>
    %270 = vector.shape_cast %269 : vector<13xf32> to vector<13x1xf32>
    %cst_111 = arith.constant 3.200000e+01 : f32
    %271 = vector.broadcast %cst_111 : f32 to vector<13x1xf32>
    %272 = arith.divf %270, %271 : vector<13x1xf32>
    %273 = vector.broadcast %265 : vector<13x1xf32> to vector<13x32xf32>
    %274 = arith.subf %259, %273 : vector<13x32xf32>
    %cst_112 = arith.constant 9.99999974E-6 : f32
    %275 = vector.broadcast %cst_112 : f32 to vector<13x1xf32>
    %276 = arith.addf %272, %275 : vector<13x1xf32>
    %277 = math.rsqrt %276 : vector<13x1xf32>
    %278 = vector.broadcast %277 : vector<13x1xf32> to vector<13x32xf32>
    %279 = arith.mulf %274, %278 : vector<13x32xf32>
    %280 = vector.broadcast %260 : vector<1x32xf32> to vector<13x32xf32>
    %281 = arith.mulf %279, %280 : vector<13x32xf32>
    %282 = vector.broadcast %261 : vector<1x32xf32> to vector<13x32xf32>
    %283 = arith.addf %281, %282 : vector<13x32xf32>
    %c0_113 = arith.constant 0 : index
    %c0_114 = arith.constant 0 : index
    %c0_115 = arith.constant 0 : index
    %284 = vector.load %arg33[%c0_113, %c0_114, %c0_115] : memref<1x13x32xf32, #tpu.memory_space<vmem>>, vector<1x13x32xf32>
    %285 = vector.shape_cast %284 : vector<1x13x32xf32> to vector<13x32xf32>
    %286 = vector.shape_cast %283 : vector<13x32xf32> to vector<1x13x32xf32>
    tpu.vector_store %arg33[%c0_113, %c0_114, %c0_115], %286 {strides = array<i32>} : memref<1x13x32xf32, #tpu.memory_space<vmem>>, vector<1x13x32xf32>,
    return
  }
  func.func @transform_0(%arg0: i32) -> (i32, i32, i32) {
    %c0_i32 = arith.constant 0 : i32
    %c0_i32_0 = arith.constant 0 : i32
    %c0_i32_1 = arith.constant 0 : i32
    return %arg0, %c0_i32, %c0_i32_0 : i32, i32, i32
  }
  func.func @transform_1(%arg0: i32) -> (i32, i32, i32) {
    %c0_i32 = arith.constant 0 : i32
    %c0_i32_0 = arith.constant 0 : i32
    %c0_i32_1 = arith.constant 0 : i32
    %c0_i32_2 = arith.constant 0 : i32
    return %c0_i32, %c0_i32_0, %c0_i32_1 : i32, i32, i32
  }
  func.func @transform_2(%arg0: i32) -> (i32, i32) {
    %c0_i32 = arith.constant 0 : i32
    %c0_i32_0 = arith.constant 0 : i32
    %c0_i32_1 = arith.constant 0 : i32
    return %c0_i32, %c0_i32_0 : i32, i32
  }
  func.func @transform_3(%arg0: i32) -> (i32, i32) {
    %c0_i32 = arith.constant 0 : i32
    %c0_i32_0 = arith.constant 0 : i32
    %c0_i32_1 = arith.constant 0 : i32
    return %c0_i32, %c0_i32_0 : i32, i32
  }
  func.func @transform_4(%arg0: i32) -> (i32, i32) {
    %c0_i32 = arith.constant 0 : i32
    %c0_i32_0 = arith.constant 0 : i32
    %c0_i32_1 = arith.constant 0 : i32
    return %c0_i32, %c0_i32_0 : i32, i32
  }
  func.func @transform_5(%arg0: i32) -> (i32, i32) {
    %c0_i32 = arith.constant 0 : i32
    %c0_i32_0 = arith.constant 0 : i32
    %c0_i32_1 = arith.constant 0 : i32
    return %c0_i32, %c0_i32_0 : i32, i32
  }
  func.func @transform_6(%arg0: i32) -> (i32, i32) {
    %c0_i32 = arith.constant 0 : i32
    %c0_i32_0 = arith.constant 0 : i32
    %c0_i32_1 = arith.constant 0 : i32
    return %c0_i32, %c0_i32_0 : i32, i32
  }
  func.func @transform_7(%arg0: i32) -> (i32, i32) {
    %c0_i32 = arith.constant 0 : i32
    %c0_i32_0 = arith.constant 0 : i32
    %c0_i32_1 = arith.constant 0 : i32
    return %c0_i32, %c0_i32_0 : i32, i32
  }
  func.func @transform_8(%arg0: i32) -> (i32, i32) {
    %c0_i32 = arith.constant 0 : i32
    %c0_i32_0 = arith.constant 0 : i32
    %c0_i32_1 = arith.constant 0 : i32
    return %c0_i32, %c0_i32_0 : i32, i32
  }
  func.func @transform_9(%arg0: i32) -> (i32, i32) {
    %c0_i32 = arith.constant 0 : i32
    %c0_i32_0 = arith.constant 0 : i32
    %c0_i32_1 = arith.constant 0 : i32
    return %c0_i32, %c0_i32_0 : i32, i32
  }
  func.func @transform_10(%arg0: i32) -> (i32, i32, i32) {
    %c0_i32 = arith.constant 0 : i32
    %c0_i32_0 = arith.constant 0 : i32
    %c0_i32_1 = arith.constant 0 : i32
    %c0_i32_2 = arith.constant 0 : i32
    return %c0_i32, %c0_i32_0, %c0_i32_1 : i32, i32, i32
  }
  func.func @transform_11(%arg0: i32) -> (i32, i32, i32) {
    %c0_i32 = arith.constant 0 : i32
    %c0_i32_0 = arith.constant 0 : i32
    %c0_i32_1 = arith.constant 0 : i32
    %c0_i32_2 = arith.constant 0 : i32
    return %c0_i32, %c0_i32_0, %c0_i32_1 : i32, i32, i32
  }
  func.func @transform_12(%arg0: i32) -> (i32, i32, i32) {
    %c0_i32 = arith.constant 0 : i32
    %c0_i32_0 = arith.constant 0 : i32
    %c0_i32_1 = arith.constant 0 : i32
    %c0_i32_2 = arith.constant 0 : i32
    return %c0_i32, %c0_i32_0, %c0_i32_1 : i32, i32, i32
  }
  func.func @transform_13(%arg0: i32) -> (i32, i32, i32) {
    %c0_i32 = arith.constant 0 : i32
    %c0_i32_0 = arith.constant 0 : i32
    %c0_i32_1 = arith.constant 0 : i32
    %c0_i32_2 = arith.constant 0 : i32
    return %c0_i32, %c0_i32_0, %c0_i32_1 : i32, i32, i32
  }
  func.func @transform_14(%arg0: i32) -> (i32, i32, i32) {
    %c0_i32 = arith.constant 0 : i32
    %c0_i32_0 = arith.constant 0 : i32
    %c0_i32_1 = arith.constant 0 : i32
    %c0_i32_2 = arith.constant 0 : i32
    return %c0_i32, %c0_i32_0, %c0_i32_1 : i32, i32, i32
  }
  func.func @transform_15(%arg0: i32) -> (i32, i32) {
    %c0_i32 = arith.constant 0 : i32
    %c0_i32_0 = arith.constant 0 : i32
    %c0_i32_1 = arith.constant 0 : i32
    return %c0_i32, %c0_i32_0 : i32, i32
  }
  func.func @transform_16(%arg0: i32) -> (i32, i32) {
    %c0_i32 = arith.constant 0 : i32
    %c0_i32_0 = arith.constant 0 : i32
    %c0_i32_1 = arith.constant 0 : i32
    return %c0_i32, %c0_i32_0 : i32, i32
  }
  func.func @transform_17(%arg0: i32) -> (i32, i32) {
    %c0_i32 = arith.constant 0 : i32
    %c0_i32_0 = arith.constant 0 : i32
    %c0_i32_1 = arith.constant 0 : i32
    return %c0_i32, %c0_i32_0 : i32, i32
  }
  func.func @transform_18(%arg0: i32) -> (i32, i32) {
    %c0_i32 = arith.constant 0 : i32
    %c0_i32_0 = arith.constant 0 : i32
    %c0_i32_1 = arith.constant 0 : i32
    return %c0_i32, %c0_i32_0 : i32, i32
  }
  func.func @transform_19(%arg0: i32) -> (i32, i32) {
    %c0_i32 = arith.constant 0 : i32
    %c0_i32_0 = arith.constant 0 : i32
    %c0_i32_1 = arith.constant 0 : i32
    return %c0_i32, %c0_i32_0 : i32, i32
  }
  func.func @transform_20(%arg0: i32) -> (i32, i32) {
    %c0_i32 = arith.constant 0 : i32
    %c0_i32_0 = arith.constant 0 : i32
    %c0_i32_1 = arith.constant 0 : i32
    return %c0_i32, %c0_i32_0 : i32, i32
  }
  func.func @transform_21(%arg0: i32) -> (i32, i32) {
    %c0_i32 = arith.constant 0 : i32
    %c0_i32_0 = arith.constant 0 : i32
    %c0_i32_1 = arith.constant 0 : i32
    return %c0_i32, %c0_i32_0 : i32, i32
  }
  func.func @transform_22(%arg0: i32) -> (i32, i32) {
    %c0_i32 = arith.constant 0 : i32
    %c0_i32_0 = arith.constant 0 : i32
    %c0_i32_1 = arith.constant 0 : i32
    return %c0_i32, %c0_i32_0 : i32, i32
  }
  func.func @transform_23(%arg0: i32) -> (i32, i32) {
    %c0_i32 = arith.constant 0 : i32
    %c0_i32_0 = arith.constant 0 : i32
    %c0_i32_1 = arith.constant 0 : i32
    return %c0_i32, %c0_i32_0 : i32, i32
  }
  func.func @transform_24(%arg0: i32) -> (i32, i32) {
    %c0_i32 = arith.constant 0 : i32
    %c0_i32_0 = arith.constant 0 : i32
    %c0_i32_1 = arith.constant 0 : i32
    return %c0_i32, %c0_i32_0 : i32, i32
  }
  func.func @transform_25(%arg0: i32) -> (i32, i32) {
    %c0_i32 = arith.constant 0 : i32
    %c0_i32_0 = arith.constant 0 : i32
    %c0_i32_1 = arith.constant 0 : i32
    return %c0_i32, %c0_i32_0 : i32, i32
  }
  func.func @transform_26(%arg0: i32) -> (i32, i32) {
    %c0_i32 = arith.constant 0 : i32
    %c0_i32_0 = arith.constant 0 : i32
    %c0_i32_1 = arith.constant 0 : i32
    return %c0_i32, %c0_i32_0 : i32, i32
  }
  func.func @transform_27(%arg0: i32) -> (i32, i32) {
    %c0_i32 = arith.constant 0 : i32
    %c0_i32_0 = arith.constant 0 : i32
    %c0_i32_1 = arith.constant 0 : i32
    return %c0_i32, %c0_i32_0 : i32, i32
  }
  func.func @transform_28(%arg0: i32) -> (i32, i32) {
    %c0_i32 = arith.constant 0 : i32
    %c0_i32_0 = arith.constant 0 : i32
    %c0_i32_1 = arith.constant 0 : i32
    return %c0_i32, %c0_i32_0 : i32, i32
  }
  func.func @transform_29(%arg0: i32) -> (i32, i32) {
    %c0_i32 = arith.constant 0 : i32
    %c0_i32_0 = arith.constant 0 : i32
    %c0_i32_1 = arith.constant 0 : i32
    return %c0_i32, %c0_i32_0 : i32, i32
  }
  func.func @transform_30(%arg0: i32) -> (i32, i32) {
    %c0_i32 = arith.constant 0 : i32
    %c0_i32_0 = arith.constant 0 : i32
    %c0_i32_1 = arith.constant 0 : i32
    return %c0_i32, %c0_i32_0 : i32, i32
  }
  func.func @transform_31(%arg0: i32) -> (i32, i32) {
    %c0_i32 = arith.constant 0 : i32
    %c0_i32_0 = arith.constant 0 : i32
    %c0_i32_1 = arith.constant 0 : i32
    return %c0_i32, %c0_i32_0 : i32, i32
  }
  func.func @transform_32(%arg0: i32) -> (i32, i32, i32) {
    %c0_i32 = arith.constant 0 : i32
    %c0_i32_0 = arith.constant 0 : i32
    %c0_i32_1 = arith.constant 0 : i32
    return %arg0, %c0_i32, %c0_i32_0 : i32, i32, i32
  }
}

module attributes {stable_mosaic.version = 11 : i64} {
  func.func @kernel(%arg0: i32, %arg1: memref<1x13x32xf32, #tpu.memory_space<vmem>>, %arg2: memref<4x13x8xbf16, #tpu.memory_space<vmem>>, %arg3: memref<1x32xf32, #tpu.memory_space<vmem>>, %arg4: memref<1x32xf32, #tpu.memory_space<vmem>>, %arg5: memref<32x64xbf16, #tpu.memory_space<vmem>>, %arg6: memref<1x64xf32, #tpu.memory_space<vmem>>, %arg7: memref<64x32xbf16, #tpu.memory_space<vmem>>, %arg8: memref<1x32xf32, #tpu.memory_space<vmem>>, %arg9: memref<1x32xf32, #tpu.memory_space<vmem>>, %arg10: memref<1x32xf32, #tpu.memory_space<vmem>>, %arg11: memref<4x32x24xbf16, #tpu.memory_space<vmem>>, %arg12: memref<4x1x24xf32, #tpu.memory_space<vmem>>, %arg13: memref<4x1x8xf32, #tpu.memory_space<vmem>>, %arg14: memref<4x1x8xf32, #tpu.memory_space<vmem>>, %arg15: memref<4x8x32xbf16, #tpu.memory_space<vmem>>, %arg16: memref<1x32xf32, #tpu.memory_space<vmem>>, %arg17: memref<1x32xf32, #tpu.memory_space<vmem>>, %arg18: memref<1x32xf32, #tpu.memory_space<vmem>>, %arg19: memref<32x64xbf16, #tpu.memory_space<vmem>>, %arg20: memref<1x64xf32, #tpu.memory_space<vmem>>, %arg21: memref<15x32xf32, #tpu.memory_space<vmem>>, %arg22: memref<1x32xf32, #tpu.memory_space<vmem>>, %arg23: memref<32x32xbf16, #tpu.memory_space<vmem>>, %arg24: memref<1x32xf32, #tpu.memory_space<vmem>>, %arg25: memref<1x32xf32, #tpu.memory_space<vmem>>, %arg26: memref<1x32xf32, #tpu.memory_space<vmem>>, %arg27: memref<32x64xbf16, #tpu.memory_space<vmem>>, %arg28: memref<1x64xf32, #tpu.memory_space<vmem>>, %arg29: memref<64x32xbf16, #tpu.memory_space<vmem>>, %arg30: memref<1x32xf32, #tpu.memory_space<vmem>>, %arg31: memref<1x32xf32, #tpu.memory_space<vmem>>, %arg32: memref<1x32xf32, #tpu.memory_space<vmem>>, %arg33: memref<1x13x32xf32, #tpu.memory_space<vmem>>, %arg34: memref<29x32xf32, #tpu.memory_space<vmem>>) attributes {dimension_semantics = [#tpu.dimension_semantics<parallel>], iteration_bounds = array<i64: 2>, scalar_prefetch = 0 : i64, scratch_operands = 1 : i64, tpu.core_type = #tpu.core_type<tc>, window_params = [{transform_indices = @transform_0, window_bounds = array<i64: 1, 13, 32>}, {pipeline_mode = #tpu.pipeline_mode<synchronous>, transform_indices = @transform_1, window_bounds = array<i64: 4, 13, 8>}, {pipeline_mode = #tpu.pipeline_mode<synchronous>, transform_indices = @transform_2, window_bounds = array<i64: 1, 32>}, {pipeline_mode = #tpu.pipeline_mode<synchronous>, transform_indices = @transform_3, window_bounds = array<i64: 1, 32>}, {pipeline_mode = #tpu.pipeline_mode<synchronous>, transform_indices = @transform_4, window_bounds = array<i64: 32, 64>}, {pipeline_mode = #tpu.pipeline_mode<synchronous>, transform_indices = @transform_5, window_bounds = array<i64: 1, 64>}, {pipeline_mode = #tpu.pipeline_mode<synchronous>, transform_indices = @transform_6, window_bounds = array<i64: 64, 32>}, {pipeline_mode = #tpu.pipeline_mode<synchronous>, transform_indices = @transform_7, window_bounds = array<i64: 1, 32>}, {pipeline_mode = #tpu.pipeline_mode<synchronous>, transform_indices = @transform_8, window_bounds = array<i64: 1, 32>}, {pipeline_mode = #tpu.pipeline_mode<synchronous>, transform_indices = @transform_9, window_bounds = array<i64: 1, 32>}, {pipeline_mode = #tpu.pipeline_mode<synchronous>, transform_indices = @transform_10, window_bounds = array<i64: 4, 32, 24>}, {pipeline_mode = #tpu.pipeline_mode<synchronous>, transform_indices = @transform_11, window_bounds = array<i64: 4, 1, 24>}, {pipeline_mode = #tpu.pipeline_mode<synchronous>, transform_indices = @transform_12, window_bounds = array<i64: 4, 1, 8>}, {pipeline_mode = #tpu.pipeline_mode<synchronous>, transform_indices = @transform_13, window_bounds = array<i64: 4, 1, 8>}, {pipeline_mode = #tpu.pipeline_mode<synchronous>, transform_indices = @transform_14, window_bounds = array<i64: 4, 8, 32>}, {pipeline_mode = #tpu.pipeline_mode<synchronous>, transform_indices = @transform_15, window_bounds = array<i64: 1, 32>}, {pipeline_mode = #tpu.pipeline_mode<synchronous>, transform_indices = @transform_16, window_bounds = array<i64: 1, 32>}, {pipeline_mode = #tpu.pipeline_mode<synchronous>, transform_indices = @transform_17, window_bounds = array<i64: 1, 32>}, {pipeline_mode = #tpu.pipeline_mode<synchronous>, transform_indices = @transform_18, window_bounds = array<i64: 32, 64>}, {pipeline_mode = #tpu.pipeline_mode<synchronous>, transform_indices = @transform_19, window_bounds = array<i64: 1, 64>}, {pipeline_mode = #tpu.pipeline_mode<synchronous>, transform_indices = @transform_20, window_bounds = array<i64: 15, 32>}, {pipeline_mode = #tpu.pipeline_mode<synchronous>, transform_indices = @transform_21, window_bounds = array<i64: 1, 32>}, {pipeline_mode = #tpu.pipeline_mode<synchronous>, transform_indices = @transform_22, window_bounds = array<i64: 32, 32>}, {pipeline_mode = #tpu.pipeline_mode<synchronous>, transform_indices = @transform_23, window_bounds = array<i64: 1, 32>}, {pipeline_mode = #tpu.pipeline_mode<synchronous>, transform_indices = @transform_24, window_bounds = array<i64: 1, 32>}, {pipeline_mode = #tpu.pipeline_mode<synchronous>, transform_indices = @transform_25, window_bounds = array<i64: 1, 32>}, {pipeline_mode = #tpu.pipeline_mode<synchronous>, transform_indices = @transform_26, window_bounds = array<i64: 32, 64>}, {pipeline_mode = #tpu.pipeline_mode<synchronous>, transform_indices = @transform_27, window_bounds = array<i64: 1, 64>}, {pipeline_mode = #tpu.pipeline_mode<synchronous>, transform_indices = @transform_28, window_bounds = array<i64: 64, 32>}, {pipeline_mode = #tpu.pipeline_mode<synchronous>, transform_indices = @transform_29, window_bounds = array<i64: 1, 32>}, {pipeline_mode = #tpu.pipeline_mode<synchronous>, transform_indices = @transform_30, window_bounds = array<i64: 1, 32>}, {pipeline_mode = #tpu.pipeline_mode<synchronous>, transform_indices = @transform_31, window_bounds = array<i64: 1, 32>}, {transform_indices = @transform_32, window_bounds = array<i64: 1, 13, 32>}]} {
    %c0 = arith.constant 0 : index
    %c0_0 = arith.constant 0 : index
    %c0_1 = arith.constant 0 : index
    %0 = vector.load %arg1[%c0, %c0_0, %c0_1] : memref<1x13x32xf32, #tpu.memory_space<vmem>>, vector<1x13x32xf32>
    %1 = vector.shape_cast %0 : vector<1x13x32xf32> to vector<13x32xf32>
    %c0_2 = arith.constant 0 : index
    %c0_3 = arith.constant 0 : index
    %2 = vector.load %arg3[%c0_2, %c0_3] : memref<1x32xf32, #tpu.memory_space<vmem>>, vector<1x32xf32>
    %c0_4 = arith.constant 0 : index
    %c0_5 = arith.constant 0 : index
    %3 = vector.load %arg4[%c0_4, %c0_5] : memref<1x32xf32, #tpu.memory_space<vmem>>, vector<1x32xf32>
    %cst = arith.constant dense<0.000000e+00> : vector<13xf32>
    %4 = vector.multi_reduction <add>, %1, %cst [1] : vector<13x32xf32> to vector<13xf32>
    %5 = vector.shape_cast %4 : vector<13xf32> to vector<13x1xf32>
    %cst_6 = arith.constant 3.200000e+01 : f32
    %6 = vector.broadcast %cst_6 : f32 to vector<13x1xf32>
    %7 = arith.divf %5, %6 : vector<13x1xf32>
    %8 = vector.broadcast %7 : vector<13x1xf32> to vector<13x32xf32>
    %9 = arith.subf %1, %8 : vector<13x32xf32>
    %10 = arith.mulf %9, %9 : vector<13x32xf32>
    %cst_7 = arith.constant dense<0.000000e+00> : vector<13xf32>
    %11 = vector.multi_reduction <add>, %10, %cst_7 [1] : vector<13x32xf32> to vector<13xf32>
    %12 = vector.shape_cast %11 : vector<13xf32> to vector<13x1xf32>
    %cst_8 = arith.constant 3.200000e+01 : f32
    %13 = vector.broadcast %cst_8 : f32 to vector<13x1xf32>
    %14 = arith.divf %12, %13 : vector<13x1xf32>
    %15 = vector.broadcast %7 : vector<13x1xf32> to vector<13x32xf32>
    %16 = arith.subf %1, %15 : vector<13x32xf32>
    %cst_9 = arith.constant 9.99999974E-6 : f32
    %17 = vector.broadcast %cst_9 : f32 to vector<13x1xf32>
    %18 = arith.addf %14, %17 : vector<13x1xf32>
    %19 = math.rsqrt %18 : vector<13x1xf32>
    %20 = vector.broadcast %19 : vector<13x1xf32> to vector<13x32xf32>
    %21 = arith.mulf %16, %20 : vector<13x32xf32>
    %22 = vector.broadcast %2 : vector<1x32xf32> to vector<13x32xf32>
    %23 = arith.mulf %21, %22 : vector<13x32xf32>
    %24 = vector.broadcast %3 : vector<1x32xf32> to vector<13x32xf32>
    %25 = arith.addf %23, %24 : vector<13x32xf32>
    %26 = arith.truncf %25 : vector<13x32xf32> to vector<13x32xbf16>
    %c0_10 = arith.constant 0 : index
    %c0_11 = arith.constant 0 : index
    %27 = vector.load %arg5[%c0_10, %c0_11] : memref<32x64xbf16, #tpu.memory_space<vmem>>, vector<32x64xbf16>
    %cst_12 = arith.constant dense<0.000000e+00> : vector<13x64xf32>
    %28 = tpu.matmul %26, %27, %cst_12 {dimension_numbers = #tpu.dot_dimension_numbers<[1], [0], [0], [1], [0, 0, 1, 1], [], []>} : vector<13x32xbf16>, vector<32x64xbf16>, vector<13x64xf32> -> vector<13x64xf32>
    %c0_13 = arith.constant 0 : index
    %c0_14 = arith.constant 0 : index
    %29 = vector.load %arg6[%c0_13, %c0_14] : memref<1x64xf32, #tpu.memory_space<vmem>>, vector<1x64xf32>
    %30 = vector.broadcast %29 : vector<1x64xf32> to vector<13x64xf32>
    %31 = arith.addf %28, %30 : vector<13x64xf32>
    %32 = arith.negf %31 : vector<13x64xf32>
    %33 = math.exp %32 : vector<13x64xf32>
    %cst_15 = arith.constant 1.000000e+00 : f32
    %34 = vector.broadcast %cst_15 : f32 to vector<13x64xf32>
    %35 = arith.addf %34, %33 : vector<13x64xf32>
    %36 = arith.divf %34, %35 : vector<13x64xf32>
    %37 = arith.mulf %31, %36 : vector<13x64xf32>
    %38 = arith.truncf %37 : vector<13x64xf32> to vector<13x64xbf16>
    %c0_16 = arith.constant 0 : index
    %c0_17 = arith.constant 0 : index
    %39 = vector.load %arg7[%c0_16, %c0_17] : memref<64x32xbf16, #tpu.memory_space<vmem>>, vector<64x32xbf16>
    %cst_18 = arith.constant dense<0.000000e+00> : vector<13x32xf32>
    %40 = tpu.matmul %38, %39, %cst_18 {dimension_numbers = #tpu.dot_dimension_numbers<[1], [0], [0], [1], [0, 0, 1, 1], [], []>} : vector<13x64xbf16>, vector<64x32xbf16>, vector<13x32xf32> -> vector<13x32xf32>
    %c0_19 = arith.constant 0 : index
    %c0_20 = arith.constant 0 : index
    %41 = vector.load %arg8[%c0_19, %c0_20] : memref<1x32xf32, #tpu.memory_space<vmem>>, vector<1x32xf32>
    %42 = vector.broadcast %41 : vector<1x32xf32> to vector<13x32xf32>
    %43 = arith.addf %40, %42 : vector<13x32xf32>
    %cst_21 = arith.constant 5.000000e-01 : f32
    %44 = vector.broadcast %cst_21 : f32 to vector<13x32xf32>
    %45 = arith.mulf %44, %43 : vector<13x32xf32>
    %46 = arith.addf %1, %45 : vector<13x32xf32>
    %c0_22 = arith.constant 0 : index
    %c0_23 = arith.constant 0 : index
    %47 = vector.load %arg9[%c0_22, %c0_23] : memref<1x32xf32, #tpu.memory_space<vmem>>, vector<1x32xf32>
    %c0_24 = arith.constant 0 : index
    %c0_25 = arith.constant 0 : index
    %48 = vector.load %arg10[%c0_24, %c0_25] : memref<1x32xf32, #tpu.memory_space<vmem>>, vector<1x32xf32>
    %cst_26 = arith.constant dense<0.000000e+00> : vector<13xf32>
    %49 = vector.multi_reduction <add>, %46, %cst_26 [1] : vector<13x32xf32> to vector<13xf32>
    %50 = vector.shape_cast %49 : vector<13xf32> to vector<13x1xf32>
    %cst_27 = arith.constant 3.200000e+01 : f32
    %51 = vector.broadcast %cst_27 : f32 to vector<13x1xf32>
    %52 = arith.divf %50, %51 : vector<13x1xf32>
    %53 = vector.broadcast %52 : vector<13x1xf32> to vector<13x32xf32>
    %54 = arith.subf %46, %53 : vector<13x32xf32>
    %55 = arith.mulf %54, %54 : vector<13x32xf32>
    %cst_28 = arith.constant dense<0.000000e+00> : vector<13xf32>
    %56 = vector.multi_reduction <add>, %55, %cst_28 [1] : vector<13x32xf32> to vector<13xf32>
    %57 = vector.shape_cast %56 : vector<13xf32> to vector<13x1xf32>
    %cst_29 = arith.constant 3.200000e+01 : f32
    %58 = vector.broadcast %cst_29 : f32 to vector<13x1xf32>
    %59 = arith.divf %57, %58 : vector<13x1xf32>
    %60 = vector.broadcast %52 : vector<13x1xf32> to vector<13x32xf32>
    %61 = arith.subf %46, %60 : vector<13x32xf32>
    %cst_30 = arith.constant 9.99999974E-6 : f32
    %62 = vector.broadcast %cst_30 : f32 to vector<13x1xf32>
    %63 = arith.addf %59, %62 : vector<13x1xf32>
    %64 = math.rsqrt %63 : vector<13x1xf32>
    %65 = vector.broadcast %64 : vector<13x1xf32> to vector<13x32xf32>
    %66 = arith.mulf %61, %65 : vector<13x32xf32>
    %67 = vector.broadcast %47 : vector<1x32xf32> to vector<13x32xf32>
    %68 = arith.mulf %66, %67 : vector<13x32xf32>
    %69 = vector.broadcast %48 : vector<1x32xf32> to vector<13x32xf32>
    %70 = arith.addf %68, %69 : vector<13x32xf32>
    %71 = arith.truncf %70 : vector<13x32xf32> to vector<13x32xbf16>
    %cst_31 = arith.constant 0.000000e+00 : f32
    %72 = vector.broadcast %cst_31 : f32 to vector<13x32xf32>
    %c0_i32 = arith.constant 0 : i32
    %c4_i32 = arith.constant 4 : i32
    %73 = arith.addi %c0_i32, %c4_i32 : i32
    %c1_i32 = arith.constant 1 : i32
    %74 = scf.for %arg35 = %c0_i32 to %73 step %c1_i32 iter_args(%arg36 = %72) -> (vector<13x32xf32>)  : i32 {
      %287 = arith.index_cast %arg35 : i32 to index
      %c0_116 = arith.constant 0 : index
      %c0_117 = arith.constant 0 : index
      %288 = vector.load %arg11[%287, %c0_116, %c0_117] : memref<4x32x24xbf16, #tpu.memory_space<vmem>>, vector<1x32x24xbf16>
      %289 = vector.shape_cast %288 : vector<1x32x24xbf16> to vector<32x24xbf16>
      %cst_118 = arith.constant dense<0.000000e+00> : vector<13x24xf32>
      %290 = tpu.matmul %71, %289, %cst_118 {dimension_numbers = #tpu.dot_dimension_numbers<[1], [0], [0], [1], [0, 0, 1, 1], [], []>} : vector<13x32xbf16>, vector<32x24xbf16>, vector<13x24xf32> -> vector<13x24xf32>
      %291 = arith.index_cast %arg35 : i32 to index
      %c0_119 = arith.constant 0 : index
      %c0_120 = arith.constant 0 : index
      %292 = vector.load %arg12[%291, %c0_119, %c0_120] : memref<4x1x24xf32, #tpu.memory_space<vmem>>, vector<1x1x24xf32>
      %293 = vector.shape_cast %292 : vector<1x1x24xf32> to vector<1x24xf32>
      %294 = vector.broadcast %293 : vector<1x24xf32> to vector<13x24xf32>
      %295 = arith.addf %290, %294 : vector<13x24xf32>
      %296 = vector.extract_strided_slice %295 {offsets = [0, 0], sizes = [13, 8], strides = [1, 1]} : vector<13x24xf32> to vector<13x8xf32>
      %297 = vector.extract_strided_slice %295 {offsets = [0, 8], sizes = [13, 8], strides = [1, 1]} : vector<13x24xf32> to vector<13x8xf32>
      %298 = arith.truncf %297 : vector<13x8xf32> to vector<13x8xbf16>
      %299 = vector.extract_strided_slice %295 {offsets = [0, 16], sizes = [13, 8], strides = [1, 1]} : vector<13x24xf32> to vector<13x8xf32>
      %300 = arith.truncf %299 : vector<13x8xf32> to vector<13x8xbf16>
      %301 = arith.index_cast %arg35 : i32 to index
      %c0_121 = arith.constant 0 : index
      %c0_122 = arith.constant 0 : index
      %302 = vector.load %arg13[%301, %c0_121, %c0_122] : memref<4x1x8xf32, #tpu.memory_space<vmem>>, vector<1x1x8xf32>
      %303 = vector.shape_cast %302 : vector<1x1x8xf32> to vector<1x8xf32>
      %304 = vector.broadcast %303 : vector<1x8xf32> to vector<13x8xf32>
      %305 = arith.addf %296, %304 : vector<13x8xf32>
      %306 = arith.truncf %305 : vector<13x8xf32> to vector<13x8xbf16>
      %307 = arith.index_cast %arg35 : i32 to index
      %c0_123 = arith.constant 0 : index
      %c0_124 = arith.constant 0 : index
      %308 = vector.load %arg14[%307, %c0_123, %c0_124] : memref<4x1x8xf32, #tpu.memory_space<vmem>>, vector<1x1x8xf32>
      %309 = vector.shape_cast %308 : vector<1x1x8xf32> to vector<1x8xf32>
      %310 = vector.broadcast %309 : vector<1x8xf32> to vector<13x8xf32>
      %311 = arith.addf %296, %310 : vector<13x8xf32>
      %312 = arith.truncf %311 : vector<13x8xf32> to vector<13x8xbf16>
      %cst_125 = arith.constant dense<0.000000e+00> : vector<13x13xf32>
      %313 = tpu.matmul %306, %298, %cst_125 {dimension_numbers = #tpu.dot_dimension_numbers<[1], [1], [0], [0], [0, 0, 1, 0], [], []>} : vector<13x8xbf16>, vector<13x8xbf16>, vector<13x13xf32> -> vector<13x13xf32>
      %314 = arith.index_cast %arg35 : i32 to index
      %c0_126 = arith.constant 0 : index
      %c0_127 = arith.constant 0 : index
      %315 = vector.load %arg2[%314, %c0_126, %c0_127] : memref<4x13x8xbf16, #tpu.memory_space<vmem>>, vector<1x13x8xbf16>
      %316 = vector.shape_cast %315 : vector<1x13x8xbf16> to vector<13x8xbf16>
      %cst_128 = arith.constant dense<0.000000e+00> : vector<13x13xf32>
      %317 = tpu.matmul %312, %316, %cst_128 {dimension_numbers = #tpu.dot_dimension_numbers<[1], [1], [0], [0], [0, 0, 1, 0], [], []>} : vector<13x8xbf16>, vector<13x8xbf16>, vector<13x13xf32> -> vector<13x13xf32>
      %318 = arith.addf %313, %317 : vector<13x13xf32>
      %cst_129 = arith.constant 0.353553385 : f32
      %319 = vector.broadcast %cst_129 : f32 to vector<13x13xf32>
      %320 = arith.mulf %318, %319 : vector<13x13xf32>
      %cst_130 = arith.constant dense<0xFF800000> : vector<13xf32>
      %321 = vector.multi_reduction <maximumf>, %320, %cst_130 [1] : vector<13x13xf32> to vector<13xf32>
      %322 = vector.shape_cast %321 : vector<13xf32> to vector<13x1xf32>
      %323 = vector.broadcast %322 : vector<13x1xf32> to vector<13x13xf32>
      %324 = arith.subf %320, %323 : vector<13x13xf32>
      %325 = math.exp %324 : vector<13x13xf32>
      %cst_131 = arith.constant dense<0.000000e+00> : vector<13xf32>
      %326 = vector.multi_reduction <add>, %325, %cst_131 [1] : vector<13x13xf32> to vector<13xf32>
      %327 = vector.shape_cast %326 : vector<13xf32> to vector<13x1xf32>
      %328 = tpu.reciprocal %327 {approx = true} : vector<13x1xf32> -> vector<13x1xf32>
      %329 = vector.broadcast %328 : vector<13x1xf32> to vector<13x13xf32>
      %330 = arith.mulf %325, %329 : vector<13x13xf32>
      %331 = arith.truncf %330 : vector<13x13xf32> to vector<13x13xbf16>
      %cst_132 = arith.constant dense<0.000000e+00> : vector<13x8xf32>
      %332 = tpu.matmul %331, %300, %cst_132 {dimension_numbers = #tpu.dot_dimension_numbers<[1], [0], [0], [1], [0, 0, 1, 1], [], []>} : vector<13x13xbf16>, vector<13x8xbf16>, vector<13x8xf32> -> vector<13x8xf32>
      %333 = arith.truncf %332 : vector<13x8xf32> to vector<13x8xbf16>
      %334 = arith.index_cast %arg35 : i32 to index
      %c0_133 = arith.constant 0 : index
      %c0_134 = arith.constant 0 : index
      %335 = vector.load %arg15[%334, %c0_133, %c0_134] : memref<4x8x32xbf16, #tpu.memory_space<vmem>>, vector<1x8x32xbf16>
      %336 = vector.shape_cast %335 : vector<1x8x32xbf16> to vector<8x32xbf16>
      %cst_135 = arith.constant dense<0.000000e+00> : vector<13x32xf32>
      %337 = tpu.matmul %333, %336, %cst_135 {dimension_numbers = #tpu.dot_dimension_numbers<[1], [0], [0], [1], [0, 0, 1, 1], [], []>} : vector<13x8xbf16>, vector<8x32xbf16>, vector<13x32xf32> -> vector<13x32xf32>
      %338 = arith.addf %arg36, %337 : vector<13x32xf32>
      scf.yield %338 : vector<13x32xf32>
    }
    %c4_i32_32 = arith.constant 4 : i32
    %75 = arith.addf %46, %74 : vector<13x32xf32>
    %c0_33 = arith.constant 0 : index
    %c0_34 = arith.constant 0 : index
    %76 = vector.load %arg16[%c0_33, %c0_34] : memref<1x32xf32, #tpu.memory_space<vmem>>, vector<1x32xf32>
    %77 = vector.broadcast %76 : vector<1x32xf32> to vector<13x32xf32>
    %78 = arith.addf %75, %77 : vector<13x32xf32>
    %c0_35 = arith.constant 0 : index
    %c0_36 = arith.constant 0 : index
    %79 = vector.load %arg17[%c0_35, %c0_36] : memref<1x32xf32, #tpu.memory_space<vmem>>, vector<1x32xf32>
    %c0_37 = arith.constant 0 : index
    %c0_38 = arith.constant 0 : index
    %80 = vector.load %arg18[%c0_37, %c0_38] : memref<1x32xf32, #tpu.memory_space<vmem>>, vector<1x32xf32>
    %cst_39 = arith.constant dense<0.000000e+00> : vector<13xf32>
    %81 = vector.multi_reduction <add>, %78, %cst_39 [1] : vector<13x32xf32> to vector<13xf32>
    %82 = vector.shape_cast %81 : vector<13xf32> to vector<13x1xf32>
    %cst_40 = arith.constant 3.200000e+01 : f32
    %83 = vector.broadcast %cst_40 : f32 to vector<13x1xf32>
    %84 = arith.divf %82, %83 : vector<13x1xf32>
    %85 = vector.broadcast %84 : vector<13x1xf32> to vector<13x32xf32>
    %86 = arith.subf %78, %85 : vector<13x32xf32>
    %87 = arith.mulf %86, %86 : vector<13x32xf32>
    %cst_41 = arith.constant dense<0.000000e+00> : vector<13xf32>
    %88 = vector.multi_reduction <add>, %87, %cst_41 [1] : vector<13x32xf32> to vector<13xf32>
    %89 = vector.shape_cast %88 : vector<13xf32> to vector<13x1xf32>
    %cst_42 = arith.constant 3.200000e+01 : f32
    %90 = vector.broadcast %cst_42 : f32 to vector<13x1xf32>
    %91 = arith.divf %89, %90 : vector<13x1xf32>
    %92 = vector.broadcast %84 : vector<13x1xf32> to vector<13x32xf32>
    %93 = arith.subf %78, %92 : vector<13x32xf32>
    %cst_43 = arith.constant 9.99999974E-6 : f32
    %94 = vector.broadcast %cst_43 : f32 to vector<13x1xf32>
    %95 = arith.addf %91, %94 : vector<13x1xf32>
    %96 = math.rsqrt %95 : vector<13x1xf32>
    %97 = vector.broadcast %96 : vector<13x1xf32> to vector<13x32xf32>
    %98 = arith.mulf %93, %97 : vector<13x32xf32>
    %99 = vector.broadcast %79 : vector<1x32xf32> to vector<13x32xf32>
    %100 = arith.mulf %98, %99 : vector<13x32xf32>
    %101 = vector.broadcast %80 : vector<1x32xf32> to vector<13x32xf32>
    %102 = arith.addf %100, %101 : vector<13x32xf32>
    %103 = arith.truncf %102 : vector<13x32xf32> to vector<13x32xbf16>
    %c0_44 = arith.constant 0 : index
    %c0_45 = arith.constant 0 : index
    %104 = vector.load %arg19[%c0_44, %c0_45] : memref<32x64xbf16, #tpu.memory_space<vmem>>, vector<32x64xbf16>
    %cst_46 = arith.constant dense<0.000000e+00> : vector<13x64xf32>
    %105 = tpu.matmul %103, %104, %cst_46 {dimension_numbers = #tpu.dot_dimension_numbers<[1], [0], [0], [1], [0, 0, 1, 1], [], []>} : vector<13x32xbf16>, vector<32x64xbf16>, vector<13x64xf32> -> vector<13x64xf32>
    %c0_47 = arith.constant 0 : index
    %c0_48 = arith.constant 0 : index
    %106 = vector.load %arg20[%c0_47, %c0_48] : memref<1x64xf32, #tpu.memory_space<vmem>>, vector<1x64xf32>
    %107 = vector.broadcast %106 : vector<1x64xf32> to vector<13x64xf32>
    %108 = arith.addf %105, %107 : vector<13x64xf32>
    %109 = vector.extract_strided_slice %108 {offsets = [0, 0], sizes = [13, 32], strides = [1, 1]} : vector<13x64xf32> to vector<13x32xf32>
    %110 = vector.extract_strided_slice %108 {offsets = [0, 32], sizes = [13, 32], strides = [1, 1]} : vector<13x64xf32> to vector<13x32xf32>
    %111 = arith.negf %110 : vector<13x32xf32>
    %112 = math.exp %111 : vector<13x32xf32>
    %cst_49 = arith.constant 1.000000e+00 : f32
    %113 = vector.broadcast %cst_49 : f32 to vector<13x32xf32>
    %114 = arith.addf %113, %112 : vector<13x32xf32>
    %115 = arith.divf %113, %114 : vector<13x32xf32>
    %116 = arith.mulf %109, %115 : vector<13x32xf32>
    %cst_50 = arith.constant 0.000000e+00 : f32
    %117 = vector.broadcast %cst_50 : f32 to vector<8x32xf32>
    %c0_51 = arith.constant 0 : index
    %c0_52 = arith.constant 0 : index
    %118 = vector.load %arg34[%c0_51, %c0_52] : memref<29x32xf32, #tpu.memory_space<vmem>>, vector<8x32xf32>
    tpu.vector_store %arg34[%c0_51, %c0_52], %117 {strides = array<i32>} : memref<29x32xf32, #tpu.memory_space<vmem>>, vector<8x32xf32>,
    %cst_53 = arith.constant 0.000000e+00 : f32
    %119 = vector.broadcast %cst_53 : f32 to vector<13x32xf32>
    %c16 = arith.constant 16 : index
    %c0_54 = arith.constant 0 : index
    %120 = vector.load %arg34[%c16, %c0_54] : memref<29x32xf32, #tpu.memory_space<vmem>>, vector<13x32xf32>
    tpu.vector_store %arg34[%c16, %c0_54], %119 {strides = array<i32>} : memref<29x32xf32, #tpu.memory_space<vmem>>, vector<13x32xf32>,
    %c8 = arith.constant 8 : index
    %c0_55 = arith.constant 0 : index
    %121 = vector.load %arg34[%c8, %c0_55] : memref<29x32xf32, #tpu.memory_space<vmem>>, vector<13x32xf32>
    tpu.vector_store %arg34[%c8, %c0_55], %116 {strides = array<i32>} : memref<29x32xf32, #tpu.memory_space<vmem>>, vector<13x32xf32>,
    %c0_56 = arith.constant 0 : index
    %c0_57 = arith.constant 0 : index
    %122 = vector.load %arg21[%c0_56, %c0_57] : memref<15x32xf32, #tpu.memory_space<vmem>>, vector<15x32xf32>
    %cst_58 = arith.constant 0.000000e+00 : f32
    %123 = vector.broadcast %cst_58 : f32 to vector<13x32xf32>
    %c1 = arith.constant 1 : index
    %c0_59 = arith.constant 0 : index
    %124 = vector.load %arg34[%c1, %c0_59] : memref<29x32xf32, #tpu.memory_space<vmem>>, vector<13x32xf32>
    %125 = vector.extract_strided_slice %122 {offsets = [0, 0], sizes = [1, 32], strides = [1, 1]} : vector<15x32xf32> to vector<1x32xf32>
    %126 = vector.broadcast %125 : vector<1x32xf32> to vector<13x32xf32>
    %127 = arith.mulf %124, %126 : vector<13x32xf32>
    %128 = arith.addf %123, %127 : vector<13x32xf32>
    %c2 = arith.constant 2 : index
    %c0_60 = arith.constant 0 : index
    %129 = vector.load %arg34[%c2, %c0_60] : memref<29x32xf32, #tpu.memory_space<vmem>>, vector<13x32xf32>
    %130 = vector.extract_strided_slice %122 {offsets = [1, 0], sizes = [1, 32], strides = [1, 1]} : vector<15x32xf32> to vector<1x32xf32>
    %131 = vector.broadcast %130 : vector<1x32xf32> to vector<13x32xf32>
    %132 = arith.mulf %129, %131 : vector<13x32xf32>
    %133 = arith.addf %128, %132 : vector<13x32xf32>
    %c3 = arith.constant 3 : index
    %c0_61 = arith.constant 0 : index
    %134 = vector.load %arg34[%c3, %c0_61] : memref<29x32xf32, #tpu.memory_space<vmem>>, vector<13x32xf32>
    %135 = vector.extract_strided_slice %122 {offsets = [2, 0], sizes = [1, 32], strides = [1, 1]} : vector<15x32xf32> to vector<1x32xf32>
    %136 = vector.broadcast %135 : vector<1x32xf32> to vector<13x32xf32>
    %137 = arith.mulf %134, %136 : vector<13x32xf32>
    %138 = arith.addf %133, %137 : vector<13x32xf32>
    %c4 = arith.constant 4 : index
    %c0_62 = arith.constant 0 : index
    %139 = vector.load %arg34[%c4, %c0_62] : memref<29x32xf32, #tpu.memory_space<vmem>>, vector<13x32xf32>
    %140 = vector.extract_strided_slice %122 {offsets = [3, 0], sizes = [1, 32], strides = [1, 1]} : vector<15x32xf32> to vector<1x32xf32>
    %141 = vector.broadcast %140 : vector<1x32xf32> to vector<13x32xf32>
    %142 = arith.mulf %139, %141 : vector<13x32xf32>
    %143 = arith.addf %138, %142 : vector<13x32xf32>
    %c5 = arith.constant 5 : index
    %c0_63 = arith.constant 0 : index
    %144 = vector.load %arg34[%c5, %c0_63] : memref<29x32xf32, #tpu.memory_space<vmem>>, vector<13x32xf32>
    %145 = vector.extract_strided_slice %122 {offsets = [4, 0], sizes = [1, 32], strides = [1, 1]} : vector<15x32xf32> to vector<1x32xf32>
    %146 = vector.broadcast %145 : vector<1x32xf32> to vector<13x32xf32>
    %147 = arith.mulf %144, %146 : vector<13x32xf32>
    %148 = arith.addf %143, %147 : vector<13x32xf32>
    %c6 = arith.constant 6 : index
    %c0_64 = arith.constant 0 : index
    %149 = vector.load %arg34[%c6, %c0_64] : memref<29x32xf32, #tpu.memory_space<vmem>>, vector<13x32xf32>
    %150 = vector.extract_strided_slice %122 {offsets = [5, 0], sizes = [1, 32], strides = [1, 1]} : vector<15x32xf32> to vector<1x32xf32>
    %151 = vector.broadcast %150 : vector<1x32xf32> to vector<13x32xf32>
    %152 = arith.mulf %149, %151 : vector<13x32xf32>
    %153 = arith.addf %148, %152 : vector<13x32xf32>
    %c7 = arith.constant 7 : index
    %c0_65 = arith.constant 0 : index
    %154 = vector.load %arg34[%c7, %c0_65] : memref<29x32xf32, #tpu.memory_space<vmem>>, vector<13x32xf32>
    %155 = vector.extract_strided_slice %122 {offsets = [6, 0], sizes = [1, 32], strides = [1, 1]} : vector<15x32xf32> to vector<1x32xf32>
    %156 = vector.broadcast %155 : vector<1x32xf32> to vector<13x32xf32>
    %157 = arith.mulf %154, %156 : vector<13x32xf32>
    %158 = arith.addf %153, %157 : vector<13x32xf32>
    %c8_66 = arith.constant 8 : index
    %c0_67 = arith.constant 0 : index
    %159 = vector.load %arg34[%c8_66, %c0_67] : memref<29x32xf32, #tpu.memory_space<vmem>>, vector<13x32xf32>
    %160 = vector.extract_strided_slice %122 {offsets = [7, 0], sizes = [1, 32], strides = [1, 1]} : vector<15x32xf32> to vector<1x32xf32>
    %161 = vector.broadcast %160 : vector<1x32xf32> to vector<13x32xf32>
    %162 = arith.mulf %159, %161 : vector<13x32xf32>
    %163 = arith.addf %158, %162 : vector<13x32xf32>
    %c9 = arith.constant 9 : index
    %c0_68 = arith.constant 0 : index
    %164 = vector.load %arg34[%c9, %c0_68] : memref<29x32xf32, #tpu.memory_space<vmem>>, vector<13x32xf32>
    %165 = vector.extract_strided_slice %122 {offsets = [8, 0], sizes = [1, 32], strides = [1, 1]} : vector<15x32xf32> to vector<1x32xf32>
    %166 = vector.broadcast %165 : vector<1x32xf32> to vector<13x32xf32>
    %167 = arith.mulf %164, %166 : vector<13x32xf32>
    %168 = arith.addf %163, %167 : vector<13x32xf32>
    %c10 = arith.constant 10 : index
    %c0_69 = arith.constant 0 : index
    %169 = vector.load %arg34[%c10, %c0_69] : memref<29x32xf32, #tpu.memory_space<vmem>>, vector<13x32xf32>
    %170 = vector.extract_strided_slice %122 {offsets = [9, 0], sizes = [1, 32], strides = [1, 1]} : vector<15x32xf32> to vector<1x32xf32>
    %171 = vector.broadcast %170 : vector<1x32xf32> to vector<13x32xf32>
    %172 = arith.mulf %169, %171 : vector<13x32xf32>
    %173 = arith.addf %168, %172 : vector<13x32xf32>
    %c11 = arith.constant 11 : index
    %c0_70 = arith.constant 0 : index
    %174 = vector.load %arg34[%c11, %c0_70] : memref<29x32xf32, #tpu.memory_space<vmem>>, vector<13x32xf32>
    %175 = vector.extract_strided_slice %122 {offsets = [10, 0], sizes = [1, 32], strides = [1, 1]} : vector<15x32xf32> to vector<1x32xf32>
    %176 = vector.broadcast %175 : vector<1x32xf32> to vector<13x32xf32>
    %177 = arith.mulf %174, %176 : vector<13x32xf32>
    %178 = arith.addf %173, %177 : vector<13x32xf32>
    %c12 = arith.constant 12 : index
    %c0_71 = arith.constant 0 : index
    %179 = vector.load %arg34[%c12, %c0_71] : memref<29x32xf32, #tpu.memory_space<vmem>>, vector<13x32xf32>
    %180 = vector.extract_strided_slice %122 {offsets = [11, 0], sizes = [1, 32], strides = [1, 1]} : vector<15x32xf32> to vector<1x32xf32>
    %181 = vector.broadcast %180 : vector<1x32xf32> to vector<13x32xf32>
    %182 = arith.mulf %179, %181 : vector<13x32xf32>
    %183 = arith.addf %178, %182 : vector<13x32xf32>
    %c13 = arith.constant 13 : index
    %c0_72 = arith.constant 0 : index
    %184 = vector.load %arg34[%c13, %c0_72] : memref<29x32xf32, #tpu.memory_space<vmem>>, vector<13x32xf32>
    %185 = vector.extract_strided_slice %122 {offsets = [12, 0], sizes = [1, 32], strides = [1, 1]} : vector<15x32xf32> to vector<1x32xf32>
    %186 = vector.broadcast %185 : vector<1x32xf32> to vector<13x32xf32>
    %187 = arith.mulf %184, %186 : vector<13x32xf32>
    %188 = arith.addf %183, %187 : vector<13x32xf32>
    %c14 = arith.constant 14 : index
    %c0_73 = arith.constant 0 : index
    %189 = vector.load %arg34[%c14, %c0_73] : memref<29x32xf32, #tpu.memory_space<vmem>>, vector<13x32xf32>
    %190 = vector.extract_strided_slice %122 {offsets = [13, 0], sizes = [1, 32], strides = [1, 1]} : vector<15x32xf32> to vector<1x32xf32>
    %191 = vector.broadcast %190 : vector<1x32xf32> to vector<13x32xf32>
    %192 = arith.mulf %189, %191 : vector<13x32xf32>
    %193 = arith.addf %188, %192 : vector<13x32xf32>
    %c15 = arith.constant 15 : index
    %c0_74 = arith.constant 0 : index
    %194 = vector.load %arg34[%c15, %c0_74] : memref<29x32xf32, #tpu.memory_space<vmem>>, vector<13x32xf32>
    %195 = vector.extract_strided_slice %122 {offsets = [14, 0], sizes = [1, 32], strides = [1, 1]} : vector<15x32xf32> to vector<1x32xf32>
    %196 = vector.broadcast %195 : vector<1x32xf32> to vector<13x32xf32>
    %197 = arith.mulf %194, %196 : vector<13x32xf32>
    %198 = arith.addf %193, %197 : vector<13x32xf32>
    %c0_75 = arith.constant 0 : index
    %c0_76 = arith.constant 0 : index
    %199 = vector.load %arg22[%c0_75, %c0_76] : memref<1x32xf32, #tpu.memory_space<vmem>>, vector<1x32xf32>
    %200 = vector.broadcast %199 : vector<1x32xf32> to vector<13x32xf32>
    %201 = arith.addf %198, %200 : vector<13x32xf32>
    %202 = arith.negf %201 : vector<13x32xf32>
    %203 = math.exp %202 : vector<13x32xf32>
    %cst_77 = arith.constant 1.000000e+00 : f32
    %204 = vector.broadcast %cst_77 : f32 to vector<13x32xf32>
    %205 = arith.addf %204, %203 : vector<13x32xf32>
    %206 = arith.divf %204, %205 : vector<13x32xf32>
    %207 = arith.mulf %201, %206 : vector<13x32xf32>
    %208 = arith.truncf %207 : vector<13x32xf32> to vector<13x32xbf16>
    %c0_78 = arith.constant 0 : index
    %c0_79 = arith.constant 0 : index
    %209 = vector.load %arg23[%c0_78, %c0_79] : memref<32x32xbf16, #tpu.memory_space<vmem>>, vector<32x32xbf16>
    %cst_80 = arith.constant dense<0.000000e+00> : vector<13x32xf32>
    %210 = tpu.matmul %208, %209, %cst_80 {dimension_numbers = #tpu.dot_dimension_numbers<[1], [0], [0], [1], [0, 0, 1, 1], [], []>} : vector<13x32xbf16>, vector<32x32xbf16>, vector<13x32xf32> -> vector<13x32xf32>
    %211 = arith.addf %78, %210 : vector<13x32xf32>
    %c0_81 = arith.constant 0 : index
    %c0_82 = arith.constant 0 : index
    %212 = vector.load %arg24[%c0_81, %c0_82] : memref<1x32xf32, #tpu.memory_space<vmem>>, vector<1x32xf32>
    %213 = vector.broadcast %212 : vector<1x32xf32> to vector<13x32xf32>
    %214 = arith.addf %211, %213 : vector<13x32xf32>
    %c0_83 = arith.constant 0 : index
    %c0_84 = arith.constant 0 : index
    %215 = vector.load %arg25[%c0_83, %c0_84] : memref<1x32xf32, #tpu.memory_space<vmem>>, vector<1x32xf32>
    %c0_85 = arith.constant 0 : index
    %c0_86 = arith.constant 0 : index
    %216 = vector.load %arg26[%c0_85, %c0_86] : memref<1x32xf32, #tpu.memory_space<vmem>>, vector<1x32xf32>
    %cst_87 = arith.constant dense<0.000000e+00> : vector<13xf32>
    %217 = vector.multi_reduction <add>, %214, %cst_87 [1] : vector<13x32xf32> to vector<13xf32>
    %218 = vector.shape_cast %217 : vector<13xf32> to vector<13x1xf32>
    %cst_88 = arith.constant 3.200000e+01 : f32
    %219 = vector.broadcast %cst_88 : f32 to vector<13x1xf32>
    %220 = arith.divf %218, %219 : vector<13x1xf32>
    %221 = vector.broadcast %220 : vector<13x1xf32> to vector<13x32xf32>
    %222 = arith.subf %214, %221 : vector<13x32xf32>
    %223 = arith.mulf %222, %222 : vector<13x32xf32>
    %cst_89 = arith.constant dense<0.000000e+00> : vector<13xf32>
    %224 = vector.multi_reduction <add>, %223, %cst_89 [1] : vector<13x32xf32> to vector<13xf32>
    %225 = vector.shape_cast %224 : vector<13xf32> to vector<13x1xf32>
    %cst_90 = arith.constant 3.200000e+01 : f32
    %226 = vector.broadcast %cst_90 : f32 to vector<13x1xf32>
    %227 = arith.divf %225, %226 : vector<13x1xf32>
    %228 = vector.broadcast %220 : vector<13x1xf32> to vector<13x32xf32>
    %229 = arith.subf %214, %228 : vector<13x32xf32>
    %cst_91 = arith.constant 9.99999974E-6 : f32
    %230 = vector.broadcast %cst_91 : f32 to vector<13x1xf32>
    %231 = arith.addf %227, %230 : vector<13x1xf32>
    %232 = math.rsqrt %231 : vector<13x1xf32>
    %233 = vector.broadcast %232 : vector<13x1xf32> to vector<13x32xf32>
    %234 = arith.mulf %229, %233 : vector<13x32xf32>
    %235 = vector.broadcast %215 : vector<1x32xf32> to vector<13x32xf32>
    %236 = arith.mulf %234, %235 : vector<13x32xf32>
    %237 = vector.broadcast %216 : vector<1x32xf32> to vector<13x32xf32>
    %238 = arith.addf %236, %237 : vector<13x32xf32>
    %239 = arith.truncf %238 : vector<13x32xf32> to vector<13x32xbf16>
    %c0_92 = arith.constant 0 : index
    %c0_93 = arith.constant 0 : index
    %240 = vector.load %arg27[%c0_92, %c0_93] : memref<32x64xbf16, #tpu.memory_space<vmem>>, vector<32x64xbf16>
    %cst_94 = arith.constant dense<0.000000e+00> : vector<13x64xf32>
    %241 = tpu.matmul %239, %240, %cst_94 {dimension_numbers = #tpu.dot_dimension_numbers<[1], [0], [0], [1], [0, 0, 1, 1], [], []>} : vector<13x32xbf16>, vector<32x64xbf16>, vector<13x64xf32> -> vector<13x64xf32>
    %c0_95 = arith.constant 0 : index
    %c0_96 = arith.constant 0 : index
    %242 = vector.load %arg28[%c0_95, %c0_96] : memref<1x64xf32, #tpu.memory_space<vmem>>, vector<1x64xf32>
    %243 = vector.broadcast %242 : vector<1x64xf32> to vector<13x64xf32>
    %244 = arith.addf %241, %243 : vector<13x64xf32>
    %245 = arith.negf %244 : vector<13x64xf32>
    %246 = math.exp %245 : vector<13x64xf32>
    %cst_97 = arith.constant 1.000000e+00 : f32
    %247 = vector.broadcast %cst_97 : f32 to vector<13x64xf32>
    %248 = arith.addf %247, %246 : vector<13x64xf32>
    %249 = arith.divf %247, %248 : vector<13x64xf32>
    %250 = arith.mulf %244, %249 : vector<13x64xf32>
    %251 = arith.truncf %250 : vector<13x64xf32> to vector<13x64xbf16>
    %c0_98 = arith.constant 0 : index
    %c0_99 = arith.constant 0 : index
    %252 = vector.load %arg29[%c0_98, %c0_99] : memref<64x32xbf16, #tpu.memory_space<vmem>>, vector<64x32xbf16>
    %cst_100 = arith.constant dense<0.000000e+00> : vector<13x32xf32>
    %253 = tpu.matmul %251, %252, %cst_100 {dimension_numbers = #tpu.dot_dimension_numbers<[1], [0], [0], [1], [0, 0, 1, 1], [], []>} : vector<13x64xbf16>, vector<64x32xbf16>, vector<13x32xf32> -> vector<13x32xf32>
    %c0_101 = arith.constant 0 : index
    %c0_102 = arith.constant 0 : index
    %254 = vector.load %arg30[%c0_101, %c0_102] : memref<1x32xf32, #tpu.memory_space<vmem>>, vector<1x32xf32>
    %255 = vector.broadcast %254 : vector<1x32xf32> to vector<13x32xf32>
    %256 = arith.addf %253, %255 : vector<13x32xf32>
    %cst_103 = arith.constant 5.000000e-01 : f32
    %257 = vector.broadcast %cst_103 : f32 to vector<13x32xf32>
    %258 = arith.mulf %257, %256 : vector<13x32xf32>
    %259 = arith.addf %214, %258 : vector<13x32xf32>
    %c0_104 = arith.constant 0 : index
    %c0_105 = arith.constant 0 : index
    %260 = vector.load %arg31[%c0_104, %c0_105] : memref<1x32xf32, #tpu.memory_space<vmem>>, vector<1x32xf32>
    %c0_106 = arith.constant 0 : index
    %c0_107 = arith.constant 0 : index
    %261 = vector.load %arg32[%c0_106, %c0_107] : memref<1x32xf32, #tpu.memory_space<vmem>>, vector<1x32xf32>
    %cst_108 = arith.constant dense<0.000000e+00> : vector<13xf32>
    %262 = vector.multi_reduction <add>, %259, %cst_108 [1] : vector<13x32xf32> to vector<13xf32>
    %263 = vector.shape_cast %262 : vector<13xf32> to vector<13x1xf32>
    %cst_109 = arith.constant 3.200000e+01 : f32
    %264 = vector.broadcast %cst_109 : f32 to vector<13x1xf32>
    %265 = arith.divf %263, %264 : vector<13x1xf32>
    %266 = vector.broadcast %265 : vector<13x1xf32> to vector<13x32xf32>
    %267 = arith.subf %259, %266 : vector<13x32xf32>
    %268 = arith.mulf %267, %267 : vector<13x32xf32>
    %cst_110 = arith.constant dense<0.000000e+00> : vector<13xf32>
    %269 = vector.multi_reduction <add>, %268, %cst_110 [1] : vector<13x32xf32> to vector<13xf32>
    %270 = vector.shape_cast %269 : vector<13xf32> to vector<13x1xf32>
    %cst_111 = arith.constant 3.200000e+01 : f32
    %271 = vector.broadcast %cst_111 : f32 to vector<13x1xf32>
    %272 = arith.divf %270, %271 : vector<13x1xf32>
    %273 = vector.broadcast %265 : vector<13x1xf32> to vector<13x32xf32>
    %274 = arith.subf %259, %273 : vector<13x32xf32>
    %cst_112 = arith.constant 9.99999974E-6 : f32
    %275 = vector.broadcast %cst_112 : f32 to vector<13x1xf32>
    %276 = arith.addf %272, %275 : vector<13x1xf32>
    %277 = math.rsqrt %276 : vector<13x1xf32>
    %278 = vector.broadcast %277 : vector<13x1xf32> to vector<13x32xf32>
    %279 = arith.mulf %274, %278 : vector<13x32xf32>
    %280 = vector.broadcast %260 : vector<1x32xf32> to vector<13x32xf32>
    %281 = arith.mulf %279, %280 : vector<13x32xf32>
    %282 = vector.broadcast %261 : vector<1x32xf32> to vector<13x32xf32>
    %283 = arith.addf %281, %282 : vector<13x32xf32>
    %c0_113 = arith.constant 0 : index
    %c0_114 = arith.constant 0 : index
    %c0_115 = arith.constant 0 : index
    %284 = vector.load %arg33[%c0_113, %c0_114, %c0_115] : memref<1x13x32xf32, #tpu.memory_space<vmem>>, vector<1x13x32xf32>
    %285 = vector.shape_cast %284 : vector<1x13x32xf32> to vector<13x32xf32>
    %286 = vector.shape_cast %283 : vector<13x32xf32> to vector<1x13x32xf32>
    tpu.vector_store %arg33[%c0_113, %c0_114, %c0_115], %286 {strides = array<i32>} : memref<1x13x32xf32, #tpu.memory_space<vmem>>, vector<1x13x32xf32>,
    return
  }
  func.func @transform_0(%arg0: i32) -> (i32, i32, i32) {
    %c0_i32 = arith.constant 0 : i32
    %c0_i32_0 = arith.constant 0 : i32
    %c0_i32_1 = arith.constant 0 : i32
    return %arg0, %c0_i32, %c0_i32_0 : i32, i32, i32
  }
  func.func @transform_1(%arg0: i32) -> (i32, i32, i32) {
    %c0_i32 = arith.constant 0 : i32
    %c0_i32_0 = arith.constant 0 : i32
    %c0_i32_1 = arith.constant 0 : i32
    %c0_i32_2 = arith.constant 0 : i32
    return %c0_i32, %c0_i32_0, %c0_i32_1 : i32, i32, i32
  }
  func.func @transform_2(%arg0: i32) -> (i32, i32) {
    %c0_i32 = arith.constant 0 : i32
    %c0_i32_0 = arith.constant 0 : i32
    %c0_i32_1 = arith.constant 0 : i32
    return %c0_i32, %c0_i32_0 : i32, i32
  }
  func.func @transform_3(%arg0: i32) -> (i32, i32) {
    %c0_i32 = arith.constant 0 : i32
    %c0_i32_0 = arith.constant 0 : i32
    %c0_i32_1 = arith.constant 0 : i32
    return %c0_i32, %c0_i32_0 : i32, i32
  }
  func.func @transform_4(%arg0: i32) -> (i32, i32) {
    %c0_i32 = arith.constant 0 : i32
    %c0_i32_0 = arith.constant 0 : i32
    %c0_i32_1 = arith.constant 0 : i32
    return %c0_i32, %c0_i32_0 : i32, i32
  }
  func.func @transform_5(%arg0: i32) -> (i32, i32) {
    %c0_i32 = arith.constant 0 : i32
    %c0_i32_0 = arith.constant 0 : i32
    %c0_i32_1 = arith.constant 0 : i32
    return %c0_i32, %c0_i32_0 : i32, i32
  }
  func.func @transform_6(%arg0: i32) -> (i32, i32) {
    %c0_i32 = arith.constant 0 : i32
    %c0_i32_0 = arith.constant 0 : i32
    %c0_i32_1 = arith.constant 0 : i32
    return %c0_i32, %c0_i32_0 : i32, i32
  }
  func.func @transform_7(%arg0: i32) -> (i32, i32) {
    %c0_i32 = arith.constant 0 : i32
    %c0_i32_0 = arith.constant 0 : i32
    %c0_i32_1 = arith.constant 0 : i32
    return %c0_i32, %c0_i32_0 : i32, i32
  }
  func.func @transform_8(%arg0: i32) -> (i32, i32) {
    %c0_i32 = arith.constant 0 : i32
    %c0_i32_0 = arith.constant 0 : i32
    %c0_i32_1 = arith.constant 0 : i32
    return %c0_i32, %c0_i32_0 : i32, i32
  }
  func.func @transform_9(%arg0: i32) -> (i32, i32) {
    %c0_i32 = arith.constant 0 : i32
    %c0_i32_0 = arith.constant 0 : i32
    %c0_i32_1 = arith.constant 0 : i32
    return %c0_i32, %c0_i32_0 : i32, i32
  }
  func.func @transform_10(%arg0: i32) -> (i32, i32, i32) {
    %c0_i32 = arith.constant 0 : i32
    %c0_i32_0 = arith.constant 0 : i32
    %c0_i32_1 = arith.constant 0 : i32
    %c0_i32_2 = arith.constant 0 : i32
    return %c0_i32, %c0_i32_0, %c0_i32_1 : i32, i32, i32
  }
  func.func @transform_11(%arg0: i32) -> (i32, i32, i32) {
    %c0_i32 = arith.constant 0 : i32
    %c0_i32_0 = arith.constant 0 : i32
    %c0_i32_1 = arith.constant 0 : i32
    %c0_i32_2 = arith.constant 0 : i32
    return %c0_i32, %c0_i32_0, %c0_i32_1 : i32, i32, i32
  }
  func.func @transform_12(%arg0: i32) -> (i32, i32, i32) {
    %c0_i32 = arith.constant 0 : i32
    %c0_i32_0 = arith.constant 0 : i32
    %c0_i32_1 = arith.constant 0 : i32
    %c0_i32_2 = arith.constant 0 : i32
    return %c0_i32, %c0_i32_0, %c0_i32_1 : i32, i32, i32
  }
  func.func @transform_13(%arg0: i32) -> (i32, i32, i32) {
    %c0_i32 = arith.constant 0 : i32
    %c0_i32_0 = arith.constant 0 : i32
    %c0_i32_1 = arith.constant 0 : i32
    %c0_i32_2 = arith.constant 0 : i32
    return %c0_i32, %c0_i32_0, %c0_i32_1 : i32, i32, i32
  }
  func.func @transform_14(%arg0: i32) -> (i32, i32, i32) {
    %c0_i32 = arith.constant 0 : i32
    %c0_i32_0 = arith.constant 0 : i32
    %c0_i32_1 = arith.constant 0 : i32
    %c0_i32_2 = arith.constant 0 : i32
    return %c0_i32, %c0_i32_0, %c0_i32_1 : i32, i32, i32
  }
  func.func @transform_15(%arg0: i32) -> (i32, i32) {
    %c0_i32 = arith.constant 0 : i32
    %c0_i32_0 = arith.constant 0 : i32
    %c0_i32_1 = arith.constant 0 : i32
    return %c0_i32, %c0_i32_0 : i32, i32
  }
  func.func @transform_16(%arg0: i32) -> (i32, i32) {
    %c0_i32 = arith.constant 0 : i32
    %c0_i32_0 = arith.constant 0 : i32
    %c0_i32_1 = arith.constant 0 : i32
    return %c0_i32, %c0_i32_0 : i32, i32
  }
  func.func @transform_17(%arg0: i32) -> (i32, i32) {
    %c0_i32 = arith.constant 0 : i32
    %c0_i32_0 = arith.constant 0 : i32
    %c0_i32_1 = arith.constant 0 : i32
    return %c0_i32, %c0_i32_0 : i32, i32
  }
  func.func @transform_18(%arg0: i32) -> (i32, i32) {
    %c0_i32 = arith.constant 0 : i32
    %c0_i32_0 = arith.constant 0 : i32
    %c0_i32_1 = arith.constant 0 : i32
    return %c0_i32, %c0_i32_0 : i32, i32
  }
  func.func @transform_19(%arg0: i32) -> (i32, i32) {
    %c0_i32 = arith.constant 0 : i32
    %c0_i32_0 = arith.constant 0 : i32
    %c0_i32_1 = arith.constant 0 : i32
    return %c0_i32, %c0_i32_0 : i32, i32
  }
  func.func @transform_20(%arg0: i32) -> (i32, i32) {
    %c0_i32 = arith.constant 0 : i32
    %c0_i32_0 = arith.constant 0 : i32
    %c0_i32_1 = arith.constant 0 : i32
    return %c0_i32, %c0_i32_0 : i32, i32
  }
  func.func @transform_21(%arg0: i32) -> (i32, i32) {
    %c0_i32 = arith.constant 0 : i32
    %c0_i32_0 = arith.constant 0 : i32
    %c0_i32_1 = arith.constant 0 : i32
    return %c0_i32, %c0_i32_0 : i32, i32
  }
  func.func @transform_22(%arg0: i32) -> (i32, i32) {
    %c0_i32 = arith.constant 0 : i32
    %c0_i32_0 = arith.constant 0 : i32
    %c0_i32_1 = arith.constant 0 : i32
    return %c0_i32, %c0_i32_0 : i32, i32
  }
  func.func @transform_23(%arg0: i32) -> (i32, i32) {
    %c0_i32 = arith.constant 0 : i32
    %c0_i32_0 = arith.constant 0 : i32
    %c0_i32_1 = arith.constant 0 : i32
    return %c0_i32, %c0_i32_0 : i32, i32
  }
  func.func @transform_24(%arg0: i32) -> (i32, i32) {
    %c0_i32 = arith.constant 0 : i32
    %c0_i32_0 = arith.constant 0 : i32
    %c0_i32_1 = arith.constant 0 : i32
    return %c0_i32, %c0_i32_0 : i32, i32
  }
  func.func @transform_25(%arg0: i32) -> (i32, i32) {
    %c0_i32 = arith.constant 0 : i32
    %c0_i32_0 = arith.constant 0 : i32
    %c0_i32_1 = arith.constant 0 : i32
    return %c0_i32, %c0_i32_0 : i32, i32
  }
  func.func @transform_26(%arg0: i32) -> (i32, i32) {
    %c0_i32 = arith.constant 0 : i32
    %c0_i32_0 = arith.constant 0 : i32
    %c0_i32_1 = arith.constant 0 : i32
    return %c0_i32, %c0_i32_0 : i32, i32
  }
  func.func @transform_27(%arg0: i32) -> (i32, i32) {
    %c0_i32 = arith.constant 0 : i32
    %c0_i32_0 = arith.constant 0 : i32
    %c0_i32_1 = arith.constant 0 : i32
    return %c0_i32, %c0_i32_0 : i32, i32
  }
  func.func @transform_28(%arg0: i32) -> (i32, i32) {
    %c0_i32 = arith.constant 0 : i32
    %c0_i32_0 = arith.constant 0 : i32
    %c0_i32_1 = arith.constant 0 : i32
    return %c0_i32, %c0_i32_0 : i32, i32
  }
  func.func @transform_29(%arg0: i32) -> (i32, i32) {
    %c0_i32 = arith.constant 0 : i32
    %c0_i32_0 = arith.constant 0 : i32
    %c0_i32_1 = arith.constant 0 : i32
    return %c0_i32, %c0_i32_0 : i32, i32
  }
  func.func @transform_30(%arg0: i32) -> (i32, i32) {
    %c0_i32 = arith.constant 0 : i32
    %c0_i32_0 = arith.constant 0 : i32
    %c0_i32_1 = arith.constant 0 : i32
    return %c0_i32, %c0_i32_0 : i32, i32
  }
  func.func @transform_31(%arg0: i32) -> (i32, i32) {
    %c0_i32 = arith.constant 0 : i32
    %c0_i32_0 = arith.constant 0 : i32
    %c0_i32_1 = arith.constant 0 : i32
    return %c0_i32, %c0_i32_0 : i32, i32
  }
  func.func @transform_32(%arg0: i32) -> (i32, i32, i32) {
    %c0_i32 = arith.constant 0 : i32
    %c0_i32_0 = arith.constant 0 : i32
    %c0_i32_1 = arith.constant 0 : i32
    return %arg0, %c0_i32, %c0_i32_0 : i32, i32, i32
  }
}

</mosaic_0001>

<bundles_post_ra>
// kernel: conformer_forward.6
= control target key start
LH: loop header
LB: loop body
LE: loop exit
PB: predicated region body
PF: predicated region fallthrough
CT: control target
= control target key end

     0   :  { %8 = vsyncpa [#allocation3], 0  ;;  %s424_s12 = smov [#allocation2]   ;;  %s684_s0 = inlined_call_operand.vmem [shape: f32[216,9], index: 0, kind: input, shape index: {}]   ;;  %s685_s1 = inlined_call_operand.vmem [shape: bf16[9,32], index: 1, kind: input, shape index: {}]   ;;  %s686_s2 = inlined_call_operand.hbm [shape: f32[1,32], index: 2, kind: input, shape index: {}]   ;;  %s687_s3 = inlined_call_operand.vmem [shape: f32[216,32], index: 3, kind: output, shape index: {}]  }
   0x1   :  { %s19_s13 = sshll.u32 %s424_s12, 4  ;;  %s20_s13 = int_to_ptr.vmem [resolvable:$true] %s19_s13 }
   0x2   :  { %s410_s14 = scalar_lea.vmem %s20_s13, 16  ;;  %s414_s15 = scalar_lea.vmem %s20_s13, 32 }
   0x3   :  { %p411_p0 = scmp.ne.s32.totalorder %s20_s13, %s410_s14  ;;  %p415_p1 = scmp.lt.s32.totalorder %s20_s13, %s20_s13 }
   0x4   :  { %p416_p2 = scmp.lt.s32.totalorder %s414_s15, %s410_s14 }
   0x6   :  { %p417_p3 = por %p416_p2, %p415_p1 }
   0x8   :  { %p418_p4 = pnand %p417_p3, %p411_p0 }
   0xa   :  { %421 = shalt.err (!%p418_p4)
}
   0xb   :  { %22 = dma.hbm_to_vmem [thread:$0]  %s686_s2, 16, %s20_s13, [#allocation3]  }
   0xc   :  { %422 = dma.done.wait [#allocation3], 16  }
   0xd   :  { %423 = vsyncadd [#allocation3], 4294967280  ;;  %vm125_vm0 = vcmask 1043456   ;;  %vm126_vm1 = vcmask 1044480   ;;  %v425_v0 = vmov 65535   ;;  %v27_v4 = vld [vmem:[%s684_s0] sm:$0xff] }
   0xe   :  { %v127_v1 = vsel %vm125_vm0, 4294967295, %v425_v0  ;;  %v401_v3 = vld [vmem:[%s685_s1] sm:$0x1f]   ;;  %v28_v5 = vld [vmem:[%s684_s0 + $0x8] sm:$0xff]  ;;  %v29_v6 = vld [vmem:[%s684_s0 + $0x10] sm:$0xff]  ;;  %vm82_vm2 = vcmask 72704  }
   0xf   :  { %v128_v2 = vsel %vm126_vm1, %v127_v1, 0  ;;  %v54_v8 = vpack.c.bf16 %v28_v5, %v27_v4  ;;  %v30_v9 = vld [vmem:[%s684_s0 + $0x18] sm:$0xff]  ;;  %v43_v10 = vld [vmem:[%s684_s0 + $0x80] sm:$0xff]  ;;  %v44_v11 = vld [vmem:[%s684_s0 + $0x88] sm:$0xff]  ;;  %vm303_vm3 = vcmask 261120  }
  0x10   :  { %v130_v7 = vand.u32 %v401_v3, %v128_v2  ;;  %v62_v12 = vpack.c.bf16 %v44_v11, %v43_v10  ;;  %v45_v13 = vld [vmem:[%s684_s0 + $0x90] sm:$0xff]  ;;  %v46_v14 = vld [vmem:[%s684_s0 + $0x98] sm:$0xff]  ;;  %v31_v15 = vld [vmem:[%s684_s0 + $0x20] sm:$0xff]  ;;  %v55_v16 = vpack.c.bf16 %v30_v9, %v29_v6 }
  0x11   :  { %v63_v17 = vpack.c.bf16 %v46_v14, %v45_v13  ;;  %v32_v18 = vld [vmem:[%s684_s0 + $0x28] sm:$0xff]  ;;  %v47_v20 = vld [vmem:[%s684_s0 + $0xa0] sm:$0xff]  ;;  %369 = vmatprep.mubr.msk.bf16.mxu0 %vm82_vm2, %v54_v8  ;;  %v33_v23 = vld [vmem:[%s684_s0 + $0x30] sm:$0xff] }
  0x12   :  { %367 = vmatprep.subr.bf16.mxu0 %v130_v7  ;;  %397 = vmatprep.subr.bf16.mxu1 %v130_v7  ;;  %v56_v19 = vpack.c.bf16 %v32_v18, %v31_v15  ;;  %v48_v21 = vld [vmem:[%s684_s0 + $0xa8] sm:$0xff]  ;;  %v34_v24 = vld [vmem:[%s684_s0 + $0x38] sm:$0xff]  ;;  %v49_v25 = vld [vmem:[%s684_s0 + $0xb0] sm:$0xff] }
  0x13   :  { %368 = vmatpush3.bf16.msra.mxu0 %v130_v7  ;;  %398 = vmatpush3.bf16.msra.mxu1 %v130_v7  ;;  %v64_v22 = vpack.c.bf16 %v48_v21, %v47_v20  ;;  %v50_v26 = vld [vmem:[%s684_s0 + $0xb8] sm:$0xff]  ;;  %v35_v27 = vld [vmem:[%s684_s0 + $0x40] sm:$0xff]  ;;  %v36_v28 = vld [vmem:[%s684_s0 + $0x48] sm:$0xff]  ;;  %v57_v31 = vpack.c.bf16 %v34_v24, %v33_v23 }
  0x14   :  { %385 = vmatprep.mubr.msk.bf16.mxu1 %vm82_vm2, %v62_v12  ;;  %v51_v29 = vld [vmem:[%s684_s0 + $0xc0] sm:$0xff]  ;;  %v52_v30 = vld [vmem:[%s684_s0 + $0xc8] sm:$0xff]  ;;  %v65_v32 = vpack.c.bf16 %v50_v26, %v49_v25  ;;  %v58_v33 = vpack.c.bf16 %v36_v28, %v35_v27  ;;  %v37_v35 = vld [vmem:[%s684_s0 + $0x50] sm:$0xff] }
  0x15   :  { %v66_v34 = vpack.c.bf16 %v52_v30, %v51_v29  ;;  %v38_v36 = vld [vmem:[%s684_s0 + $0x58] sm:$0xff]  ;;  %v53_v37 = vld [vmem:[%s684_s0 + $0xd0] sm:$0xff]  ;;  %v39_v38 = vld [vmem:[%s684_s0 + $0x60] sm:$0xff] }
  0x16   :  { %370 = vmatmul.mubr.msk.bf16.vlgmr.msra.gmra.mxu0 %vm82_vm2, %v55_v16  ;;  %386 = vmatmul.mubr.msk.bf16.vlgmr.msra.gmra.mxu1 %vm82_vm2, %v63_v17  ;;  %v40_v39 = vld [vmem:[%s684_s0 + $0x68] sm:$0xff]  ;;  %v59_v40 = vpack.c.bf16 %v38_v36, %v37_v35  ;;  %v67_v41 = vpack.c.bf16 %v53_v37, %v53_v37  ;;  %v41_v43 = vld [vmem:[%s684_s0 + $0x70] sm:$0xff]  ;;  %v42_v44 = vld [vmem:[%s684_s0 + $0x78] sm:$0xff] }
  0x17   :  { %373 = vmatprep.mubr.msk.bf16.mxu0 %vm82_vm2, %v56_v19  ;;  %389 = vmatprep.mubr.msk.bf16.mxu1 %vm82_vm2, %v64_v22  ;;  %v60_v42 = vpack.c.bf16 %v40_v39, %v39_v38  ;;  %v61_v45 = vpack.c.bf16 %v42_v44, %v41_v43  ;;  %v547_v46 = vld [vmem:[#allocation2] ss:$0 sm:$0xff] }
  0x1e   :  { %374 = vmatmul.mubr.msk.bf16.gmra.mxu0 %vm82_vm2, %v57_v31  ;;  %390 = vmatmul.mubr.msk.bf16.gmra.mxu1 %vm82_vm2, %v65_v32 }
  0x1f   :  { %377 = vmatprep.mubr.msk.bf16.mxu0 %vm82_vm2, %v58_v33  ;;  %393 = vmatprep.mubr.msk.bf16.mxu1 %vm82_vm2, %v66_v34 }
  0x26   :  { %378 = vmatmul.mubr.msk.bf16.gmra.mxu0 %vm82_vm2, %v59_v40  ;;  %394 = vmatmul.mubr.msk.bf16.gmra.mxu1 %vm82_vm2, %v67_v41 }
  0x27   :  { %381 = vmatprep.mubr.msk.bf16.mxu0 %vm82_vm2, %v60_v42 }
  0x2e   :  { %382 = vmatmul.mubr.msk.bf16.gmra.mxu0 %vm82_vm2, %v61_v45 }
  0xd6   :  { %v371_v47 = vpop.f32.mrf.mxu0  ;;  %v387_v48 = vpop.f32.mrf.mxu1 }
  0xd7   :  { %v175_v49 = vadd.f32 %v371_v47, %v547_v46  ;;  %v239_v50 = vadd.f32 %v387_v48, %v547_v46 }
  0xd8   :  { %v166_v51 = vpop.f32.mrf.mxu0  ;;  %v230_v52 = vpop.f32.mrf.mxu1 }
  0xd9   :  { %v278_v53 = vmax.f32 %v175_v49, 0.0  ;;  %v167_v54 = vadd.f32 %v547_v46, %v166_v51  ;;  %v294_v55 = vmax.f32 %v239_v50, 0.0  ;;  %v231_v56 = vadd.f32 %v547_v46, %v230_v52 }
  0xda   :  { %v372_v57 = vpop.f32.mrf.mxu0  ;;  %v388_v58 = vpop.f32.mrf.mxu1 }
  0xdb   :  { %306 = vst.msk [vmem:[%s687_s3 + $0x10] sm:$0xff] %vm303_vm3, %v278_v53  ;;  %v276_v59 = vmax.f32 %v167_v54, 0.0  ;;  %322 = vst.msk [vmem:[%s687_s3 + $0x90] sm:$0xff] %vm303_vm3, %v294_v55  ;;  %v178_v60 = vadd.f32 %v372_v57, %v547_v46  ;;  %v292_v61 = vmax.f32 %v231_v56, 0.0  ;;  %v242_v62 = vadd.f32 %v388_v58, %v547_v46 }
  0xdc   :  { %v169_v63 = vpop.f32.mrf.mxu0  ;;  %v233_v0 = vpop.f32.mrf.mxu1 }
  0xdd   :  { %304 = vst.msk [vmem:[%s687_s3] sm:$0xff] %vm303_vm3, %v276_v59  ;;  %v279_v1 = vmax.f32 %v178_v60, 0.0  ;;  %320 = vst.msk [vmem:[%s687_s3 + $0x80] sm:$0xff] %vm303_vm3, %v292_v61  ;;  %v170_v2 = vadd.f32 %v547_v46, %v169_v63  ;;  %v295_v3 = vmax.f32 %v242_v62, 0.0  ;;  %v234_v4 = vadd.f32 %v547_v46, %v233_v0 }
  0xde   :  { %v375_v5 = vpop.f32.mrf.mxu0  ;;  %v391_v6 = vpop.f32.mrf.mxu1 }
  0xdf   :  { %307 = vst.msk [vmem:[%s687_s3 + $0x18] sm:$0xff] %vm303_vm3, %v279_v1  ;;  %v277_v7 = vmax.f32 %v170_v2, 0.0  ;;  %323 = vst.msk [vmem:[%s687_s3 + $0x98] sm:$0xff] %vm303_vm3, %v295_v3  ;;  %v191_v8 = vadd.f32 %v375_v5, %v547_v46  ;;  %v293_v9 = vmax.f32 %v234_v4, 0.0  ;;  %v255_v10 = vadd.f32 %v391_v6, %v547_v46 }
  0xe0   :  { %v182_v11 = vpop.f32.mrf.mxu0  ;;  %v246_v12 = vpop.f32.mrf.mxu1 }
  0xe1   :  { %305 = vst.msk [vmem:[%s687_s3 + $0x8] sm:$0xff] %vm303_vm3, %v277_v7  ;;  %v282_v13 = vmax.f32 %v191_v8, 0.0  ;;  %321 = vst.msk [vmem:[%s687_s3 + $0x88] sm:$0xff] %vm303_vm3, %v293_v9  ;;  %v183_v14 = vadd.f32 %v547_v46, %v182_v11  ;;  %v298_v15 = vmax.f32 %v255_v10, 0.0  ;;  %v247_v16 = vadd.f32 %v547_v46, %v246_v12 }
  0xe2   :  { %v376_v17 = vpop.f32.mrf.mxu0  ;;  %v392_v18 = vpop.f32.mrf.mxu1 }
  0xe3   :  { %310 = vst.msk [vmem:[%s687_s3 + $0x30] sm:$0xff] %vm303_vm3, %v282_v13  ;;  %v280_v19 = vmax.f32 %v183_v14, 0.0  ;;  %326 = vst.msk [vmem:[%s687_s3 + $0xb0] sm:$0xff] %vm303_vm3, %v298_v15  ;;  %v194_v20 = vadd.f32 %v376_v17, %v547_v46  ;;  %v296_v21 = vmax.f32 %v247_v16, 0.0  ;;  %v258_v22 = vadd.f32 %v392_v18, %v547_v46 }
  0xe4   :  { %v185_v23 = vpop.f32.mrf.mxu0  ;;  %v249_v24 = vpop.f32.mrf.mxu1 }
  0xe5   :  { %308 = vst.msk [vmem:[%s687_s3 + $0x20] sm:$0xff] %vm303_vm3, %v280_v19  ;;  %v283_v25 = vmax.f32 %v194_v20, 0.0  ;;  %324 = vst.msk [vmem:[%s687_s3 + $0xa0] sm:$0xff] %vm303_vm3, %v296_v21  ;;  %v186_v26 = vadd.f32 %v547_v46, %v185_v23  ;;  %v299_v27 = vmax.f32 %v258_v22, 0.0  ;;  %v250_v28 = vadd.f32 %v547_v46, %v249_v24 }
  0xe6   :  { %v379_v29 = vpop.f32.mrf.mxu0  ;;  %v395_v30 = vpop.f32.mrf.mxu1 }
  0xe7   :  { %311 = vst.msk [vmem:[%s687_s3 + $0x38] sm:$0xff] %vm303_vm3, %v283_v25  ;;  %v281_v31 = vmax.f32 %v186_v26, 0.0  ;;  %327 = vst.msk [vmem:[%s687_s3 + $0xb8] sm:$0xff] %vm303_vm3, %v299_v27  ;;  %v207_v32 = vadd.f32 %v379_v29, %v547_v46  ;;  %v297_v33 = vmax.f32 %v250_v28, 0.0  ;;  %v271_v34 = vadd.f32 %v395_v30, %v547_v46 }
  0xe8   :  { %v198_v35 = vpop.f32.mrf.mxu0  ;;  %v262_v36 = vpop.f32.mrf.mxu1 }
  0xe9   :  { %309 = vst.msk [vmem:[%s687_s3 + $0x28] sm:$0xff] %vm303_vm3, %v281_v31  ;;  %v286_v37 = vmax.f32 %v207_v32, 0.0  ;;  %325 = vst.msk [vmem:[%s687_s3 + $0xa8] sm:$0xff] %vm303_vm3, %v297_v33  ;;  %v199_v38 = vadd.f32 %v547_v46, %v198_v35  ;;  %v302_v39 = vmax.f32 %v271_v34, 0.0  ;;  %v263_v40 = vadd.f32 %v547_v46, %v262_v36 }
  0xea   :  { %v380_v41 = vpop.f32.mrf.mxu0  ;;  %v396_v42 = vpop.f32.mrf.mxu1 }
  0xeb   :  { %314 = vst.msk [vmem:[%s687_s3 + $0x50] sm:$0xff] %vm303_vm3, %v286_v37  ;;  %v284_v43 = vmax.f32 %v199_v38, 0.0  ;;  %330 = vst.msk [vmem:[%s687_s3 + $0xd0] sm:$0xff] %vm303_vm3, %v302_v39  ;;  %v210_v44 = vadd.f32 %v380_v41, %v547_v46  ;;  %v300_v45 = vmax.f32 %v263_v40, 0.0 }
  0xec   :  { %v201_v47 = vpop.f32.mrf.mxu0  ;;  %v265_v48 = vpop.f32.mrf.mxu1 }
  0xed   :  { %312 = vst.msk [vmem:[%s687_s3 + $0x40] sm:$0xff] %vm303_vm3, %v284_v43  ;;  %v287_v49 = vmax.f32 %v210_v44, 0.0  ;;  %328 = vst.msk [vmem:[%s687_s3 + $0xc0] sm:$0xff] %vm303_vm3, %v300_v45  ;;  %v202_v50 = vadd.f32 %v547_v46, %v201_v47  ;;  %v266_v51 = vadd.f32 %v547_v46, %v265_v48 }
  0xee   :  { %v383_v52 = vpop.f32.mrf.mxu0 }
  0xef   :  { %315 = vst.msk [vmem:[%s687_s3 + $0x58] sm:$0xff] %vm303_vm3, %v287_v49  ;;  %v285_v53 = vmax.f32 %v202_v50, 0.0  ;;  %v223_v54 = vadd.f32 %v383_v52, %v547_v46  ;;  %v301_v55 = vmax.f32 %v266_v51, 0.0 }
  0xf0   :  { %v214_v56 = vpop.f32.mrf.mxu0 }
  0xf1   :  { %313 = vst.msk [vmem:[%s687_s3 + $0x48] sm:$0xff] %vm303_vm3, %v285_v53  ;;  %v290_v57 = vmax.f32 %v223_v54, 0.0  ;;  %329 = vst.msk [vmem:[%s687_s3 + $0xc8] sm:$0xff] %vm303_vm3, %v301_v55  ;;  %v215_v58 = vadd.f32 %v547_v46, %v214_v56 }
  0xf2   :  { %v384_v59 = vpop.f32.mrf.mxu0 }
  0xf3   :  { %318 = vst.msk [vmem:[%s687_s3 + $0x70] sm:$0xff] %vm303_vm3, %v290_v57  ;;  %v288_v60 = vmax.f32 %v215_v58, 0.0  ;;  %v226_v61 = vadd.f32 %v384_v59, %v547_v46 }
  0xf4   :  { %v217_v62 = vpop.f32.mrf.mxu0 }
  0xf5   :  { %316 = vst.msk [vmem:[%s687_s3 + $0x60] sm:$0xff] %vm303_vm3, %v288_v60  ;;  %v291_v63 = vmax.f32 %v226_v61, 0.0  ;;  %v218_v0 = vadd.f32 %v547_v46, %v217_v62 }
  0xf7   :  { %319 = vst.msk [vmem:[%s687_s3 + $0x78] sm:$0xff] %vm303_vm3, %v291_v63  ;;  %v289_v1 = vmax.f32 %v218_v0, 0.0 }
  0xf9   :  { %317 = vst.msk [vmem:[%s687_s3 + $0x68] sm:$0xff] %vm303_vm3, %v289_v1 }
  0xfa   :  { %335 = vsyncpa [#allocation3], 1 }

// kernel: conformer_forward.7
= control target key start
LH: loop header
LB: loop body
LE: loop exit
PB: predicated region body
PF: predicated region fallthrough
CT: control target
= control target key end

     0   :  { %8 = vsyncpa [#allocation3], 0  ;;  %s723_s12 = smov [#allocation2]   ;;  %s1072_s0 = inlined_call_operand.vmem [shape: f32[136,288], index: 0, kind: input, shape index: {}]   ;;  %s1073_s1 = inlined_call_operand.vmem [shape: bf16[288,32], index: 1, kind: input, shape index: {}]   ;;  %s1074_s2 = inlined_call_operand.hbm [shape: f32[1,32], index: 2, kind: input, shape index: {}]   ;;  %s1075_s3 = inlined_call_operand.vmem [shape: f32[136,32], index: 3, kind: output, shape index: {}]  }
   0x1   :  { %s19_s13 = sshll.u32 %s723_s12, 4  ;;  %s20_s13 = int_to_ptr.vmem [resolvable:$true] %s19_s13 }
   0x2   :  { %s709_s14 = scalar_lea.vmem %s20_s13, 16  ;;  %s713_s15 = scalar_lea.vmem %s20_s13, 32 }
   0x3   :  { %p710_p0 = scmp.ne.s32.totalorder %s20_s13, %s709_s14  ;;  %p714_p1 = scmp.lt.s32.totalorder %s20_s13, %s20_s13 }
   0x4   :  { %p715_p2 = scmp.lt.s32.totalorder %s713_s15, %s709_s14 }
   0x6   :  { %p716_p3 = por %p715_p2, %p714_p1 }
   0x8   :  { %p717_p4 = pnand %p716_p3, %p710_p0 }
   0xa   :  { %720 = shalt.err (!%p717_p4)
}
   0xb   :  { %22 = dma.hbm_to_vmem [thread:$0]  %s1074_s2, 16, %s20_s13, [#allocation3]  }
   0xc   :  { %721 = dma.done.wait [#allocation3], 16  }
   0xd   :  { %722 = vsyncadd [#allocation3], 4294967280  ;;  %v724_v0 = vmov 0.0   ;;  %vm725_vm0 = vmmov 0   ;;  %v683_v1 = vld [vmem:[%s1073_s1 + $0x78] sm:$0xff]   ;;  %v685_v3 = vld [vmem:[%s1073_s1 + $0x70] sm:$0xff]  }
   0xe   :  { %640 = vmatprep.subr.bf16.mxu1 %v724_v0  ;;  %644 = vmatprep.mubr.msk.bf16.mxu1 %vm725_vm0, %v724_v0  ;;  %v684_v2 = vld [vmem:[%s1073_s1 + $0x38] sm:$0xff]   ;;  %v686_v4 = vld [vmem:[%s1073_s1 + $0x30] sm:$0xff]   ;;  %v687_v5 = vld [vmem:[%s1073_s1 + $0x68] sm:$0xff]   ;;  %vm256_vm1 = vcmask 261120  }
   0xf   :  { %559 = vmatprep.subr.bf16.mxu0 %v683_v1  ;;  %v688_v6 = vld [vmem:[%s1073_s1 + $0x28] sm:$0xff]   ;;  %v689_v7 = vld [vmem:[%s1073_s1 + $0x60] sm:$0xff]   ;;  %v691_v9 = vld [vmem:[%s1073_s1 + $0x58] sm:$0xff]  }
  0x10   :  { %560 = vmatpush3.bf16.msra.mxu0 %v684_v2  ;;  %v690_v8 = vld [vmem:[%s1073_s1 + $0x20] sm:$0xff]   ;;  %v696_v10 = vld [vmem:[%s1073_s1 + $0x88] sm:$0xff]   ;;  %v692_v11 = vld [vmem:[%s1073_s1 + $0x18] sm:$0xff]  }
  0x11   :  { %561 = vmatprep.subr.bf16.mxu0 %v685_v3  ;;  %v693_v12 = vld [vmem:[%s1073_s1 + $0x50] sm:$0xff]   ;;  %641 = vmatpush3.bf16.msra.mxu1 %v696_v10  ;;  %v699_v13 = vld [vmem:[%s1073_s1 + $0x80] sm:$0xff]   ;;  %v28_v14 = vld [vmem:[%s1072_s0 + $0x8] sm:$0xff] }
  0x12   :  { %642 = vmatprep.subr.bf16.mxu1 %v724_v0  ;;  %v31_v15 = vld [vmem:[%s1072_s0 + $0x20] sm:$0xff]  ;;  %v29_v16 = vld [vmem:[%s1072_s0 + $0x10] sm:$0xff]  ;;  %v32_v19 = vld [vmem:[%s1072_s0 + $0x28] sm:$0xff] }
  0x13   :  { %v694_v17 = vld [vmem:[%s1073_s1 + $0x10] sm:$0xff]   ;;  %v79_v18 = vpack.c.bf16 %v31_v15, %v28_v14  ;;  %v695_v20 = vld [vmem:[%s1073_s1 + $0x48] sm:$0xff]   ;;  %v80_v21 = vpack.c.bf16 %v32_v19, %v29_v16  ;;  %v35_v23 = vld [vmem:[%s1072_s0 + $0x40] sm:$0xff] }
  0x14   :  { %562 = vmatpush3.bf16.msra.mxu0 %v686_v4  ;;  %v697_v22 = vld [vmem:[%s1073_s1 + $0x8] sm:$0xff]   ;;  %v38_v24 = vld [vmem:[%s1072_s0 + $0x58] sm:$0xff]  ;;  %v698_v25 = vld [vmem:[%s1073_s1 + $0x40] sm:$0xff]  }
  0x15   :  { %563 = vmatprep.subr.bf16.mxu0 %v687_v5  ;;  %643 = vmatpush3.bf16.msra.mxu1 %v699_v13  ;;  %v83_v26 = vpack.c.bf16 %v38_v24, %v35_v23  ;;  %v700_v27 = vld [vmem:[%s1073_s1] sm:$0xff]   ;;  %v30_v29 = vld [vmem:[%s1072_s0 + $0x18] sm:$0xff]  ;;  %v37_v31 = vld [vmem:[%s1072_s0 + $0x50] sm:$0xff] }
  0x16   :  { %316 = vmatprep.mubr.bf16.mxu0 %v79_v18  ;;  %v27_v28 = vld [vmem:[%s1072_s0] sm:$0xff]  ;;  %v34_v30 = vld [vmem:[%s1072_s0 + $0x38] sm:$0xff]  ;;  %v41_v34 = vld [vmem:[%s1072_s0 + $0x70] sm:$0xff] }
  0x17   :  { %v78_v32 = vpack.c.bf16 %v30_v29, %v27_v28  ;;  %v82_v33 = vpack.c.bf16 %v37_v31, %v34_v30  ;;  %v44_v35 = vld [vmem:[%s1072_s0 + $0x88] sm:$0xff]  ;;  %v33_v37 = vld [vmem:[%s1072_s0 + $0x30] sm:$0xff]  ;;  %v43_v40 = vld [vmem:[%s1072_s0 + $0x80] sm:$0xff] }
  0x18   :  { %564 = vmatpush3.bf16.msra.mxu0 %v688_v6  ;;  %645 = vmatmul.mubr.msk.bf16.vlgmr.msra.gmra.mxu1 %vm256_vm1, %v80_v21  ;;  %v86_v36 = vpack.c.bf16 %v44_v35, %v41_v34  ;;  %v36_v38 = vld [vmem:[%s1072_s0 + $0x48] sm:$0xff]  ;;  %v47_v43 = vld [vmem:[%s1072_s0 + $0xa0] sm:$0xff]  ;;  %v50_v44 = vld [vmem:[%s1072_s0 + $0xb8] sm:$0xff] }
  0x19   :  { %565 = vmatprep.subr.bf16.mxu0 %v689_v7  ;;  %648 = vmatprep.mubr.msk.bf16.mxu1 %vm725_vm0, %v724_v0  ;;  %v40_v39 = vld [vmem:[%s1072_s0 + $0x68] sm:$0xff]  ;;  %v81_v41 = vpack.c.bf16 %v36_v38, %v33_v37  ;;  %v89_v45 = vpack.c.bf16 %v50_v44, %v47_v43  ;;  %v39_v46 = vld [vmem:[%s1072_s0 + $0x60] sm:$0xff]  ;;  %v42_v47 = vld [vmem:[%s1072_s0 + $0x78] sm:$0xff] }
  0x1a   :  { %v85_v42 = vpack.c.bf16 %v43_v40, %v40_v39  ;;  %v46_v48 = vld [vmem:[%s1072_s0 + $0x98] sm:$0xff]  ;;  %v49_v49 = vld [vmem:[%s1072_s0 + $0xb0] sm:$0xff]  ;;  %v84_v50 = vpack.c.bf16 %v42_v47, %v39_v46  ;;  %v56_v53 = vld [vmem:[%s1072_s0 + $0xe8] sm:$0xff] }
  0x1b   :  { %v88_v51 = vpack.c.bf16 %v49_v49, %v46_v48  ;;  %v53_v52 = vld [vmem:[%s1072_s0 + $0xd0] sm:$0xff]  ;;  %v48_v56 = vld [vmem:[%s1072_s0 + $0xa8] sm:$0xff]  ;;  %v55_v58 = vld [vmem:[%s1072_s0 + $0xe0] sm:$0xff] }
  0x1c   :  { %566 = vmatpush3.bf16.msra.mxu0 %v690_v8  ;;  %v92_v54 = vpack.c.bf16 %v56_v53, %v53_v52  ;;  %v45_v55 = vld [vmem:[%s1072_s0 + $0x90] sm:$0xff]  ;;  %v52_v57 = vld [vmem:[%s1072_s0 + $0xc8] sm:$0xff]  ;;  %v59_v61 = vld [vmem:[%s1072_s0 + $0x100] sm:$0xff] }
  0x1d   :  { %567 = vmatprep.subr.bf16.mxu0 %v691_v9  ;;  %v87_v59 = vpack.c.bf16 %v48_v56, %v45_v55  ;;  %v91_v60 = vpack.c.bf16 %v55_v58, %v52_v57  ;;  %v62_v62 = vld [vmem:[%s1072_s0 + $0x118] sm:$0xff]  ;;  %v51_v1 = vld [vmem:[%s1072_s0 + $0xc0] sm:$0xff]  ;;  %v61_v4 = vld [vmem:[%s1072_s0 + $0x110] sm:$0xff] }
  0x1e   :  { %v95_v63 = vpack.c.bf16 %v62_v62, %v59_v61  ;;  %v54_v2 = vld [vmem:[%s1072_s0 + $0xd8] sm:$0xff]  ;;  %v65_v7 = vld [vmem:[%s1072_s0 + $0x130] sm:$0xff]  ;;  %v68_v8 = vld [vmem:[%s1072_s0 + $0x148] sm:$0xff] }
  0x1f   :  { %v58_v3 = vld [vmem:[%s1072_s0 + $0xf8] sm:$0xff]  ;;  %v90_v5 = vpack.c.bf16 %v54_v2, %v51_v1  ;;  %v98_v9 = vpack.c.bf16 %v68_v8, %v65_v7  ;;  %v57_v10 = vld [vmem:[%s1072_s0 + $0xf0] sm:$0xff]  ;;  %v67_v13 = vld [vmem:[%s1072_s0 + $0x140] sm:$0xff] }
  0x20   :  { %568 = vmatpush3.bf16.msra.mxu0 %v692_v11  ;;  %649 = vmatmul.mubr.msk.bf16.gmra.mxu1 %vm256_vm1, %v83_v26  ;;  %v94_v6 = vpack.c.bf16 %v61_v4, %v58_v3  ;;  %v60_v11 = vld [vmem:[%s1072_s0 + $0x108] sm:$0xff]  ;;  %v71_v16 = vld [vmem:[%s1072_s0 + $0x160] sm:$0xff]  ;;  %v70_v21 = vld [vmem:[%s1072_s0 + $0x158] sm:$0xff] }
  0x21   :  { %569 = vmatprep.subr.bf16.mxu0 %v693_v12  ;;  %652 = vmatprep.mubr.msk.bf16.mxu1 %vm725_vm0, %v724_v0  ;;  %v64_v12 = vld [vmem:[%s1072_s0 + $0x128] sm:$0xff]  ;;  %v93_v14 = vpack.c.bf16 %v60_v11, %v57_v10  ;;  %v63_v19 = vld [vmem:[%s1072_s0 + $0x120] sm:$0xff] }
  0x22   :  { %v97_v15 = vpack.c.bf16 %v67_v13, %v64_v12  ;;  %v72_v28 = vld [vmem:[%s1072_s0 + $0x168] sm:$0xff]  ;;  %v75_v31 = vld [vmem:[%s1072_s0 + $0x180] sm:$0xff] }
  0x23   :  { %v76_v29 = vld [vmem:[%s1072_s0 + $0x188] sm:$0xff] }
  0x24   :  { %570 = vmatpush3.bf16.msra.mxu0 %v694_v17  ;;  %v74_v17 = vld [vmem:[%s1072_s0 + $0x178] sm:$0xff]  ;;  %v103_v30 = vpack.c.bf16 %v76_v29, %v76_v29 }
  0x25   :  { %571 = vmatprep.subr.bf16.mxu0 %v695_v20  ;;  %v101_v18 = vpack.c.bf16 %v74_v17, %v71_v16  ;;  %v66_v20 = vld [vmem:[%s1072_s0 + $0x138] sm:$0xff] }
  0x26   :  { %v96_v23 = vpack.c.bf16 %v66_v20, %v63_v19 }
  0x28   :  { %572 = vmatpush3.bf16.msra.mxu0 %v697_v22  ;;  %653 = vmatmul.mubr.msk.bf16.gmra.mxu1 %vm256_vm1, %v86_v36  ;;  %v73_v22 = vld [vmem:[%s1072_s0 + $0x170] sm:$0xff] }
  0x29   :  { %573 = vmatprep.subr.bf16.mxu0 %v698_v25  ;;  %656 = vmatprep.mubr.msk.bf16.mxu1 %vm725_vm0, %v724_v0  ;;  %v100_v24 = vpack.c.bf16 %v73_v22, %v70_v21  ;;  %v77_v25 = vld [vmem:[%s1072_s0 + $0x190] sm:$0xff] }
  0x2a   :  { %v104_v26 = vpack.c.bf16 %v77_v25, %v77_v25 }
  0x2c   :  { %574 = vmatpush3.bf16.msra.mxu0 %v700_v27  ;;  %v69_v27 = vld [vmem:[%s1072_s0 + $0x150] sm:$0xff] }
  0x2f   :  { %317 = vmatmul.mubr.bf16.vlgmr.msra.gmra.mxu0 %v78_v32  ;;  %v102_v32 = vpack.c.bf16 %v75_v31, %v75_v31 }
  0x30   :  { %324 = vmatprep.mubr.bf16.mxu0 %v82_v33  ;;  %657 = vmatmul.mubr.msk.bf16.gmra.mxu1 %vm256_vm1, %v89_v45 }
  0x31   :  { %660 = vmatprep.mubr.msk.bf16.mxu1 %vm725_vm0, %v724_v0 }
  0x37   :  { %325 = vmatmul.mubr.bf16.gmra.mxu0 %v81_v41  ;;  %v985_v41 = vld [vmem:[#allocation2] ss:$0 sm:$0xff] }
  0x38   :  { %332 = vmatprep.mubr.bf16.mxu0 %v85_v42  ;;  %661 = vmatmul.mubr.msk.bf16.gmra.mxu1 %vm256_vm1, %v92_v54 }
  0x39   :  { %664 = vmatprep.mubr.msk.bf16.mxu1 %vm725_vm0, %v724_v0 }
  0x3f   :  { %333 = vmatmul.mubr.bf16.gmra.mxu0 %v84_v50 }
  0x40   :  { %340 = vmatprep.mubr.bf16.mxu0 %v88_v51  ;;  %665 = vmatmul.mubr.msk.bf16.gmra.mxu1 %vm256_vm1, %v95_v63 }
  0x41   :  { %668 = vmatprep.mubr.msk.bf16.mxu1 %vm725_vm0, %v724_v0 }
  0x47   :  { %341 = vmatmul.mubr.bf16.gmra.mxu0 %v87_v59 }
  0x48   :  { %348 = vmatprep.mubr.bf16.mxu0 %v91_v60  ;;  %669 = vmatmul.mubr.msk.bf16.gmra.mxu1 %vm256_vm1, %v98_v9 }
  0x49   :  { %672 = vmatprep.mubr.msk.bf16.mxu1 %vm725_vm0, %v724_v0 }
  0x4f   :  { %349 = vmatmul.mubr.bf16.gmra.mxu0 %v90_v5 }
  0x50   :  { %356 = vmatprep.mubr.bf16.mxu0 %v94_v6  ;;  %673 = vmatmul.mubr.msk.bf16.gmra.mxu1 %vm256_vm1, %v101_v18 }
  0x51   :  { %676 = vmatprep.mubr.msk.bf16.mxu1 %vm725_vm0, %v724_v0  ;;  %v99_v0 = vpack.c.bf16 %v72_v28, %v69_v27 }
  0x57   :  { %357 = vmatmul.mubr.bf16.gmra.mxu0 %v93_v14 }
  0x58   :  { %364 = vmatprep.mubr.bf16.mxu0 %v97_v15  ;;  %677 = vmatmul.mubr.msk.bf16.gmra.mxu1 %vm256_vm1, %v104_v26 }
  0x5f   :  { %365 = vmatmul.mubr.bf16.gmra.mxu0 %v96_v23 }
  0x60   :  { %372 = vmatprep.mubr.bf16.mxu0 %v100_v24 }
  0x67   :  { %373 = vmatmul.mubr.bf16.gmra.mxu0 %v99_v0 }
  0x68   :  { %380 = vmatprep.mubr.bf16.mxu0 %v103_v30 }
  0x6f   :  { %381 = vmatmul.mubr.bf16.gmra.mxu0 %v102_v32 }
  0xd8   :  { %v422_v33 = vpop.f32.mrf.mxu1 }
  0xda   :  { %v646_v34 = vpop.f32.mrf.mxu1 }
  0xdc   :  { %v425_v35 = vpop.f32.mrf.mxu1 }
  0xde   :  { %v647_v36 = vpop.f32.mrf.mxu1 }
  0xe0   :  { %v430_v37 = vpop.f32.mrf.mxu1 }
  0xe2   :  { %v650_v38 = vpop.f32.mrf.mxu1 }
  0xe4   :  { %v433_v40 = vpop.f32.mrf.mxu1 }
  0xe6   :  { %v651_v43 = vpop.f32.mrf.mxu1 }
  0xe8   :  { %v438_v46 = vpop.f32.mrf.mxu1 }
  0xea   :  { %v654_v49 = vpop.f32.mrf.mxu1 }
  0xec   :  { %v441_v53 = vpop.f32.mrf.mxu1 }
  0xee   :  { %v655_v57 = vpop.f32.mrf.mxu1 }
  0xef   :  { %v575_v39 = vpop.f32.mrf.mxu0 }
  0xf0   :  { %v446_v61 = vpop.f32.mrf.mxu1 }
  0xf1   :  { %v576_v42 = vpop.f32.mrf.mxu0 }
  0xf2   :  { %v577_v44 = vadd.f32 %v576_v42, %v575_v39  ;;  %v658_v2 = vpop.f32.mrf.mxu1 }
  0xf3   :  { %v578_v45 = vpop.f32.mrf.mxu0 }
  0xf4   :  { %v319_v47 = vadd.f32 %v577_v44, %v985_v41  ;;  %v449_v6 = vpop.f32.mrf.mxu1 }
  0xf5   :  { %v579_v48 = vpop.f32.mrf.mxu0 }
  0xf6   :  { %v423_v50 = vadd.f32 %v422_v33, %v319_v47  ;;  %v580_v51 = vadd.f32 %v579_v48, %v578_v45  ;;  %v659_v10 = vpop.f32.mrf.mxu1 }
  0xf7   :  { %v581_v52 = vpop.f32.mrf.mxu0 }
  0xf8   :  { %v492_v54 = vmax.f32 %v423_v50, 0.0  ;;  %v322_v55 = vadd.f32 %v580_v51, %v985_v41  ;;  %v454_v14 = vpop.f32.mrf.mxu1 }
  0xf9   :  { %v582_v56 = vpop.f32.mrf.mxu0 }
  0xfa   :  { %509 = vst.msk [vmem:[%s1075_s3] sm:$0xff] %vm256_vm1, %v492_v54  ;;  %v426_v58 = vadd.f32 %v425_v35, %v322_v55  ;;  %v583_v59 = vadd.f32 %v582_v56, %v581_v52  ;;  %v662_v18 = vpop.f32.mrf.mxu1 }
  0xfb   :  { %v584_v60 = vpop.f32.mrf.mxu0 }
  0xfc   :  { %v493_v62 = vmax.f32 %v426_v58, 0.0  ;;  %v327_v63 = vadd.f32 %v583_v59, %v985_v41  ;;  %v457_v22 = vpop.f32.mrf.mxu1 }
  0xfd   :  { %v585_v1 = vpop.f32.mrf.mxu0 }
  0xfe   :  { %510 = vst.msk [vmem:[%s1075_s3 + $0x8] sm:$0xff] %vm256_vm1, %v493_v62  ;;  %v431_v3 = vadd.f32 %v430_v37, %v327_v63  ;;  %v586_v4 = vadd.f32 %v585_v1, %v584_v60  ;;  %v663_v26 = vpop.f32.mrf.mxu1 }
  0xff   :  { %v587_v5 = vpop.f32.mrf.mxu0 }
 0x100   :  { %v494_v7 = vmax.f32 %v431_v3, 0.0  ;;  %v330_v8 = vadd.f32 %v586_v4, %v985_v41  ;;  %v462_v0 = vpop.f32.mrf.mxu1 }
 0x101   :  { %v588_v9 = vpop.f32.mrf.mxu0 }
 0x102   :  { %511 = vst.msk [vmem:[%s1075_s3 + $0x10] sm:$0xff] %vm256_vm1, %v494_v7  ;;  %v434_v11 = vadd.f32 %v433_v40, %v330_v8  ;;  %v589_v12 = vadd.f32 %v588_v9, %v587_v5  ;;  %v666_v33 = vpop.f32.mrf.mxu1 }
 0x103   :  { %v590_v13 = vpop.f32.mrf.mxu0 }
 0x104   :  { %v495_v15 = vmax.f32 %v434_v11, 0.0  ;;  %v335_v16 = vadd.f32 %v589_v12, %v985_v41  ;;  %v465_v37 = vpop.f32.mrf.mxu1 }
 0x105   :  { %v591_v17 = vpop.f32.mrf.mxu0 }
 0x106   :  { %512 = vst.msk [vmem:[%s1075_s3 + $0x18] sm:$0xff] %vm256_vm1, %v495_v15  ;;  %v439_v19 = vadd.f32 %v438_v46, %v335_v16  ;;  %v592_v20 = vadd.f32 %v591_v17, %v590_v13  ;;  %v667_v42 = vpop.f32.mrf.mxu1 }
 0x107   :  { %v593_v21 = vpop.f32.mrf.mxu0 }
 0x108   :  { %v496_v23 = vmax.f32 %v439_v19, 0.0  ;;  %v338_v24 = vadd.f32 %v592_v20, %v985_v41  ;;  %v470_v46 = vpop.f32.mrf.mxu1 }
 0x109   :  { %v594_v25 = vpop.f32.mrf.mxu0 }
 0x10a   :  { %513 = vst.msk [vmem:[%s1075_s3 + $0x20] sm:$0xff] %vm256_vm1, %v496_v23  ;;  %v442_v27 = vadd.f32 %v441_v53, %v338_v24  ;;  %v595_v28 = vadd.f32 %v594_v25, %v593_v21  ;;  %v670_v50 = vpop.f32.mrf.mxu1 }
 0x10b   :  { %v596_v29 = vpop.f32.mrf.mxu0 }
 0x10c   :  { %v497_v30 = vmax.f32 %v442_v27, 0.0  ;;  %v343_v31 = vadd.f32 %v595_v28, %v985_v41  ;;  %v473_v54 = vpop.f32.mrf.mxu1 }
 0x10d   :  { %v597_v32 = vpop.f32.mrf.mxu0 }
 0x10e   :  { %514 = vst.msk [vmem:[%s1075_s3 + $0x28] sm:$0xff] %vm256_vm1, %v497_v30  ;;  %v447_v34 = vadd.f32 %v446_v61, %v343_v31  ;;  %v598_v35 = vadd.f32 %v597_v32, %v596_v29  ;;  %v671_v58 = vpop.f32.mrf.mxu1 }
 0x10f   :  { %v599_v36 = vpop.f32.mrf.mxu0 }
 0x110   :  { %v498_v38 = vmax.f32 %v447_v34, 0.0  ;;  %v346_v39 = vadd.f32 %v598_v35, %v985_v41  ;;  %v478_v62 = vpop.f32.mrf.mxu1 }
 0x111   :  { %v600_v40 = vpop.f32.mrf.mxu0 }
 0x112   :  { %515 = vst.msk [vmem:[%s1075_s3 + $0x30] sm:$0xff] %vm256_vm1, %v498_v38  ;;  %v450_v43 = vadd.f32 %v449_v6, %v346_v39  ;;  %v601_v44 = vadd.f32 %v600_v40, %v599_v36  ;;  %v674_v3 = vpop.f32.mrf.mxu1 }
 0x113   :  { %v602_v45 = vpop.f32.mrf.mxu0 }
 0x114   :  { %v499_v47 = vmax.f32 %v450_v43, 0.0  ;;  %v351_v48 = vadd.f32 %v601_v44, %v985_v41  ;;  %v481_v7 = vpop.f32.mrf.mxu1 }
 0x115   :  { %v603_v49 = vpop.f32.mrf.mxu0 }
 0x116   :  { %516 = vst.msk [vmem:[%s1075_s3 + $0x38] sm:$0xff] %vm256_vm1, %v499_v47  ;;  %v455_v51 = vadd.f32 %v454_v14, %v351_v48  ;;  %v604_v52 = vadd.f32 %v603_v49, %v602_v45  ;;  %v675_v11 = vpop.f32.mrf.mxu1 }
 0x117   :  { %v605_v53 = vpop.f32.mrf.mxu0 }
 0x118   :  { %v500_v55 = vmax.f32 %v455_v51, 0.0  ;;  %v354_v56 = vadd.f32 %v604_v52, %v985_v41  ;;  %v486_v15 = vpop.f32.mrf.mxu1 }
 0x119   :  { %v606_v57 = vpop.f32.mrf.mxu0 }
 0x11a   :  { %517 = vst.msk [vmem:[%s1075_s3 + $0x40] sm:$0xff] %vm256_vm1, %v500_v55  ;;  %v458_v59 = vadd.f32 %v457_v22, %v354_v56  ;;  %v607_v60 = vadd.f32 %v606_v57, %v605_v53  ;;  %v678_v19 = vpop.f32.mrf.mxu1 }
 0x11b   :  { %v608_v61 = vpop.f32.mrf.mxu0 }
 0x11c   :  { %v501_v63 = vmax.f32 %v458_v59, 0.0  ;;  %v359_v1 = vadd.f32 %v607_v60, %v985_v41  ;;  %v489_v23 = vpop.f32.mrf.mxu1 }
 0x11d   :  { %v609_v2 = vpop.f32.mrf.mxu0 }
 0x11e   :  { %518 = vst.msk [vmem:[%s1075_s3 + $0x48] sm:$0xff] %vm256_vm1, %v501_v63  ;;  %v463_v4 = vadd.f32 %v462_v0, %v359_v1  ;;  %v610_v5 = vadd.f32 %v609_v2, %v608_v61  ;;  %v679_v27 = vpop.f32.mrf.mxu1 }
 0x11f   :  { %v611_v6 = vpop.f32.mrf.mxu0 }
 0x120   :  { %v502_v8 = vmax.f32 %v463_v4, 0.0  ;;  %v362_v9 = vadd.f32 %v610_v5, %v985_v41 }
 0x121   :  { %v612_v10 = vpop.f32.mrf.mxu0 }
 0x122   :  { %519 = vst.msk [vmem:[%s1075_s3 + $0x50] sm:$0xff] %vm256_vm1, %v502_v8  ;;  %v466_v12 = vadd.f32 %v465_v37, %v362_v9  ;;  %v613_v13 = vadd.f32 %v612_v10, %v611_v6 }
 0x123   :  { %v614_v14 = vpop.f32.mrf.mxu0 }
 0x124   :  { %v503_v16 = vmax.f32 %v466_v12, 0.0  ;;  %v367_v17 = vadd.f32 %v613_v13, %v985_v41 }
 0x125   :  { %v615_v18 = vpop.f32.mrf.mxu0 }
 0x126   :  { %520 = vst.msk [vmem:[%s1075_s3 + $0x58] sm:$0xff] %vm256_vm1, %v503_v16  ;;  %v471_v20 = vadd.f32 %v470_v46, %v367_v17  ;;  %v616_v21 = vadd.f32 %v615_v18, %v614_v14 }
 0x127   :  { %v617_v22 = vpop.f32.mrf.mxu0 }
 0x128   :  { %v504_v24 = vmax.f32 %v471_v20, 0.0  ;;  %v370_v25 = vadd.f32 %v616_v21, %v985_v41 }
 0x129   :  { %v618_v26 = vpop.f32.mrf.mxu0 }
 0x12a   :  { %521 = vst.msk [vmem:[%s1075_s3 + $0x60] sm:$0xff] %vm256_vm1, %v504_v24  ;;  %v474_v28 = vadd.f32 %v473_v54, %v370_v25  ;;  %v619_v29 = vadd.f32 %v618_v26, %v617_v22 }
 0x12b   :  { %v620_v0 = vpop.f32.mrf.mxu0 }
 0x12c   :  { %v505_v30 = vmax.f32 %v474_v28, 0.0  ;;  %v375_v31 = vadd.f32 %v619_v29, %v985_v41 }
 0x12d   :  { %v621_v32 = vpop.f32.mrf.mxu0 }
 0x12e   :  { %522 = vst.msk [vmem:[%s1075_s3 + $0x68] sm:$0xff] %vm256_vm1, %v505_v30  ;;  %v479_v33 = vadd.f32 %v478_v62, %v375_v31  ;;  %v622_v34 = vadd.f32 %v621_v32, %v620_v0 }
 0x12f   :  { %v623_v35 = vpop.f32.mrf.mxu0 }
 0x130   :  { %v506_v36 = vmax.f32 %v479_v33, 0.0  ;;  %v378_v37 = vadd.f32 %v622_v34, %v985_v41 }
 0x131   :  { %v624_v38 = vpop.f32.mrf.mxu0 }
 0x132   :  { %523 = vst.msk [vmem:[%s1075_s3 + $0x70] sm:$0xff] %vm256_vm1, %v506_v36  ;;  %v482_v39 = vadd.f32 %v481_v7, %v378_v37  ;;  %v625_v40 = vadd.f32 %v624_v38, %v623_v35 }
 0x133   :  { %v626_v42 = vpop.f32.mrf.mxu0 }
 0x134   :  { %v507_v43 = vmax.f32 %v482_v39, 0.0  ;;  %v383_v44 = vadd.f32 %v625_v40, %v985_v41 }
 0x135   :  { %v627_v45 = vpop.f32.mrf.mxu0 }
 0x136   :  { %524 = vst.msk [vmem:[%s1075_s3 + $0x78] sm:$0xff] %vm256_vm1, %v507_v43  ;;  %v487_v46 = vadd.f32 %v486_v15, %v383_v44 }
 0x138   :  { %v508_v47 = vmax.f32 %v487_v46, 0.0 }
 0x13a   :  { %525 = vst.msk [vmem:[%s1075_s3 + $0x80] sm:$0xff] %vm256_vm1, %v508_v47 }
 0x13b   :  { %530 = vsyncpa [#allocation3], 1 }

// kernel: conformer_forward.8
= control target key start
LH: loop header
LB: loop body
LE: loop exit
PB: predicated region body
PF: predicated region fallthrough
CT: control target
= control target key end

     0   :  { %v226_v0 = vmov 0   ;;  %vm114_vm0 = vcmask 261120   ;;  %s322_s1 = inlined_call_operand.vmem [shape: bf16[160,32], index: 1, kind: input, shape index: {}]   ;;  %s323_s0 = inlined_call_operand.vmem [shape: f32[32,160], index: 0, kind: input, shape index: {}]   ;;  %s324_s2 = inlined_call_operand.vmem [shape: f32[1,32], index: 2, kind: input, shape index: {}]   ;;  %s325_s3 = inlined_call_operand.vmem [shape: f32[32,32], index: 3, kind: output, shape index: {}]  }
   0x1   :  { %121 = vmatprep.subr.bf16.mxu0 %v226_v0  ;;  %195 = vmatprep.subr.bf16.mxu1 %v226_v0  ;;  %v216_v1 = vld [vmem:[%s322_s1 + $0x38] sm:$0xff]   ;;  %v217_v2 = vld [vmem:[%s322_s1 + $0x30] sm:$0xff]   ;;  %v218_v3 = vld [vmem:[%s322_s1 + $0x28] sm:$0xff]  }
   0x2   :  { %122 = vmatpush1.bf16.msra.mxu0 %v216_v1  ;;  %205 = vmatpush1.bf16.msra.mxu1 %v216_v1  ;;  %v219_v4 = vld [vmem:[%s322_s1 + $0x20] sm:$0xff]   ;;  %v16_v5 = vld [vmem:[%s323_s0 + $0x8] sm:$0xff]  ;;  %v18_v6 = vld [vmem:[%s323_s0 + $0x18] sm:$0xff] }
   0x3   :  { %123 = vmatprep.subr.bf16.mxu0 %v226_v0  ;;  %196 = vmatprep.subr.bf16.mxu1 %v226_v0  ;;  %v20_v7 = vld [vmem:[%s323_s0 + $0x28] sm:$0xff]  ;;  %v24_v8 = vpack.c.bf16 %v18_v6, %v16_v5  ;;  %v22_v9 = vld [vmem:[%s323_s0 + $0x38] sm:$0xff]  ;;  %v221_v12 = vld [vmem:[%s322_s1 + $0x10] sm:$0xff]  }
   0x4   :  { %v26_v10 = vpack.c.bf16 %v22_v9, %v20_v7  ;;  %v220_v11 = vld [vmem:[%s322_s1 + $0x18] sm:$0xff]   ;;  %v222_v13 = vld [vmem:[%s322_s1 + $0x8] sm:$0xff]   ;;  %v223_v14 = vld [vmem:[%s322_s1] sm:$0xff]  }
   0x5   :  { %193 = vmatprep.mubr.msk.bf16.mxu0 %vm114_vm0, %v24_v8  ;;  %v224_v15 = vld [vmem:[%s322_s1 + $0x48] sm:$0xff]   ;;  %v225_v16 = vld [vmem:[%s322_s1 + $0x40] sm:$0xff]   ;;  %v17_v18 = vld [vmem:[%s323_s0 + $0x10] sm:$0xff] }
   0x6   :  { %124 = vmatpush1.bf16.msra.mxu0 %v217_v2  ;;  %206 = vmatpush1.bf16.msra.mxu1 %v217_v2  ;;  %v15_v17 = vld [vmem:[%s323_s0] sm:$0xff]  ;;  %v21_v20 = vld [vmem:[%s323_s0 + $0x30] sm:$0xff] }
   0x7   :  { %125 = vmatprep.subr.bf16.mxu0 %v226_v0  ;;  %197 = vmatprep.subr.bf16.mxu1 %v226_v0  ;;  %v19_v19 = vld [vmem:[%s323_s0 + $0x20] sm:$0xff]  ;;  %v23_v21 = vpack.c.bf16 %v17_v18, %v15_v17 }
   0x8   :  { %194 = vmatprep.mubr.msk.bf16.mxu1 %vm114_vm0, %v26_v10  ;;  %v25_v22 = vpack.c.bf16 %v21_v20, %v19_v19  ;;  %v182_v23 = vld [vmem:[%s324_s2] ss:$0 sm:$0xff] }
   0xa   :  { %126 = vmatpush1.bf16.msra.mxu0 %v218_v3  ;;  %207 = vmatpush1.bf16.msra.mxu1 %v218_v3 }
   0xb   :  { %127 = vmatprep.subr.bf16.mxu0 %v226_v0  ;;  %198 = vmatprep.subr.bf16.mxu1 %v226_v0 }
   0xe   :  { %128 = vmatpush1.bf16.msra.mxu0 %v219_v4  ;;  %208 = vmatpush1.bf16.msra.mxu1 %v219_v4 }
   0xf   :  { %129 = vmatprep.subr.bf16.mxu0 %v226_v0  ;;  %199 = vmatprep.subr.bf16.mxu1 %v226_v0 }
  0x12   :  { %130 = vmatpush1.bf16.msra.mxu0 %v220_v11  ;;  %209 = vmatpush1.bf16.msra.mxu1 %v220_v11 }
  0x13   :  { %131 = vmatprep.subr.bf16.mxu0 %v226_v0  ;;  %200 = vmatprep.subr.bf16.mxu1 %v226_v0 }
  0x16   :  { %132 = vmatpush1.bf16.msra.mxu0 %v221_v12  ;;  %210 = vmatpush1.bf16.msra.mxu1 %v221_v12 }
  0x17   :  { %133 = vmatprep.subr.bf16.mxu0 %v226_v0  ;;  %201 = vmatprep.subr.bf16.mxu1 %v226_v0 }
  0x1a   :  { %134 = vmatpush1.bf16.msra.mxu0 %v222_v13  ;;  %211 = vmatpush1.bf16.msra.mxu1 %v222_v13 }
  0x1b   :  { %135 = vmatprep.subr.bf16.mxu0 %v226_v0  ;;  %202 = vmatprep.subr.bf16.mxu1 %v226_v0 }
  0x1e   :  { %136 = vmatpush1.bf16.msra.mxu0 %v223_v14  ;;  %212 = vmatpush1.bf16.msra.mxu1 %v223_v14 }
  0x1f   :  { %149 = vmatprep.subr.bf16.mxu0 %v226_v0  ;;  %203 = vmatprep.subr.bf16.mxu1 %v226_v0 }
  0x22   :  { %150 = vmatpush2.bf16.msra.mxu0 %v224_v15  ;;  %213 = vmatpush2.bf16.msra.mxu1 %v224_v15 }
  0x23   :  { %151 = vmatprep.subr.bf16.mxu0 %v226_v0  ;;  %204 = vmatprep.subr.bf16.mxu1 %v226_v0 }
  0x26   :  { %152 = vmatpush2.bf16.msra.mxu0 %v225_v16  ;;  %214 = vmatpush2.bf16.msra.mxu1 %v225_v16 }
  0x29   :  { %154 = vmatmul.mubr.bf16.vlgmr.msra.gmra.mxu0 %v23_v21  ;;  %162 = vmatmul.mubr.bf16.vlgmr.msra.gmra.mxu1 %v25_v22 }
  0xe9   :  { %v155_v24 = vpop.f32.mrf.mxu0  ;;  %v163_v25 = vpop.f32.mrf.mxu1 }
  0xea   :  { %v156_v26 = vadd.f32 %v182_v23, %v155_v24  ;;  %v164_v27 = vadd.f32 %v182_v23, %v163_v25 }
  0xeb   :  { %v157_v28 = vpop.f32.mrf.mxu0  ;;  %v165_v29 = vpop.f32.mrf.mxu1 }
  0xec   :  { %v170_v30 = vmul.f32 5.656854, %v156_v26  ;;  %v172_v31 = vmul.f32 5.656854, %v164_v27 }
  0xed   :  { %v158_v32 = vpop.f32.mrf.mxu0  ;;  %v166_v33 = vpop.f32.mrf.mxu1 }
  0xee   :  { %174 = vst.msk [vmem:[%s325_s3] sm:$0xff] %vm114_vm0, %v170_v30  ;;  %176 = vst.msk [vmem:[%s325_s3 + $0x10] sm:$0xff] %vm114_vm0, %v172_v31  ;;  %v159_v34 = vadd.f32 %v182_v23, %v158_v32  ;;  %v167_v35 = vadd.f32 %v182_v23, %v166_v33 }
  0xef   :  { %v160_v36 = vpop.f32.mrf.mxu0  ;;  %v168_v37 = vpop.f32.mrf.mxu1 }
  0xf0   :  { %v171_v38 = vmul.f32 5.656854, %v159_v34  ;;  %v173_v39 = vmul.f32 5.656854, %v167_v35 }
  0xf2   :  { %175 = vst.msk [vmem:[%s325_s3 + $0x8] sm:$0xff] %vm114_vm0, %v171_v38  ;;  %177 = vst.msk [vmem:[%s325_s3 + $0x18] sm:$0xff] %vm114_vm0, %v173_v39 }

// kernel: conformer_forward.9
= control target key start
LH: loop header
LB: loop body
LE: loop exit
PB: predicated region body
PF: predicated region fallthrough
CT: control target
= control target key end

     0   :  { %s331_s9 = smov 0   ;;  %s354_s0 = inlined_call_operand.vmem [shape: f32[13,32], index: 0, kind: input, shape index: {}]   ;;  %s355_s1 = inlined_call_operand.vmem [shape: bf16[2,32,32], index: 1, kind: input, shape index: {}]   ;;  %s356_s2 = inlined_call_operand.vmem [shape: f32[2,13,32], index: 2, kind: output, shape index: {}]  }
   0x1 LB: > { %s267_s10 = sadd.s32 4294967295, %s312_s9   ;;  %p271_p0 = scmp.ge.s32.totalorder %s312_s9, 1  ;;  %s312_s9 = sphi %s331_s9, %s12_s9  }
   0x2   : > { %p112_p1 = scmp.lt.s32.totalorder %s312_s9, 3 }
   0x4   : > { %p113_p2 = pnand %p271_p0, %p112_p1 }
   0x5   : > { %p134_p3 = scmp.lt.s32.totalorder (!%p113_p2), %s267_s10, 1 }
   0x6   : > { %116 = sbr.rel (%p113_p2) target bundleno = 221 (0xdd), region = 28 }
   0xb   : > { %v314_v0 = vmov 0.0   ;;  %vm315_vm0 = vmmov 0   ;;  %s358_s10 = smov (!%p134_p3, %s267_s10), 1  ;;  %v145_v3 = vld [vmem:[%s354_s0] sm:$0xff]  ;;  %v146_v4 = vld [vmem:[%s354_s0 + $0x8] sm:$0x1f] }
   0xc   : > { %286 = vmatprep.subr.bf16.mxu0 %v314_v0  ;;  %290 = vmatprep.mubr.msk.bf16.mxu0 %vm315_vm0, %v314_v0  ;;  %s281_s11 = sshll.u32 %s358_s10, 4  ;;  %v147_v5 = vpack.c.bf16 %v146_v4, %v145_v3  ;;  %vm164_vm1 = vcmask 261120   ;;  %vm210_vm2 = vcmask 258048  }
   0xd   : > { %s138_s14 = scalar_lea.vmem %s355_s1, %s281_s11  ;;  %s143_s21 = scalar_lea.vmem %s356_s2, %s281_s11 }
   0xe   : > { %v304_v1 = vld [vmem:[%s138_s14 + $0x8] sm:$0xff]   ;;  %v305_v2 = vld [vmem:[%s138_s14] sm:$0xff]  }
   0xf   : > { %287 = vmatpush3.bf16.msra.mxu0 %v304_v1 }
  0x10   : > { %288 = vmatprep.subr.bf16.mxu0 %v314_v0 }
  0x13   : > { %289 = vmatpush3.bf16.msra.mxu0 %v305_v2 }
  0x16   : > { %291 = vmatmul.mubr.msk.bf16.vlgmr.msra.gmra.mxu0 %vm164_vm1, %v147_v5 }
  0xd6   : > { %v202_v6 = vpop.f32.mrf.mxu0 }
  0xd7   : > { %209 = vst.msk [vmem:[%s143_s21] sm:$0xff] %vm164_vm1, %v202_v6 }
  0xd8   : > { %v292_v7 = vpop.f32.mrf.mxu0 }
  0xda   : > { %v205_v8 = vpop.f32.mrf.mxu0 }
  0xdb   : > { %211 = vst.msk [vmem:[%s143_s21 + $0x8] sm:$0x1f] %vm210_vm2, %v205_v8 }
  0xdc   : > { %v293_v9 = vpop.f32.mrf.mxu0 }
  0xdd PF: > { %s12_s9 = sadd.s32 1, %s312_s9  }
  0xde   : > { %p9_p4 = scmp.ge.s32.totalorder %s12_s9, 4  }
  0xe0   :  { %11 = sbr.rel (!%p9_p4) target bundleno = 1 (0x1), region = 58 }

// kernel: conformer_forward.11
= control target key start
LH: loop header
LB: loop body
LE: loop exit
PB: predicated region body
PF: predicated region fallthrough
CT: control target
= control target key end

     0   :  { %s3869_s6 = smov 1   ;;  %s3870_s10 = smov 2   ;;  %s4510_s0 = inlined_call_operand.smem [shape: u32[33], index: -1, kind: input, shape index: {}] }
   0x1   :  { %s3935_s5 = sld [smem:[%s4510_s0]]   ;;  %s3871_s14 = smov 3  }
   0x2   :  { %s3940_s9 = sld [smem:[%s4510_s0 + %s3869_s6]]   ;;  %s3872_s18 = smov 4  }
   0x3   :  { %s3945_s13 = sld [smem:[%s4510_s0 + %s3870_s10]]   ;;  %s3873_s22 = smov 5  }
   0x4   :  { %s3950_s17 = sld [smem:[%s4510_s0 + %s3871_s14]]   ;;  %s3874_s26 = smov 6  }
   0x5   :  { %s3955_s21 = sld [smem:[%s4510_s0 + %s3872_s18]]   ;;  %s3875_s30 = smov 7  }
   0x6   :  { %s3960_s25 = sld [smem:[%s4510_s0 + %s3873_s22]]   ;;  %s3876_s4 = smov 8  }
   0x7   :  { %4520 = sst [smem:[#allocation41_spill]] %s3935_s5  ;;  %s3877_s10 = smov 9  }
   0x8   :  { %4521 = sst [smem:[#allocation42_spill]] %s3940_s9  ;;  %s3878_s15 = smov 10  }
   0x9   :  { %s3965_s29 = sld [smem:[%s4510_s0 + %s3874_s26]]   ;;  %s3879_s20 = smov 11  }
   0xa   :  { %s3970_s3 = sld [smem:[%s4510_s0 + %s3875_s30]]   ;;  %s3880_s26 = smov 12  }
   0xb   :  { %4522 = sst [smem:[#allocation43_spill]] %s3955_s21  ;;  %s3881_s1 = smov 13  }
   0xc   :  { %s3975_s8 = sld [smem:[%s4510_s0 + %s3876_s4]]   ;;  %s3882_s7 = smov 14  }
   0xd   :  { %s3980_s14 = sld [smem:[%s4510_s0 + %s3877_s10]]   ;;  %s3884_s22 = smov 16  }
   0xe   :  { %s3985_s19 = sld [smem:[%s4510_s0 + %s3878_s15]]   ;;  %s3883_s15 = smov 15  }
   0xf   :  { %4523 = sst [smem:[#allocation44_spill]] %s3965_s29  ;;  %s3885_s28 = smov 17  }
  0x10   :  { %4524 = sst [smem:[#allocation45_spill]] %s3970_s3 }
  0x11   :  { %s3990_s24 = sld [smem:[%s4510_s0 + %s3879_s20]]  }
  0x12   :  { %s3995_s30 = sld [smem:[%s4510_s0 + %s3880_s26]]  }
  0x13   :  { %s4000_s6 = sld [smem:[%s4510_s0 + %s3881_s1]]  }
  0x14   :  { %4525 = sst [smem:[#allocation46_spill]] %s3985_s19 }
  0x15   :  { %s4005_s12 = sld [smem:[%s4510_s0 + %s3882_s7]]   ;;  %s3886_s7 = smov 18  }
  0x16   :  { %s4010_s20 = sld [smem:[%s4510_s0 + %s3883_s15]]   ;;  %s3887_s15 = smov 19  }
  0x17   :  { %4526 = sst [smem:[#allocation47_spill]] %s3990_s24 }
  0x18   :  { %4527 = sst [smem:[#allocation48_spill]] %s3995_s30 }
  0x19   :  { %4528 = sst [smem:[#allocation49_spill]] %s4000_s6 }
  0x1a   :  { %s4015_s27 = sld [smem:[%s4510_s0 + %s3884_s22]]   ;;  %s3888_s22 = smov 20  }
  0x1b   :  { %4529 = sst [smem:[#allocation50_spill]] %s4005_s12 }
  0x1c   :  { %s4020_s4 = sld [smem:[%s4510_s0 + %s3885_s28]]   ;;  %s3889_s28 = smov 21  }
  0x1d   :  { %s4025_s12 = sld [smem:[%s4510_s0 + %s3886_s7]]   ;;  %s3890_s7 = smov 22  }
  0x1e   :  { %s4030_s6 = sld [smem:[%s4510_s0 + %s3887_s15]]   ;;  %s3891_s15 = smov 23  }
  0x1f   :  { %s4035_s30 = sld [smem:[%s4510_s0 + %s3888_s22]]   ;;  %s3892_s22 = smov 24  }
  0x20   :  { %s4040_s24 = sld [smem:[%s4510_s0 + %s3889_s28]]   ;;  %s3893_s28 = smov 25  }
  0x21   :  { %s4050_s9 = sld [smem:[%s4510_s0 + %s3891_s15]]   ;;  %s3895_s15 = smov 27  }
  0x22   :  { %4530 = sst [smem:[#allocation51_spill]] %s4020_s4 }
  0x23   :  { %4531 = sst [smem:[#allocation52_spill]] %s4025_s12 }
  0x24   :  { %s4045_s12 = sld [smem:[%s4510_s0 + %s3890_s7]]   ;;  %s3894_s7 = smov 26  }
  0x25   :  { %4532 = sst [smem:[#allocation53_spill]] %s4035_s30 }
  0x26   :  { %s4055_s30 = sld [smem:[%s4510_s0 + %s3892_s22]]   ;;  %s3896_s22 = smov 28  }
  0x27   :  { %s4060_s19 = sld [smem:[%s4510_s0 + %s3893_s28]]   ;;  %s3897_s28 = smov 29  }
  0x28   :  { %s4070_s29 = sld [smem:[%s4510_s0 + %s3895_s15]]   ;;  %s3899_s15 = smov 31  }
  0x29   :  { %s4075_s21 = sld [smem:[%s4510_s0 + %s3896_s22]]   ;;  %s3900_s22 = smov 32  }
  0x2a   :  { %4533 = sst [smem:[#allocation54_spill]] %s4045_s12 }
  0x2b   :  { %s4065_s12 = sld [smem:[%s4510_s0 + %s3894_s7]]   ;;  %s3898_s7 = smov 30  }
  0x2c   :  { %s4080_s5 = sld [smem:[%s4510_s0 + %s3897_s28]]  }
  0x2e   :  { %4535 = sst [smem:[#allocation56_spill]] %s4070_s29 }
  0x2f   :  { %4536 = sst [smem:[#allocation57_spill]] %s4075_s21 }
  0x30   :  { %s4090_s29 = sld [smem:[%s4510_s0 + %s3899_s15]]  }
  0x31   :  { %4534 = sst [smem:[#allocation55_spill]] %s4065_s12 }
  0x32   :  { %s4085_s12 = sld [smem:[%s4510_s0 + %s3898_s7]]  }
  0x33   :  { %s4095_s21 = sld [smem:[%s4510_s0 + %s3900_s22]]  }
  0x34   :  { %70 = vsyncpa [#allocation4], 0 }
  0x35   :  { %71 = vsyncpa [#allocation6], 0 }
  0x36   :  { %72 = vsyncpa [#allocation9], 0 }
  0x37   :  { %73 = vsyncpa [#allocation12], 0 }
  0x38   :  { %74 = vsyncpa [#allocation15], 0 }
  0x39   :  { %75 = vsyncpa [#allocation18], 0 }
  0x3a   :  { %76 = vsyncpa [#allocation21], 0 }
  0x3b   :  { %77 = vsyncpa [#allocation24], 0 }
  0x3c   :  { %78 = vsyncpa [#allocation27], 0 }
  0x3d   :  { %79 = vsyncpa [#allocation30], 0  ;;  %s4097_s28 = smov 0  }
  0x3e LB: > { %s3901_s0 = smov [#allocation5]   ;;  %s4103_s2 = sadd.s32 4294967295, %s3855_s28   ;;  %s3855_s28 = sphi %s4097_s28, %s85_s28  }
  0x3f   : > { %s820_s1 = sshll.u32 %s3901_s0, 4  ;;  %p2763_p0 = scmp.ge.s32.totalorder %s3855_s28, 1  ;;  %s821_s1 = int_to_ptr.vmem [resolvable:$true] %s820_s1 }
  0x40   : > { %p793_p1 = scmp.lt.s32.totalorder %s3855_s28, 3  ;;  %p4518_p2 = scmp.eq.s32.totalorder %s4103_s2, 0 }
  0x41   : > { %s3902_s10 = smov [#allocation8]   ;;  %s3903_s15 = smov [#allocation11]  }
  0x42   : > { %p4108_p3 = pnand %p2763_p0, %p793_p1  ;;  %s848_s11 = sshll.u32 %s3902_s10, 4  ;;  %s4114_s11 = int_to_ptr.vmem [resolvable:$true] %s848_s11 }
  0x43   : > { %s870_s16 = sshll.u32 %s3903_s15, 4  ;;  %s3904_s22 = smov [#allocation14]   ;;  %s4122_s16 = int_to_ptr.vmem [resolvable:$true] %s870_s16 }
  0x44   : > { %s4537_s7 = scalar_select %p4108_p3, 1, 0 }
  0x45   : > { %p3069_p4 = pneg %p4108_p3  ;;  %s907_s23 = sshll.u32 %s3904_s22, 4  ;;  %s4124_s23 = int_to_ptr.vmem [resolvable:$true] %s907_s23 }
  0x46   : > { %s3340_s0 = scalar_lea.vmem %s821_s1, 16  ;;  %s3347_s10 = scalar_lea.vmem %s821_s1, 32 }
  0x47   : > { %p4118_p5 = pnand %p4518_p2, %p3069_p4  ;;  %p3341_p7 = scmp.ne.s32.totalorder %s821_s1, %s3340_s0 }
  0x48   : > { %p3348_p10 = scmp.lt.s32.totalorder %s821_s1, %s821_s1  ;;  %p3349_p11 = scmp.lt.s32.totalorder %s3347_s10, %s3340_s0 }
  0x49   : > { %p4128_p6 = pneg %p4118_p5 }
  0x4a   : > { %p3350_p12 = por %p3349_p11, %p3348_p10 }
  0x4b   : > { %p3343_p8 = pnand %p3341_p7, %p4128_p6 }
  0x4d   : > { %p3344_p9 = pneg %p3343_p8 }
  0x4f   : > { %p3351_p13 = pnand %p3350_p12, %p3344_p9 }
  0x51   : > { %3354 = shalt.err (!%p3351_p13)
}
  0x52   : > { %3075 = dma.hbm_to_vmem [thread:$0]  (!%p4118_p5), %s3950_s17, 16, %s821_s1, [#allocation6]  }
  0x53   : > { %s3366_s15 = scalar_lea.vmem %s4114_s11, 16  ;;  %s3373_s22 = scalar_lea.vmem %s4114_s11, 32 }
  0x54   : > { %p3367_p0 = scmp.ne.s32.totalorder %s4114_s11, %s3366_s15  ;;  %p3374_p7 = scmp.lt.s32.totalorder %s4114_s11, %s4114_s11 }
  0x55   : > { %p3375_p8 = scmp.lt.s32.totalorder %s3373_s22, %s3366_s15 }
  0x56   : > { %p3369_p1 = pnand %p3367_p0, %p4128_p6 }
  0x57   : > { %p3376_p9 = por %p3375_p8, %p3374_p7 }
  0x58   : > { %p3370_p4 = pneg %p3369_p1 }
  0x5a   : > { %p3377_p10 = pnand %p3376_p9, %p3370_p4 }
  0x5c   : > { %3380 = shalt.err (!%p3377_p10)
}
  0x5d   : > { %s4540_s3 = sld [smem:[#allocation45_spill]]  ;;  %s3392_s1 = scalar_lea.vmem %s4122_s16, 16 }
  0x5e   : > { %p3393_p11 = scmp.ne.s32.totalorder %s4122_s16, %s3392_s1  ;;  %s3399_s0 = scalar_lea.vmem %s4122_s16, 32 }
  0x5f   : > { %p3400_p0 = scmp.lt.s32.totalorder %s4122_s16, %s4122_s16  ;;  %p3401_p1 = scmp.lt.s32.totalorder %s3399_s0, %s3392_s1 }
  0x60   : > { %p3395_p12 = pnand %p3393_p11, %p4128_p6 }
  0x61   : > { %p3402_p4 = por %p3401_p1, %p3400_p0 }
  0x62   : > { %p3396_p13 = pneg %p3395_p12 }
  0x63   : > { %3081 = dma.hbm_to_vmem [thread:$0]  (!%p4118_p5), %s4540_s3, 16, %s4114_s11, [#allocation9]  }
  0x64   : > { %p3403_p7 = pnand %p3402_p4, %p3396_p13 }
  0x66   : > { %3406 = shalt.err (!%p3403_p7)
}
  0x67   : > { %3087 = dma.hbm_to_vmem [thread:$0]  (!%p4118_p5), %s3980_s14, 16, %s4122_s16, [#allocation12]  }
  0x68   : > { %s3418_s11 = scalar_lea.vmem %s4124_s23, 16  ;;  %s3425_s10 = scalar_lea.vmem %s4124_s23, 32 }
  0x69   : > { %p3419_p8 = scmp.ne.s32.totalorder %s4124_s23, %s3418_s11  ;;  %p3426_p11 = scmp.lt.s32.totalorder %s4124_s23, %s4124_s23 }
  0x6a   : > { %p3427_p12 = scmp.lt.s32.totalorder %s3425_s10, %s3418_s11 }
  0x6b   : > { %p3421_p9 = pnand %p3419_p8, %p4128_p6 }
  0x6c   : > { %p3428_p13 = por %p3427_p12, %p3426_p11 }
  0x6d   : > { %p3422_p10 = pneg %p3421_p9 }
  0x6f   : > { %p3429_p0 = pnand %p3428_p13, %p3422_p10 }
  0x71   : > { %3432 = shalt.err (!%p3429_p0)
}
  0x72   : > { %3093 = dma.hbm_to_vmem [thread:$0]  (!%p4118_p5), %s4015_s27, 16, %s4124_s23, [#allocation15]  }
  0x73   : > { %s3905_s15 = smov [#allocation17]   ;;  %s3906_s22 = smov [#allocation20]  }
  0x74   : > { %s932_s16 = sshll.u32 %s3905_s15, 4  ;;  %s960_s1 = sshll.u32 %s3906_s22, 4  ;;  %s933_s16 = int_to_ptr.vmem [resolvable:$true] %s932_s16  ;;  %s961_s1 = int_to_ptr.vmem [resolvable:$true] %s960_s1 }
  0x75   : > { %s3444_s0 = scalar_lea.vmem %s933_s16, 16  ;;  %s3451_s11 = scalar_lea.vmem %s933_s16, 32 }
  0x76   : > { %p3445_p1 = scmp.ne.s32.totalorder %s933_s16, %s3444_s0  ;;  %p3452_p8 = scmp.lt.s32.totalorder %s933_s16, %s933_s16 }
  0x77   : > { %p3453_p9 = scmp.lt.s32.totalorder %s3451_s11, %s3444_s0 }
  0x78   : > { %p3447_p4 = pnand %p3445_p1, %p4128_p6 }
  0x79   : > { %p3454_p10 = por %p3453_p9, %p3452_p8 }
  0x7a   : > { %p3448_p7 = pneg %p3447_p4 }
  0x7c   : > { %p3455_p11 = pnand %p3454_p10, %p3448_p7 }
  0x7e   : > { %3458 = shalt.err (!%p3455_p11)
}
  0x7f   : > { %3099 = dma.hbm_to_vmem [thread:$0]  (!%p4118_p5), %s4030_s6, 16, %s933_s16, [#allocation18]  }
  0x80   : > { %s3470_s23 = scalar_lea.vmem %s961_s1, 16  ;;  %s3477_s10 = scalar_lea.vmem %s961_s1, 32 }
  0x81   : > { %p3471_p12 = scmp.ne.s32.totalorder %s961_s1, %s3470_s23  ;;  %p3478_p1 = scmp.lt.s32.totalorder %s961_s1, %s961_s1 }
  0x82   : > { %p3479_p4 = scmp.lt.s32.totalorder %s3477_s10, %s3470_s23 }
  0x83   : > { %p3473_p13 = pnand %p3471_p12, %p4128_p6 }
  0x84   : > { %p3480_p2 = por %p3479_p4, %p3478_p1 }
  0x85   : > { %p3474_p0 = pneg %p3473_p13 }
  0x87   : > { %p3481_p3 = pnand %p3480_p2, %p3474_p0 }
  0x89   : > { %3484 = shalt.err (!%p3481_p3)
}
  0x8a   : > { %3105 = dma.hbm_to_vmem [thread:$0]  (!%p4118_p5), %s4050_s9, 16, %s961_s1, [#allocation21]  }
  0x8b   : > { %s3907_s15 = smov [#allocation23]   ;;  %s3908_s16 = smov [#allocation26]  }
  0x8c   : > { %s982_s22 = sshll.u32 %s3907_s15, 4  ;;  %s1010_s0 = sshll.u32 %s3908_s16, 4  ;;  %s983_s22 = int_to_ptr.vmem [resolvable:$true] %s982_s22  ;;  %s1011_s0 = int_to_ptr.vmem [resolvable:$true] %s1010_s0 }
  0x8d   : > { %s3496_s11 = scalar_lea.vmem %s983_s22, 16  ;;  %s3503_s3 = scalar_lea.vmem %s983_s22, 32 }
  0x8e   : > { %p3497_p7 = scmp.ne.s32.totalorder %s983_s22, %s3496_s11  ;;  %p3504_p10 = scmp.lt.s32.totalorder %s983_s22, %s983_s22 }
  0x8f   : > { %p3505_p11 = scmp.lt.s32.totalorder %s3503_s3, %s3496_s11 }
  0x90   : > { %p3499_p8 = pnand %p3497_p7, %p4128_p6 }
  0x91   : > { %p3506_p2 = por %p3505_p11, %p3504_p10 }
  0x92   : > { %p3500_p9 = pneg %p3499_p8 }
  0x94   : > { %p3507_p3 = pnand %p3506_p2, %p3500_p9 }
  0x96   : > { %3510 = shalt.err (!%p3507_p3)
}
  0x97   : > { %3111 = dma.hbm_to_vmem [thread:$0]  (!%p4118_p5), %s4060_s19, 16, %s983_s22, [#allocation24]  }
  0x98   : > { %s3522_s1 = scalar_lea.vmem %s1011_s0, 16  ;;  %s3529_s23 = scalar_lea.vmem %s1011_s0, 32 }
  0x99   : > { %p3523_p12 = scmp.ne.s32.totalorder %s1011_s0, %s3522_s1  ;;  %p3530_p1 = scmp.lt.s32.totalorder %s1011_s0, %s1011_s0 }
  0x9a   : > { %p3531_p4 = scmp.lt.s32.totalorder %s3529_s23, %s3522_s1 }
  0x9b   : > { %p3525_p13 = pnand %p3523_p12, %p4128_p6 }
  0x9c   : > { %p3532_p7 = por %p3531_p4, %p3530_p1 }
  0x9d   : > { %p3526_p0 = pneg %p3525_p13 }
  0x9f   : > { %p3533_p8 = pnand %p3532_p7, %p3526_p0 }
  0xa1   : > { %3536 = shalt.err (!%p3533_p8)
}
  0xa2   : > { %3117 = dma.hbm_to_vmem [thread:$0]  (!%p4118_p5), %s4080_s5, 16, %s1011_s0, [#allocation27]  }
  0xa3   : > { %s3909_s3 = smov [#allocation3]   ;;  %s3910_s15 = smov [#allocation7]  }
  0xa4   : > { %s809_s10 = sshll.u32 %s3909_s3, 4  ;;  %s834_s22 = sshll.u32 %s3910_s15, 4  ;;  %s810_s10 = int_to_ptr.vmem [resolvable:$true] %s809_s10  ;;  %s835_s22 = int_to_ptr.vmem [resolvable:$true] %s834_s22 }
  0xa5   : > { %s3548_s16 = scalar_lea.vmem %s810_s10, 16  ;;  %s3555_s11 = scalar_lea.vmem %s810_s10, 32 }
  0xa6   : > { %p3549_p9 = scmp.ne.s32.totalorder %s810_s10, %s3548_s16  ;;  %p3556_p2 = scmp.lt.s32.totalorder %s810_s10, %s810_s10 }
  0xa7   : > { %p3557_p3 = scmp.lt.s32.totalorder %s3555_s11, %s3548_s16 }
  0xa8   : > { %p3551_p10 = pnand %p3549_p9, %p4128_p6 }
  0xa9   : > { %p3558_p12 = por %p3557_p3, %p3556_p2 }
  0xaa   : > { %p3552_p11 = pneg %p3551_p10 }
  0xac   : > { %p3559_p13 = pnand %p3558_p12, %p3552_p11 }
  0xae   : > { %3562 = shalt.err (!%p3559_p13)
}
  0xaf   : > { %3072 = dma.hbm_to_vmem [thread:$0]  (!%p4118_p5), %s3945_s13, 16, %s810_s10, [#allocation4]  }
  0xb0   : > { %s3574_s0 = scalar_lea.vmem %s835_s22, 16  ;;  %s3581_s1 = scalar_lea.vmem %s835_s22, 32 }
  0xb1   : > { %p3575_p0 = scmp.ne.s32.totalorder %s835_s22, %s3574_s0  ;;  %p3582_p7 = scmp.lt.s32.totalorder %s835_s22, %s835_s22 }
  0xb2   : > { %p3583_p8 = scmp.lt.s32.totalorder %s3581_s1, %s3574_s0 }
  0xb3   : > { %p3577_p1 = pnand %p3575_p0, %p4128_p6 }
  0xb4   : > { %p3584_p9 = por %p3583_p8, %p3582_p7 }
  0xb5   : > { %p3578_p4 = pneg %p3577_p1 }
  0xb7   : > { %p3585_p10 = pnand %p3584_p9, %p3578_p4 }
  0xb9   : > { %3588 = shalt.err (!%p3585_p10)
}
  0xba   : > { %3078 = dma.hbm_to_vmem [thread:$0]  (!%p4118_p5), %s3960_s25, 16, %s835_s22, [#allocation6]  }
  0xbb   : > { %s3911_s23 = smov [#allocation10]   ;;  %s3912_s10 = smov [#allocation13]  }
  0xbc   : > { %s859_s3 = sshll.u32 %s3911_s23, 4  ;;  %s896_s15 = sshll.u32 %s3912_s10, 4  ;;  %s860_s3 = int_to_ptr.vmem [resolvable:$true] %s859_s3  ;;  %s897_s15 = int_to_ptr.vmem [resolvable:$true] %s896_s15 }
  0xbd   : > { %s3600_s16 = scalar_lea.vmem %s860_s3, 16  ;;  %s3607_s11 = scalar_lea.vmem %s860_s3, 32 }
  0xbe   : > { %p3601_p11 = scmp.ne.s32.totalorder %s860_s3, %s3600_s16  ;;  %p3608_p12 = scmp.lt.s32.totalorder %s860_s3, %s860_s3 }
  0xbf   : > { %p3609_p13 = scmp.lt.s32.totalorder %s3607_s11, %s3600_s16 }
  0xc0   : > { %p3603_p2 = pnand %p3601_p11, %p4128_p6 }
  0xc1   : > { %p3610_p0 = por %p3609_p13, %p3608_p12 }
  0xc2   : > { %p3604_p3 = pneg %p3603_p2 }
  0xc4   : > { %p3611_p1 = pnand %p3610_p0, %p3604_p3 }
  0xc6   : > { %3614 = shalt.err (!%p3611_p1)
}
  0xc7   : > { %3084 = dma.hbm_to_vmem [thread:$0]  (!%p4118_p5), %s3975_s8, 16, %s860_s3, [#allocation9]  }
  0xc8   : > { %s3626_s22 = scalar_lea.vmem %s897_s15, 16  ;;  %s3633_s0 = scalar_lea.vmem %s897_s15, 32 }
  0xc9   : > { %p3627_p4 = scmp.ne.s32.totalorder %s897_s15, %s3626_s22  ;;  %p3634_p9 = scmp.lt.s32.totalorder %s897_s15, %s897_s15 }
  0xca   : > { %p3635_p10 = scmp.lt.s32.totalorder %s3633_s0, %s3626_s22 }
  0xcb   : > { %p3629_p7 = pnand %p3627_p4, %p4128_p6 }
  0xcc   : > { %p3636_p11 = por %p3635_p10, %p3634_p9 }
  0xcd   : > { %p3630_p8 = pneg %p3629_p7 }
  0xcf   : > { %p3637_p2 = pnand %p3636_p11, %p3630_p8 }
  0xd1   : > { %3640 = shalt.err (!%p3637_p2)
}
  0xd2   : > { %3090 = dma.hbm_to_vmem [thread:$0]  (!%p4118_p5), %s4010_s20, 16, %s897_s15, [#allocation12]  }
  0xd3   : > { %s3913_s1 = smov [#allocation16]   ;;  %s3914_s3 = smov [#allocation19]  }
  0xd4   : > { %s918_s23 = sshll.u32 %s3913_s1, 4  ;;  %s946_s10 = sshll.u32 %s3914_s3, 4  ;;  %s919_s23 = int_to_ptr.vmem [resolvable:$true] %s918_s23  ;;  %s947_s10 = int_to_ptr.vmem [resolvable:$true] %s946_s10 }
  0xd5   : > { %s3652_s16 = scalar_lea.vmem %s919_s23, 16  ;;  %s3659_s11 = scalar_lea.vmem %s919_s23, 32 }
  0xd6   : > { %p3653_p3 = scmp.ne.s32.totalorder %s919_s23, %s3652_s16  ;;  %p3660_p0 = scmp.lt.s32.totalorder %s919_s23, %s919_s23 }
  0xd7   : > { %p3661_p1 = scmp.lt.s32.totalorder %s3659_s11, %s3652_s16 }
  0xd8   : > { %p3655_p12 = pnand %p3653_p3, %p4128_p6 }
  0xd9   : > { %p3662_p4 = por %p3661_p1, %p3660_p0 }
  0xda   : > { %p3656_p13 = pneg %p3655_p12 }
  0xdc   : > { %p3663_p7 = pnand %p3662_p4, %p3656_p13 }
  0xde   : > { %3666 = shalt.err (!%p3663_p7)
}
  0xdf   : > { %s4541_s4 = sld [smem:[#allocation51_spill]]  ;;  %s3678_s15 = scalar_lea.vmem %s947_s10, 16 }
  0xe0   : > { %p3679_p8 = scmp.ne.s32.totalorder %s947_s10, %s3678_s15  ;;  %s3685_s22 = scalar_lea.vmem %s947_s10, 32 }
  0xe1   : > { %p3686_p11 = scmp.lt.s32.totalorder %s947_s10, %s947_s10  ;;  %p3687_p2 = scmp.lt.s32.totalorder %s3685_s22, %s3678_s15 }
  0xe2   : > { %p3681_p9 = pnand %p3679_p8, %p4128_p6 }
  0xe3   : > { %p3688_p3 = por %p3687_p2, %p3686_p11 }
  0xe4   : > { %p3682_p10 = pneg %p3681_p9 }
  0xe5   : > { %3096 = dma.hbm_to_vmem [thread:$0]  (!%p4118_p5), %s4541_s4, 16, %s919_s23, [#allocation15]  }
  0xe6   : > { %p3689_p12 = pnand %p3688_p3, %p3682_p10 }
  0xe8   : > { %3692 = shalt.err (!%p3689_p12)
}
  0xe9   : > { %3102 = dma.hbm_to_vmem [thread:$0]  (!%p4118_p5), %s4040_s24, 16, %s947_s10, [#allocation18]  }
  0xea   : > { %s3915_s0 = smov [#allocation22]   ;;  %s3916_s23 = smov [#allocation25]  }
  0xeb   : > { %s971_s1 = sshll.u32 %s3915_s0, 4  ;;  %s996_s3 = sshll.u32 %s3916_s23, 4  ;;  %s972_s1 = int_to_ptr.vmem [resolvable:$true] %s971_s1  ;;  %s997_s3 = int_to_ptr.vmem [resolvable:$true] %s996_s3 }
  0xec   : > { %s3704_s16 = scalar_lea.vmem %s972_s1, 16  ;;  %s3711_s11 = scalar_lea.vmem %s972_s1, 32 }
  0xed   : > { %p3705_p13 = scmp.ne.s32.totalorder %s972_s1, %s3704_s16  ;;  %p3712_p4 = scmp.lt.s32.totalorder %s972_s1, %s972_s1 }
  0xee   : > { %p3713_p7 = scmp.lt.s32.totalorder %s3711_s11, %s3704_s16 }
  0xef   : > { %p3707_p0 = pnand %p3705_p13, %p4128_p6 }
  0xf0   : > { %p3714_p8 = por %p3713_p7, %p3712_p4 }
  0xf1   : > { %p3708_p1 = pneg %p3707_p0 }
  0xf3   : > { %p3715_p9 = pnand %p3714_p8, %p3708_p1 }
  0xf5   : > { %3718 = shalt.err (!%p3715_p9)
}
  0xf6   : > { %3108 = dma.hbm_to_vmem [thread:$0]  (!%p4118_p5), %s4055_s30, 16, %s972_s1, [#allocation21]  }
  0xf7   : > { %s3730_s10 = scalar_lea.vmem %s997_s3, 16  ;;  %s3737_s15 = scalar_lea.vmem %s997_s3, 32 }
  0xf8   : > { %p3731_p10 = scmp.ne.s32.totalorder %s997_s3, %s3730_s10  ;;  %p3738_p3 = scmp.lt.s32.totalorder %s997_s3, %s997_s3 }
  0xf9   : > { %p3739_p12 = scmp.lt.s32.totalorder %s3737_s15, %s3730_s10 }
  0xfa   : > { %p3733_p11 = pnand %p3731_p10, %p4128_p6 }
  0xfb   : > { %p3740_p13 = por %p3739_p12, %p3738_p3 }
  0xfc   : > { %p3734_p2 = pneg %p3733_p11 }
  0xfe   : > { %p3741_p0 = pnand %p3740_p13, %p3734_p2 }
 0x100   : > { %3744 = shalt.err (!%p3741_p0)
}
 0x101   : > { %s4542_s22 = sld [smem:[#allocation56_spill]]  ;;  %s3917_s0 = smov [#allocation28]  }
 0x102   : > { %s1021_s23 = sshll.u32 %s3917_s0, 4  ;;  %s3918_s1 = smov [#allocation29]   ;;  %s1022_s23 = int_to_ptr.vmem [resolvable:$true] %s1021_s23 }
 0x103   : > { %s1032_s16 = sshll.u32 %s3918_s1, 4  ;;  %s3756_s11 = scalar_lea.vmem %s1022_s23, 16  ;;  %s1033_s16 = int_to_ptr.vmem [resolvable:$true] %s1032_s16 }
 0x104   : > { %p3757_p1 = scmp.ne.s32.totalorder %s1022_s23, %s3756_s11  ;;  %s3763_s4 = scalar_lea.vmem %s1022_s23, 32 }
 0x105   : > { %p3764_p8 = scmp.lt.s32.totalorder %s1022_s23, %s1022_s23  ;;  %p3765_p9 = scmp.lt.s32.totalorder %s3763_s4, %s3756_s11 }
 0x106   : > { %p3759_p4 = pnand %p3757_p1, %p4128_p6 }
 0x107   : > { %3114 = dma.hbm_to_vmem [thread:$0]  (!%p4118_p5), %s4542_s22, 16, %s997_s3, [#allocation24]  }
 0x108   : > { %p3760_p7 = pneg %p3759_p4  ;;  %p3766_p10 = por %p3765_p9, %p3764_p8 }
 0x10a   : > { %p3767_p11 = pnand %p3766_p10, %p3760_p7 }
 0x10c   : > { %3770 = shalt.err (!%p3767_p11)
}
 0x10d   : > { %3120 = dma.hbm_to_vmem [thread:$0]  (!%p4118_p5), %s4085_s12, 16, %s1022_s23, [#allocation27]  }
 0x10e   : > { %s3782_s3 = scalar_lea.vmem %s1033_s16, 16  ;;  %s3789_s10 = scalar_lea.vmem %s1033_s16, 32 }
 0x10f   : > { %p3783_p2 = scmp.ne.s32.totalorder %s1033_s16, %s3782_s3  ;;  %p3790_p13 = scmp.lt.s32.totalorder %s1033_s16, %s1033_s16 }
 0x110   : > { %p3791_p0 = scmp.lt.s32.totalorder %s3789_s10, %s3782_s3 }
 0x111   : > { %p3785_p3 = pnand %p3783_p2, %p4128_p6 }
 0x112   : > { %p3792_p1 = por %p3791_p0, %p3790_p13 }
 0x113   : > { %p3786_p12 = pneg %p3785_p3 }
 0x115   : > { %p3793_p4 = pnand %p3792_p1, %p3786_p12 }
 0x117   : > { %3796 = shalt.err (!%p3793_p4)
}
 0x118   : > { %3123 = dma.hbm_to_vmem [thread:$0]  (!%p4118_p5), %s4090_s29, 16, %s1033_s16, [#allocation30]  }
 0x119   : > { %p4543_p7 = scmp.ne.s32.totalorder %s4537_s7, 0 }
 0x11a   : > { %p4544_p8 = scmp.eq.s32.totalorder (!%p4543_p7), %s4103_s2, 0 }
 0x11b   : > { %1053 = sbr.rel (%p4543_p7) target bundleno = 4632 (0x1218), region = 148 }
 0x120   : > { %3814 = dma.done.wait (%p4544_p8), [#allocation4], 16   ;;  %p4545_p9 = pmov %p4544_p8 }
 0x121   : > { %p4546_p6 = pmov %p4544_p8 }
 0x122   : > { %3816 = vsyncadd (%p4545_p9), [#allocation4], 4294967280 }
 0x123   : > { %3818 = dma.done.wait (%p4546_p6), [#allocation6], 32   ;;  %p4547_p10 = pmov %p4546_p6 }
 0x124   : > { %p4548_p11 = pmov %p4546_p6 }
 0x125   : > { %3820 = vsyncadd (%p4547_p10), [#allocation6], 4294967264 }
 0x126   : > { %3822 = dma.done.wait (%p4548_p11), [#allocation9], 32   ;;  %p4549_p5 = pmov %p4546_p6 }
 0x128   : > { %3824 = vsyncadd (%p4549_p5), [#allocation9], 4294967264  ;;  %p4550_p2 = pmov %p4549_p5 }
 0x12a   : > { %3826 = dma.done.wait (%p4550_p2), [#allocation12], 32   ;;  %p4551_p3 = pmov %p4550_p2 }
 0x12b   : > { %p4552_p12 = pmov %p4550_p2 }
 0x12c   : > { %3828 = vsyncadd (%p4551_p3), [#allocation12], 4294967264 }
 0x12d   : > { %3830 = dma.done.wait (%p4552_p12), [#allocation15], 32   ;;  %p4553_p13 = pmov %p4550_p2 }
 0x12e   : > { %p4554_p0 = pmov %p4550_p2 }
 0x12f   : > { %3832 = vsyncadd (%p4553_p13), [#allocation15], 4294967264 }
 0x130   : > { %3834 = dma.done.wait (%p4554_p0), [#allocation18], 32   ;;  %p4555_p1 = pmov %p4554_p0 }
 0x131   : > { %p4556_p4 = pmov %p4554_p0 }
 0x132   : > { %3836 = vsyncadd (%p4555_p1), [#allocation18], 4294967264 }
 0x133   : > { %3838 = dma.done.wait (%p4556_p4), [#allocation21], 32   ;;  %p4557_p7 = pmov %p4554_p0 }
 0x134   : > { %p4558_p8 = pmov %p4554_p0 }
 0x135   : > { %3840 = vsyncadd (%p4557_p7), [#allocation21], 4294967264 }
 0x136   : > { %3842 = dma.done.wait (%p4558_p8), [#allocation24], 32   ;;  %p4559_p9 = pmov %p4554_p0 }
 0x137   : > { %p4560_p6 = pmov %p4554_p0 }
 0x138   : > { %3844 = vsyncadd (%p4559_p9), [#allocation24], 4294967264 }
 0x139   : > { %3846 = dma.done.wait (%p4560_p6), [#allocation27], 32   ;;  %p4561_p10 = pmov %p4554_p0 }
 0x13a   : > { %p4562_p11 = pmov %p4554_p0 }
 0x13b   : > { %3848 = vsyncadd (%p4561_p10), [#allocation27], 4294967264 }
 0x13c   : > { %3850 = dma.done.wait (%p4562_p11), [#allocation30], 16   ;;  %p4563_p5 = pmov %p4554_p0 }
 0x13d   : > { %s4564_s4 = sld [smem:[#allocation41_spill]]  ;;  %p1203_p2 = scmp.lt.s32.totalorder %s4103_s2, 1  ;;  %vm1218_vm0 = vcmask 261120   ;;  %vm1222_vm1 = vcmask 258048   ;;  %v3919_v15 = vmov 0.0   ;;  %vm3920_vm2 = vmmov 0  }
 0x13e   : > { %3852 = vsyncadd (%p4563_p5), [#allocation30], 4294967280  ;;  %s4565_s15 = sld [smem:[#allocation43_spill]]  ;;  %2909 = vmatprep.subr.bf16.mxu0 %v3919_v15  ;;  %2913 = vmatprep.mubr.msk.bf16.mxu0 %vm3920_vm2, %v3919_v15  ;;  %v2806_v25 = vld [vmem:[#allocation3] ss:$0 sm:$0xff]  ;;  %vm1385_vm3 = vcmask 523264  }
 0x13f   : > { %s4581_s2 = smov (!%p1203_p2, %s4103_s2), 1  ;;  %2917 = vmatprep.subr.bf16.mxu1 %v3919_v15  ;;  %2925 = vmatprep.mubr.msk.bf16.mxu1 %vm3920_vm2, %v3919_v15  ;;  %v2807_v29 = vld [vmem:[#allocation5] ss:$0 sm:$0xff]  ;;  %v2808_v38 = vld [vmem:[#allocation7] ss:$0 sm:$0xff]  ;;  %s4342_s22 = smov 0  }
 0x140   : > { %s2872_s7 = sshll.u32 %s4581_s2, 4  ;;  %s4566_s2 = sld [smem:[#allocation44_spill]]  ;;  %v2814_v56 = vld [vmem:[#allocation8] ss:$0 sm:$0xff] }
 0x141   : > { %s4286_s26 = scalar_lea.vmem %s4095_s21, %s2872_s7 }
 0x143   : > { %s1207_s18 = scalar_lea.vmem %s4564_s4, %s2872_s7 }
 0x144   : > { %v4288_v0 = vld [vmem:[%s1207_s18] sm:$0xff]  ;;  %v4290_v1 = vld [vmem:[%s1207_s18 + $0x8] sm:$0x1f] }
 0x145   : > { %v1219_v2 = vsel %vm1218_vm0, %v4288_v0, 0.0  ;;  %v1223_v3 = vsel %vm1222_vm1, %v4290_v1, 0.0  ;;  %v3250_v14 = vld [vmem:[%s4565_s15 + $0x8] sm:$0xff]   ;;  %v3251_v16 = vld [vmem:[%s4565_s15] sm:$0xff]  }
 0x146   : > { %1220 = vadd.xlane.f32.xlu0 %v1219_v2  ;;  %2910 = vmatpush3.bf16.msra.mxu0 %v3250_v14  ;;  %v3252_v34 = vld [vmem:[%s4566_s2 + $0x18] sm:$0xff]   ;;  %v3253_v35 = vld [vmem:[%s4566_s2 + $0x10] sm:$0xff]   ;;  %v3254_v36 = vld [vmem:[%s4566_s2 + $0x8] sm:$0xff]  }
 0x147   : > { %2911 = vmatprep.subr.bf16.mxu0 %v3919_v15  ;;  %2918 = vmatpush3.bf16.msra.mxu1 %v3252_v34  ;;  %v3255_v37 = vld [vmem:[%s4566_s2] sm:$0xff]   ;;  %v4340_v34 = vmov 0.0  }
 0x148   : > { %2919 = vmatprep.subr.bf16.mxu1 %v3919_v15 }
 0x14a   : > { %1224 = vadd.xlane.f32.xlu0 %v1223_v3  ;;  %2912 = vmatpush3.bf16.msra.mxu0 %v3251_v16 }
 0x14b   : > { %2920 = vmatpush3.bf16.msra.mxu1 %v3253_v35 }
 0x14c   : > { %2921 = vmatprep.subr.bf16.mxu1 %v3919_v15 }
 0x14f   : > { %2922 = vmatpush3.bf16.msra.mxu1 %v3254_v36 }
 0x150   : > { %2923 = vmatprep.subr.bf16.mxu1 %v3919_v15 }
 0x153   : > { %2924 = vmatpush3.bf16.msra.mxu1 %v3255_v37 }
 0x1cf   : > { %v1221_v4 = vpop.xlane.xlu0 %1220 }
 0x1d0   : > { %v1227_v5 = vmul.f32 0.03125, %v1221_v4 }
 0x1d2   : > { %v1229_v6 = vsub.f32 %v4288_v0, %v1227_v5 }
 0x1d3   : > { %v1225_v7 = vpop.xlane.xlu0 %1224 }
 0x1d4   : > { %v1228_v8 = vmul.f32 0.03125, %v1225_v7  ;;  %v1231_v9 = vmul.f32 %v1229_v6, %v1229_v6 }
 0x1d6   : > { %v1230_v10 = vsub.f32 %v4290_v1, %v1228_v8  ;;  %v1233_v11 = vsel %vm1218_vm0, %v1231_v9, 0.0 }
 0x1d7   : > { %1234 = vadd.xlane.f32.xlu1 %v1233_v11 }
 0x1d8   : > { %v1232_v12 = vmul.f32 %v1230_v10, %v1230_v10 }
 0x1da   : > { %v1236_v13 = vsel %vm1222_vm1, %v1232_v12, 0.0 }
 0x1db   : > { %1237 = vadd.xlane.f32.xlu1 %v1236_v13 }
 0x260   : > { %v1235_v17 = vpop.xlane.xlu1 %1234 }
 0x261   : > { %v1239_v18 = vmul.f32 0.03125, %v1235_v17 }
 0x263   : > { %v1241_v19 = vadd.f32 1e-05, %v1239_v18 }
 0x264   : > { %v1238_v20 = vpop.xlane.xlu1 %1237 }
 0x265   : > { %3256 = vrsqrt.f32 %v1241_v19  ;;  %v1240_v21 = vmul.f32 0.03125, %v1238_v20 }
 0x267   : > { %v1242_v22 = vadd.f32 1e-05, %v1240_v21 }
 0x269   : > { %3258 = vrsqrt.f32 %v1242_v22 }
 0x272   : > { %v3257_v23 = vpop.eup %3256 }
 0x273   : > { %v1245_v24 = vmul.f32 %v3257_v23, %v1229_v6 }
 0x275   : > { %v1253_v28 = vmul.f32 %v2806_v25, %v1245_v24  ;;  %v2820_v24 = vld [vmem:[#allocation10] ss:$0 sm:$0xff] }
 0x276   : > { %v3259_v26 = vpop.eup %3258 }
 0x277   : > { %v1246_v27 = vmul.f32 %v3259_v26, %v1230_v10  ;;  %v1261_v31 = vadd.f32 %v2807_v29, %v1253_v28  ;;  %v2821_v28 = vld [vmem:[#allocation11] ss:$0 sm:$0xff] }
 0x279   : > { %v1254_v30 = vmul.f32 %v2806_v25, %v1246_v27 }
 0x27b   : > { %v1262_v32 = vadd.f32 %v2807_v29, %v1254_v30 }
 0x27d   : > { %v1263_v33 = vpack.c.bf16 %v1262_v32, %v1261_v31 }
 0x27f   : > { %2914 = vmatmul.mubr.msk.bf16.vlgmr.msra.gmra.mxu0 %vm1218_vm0, %v1263_v33  ;;  %v4338_v33 = vmov 0.0  }
 0x33f   : > { %v1324_v39 = vpop.f32.mrf.mxu0 }
 0x340   : > { %v1325_v40 = vadd.f32 %v2808_v38, %v1324_v39 }
 0x341   : > { %v2915_v41 = vpop.f32.mrf.mxu0 }
 0x342   : > { %v2812_v42 = vmul.f32 -1.442695, %v1325_v40 }
 0x343   : > { %v1327_v43 = vpop.f32.mrf.mxu0 }
 0x344   : > { %3260 = vpow2.f32 %v2812_v42  ;;  %v1328_v44 = vadd.f32 %v2808_v38, %v1327_v43 }
 0x345   : > { %v2916_v45 = vpop.f32.mrf.mxu0 }
 0x346   : > { %v2813_v46 = vmul.f32 -1.442695, %v1328_v44 }
 0x348   : > { %3262 = vpow2.f32 %v2813_v46 }
 0x351   : > { %v3261_v47 = vpop.eup %3260 }
 0x352   : > { %v1337_v48 = vadd.f32 1.0, %v3261_v47 }
 0x354   : > { %3264 = vrcp.f32 %v1337_v48 }
 0x355   : > { %v3263_v49 = vpop.eup %3262 }
 0x356   : > { %v1338_v50 = vadd.f32 1.0, %v3263_v49 }
 0x358   : > { %3266 = vrcp.f32 %v1338_v50 }
 0x361   : > { %v3265_v51 = vpop.eup %3264 }
 0x362   : > { %v1343_v53 = vmul.f32 %v3265_v51, %v1325_v40 }
 0x365   : > { %v3267_v52 = vpop.eup %3266 }
 0x366   : > { %v1344_v54 = vmul.f32 %v3267_v52, %v1328_v44 }
 0x368   : > { %v1345_v55 = vpack.c.bf16 %v1344_v54, %v1343_v53 }
 0x36a   : > { %2926 = vmatmul.mubr.msk.bf16.vlgmr.msra.gmra.mxu1 %vm1385_vm3, %v1345_v55 }
 0x42a   : > { %v1423_v57 = vpop.f32.mrf.mxu1 }
 0x42b   : > { %v1424_v58 = vadd.f32 %v2814_v56, %v1423_v57 }
 0x42c   : > { %v2927_v59 = vpop.f32.mrf.mxu1 }
 0x42d   : > { %v1430_v60 = vmul.f32 0.5, %v1424_v58 }
 0x42e   : > { %v1426_v61 = vpop.f32.mrf.mxu1 }
 0x42f   : > { %v1427_v62 = vadd.f32 %v2814_v56, %v1426_v61  ;;  %v4319_v63 = vadd.f32 %v1430_v60, %v4288_v0 }
 0x430   : > { %v2928_v2 = vpop.f32.mrf.mxu1 }
 0x431   : > { %v1431_v3 = vmul.f32 0.5, %v1427_v62  ;;  %v1436_v4 = vsel %vm1218_vm0, %v4319_v63, 0.0 }
 0x432   : > { %1437 = vadd.xlane.f32.xlu0 %v1436_v4 }
 0x433   : > { %v4324_v5 = vadd.f32 %v1431_v3, %v4290_v1 }
 0x435   : > { %v1439_v6 = vsel %vm1222_vm1, %v4324_v5, 0.0 }
 0x436   : > { %1440 = vadd.xlane.f32.xlu1 %v1439_v6 }
 0x4bb   : > { %v1438_v7 = vpop.xlane.xlu0 %1437 }
 0x4bc   : > { %v1442_v8 = vmul.f32 0.03125, %v1438_v7 }
 0x4be   : > { %v1444_v9 = vsub.f32 %v4319_v63, %v1442_v8 }
 0x4bf   : > { %v1441_v10 = vpop.xlane.xlu1 %1440 }
 0x4c0   : > { %v1443_v0 = vmul.f32 0.03125, %v1441_v10  ;;  %v1446_v11 = vmul.f32 %v1444_v9, %v1444_v9 }
 0x4c2   : > { %v1445_v12 = vsub.f32 %v4324_v5, %v1443_v0  ;;  %v1448_v13 = vsel %vm1218_vm0, %v1446_v11, 0.0 }
 0x4c3   : > { %1449 = vadd.xlane.f32.xlu0 %v1448_v13 }
 0x4c4   : > { %v1447_v14 = vmul.f32 %v1445_v12, %v1445_v12 }
 0x4c6   : > { %v1451_v1 = vsel %vm1222_vm1, %v1447_v14, 0.0 }
 0x4c7   : > { %1452 = vadd.xlane.f32.xlu1 %v1451_v1 }
 0x54c   : > { %v1450_v16 = vpop.xlane.xlu0 %1449 }
 0x54d   : > { %v1454_v17 = vmul.f32 0.03125, %v1450_v16 }
 0x54f   : > { %v1456_v18 = vadd.f32 1e-05, %v1454_v17 }
 0x550   : > { %v1453_v19 = vpop.xlane.xlu1 %1452 }
 0x551   : > { %3268 = vrsqrt.f32 %v1456_v18  ;;  %v1455_v20 = vmul.f32 0.03125, %v1453_v19 }
 0x553   : > { %v1457_v21 = vadd.f32 1e-05, %v1455_v20 }
 0x555   : > { %3270 = vrsqrt.f32 %v1457_v21 }
 0x55e   : > { %v3269_v22 = vpop.eup %3268 }
 0x55f   : > { %v1460_v23 = vmul.f32 %v3269_v22, %v1444_v9 }
 0x561   : > { %v1468_v26 = vmul.f32 %v2820_v24, %v1460_v23 }
 0x562   : > { %v3271_v25 = vpop.eup %3270 }
 0x563   : > { %v1461_v27 = vmul.f32 %v3271_v25, %v1445_v12  ;;  %v4332_v30 = vadd.f32 %v2821_v28, %v1468_v26 }
 0x565   : > { %v1469_v29 = vmul.f32 %v2820_v24, %v1461_v27 }
 0x567   : > { %v4334_v31 = vadd.f32 %v2821_v28, %v1469_v29 }
 0x569   : > { %v1478_v32 = vpack.c.bf16 %v4334_v31, %v4332_v30 }
 0x56a LB: >> { %s4567_s0 = sld [smem:[#allocation46_spill]]  ;;  %v3921_v35 = vmov 0.0   ;;  %vm3922_vm4 = vmmov 0   ;;  %s2874_s1 = sshll.u32 %s3867_s22, 4  ;;  %vm1591_vm5 = vcmask 64512   ;;  %vm1691_vm6 = vcmask 105472   ;;  %s3867_s22 = sphi %s4342_s22, %s1484_s22   ;;  %v3863_v34 = vphi %v4340_v34, %v4574_v34   ;;  %v3859_v33 = vphi %v4338_v33, %v4573_v33  }
 0x56b   : >> { %2929 = vmatprep.subr.bf16.mxu0 %v3921_v35  ;;  %s4568_s23 = sld [smem:[#allocation42_spill]]  ;;  %2933 = vmatprep.mubr.msk.bf16.mxu0 %vm3922_vm4, %v3921_v35  ;;  %s2875_s4 = sshll.u32 %s3867_s22, 3  ;;  %vm1695_vm7 = vcmask 102400   ;;  %vm1721_vm8 = vcmask 1045504   ;;  %vm1722_vm9 = vcmask 1046528   ;;  %v3925_v22 = vmov 65535  }
 0x56c   : >> { %2937 = vmatprep.subr.bf16.mxu1 %v3921_v35  ;;  %2939 = vmatprep.mubr.msk.bf16.mxu1 %vm3922_vm4, %v3921_v35  ;;  %s4569_s11 = sld [smem:[#allocation47_spill]]  ;;  %v1723_v23 = vsel %vm1721_vm8, 4294967295, %v3925_v22  ;;  %vm1776_vm10 = vcmask 1043456  }
 0x56d   : >> { %s4570_s3 = sld [smem:[#allocation48_spill]]  ;;  %v1724_v25 = vsel %vm1722_vm9, %v1723_v23, 0 }
 0x56e   : >> { %s4571_s10 = sld [smem:[#allocation49_spill]] }
 0x570   : >> { %s1489_s16 = scalar_lea.vmem %s4567_s0, %s2874_s1 }
 0x571   : >> { %v3272_v36 = vld [vmem:[%s1489_s16 + $0x8] sm:$0xff]   ;;  %v3273_v37 = vld [vmem:[%s1489_s16] sm:$0xff]   ;;  %s1583_s7 = scalar_lea.vmem %s4568_s23, %s2875_s4  ;;  %s3923_s23 = smov 120  }
 0x572   : >> { %2930 = vmatpush3.bf16.msra.mxu0 %v3272_v36  ;;  %v3274_v38 = vld [vmem:[%s1583_s7] sm:$0x7f]   ;;  %s1494_s18 = scalar_lea.vmem %s4569_s11, %s3867_s22  ;;  %s3924_s16 = smov 112  }
 0x573   : >> { %2931 = vmatprep.subr.bf16.mxu0 %v3921_v35  ;;  %v1596_v39 = vsel %vm1591_vm5, %v3274_v38, 0  ;;  %v2824_v40 = vld [vmem:[%s1494_s18] ss:$0 sm:$0xff]  ;;  %s1559_s0 = scalar_lea.vmem %s4570_s3, %s3867_s22  ;;  %s4572_s11 = sld [smem:[#allocation50_spill]] }
 0x574   : >> { %2938 = vmatpush3.bf16.xpose.msra.mxu1 %v1596_v39  ;;  %s1570_s1 = scalar_lea.vmem %s4571_s10, %s3867_s22  ;;  %v2828_v44 = vld [vmem:[%s1559_s0] ss:$0 sm:$0xff]  ;;  %s2836_s3 = sshll.u32 %s3867_s22, 2 }
 0x575   : >> { %2949 = vmatprep.subr.bf16.mxu1 %v3921_v35  ;;  %v2829_v45 = vld [vmem:[%s1570_s1] ss:$0 sm:$0xff]  ;;  %s1484_s22 = sadd.s32 1, %s3867_s22  }
 0x576   : >> { %2932 = vmatpush3.bf16.msra.mxu0 %v3273_v37  ;;  %p1481_p3 = scmp.ge.s32.totalorder %s1484_s22, 4  }
 0x577   : >> { %2943 = vmatprep.subr.bf16.mxu0 %v3921_v35  ;;  %1969 = vst.msk [vmem:[#allocation2 + $0x10] sm:$0xff] (%p1481_p3), %vm1218_vm0, %v3919_v15  ;;  %1968 = vst.msk [vmem:[#allocation2] sm:$0xff] (%p1481_p3), %vm1218_vm0, %v3919_v15  ;;  %s4575_s22 = sld [smem:[#allocation52_spill]] (%p1481_p3)  ;;  %s3926_s18 = smov (%p1481_p3), 96  }
 0x578   : > { %1970 = vst.msk [vmem:[#allocation2 + $0x18] sm:$0x1f] (%p1481_p3), %vm1222_vm1, %v3919_v15  ;;  %s4576_s4 = sld [smem:[#allocation54_spill]] (%p1481_p3) }
 0x579   : >> { %2934 = vmatmul.mubr.msk.bf16.vlgmr.msra.gmra.mxu0 %vm1218_vm0, %v1478_v32  ;;  %s1771_s10 = scalar_lea.vmem %s4572_s11, %s2836_s3  ;;  %s4577_s7 = sld [smem:[#allocation53_spill]] (%p1481_p3) }
 0x57a   : >> { %2945 = vmatprep.mubr.msk.bf16.mxu0 %vm3922_vm4, %v3921_v35  ;;  %v1772_v38 = vld [vmem:[%s1771_s10] sm:$0xf]  ;;  %s4578_s0 = sld [smem:[#allocation55_spill]] (%p1481_p3) }
 0x57b   : >> { %v1778_v39 = vsel %vm1776_vm10, %v1772_v38, 0  ;;  %s4579_s1 = sld [smem:[#allocation57_spill]] (%p1481_p3) }
 0x57e   : > { %v3286_v38 = vld [vmem:[%s4576_s4] sm:$0xff] (%p1481_p3)  }
 0x639   : >> { %v1551_v41 = vpop.f32.mrf.mxu0 }
 0x63a   : >> { %v1552_v42 = vadd.f32 %v2824_v40, %v1551_v41 }
 0x63b   : >> { %v2935_v43 = vpop.f32.mrf.mxu0 }
 0x63c   : >> { %v1567_v48 = vadd.f32 %v2828_v44, %v1552_v42  ;;  %v1578_v50 = vadd.f32 %v2829_v45, %v1552_v42 }
 0x63d   : >> { %v1554_v46 = vpop.f32.mrf.mxu0 }
 0x63e   : >> { %v1555_v47 = vadd.f32 %v2824_v40, %v1554_v46 }
 0x63f   : >> { %v2936_v49 = vpop.f32.mrf.mxu0 }
 0x640   : >> { %v1568_v51 = vadd.f32 %v2828_v44, %v1555_v47  ;;  %v1579_v52 = vadd.f32 %v2829_v45, %v1555_v47  ;;  %v1558_v53 = vpack.c.bf16 %v1555_v47, %v1552_v42 }
 0x642   : >> { %v1569_v54 = vpack.c.bf16 %v1568_v51, %v1567_v48  ;;  %v1580_v55 = vpack.c.bf16 %v1579_v52, %v1578_v50  ;;  %1640 = vrot.lane.b32.xlu0 %v1558_v53, %s3923_s23  ;;  %v2838_v52 = vld [vmem:[#allocation13] ss:$0 sm:$0xff] (%p1481_p3) }
 0x644   : >> { %2940 = vmatmul.mubr.msk.bf16.vlgmr.msra.gmra.mxu1 %vm1591_vm5, %v1580_v55 }
 0x645   : >> { %2951 = vmatprep.mubr.msk.bf16.mxu1 %vm3922_vm4, %v3921_v35 }
 0x6b4   : >> { %v1641_v56 = vpop.permute.xlu0 %1640 }
 0x6b5   : >> { %v1646_v57 = vsel %vm1591_vm5, %v1641_v56, 0 }
 0x6b6   : >> { %2944 = vmatpush3.bf16.xpose.msra.mxu0 %v1646_v57 }
 0x6b7   : >> { %2955 = vmatprep.subr.bf16.mxu0 %v3921_v35 }
 0x6bd   : >> { %2946 = vmatmul.mubr.msk.bf16.vlgmr.msra.gmra.mxu0 %vm1591_vm5, %v1569_v54 }
 0x6be   : >> { %2957 = vmatprep.mubr.msk.bf16.mxu0 %vm3922_vm4, %v3921_v35  ;;  %2956 = vmatpush3.bf16.msra.mxu0 %v1778_v39 }
 0x6bf   : > { %2961 = vmatprep.subr.bf16.mxu0 (%p1481_p3), %v3919_v15 }
 0x704   : >> { %v1632_v58 = vpop.f32.mrf.mxu1 }
 0x706   : >> { %v2941_v59 = vpop.f32.mrf.mxu1 }
 0x708   : >> { %v1635_v60 = vpop.f32.mrf.mxu1 }
 0x70a   : >> { %v2942_v61 = vpop.f32.mrf.mxu1 }
 0x70b   : > { %v3283_v61 = vld [vmem:[%s4575_s22 + $0x8] sm:$0xff] (%p1481_p3)  }
 0x77d   : >> { %v1682_v62 = vpop.f32.mrf.mxu0 }
 0x77e   : >> { %v1683_v2 = vadd.f32 %v1682_v62, %v1632_v58  ;;  %v3284_v62 = vld [vmem:[%s4575_s22] sm:$0xff] (%p1481_p3)  }
 0x77f   : >> { %v2947_v3 = vpop.f32.mrf.mxu0 }
 0x780   : >> { %v1689_v4 = vmul.f32 0.35355338, %v1683_v2 }
 0x781   : >> { %v1685_v6 = vpop.f32.mrf.mxu0 }
 0x782   : >> { %v1686_v7 = vadd.f32 %v1685_v6, %v1635_v60  ;;  %v1692_v8 = vsel %vm1691_vm6, %v1689_v4, -inf }
 0x783   : >> { %1693 = vmax.xlane.f32.xlu0 %v1692_v8  ;;  %v2948_v9 = vpop.f32.mrf.mxu0 }
 0x784   : >> { %v1690_v10 = vmul.f32 0.35355338, %v1686_v7 }
 0x786   : >> { %v1696_v0 = vsel %vm1695_vm7, %v1690_v10, -inf }
 0x787   : >> { %1697 = vmax.xlane.f32.xlu1 %v1696_v0  ;;  %v2839_v0 = vld [vmem:[#allocation14] ss:$0 sm:$0xff] (%p1481_p3) }
 0x80c   : >> { %v1694_v11 = vpop.xlane.xlu0 %1693 }
 0x80d   : >> { %v1699_v12 = vsub.f32 %v1689_v4, %v1694_v11 }
 0x80f   : >> { %v1701_v13 = vmul.f32 1.442695, %v1699_v12 }
 0x810   : >> { %v1698_v14 = vpop.xlane.xlu1 %1697 }
 0x811   : >> { %3275 = vpow2.f32 %v1701_v13  ;;  %v1700_v1 = vsub.f32 %v1690_v10, %v1698_v14  ;;  %v2840_v14 = vld [vmem:[#allocation16] ss:$0 sm:$0xff] (%p1481_p3) }
 0x813   : >> { %v1703_v16 = vmul.f32 1.442695, %v1700_v1 }
 0x815   : >> { %3277 = vpow2.f32 %v1703_v16 }
 0x81e   : >> { %v3276_v17 = vpop.eup %3275 }
 0x81f   : >> { %v1705_v18 = vsel %vm1691_vm6, %v3276_v17, 0.0 }
 0x820   : >> { %1706 = vadd.xlane.f32.xlu1 %v1705_v18 }
 0x822   : >> { %v3278_v19 = vpop.eup %3277 }
 0x823   : >> { %v1708_v20 = vsel %vm1695_vm7, %v3278_v19, 0.0 }
 0x824   : >> { %1709 = vadd.xlane.f32.xlu1 %v1708_v20 }
 0x835   : >> { %1716 = vrot.lane.b32.xlu1 %v1558_v53, %s3924_s16 }
 0x8a9   : >> { %v1707_v21 = vpop.xlane.xlu1 %1706 }
 0x8aa   : >> { %3279 = vrcp.f32 %v1707_v21 }
 0x8ad   : >> { %v1710_v24 = vpop.xlane.xlu1 %1709 }
 0x8ae   : >> { %3281 = vrcp.f32 %v1710_v24 }
 0x8b1   : >> { %v1717_v26 = vpop.permute.xlu1 %1716 }
 0x8b2   : >> { %v1726_v27 = vand.u32 %v1724_v25, %v1717_v26 }
 0x8b4   : >> { %2950 = vmatpush3.bf16.msra.mxu1 %v1726_v27 }
 0x8b5   : > { %2969 = vmatprep.subr.bf16.mxu1 (%p1481_p3), %v3919_v15 }
 0x8b7   : >> { %v3280_v28 = vpop.eup %3279 }
 0x8b8   : >> { %v1713_v35 = vmul.f32 %v3280_v28, %v3276_v17 }
 0x8bb   : >> { %v3282_v29 = vpop.eup %3281 }
 0x8bc   : >> { %v1714_v36 = vmul.f32 %v3282_v29, %v3278_v19  ;;  %v2841_v19 = vld [vmem:[#allocation17] ss:$0 sm:$0xff] (%p1481_p3) }
 0x8be   : >> { %v1715_v37 = vpack.c.bf16 %v1714_v36, %v1713_v35 }
 0x8c0   : >> { %2952 = vmatmul.mubr.msk.bf16.vlgmr.msra.gmra.mxu1 %vm1691_vm6, %v1715_v37  ;;  %v3285_v37 = vld [vmem:[%s4576_s4 + $0x8] sm:$0xff] (%p1481_p3)  }
 0x8c1   : > { %2973 = vmatprep.mubr.msk.bf16.mxu1 (%p1481_p3), %vm3920_vm2, %v3919_v15  ;;  %2970 = vmatpush3.bf16.msra.mxu1 (%p1481_p3), %v3285_v37 }
 0x8c2   : > { %2971 = vmatprep.subr.bf16.mxu1 (%p1481_p3), %v3919_v15 }
 0x8c5   : > { %2972 = vmatpush3.bf16.msra.mxu1 (%p1481_p3), %v3286_v38 }
 0x8c6   : > { %2985 = vmatprep.subr.bf16.mxu1 (%p1481_p3), %v3919_v15 }
 0x980   : >> { %v1762_v40 = vpop.f32.mrf.mxu1 }
 0x982   : >> { %v2953_v41 = vpop.f32.mrf.mxu1 }
 0x983   : > { %v1977_v41 = vlaneseq (%p1481_p3) }
 0x984   : >> { %v1765_v42 = vpop.f32.mrf.mxu1 }
 0x985   : >> { %v1769_v43 = vpack.c.bf16 %v1765_v42, %v1762_v40  ;;  %v4430_v42 = vshrl.u32 (%p1481_p3), %v1977_v41, 7 }
 0x986   : >> { %v2954_v44 = vpop.f32.mrf.mxu1 }
 0x987   : >> { %2958 = vmatmul.mubr.msk.bf16.vlgmr.msra.gmra.mxu0 %vm1591_vm5, %v1769_v43 }
 0x988   : > { %2965 = vmatprep.mubr.msk.bf16.mxu0 (%p1481_p3), %vm3920_vm2, %v3919_v15  ;;  %2962 = vmatpush3.bf16.msra.mxu0 (%p1481_p3), %v3283_v61 }
 0x989   : > { %2963 = vmatprep.subr.bf16.mxu0 (%p1481_p3), %v3919_v15 }
 0x98c   : > { %2964 = vmatpush3.bf16.msra.mxu0 (%p1481_p3), %v3284_v62 }
 0x98d   : > { %2977 = vmatprep.subr.bf16.mxu0 (%p1481_p3), %v3919_v15 }
 0xa47   : >> { %v1814_v45 = vpop.f32.mrf.mxu0 }
 0xa48   : >> { %v1821_v46 = vadd.f32 %v3863_v34, %v1814_v45   ;;  %v1979_v45 = vsub.s32 (%p1481_p3), 0, %v4430_v42 }
 0xa49   : >> { %v2959_v47 = vpop.f32.mrf.mxu0 }
 0xa4a   : >> { %v4574_v34 = vmov %v1821_v46  ;;  %1483 = sbr.rel (!%p1481_p3) target bundleno = 1386 (0x56a), region = 296  ;;  %v1823_v51 = vadd.f32 (%p1481_p3), %v1821_v46, %v4319_v63  ;;  %v1989_v46 = vsub.s32 (%p1481_p3), 1, %v4430_v42 }
 0xa4b   : >> { %v1817_v48 = vpop.f32.mrf.mxu0 }
 0xa4c   : >> { %v1822_v49 = vadd.f32 %v3859_v33, %v1817_v48   ;;  %v4407_v63 = vadd.f32 (%p1481_p3), %v2838_v52, %v1823_v51  ;;  %v1973_v48 = vld [vmem:[%s4577_s7] sm:$0xff] (%p1481_p3) }
 0xa4d   : >> { %v2960_v50 = vpop.f32.mrf.mxu0  ;;  %v1980_v51 = vrot.slane (%p1481_p3), %v1973_v48, %v1979_v45 }
 0xa4e   : >> { %v4573_v33 = vmov %v1822_v49  ;;  %v1824_v34 = vadd.f32 (%p1481_p3), %v1822_v49, %v4324_v5  ;;  %v1836_v30 = vsel (%p1481_p3), %vm1218_vm0, %v4407_v63, 0.0  ;;  %v1999_v50 = vsub.s32 (%p1481_p3), 2, %v4430_v42 }
 0xa4f   : > { %1837 = vadd.xlane.f32.xlu0 %v1836_v30 }
 0xa50   : > { %v4409_v5 = vadd.f32 %v2838_v52, %v1824_v34  ;;  %v1990_v52 = vrot.slane %v1973_v48, %v1989_v46  ;;  %v2009_v34 = vsub.s32 3, %v4430_v42  ;;  %v2000_v30 = vrot.slane %v1973_v48, %v1999_v50 }
 0xa52   : > { %v1839_v31 = vsel %vm1222_vm1, %v4409_v5, 0.0  ;;  %v2010_v61 = vrot.slane %v1973_v48, %v2009_v34 }
 0xa53   : > { %1840 = vadd.xlane.f32.xlu0 %v1839_v31  ;;  %v2019_v31 = vsub.s32 4, %v4430_v42 }
 0xad8   : > { %v1838_v32 = vpop.xlane.xlu0 %1837 }
 0xad9   : > { %v1842_v33 = vmul.f32 0.03125, %v1838_v32 }
 0xadb   : > { %v1844_v53 = vsub.f32 %v4407_v63, %v1842_v33 }
 0xadc   : > { %v1841_v54 = vpop.xlane.xlu0 %1840 }
 0xadd   : > { %v1843_v55 = vmul.f32 0.03125, %v1841_v54  ;;  %v1846_v56 = vmul.f32 %v1844_v53, %v1844_v53  ;;  %v2029_v54 = vsub.s32 5, %v4430_v42 }
 0xadf   : > { %v1845_v57 = vsub.f32 %v4409_v5, %v1843_v55  ;;  %v1848_v58 = vsel %vm1218_vm0, %v1846_v56, 0.0 }
 0xae0   : > { %1849 = vadd.xlane.f32.xlu1 %v1848_v58 }
 0xae1   : > { %v1847_v59 = vmul.f32 %v1845_v57, %v1845_v57 }
 0xae3   : > { %v1851_v60 = vsel %vm1222_vm1, %v1847_v59, 0.0 }
 0xae4   : > { %1852 = vadd.xlane.f32.xlu1 %v1851_v60 }
 0xb69   : > { %v1850_v2 = vpop.xlane.xlu1 %1849 }
 0xb6a   : > { %v1854_v3 = vmul.f32 0.03125, %v1850_v2 }
 0xb6c   : > { %v1856_v4 = vadd.f32 1e-05, %v1854_v3 }
 0xb6d   : > { %v1853_v6 = vpop.xlane.xlu1 %1852 }
 0xb6e   : > { %3293 = vrsqrt.f32 %v1856_v4  ;;  %v1855_v7 = vmul.f32 0.03125, %v1853_v6  ;;  %v2020_v6 = vrot.slane %v1973_v48, %v2019_v31 }
 0xb70   : > { %v1857_v8 = vadd.f32 1e-05, %v1855_v7  ;;  %v2039_v7 = vsub.s32 6, %v4430_v42 }
 0xb72   : > { %3295 = vrsqrt.f32 %v1857_v8 }
 0xb7b   : > { %v3294_v9 = vpop.eup %3293 }
 0xb7c   : > { %v1860_v10 = vmul.f32 %v3294_v9, %v1844_v53 }
 0xb7e   : > { %v1868_v13 = vmul.f32 %v2839_v0, %v1860_v10 }
 0xb7f   : > { %v3296_v11 = vpop.eup %3295 }
 0xb80   : > { %v1861_v12 = vmul.f32 %v3296_v11, %v1845_v57  ;;  %v1876_v16 = vadd.f32 %v2840_v14, %v1868_v13  ;;  %v2049_v11 = vsub.s32 7, %v4430_v42 }
 0xb82   : > { %v1869_v1 = vmul.f32 %v2839_v0, %v1861_v12 }
 0xb84   : > { %v1877_v17 = vadd.f32 %v2840_v14, %v1869_v1 }
 0xb86   : > { %v1878_v18 = vpack.c.bf16 %v1877_v17, %v1876_v16  ;;  %v2030_v16 = vrot.slane %v1973_v48, %v2029_v54 }
 0xb88   : > { %2966 = vmatmul.mubr.msk.bf16.vlgmr.msra.gmra.mxu0 %vm1218_vm0, %v1878_v18 }
 0xb89   : > { %2981 = vmatprep.mubr.msk.bf16.mxu0 %vm3920_vm2, %v3919_v15 }
 0xc48   : > { %v1939_v20 = vpop.f32.mrf.mxu0 }
 0xc49   : > { %v1940_v21 = vadd.f32 %v2841_v19, %v1939_v20 }
 0xc4a   : > { %v2967_v22 = vpop.f32.mrf.mxu0 }
 0xc4b   : > { %v2845_v23 = vmul.f32 -1.442695, %v1940_v21  ;;  %v2040_v22 = vrot.slane %v1973_v48, %v2039_v7 }
 0xc4c   : > { %v1942_v24 = vpop.f32.mrf.mxu0 }
 0xc4d   : > { %3297 = vpow2.f32 %v2845_v23  ;;  %v1943_v25 = vadd.f32 %v2841_v19, %v1942_v24  ;;  %v1974_v23 = vld [vmem:[%s4577_s7 + $0x8] sm:$0x7f] }
 0xc4e   : > { %v2968_v26 = vpop.f32.mrf.mxu0 }
 0xc4f   : > { %v2846_v27 = vmul.f32 -1.442695, %v1943_v25 }
 0xc51   : > { %3299 = vpow2.f32 %v2846_v27 }
 0xc5a   : > { %v3298_v28 = vpop.eup %3297 }
 0xc5b   : > { %v1952_v29 = vadd.f32 1.0, %v3298_v28 }
 0xc5d   : > { %3301 = vrcp.f32 %v1952_v29 }
 0xc5e   : > { %v3300_v35 = vpop.eup %3299 }
 0xc5f   : > { %v1953_v36 = vadd.f32 1.0, %v3300_v35  ;;  %v2050_v35 = vrot.slane %v1973_v48, %v2049_v11  ;;  %v2100_v11 = vrot.slane %v1974_v23, %v2019_v31 }
 0xc61   : > { %3303 = vrcp.f32 %v1953_v36 }
 0xc6a   : > { %v3302_v39 = vpop.eup %3301 }
 0xc6b   : > { %1960 = vrot.lane.b32.xlu0 %v3302_v39, %s3926_s18 }
 0xc6e   : > { %v3304_v40 = vpop.eup %3303 }
 0xc6f   : > { %1962 = vrot.lane.b32.xlu1 %v3304_v40, %s3926_s18 }
 0xcdd   : > { %v1961_v43 = vpop.permute.xlu0 %1960 }
 0xcde   : > { %v1966_v44 = vmul.f32 %v1961_v43, %v1940_v21  ;;  %v2060_v43 = vrot.slane %v1974_v23, %v1979_v45 }
 0xce0   : > { %1971 = vst.msk [vmem:[#allocation2 + $0x8] sm:$0xff] %vm1218_vm0, %v1966_v44 }
 0xce1   : > { %v1963_v47 = vpop.permute.xlu1 %1962 }
 0xce2   : > { %v1967_v49 = vmul.f32 %v1963_v47, %v1943_v25 }
 0xce4   : > { %1972 = vst.msk [vmem:[#allocation2 + $0x10] sm:$0x1f] %vm1222_vm1, %v1967_v49 }
 0xce7   : > { %v1975_v32 = vld [vmem:[#allocation2 + $0x1] sm:$0xff]  ;;  %v1976_v33 = vld [vmem:[#allocation2 + $0x9] sm:$0x1f] }
 0xce8   : > { %v1985_v53 = vld [vmem:[#allocation2 + $0x2] sm:$0xff]  ;;  %v1981_v55 = vmul.f32 %v1980_v51, %v1975_v32  ;;  %v1982_v56 = vmul.f32 %v1980_v51, %v1976_v33  ;;  %v1986_v57 = vld [vmem:[#allocation2 + $0xa] sm:$0x1f]  ;;  %v2070_v32 = vrot.slane %v1974_v23, %v1989_v46 }
 0xce9   : > { %v1991_v58 = vmul.f32 %v1990_v52, %v1985_v53  ;;  %v1995_v59 = vld [vmem:[#allocation2 + $0x3] sm:$0xff]  ;;  %v1996_v60 = vld [vmem:[#allocation2 + $0xb] sm:$0x1f]  ;;  %v1992_v62 = vmul.f32 %v1990_v52, %v1986_v57 }
 0xcea   : > { %v2005_v2 = vld [vmem:[#allocation2 + $0x4] sm:$0xff]  ;;  %v2001_v4 = vmul.f32 %v2000_v30, %v1995_v59  ;;  %v2002_v9 = vmul.f32 %v2000_v30, %v1996_v60 }
 0xceb   : > { %v1993_v3 = vadd.f32 %v1991_v58, %v1981_v55  ;;  %v1994_v8 = vadd.f32 %v1992_v62, %v1982_v56  ;;  %v2006_v10 = vld [vmem:[#allocation2 + $0xc] sm:$0x1f]  ;;  %v2011_v13 = vmul.f32 %v2010_v61, %v2005_v2  ;;  %v2056_v30 = vld [vmem:[#allocation2 + $0x11] sm:$0x1f]  ;;  %v2080_v58 = vrot.slane %v1974_v23, %v1999_v50 }
 0xcec   : > { %v2015_v0 = vld [vmem:[#allocation2 + $0x5] sm:$0xff]  ;;  %v2012_v14 = vmul.f32 %v2010_v61, %v2006_v10  ;;  %v2016_v1 = vld [vmem:[#allocation2 + $0xd] sm:$0x1f]  ;;  %v2066_v57 = vld [vmem:[#allocation2 + $0x12] sm:$0x1f]  ;;  %v2062_v45 = vmul.f32 %v2060_v43, %v2056_v30 }
 0xced   : > { %v2003_v12 = vadd.f32 %v2001_v4, %v1993_v3  ;;  %v2004_v17 = vadd.f32 %v2002_v9, %v1994_v8  ;;  %v2025_v18 = vld [vmem:[#allocation2 + $0x6] sm:$0xff]  ;;  %v2021_v20 = vmul.f32 %v2020_v6, %v2015_v0  ;;  %v2026_v21 = vld [vmem:[#allocation2 + $0xe] sm:$0x1f]  ;;  %v2022_v25 = vmul.f32 %v2020_v6, %v2016_v1  ;;  %v2076_v2 = vld [vmem:[#allocation2 + $0x13] sm:$0x1f] }
 0xcee   : > { %v2035_v26 = vld [vmem:[#allocation2 + $0x7] sm:$0xff]  ;;  %v2031_v28 = vmul.f32 %v2030_v16, %v2025_v18  ;;  %v2036_v29 = vld [vmem:[#allocation2 + $0xf] sm:$0x1f]  ;;  %v2032_v37 = vmul.f32 %v2030_v16, %v2026_v21  ;;  %v2090_v3 = vrot.slane %v1974_v23, %v2009_v34  ;;  %v2072_v46 = vmul.f32 %v2070_v32, %v2066_v57  ;;  %v2086_v10 = vld [vmem:[#allocation2 + $0x14] sm:$0x1f] }
 0xcef   : > { %v2013_v19 = vadd.f32 %v2011_v13, %v2003_v12  ;;  %v2014_v24 = vadd.f32 %v2012_v14, %v2004_v17  ;;  %v2045_v38 = vld [vmem:[#allocation2 + $0x8] sm:$0xff]  ;;  %v2041_v40 = vmul.f32 %v2040_v22, %v2035_v26  ;;  %v2046_v41 = vld [vmem:[#allocation2 + $0x10] sm:$0x1f]  ;;  %v2042_v47 = vmul.f32 %v2040_v22, %v2036_v29  ;;  %v2096_v0 = vld [vmem:[#allocation2 + $0x15] sm:$0x1f] }
 0xcf0   : > { %v2055_v49 = vld [vmem:[#allocation2 + $0x9] sm:$0xff]  ;;  %v2051_v52 = vmul.f32 %v2050_v35, %v2045_v38  ;;  %v2052_v53 = vmul.f32 %v2050_v35, %v2046_v41  ;;  %v2082_v12 = vmul.f32 %v2080_v58, %v2076_v2  ;;  %v2106_v16 = vld [vmem:[#allocation2 + $0x16] sm:$0x1f]  ;;  %v2110_v17 = vrot.slane %v1974_v23, %v2029_v54 }
 0xcf1   : > { %v2023_v27 = vadd.f32 %v2021_v20, %v2013_v19  ;;  %v2024_v36 = vadd.f32 %v2022_v25, %v2014_v24  ;;  %v2065_v55 = vld [vmem:[#allocation2 + $0xa] sm:$0xff]  ;;  %v2061_v56 = vmul.f32 %v2060_v43, %v2055_v49  ;;  %v2092_v18 = vmul.f32 %v2090_v3, %v2086_v10  ;;  %v2116_v24 = vld [vmem:[#allocation2 + $0x17] sm:$0x1f] }
 0xcf2   : > { %v2075_v60 = vld [vmem:[#allocation2 + $0xb] sm:$0xff]  ;;  %v2071_v62 = vmul.f32 %v2070_v32, %v2065_v55  ;;  %v2102_v19 = vmul.f32 %v2100_v11, %v2096_v0  ;;  %v2120_v25 = vrot.slane %v1974_v23, %v2039_v7  ;;  %v2112_v26 = vmul.f32 %v2110_v17, %v2106_v16 }
 0xcf3   : > { %v2033_v39 = vadd.f32 %v2031_v28, %v2023_v27  ;;  %v2034_v44 = vadd.f32 %v2032_v37, %v2024_v36  ;;  %v2085_v6 = vld [vmem:[#allocation2 + $0xc] sm:$0xff]  ;;  %v2081_v9 = vmul.f32 %v2080_v58, %v2075_v60 }
 0xcf4   : > { %v2095_v13 = vld [vmem:[#allocation2 + $0xd] sm:$0xff]  ;;  %v2091_v1 = vmul.f32 %v2090_v3, %v2085_v6  ;;  %v2122_v36 = vmul.f32 %v2120_v25, %v2116_v24  ;;  %v2855_v24 = vld [vmem:[#allocation23] ss:$0 sm:$0xff] }
 0xcf5   : > { %v2043_v51 = vadd.f32 %v2041_v40, %v2033_v39  ;;  %v2044_v33 = vadd.f32 %v2042_v47, %v2034_v44  ;;  %v2105_v20 = vld [vmem:[#allocation2 + $0xe] sm:$0xff]  ;;  %v2101_v22 = vmul.f32 %v2100_v11, %v2095_v13 }
 0xcf6   : > { %v2115_v27 = vld [vmem:[#allocation2 + $0xf] sm:$0xff]  ;;  %v2111_v29 = vmul.f32 %v2110_v17, %v2105_v20 }
 0xcf7   : > { %v2053_v48 = vadd.f32 %v2051_v52, %v2043_v51  ;;  %v2054_v59 = vadd.f32 %v2052_v53, %v2044_v33  ;;  %v2121_v38 = vmul.f32 %v2120_v25, %v2115_v27  ;;  %v2847_v39 = vld [vmem:[#allocation19] ss:$0 sm:$0xff]  ;;  %v3287_v11 = vld [vmem:[%s4578_s0 + $0x8] sm:$0xff]  }
 0xcf8   : > { %2978 = vmatpush3.bf16.msra.mxu0 %v3287_v11 }
 0xcf9   : > { %v2063_v61 = vadd.f32 %v2061_v56, %v2053_v48  ;;  %v2064_v4 = vadd.f32 %v2062_v45, %v2054_v59  ;;  %v2853_v48 = vld [vmem:[#allocation20] ss:$0 sm:$0xff]  ;;  %2979 = vmatprep.subr.bf16.mxu0 %v3919_v15 }
 0xcfb   : > { %v2073_v8 = vadd.f32 %v2071_v62, %v2063_v61  ;;  %v2074_v50 = vadd.f32 %v2072_v46, %v2064_v4 }
 0xcfd   : > { %v2083_v14 = vadd.f32 %v2081_v9, %v2073_v8  ;;  %v2084_v34 = vadd.f32 %v2082_v12, %v2074_v50  ;;  %v3288_v50 = vld [vmem:[%s4578_s0] sm:$0xff]  }
 0xcfe   : > { %2980 = vmatpush3.bf16.msra.mxu0 %v3288_v50 }
 0xcff   : > { %v2093_v21 = vadd.f32 %v2091_v1, %v2083_v14  ;;  %v2094_v31 = vadd.f32 %v2092_v18, %v2084_v34 }
 0xd01   : > { %v2103_v28 = vadd.f32 %v2101_v22, %v2093_v21  ;;  %v2104_v35 = vadd.f32 %v2102_v19, %v2094_v31  ;;  %v2854_v19 = vld [vmem:[#allocation22] ss:$0 sm:$0xff] }
 0xd03   : > { %v2113_v37 = vadd.f32 %v2111_v29, %v2103_v28  ;;  %v2114_v54 = vadd.f32 %v2112_v26, %v2104_v35  ;;  %v3289_v28 = vld [vmem:[%s4579_s1 + $0x18] sm:$0xff]   ;;  %v3290_v29 = vld [vmem:[%s4579_s1 + $0x10] sm:$0xff]   ;;  %v3291_v35 = vld [vmem:[%s4579_s1 + $0x8] sm:$0xff]  }
 0xd05   : > { %v2123_v40 = vadd.f32 %v2121_v38, %v2113_v37  ;;  %v2124_v41 = vadd.f32 %v2122_v36, %v2114_v54  ;;  %v3292_v36 = vld [vmem:[%s4579_s1] sm:$0xff]   ;;  %v2856_v37 = vld [vmem:[#allocation25] ss:$0 sm:$0xff] }
 0xd07   : > { %v2132_v43 = vadd.f32 %v2847_v39, %v2123_v40  ;;  %v2133_v44 = vadd.f32 %v2847_v39, %v2124_v41 }
 0xd09   : > { %v2848_v47 = vmul.f32 -1.442695, %v2132_v43  ;;  %v2849_v49 = vmul.f32 -1.442695, %v2133_v44 }
 0xd0b   : > { %3305 = vpow2.f32 %v2848_v47 }
 0xd0c   : > { %3307 = vpow2.f32 %v2849_v49 }
 0xd18   : > { %v3306_v42 = vpop.eup %3305 }
 0xd19   : > { %v3308_v7 = vpop.eup %3307  ;;  %v2140_v23 = vadd.f32 1.0, %v3306_v42 }
 0xd1a   : > { %v2141_v51 = vadd.f32 1.0, %v3308_v7 }
 0xd1b   : > { %3309 = vrcp.f32 %v2140_v23 }
 0xd1c   : > { %3311 = vrcp.f32 %v2141_v51 }
 0xd28   : > { %v3310_v52 = vpop.eup %3309 }
 0xd29   : > { %v3312_v30 = vpop.eup %3311  ;;  %v2146_v32 = vmul.f32 %v3310_v52, %v2132_v43 }
 0xd2a   : > { %v2147_v33 = vmul.f32 %v3312_v30, %v2133_v44 }
 0xd2c   : > { %v2148_v53 = vpack.c.bf16 %v2147_v33, %v2146_v32  ;;  %v2862_v33 = vld [vmem:[#allocation26] ss:$0 sm:$0xff] }
 0xd2e   : > { %2974 = vmatmul.mubr.msk.bf16.vlgmr.msra.gmra.mxu1 %vm1218_vm0, %v2148_v53 }
 0xd2f   : > { %2993 = vmatprep.mubr.msk.bf16.mxu1 %vm3920_vm2, %v3919_v15  ;;  %2986 = vmatpush3.bf16.msra.mxu1 %v3289_v28 }
 0xd30   : > { %2987 = vmatprep.subr.bf16.mxu1 %v3919_v15 }
 0xd33   : > { %2988 = vmatpush3.bf16.msra.mxu1 %v3290_v29 }
 0xd34   : > { %2989 = vmatprep.subr.bf16.mxu1 %v3919_v15 }
 0xd37   : > { %2990 = vmatpush3.bf16.msra.mxu1 %v3291_v35 }
 0xd38   : > { %2991 = vmatprep.subr.bf16.mxu1 %v3919_v15 }
 0xd3b   : > { %2992 = vmatpush3.bf16.msra.mxu1 %v3292_v36 }
 0xdee   : > { %v2202_v55 = vpop.f32.mrf.mxu1 }
 0xdef   : > { %v2209_v56 = vadd.f32 %v2202_v55, %v4407_v63 }
 0xdf0   : > { %v2975_v57 = vpop.f32.mrf.mxu1 }
 0xdf1   : > { %v4472_v58 = vadd.f32 %v2853_v48, %v2209_v56 }
 0xdf2   : > { %v2205_v59 = vpop.f32.mrf.mxu1 }
 0xdf3   : > { %v2210_v45 = vadd.f32 %v2205_v59, %v4409_v5  ;;  %v2222_v60 = vsel %vm1218_vm0, %v4472_v58, 0.0 }
 0xdf4   : > { %2223 = vadd.xlane.f32.xlu1 %v2222_v60  ;;  %v2976_v61 = vpop.f32.mrf.mxu1 }
 0xdf5   : > { %v4477_v62 = vadd.f32 %v2853_v48, %v2210_v45 }
 0xdf7   : > { %v2225_v2 = vsel %vm1222_vm1, %v4477_v62, 0.0 }
 0xdf8   : > { %2226 = vadd.xlane.f32.xlu0 %v2225_v2 }
 0xe7d   : > { %v2224_v63 = vpop.xlane.xlu1 %2223 }
 0xe7e   : > { %v2228_v3 = vmul.f32 0.03125, %v2224_v63 }
 0xe80   : > { %v2230_v4 = vsub.f32 %v4472_v58, %v2228_v3 }
 0xe81   : > { %v2227_v46 = vpop.xlane.xlu0 %2226 }
 0xe82   : > { %v2229_v6 = vmul.f32 0.03125, %v2227_v46  ;;  %v2232_v5 = vmul.f32 %v2230_v4, %v2230_v4 }
 0xe84   : > { %v2231_v8 = vsub.f32 %v4477_v62, %v2229_v6  ;;  %v2234_v9 = vsel %vm1218_vm0, %v2232_v5, 0.0 }
 0xe85   : > { %2235 = vadd.xlane.f32.xlu0 %v2234_v9 }
 0xe86   : > { %v2233_v10 = vmul.f32 %v2231_v8, %v2231_v8 }
 0xe88   : > { %v2237_v0 = vsel %vm1222_vm1, %v2233_v10, 0.0 }
 0xe89   : > { %2238 = vadd.xlane.f32.xlu1 %v2237_v0 }
 0xf0e   : > { %v2236_v12 = vpop.xlane.xlu0 %2235 }
 0xf0f   : > { %v2240_v13 = vmul.f32 0.03125, %v2236_v12 }
 0xf11   : > { %v2242_v14 = vadd.f32 1e-05, %v2240_v13 }
 0xf12   : > { %v2239_v1 = vpop.xlane.xlu1 %2238 }
 0xf13   : > { %3313 = vrsqrt.f32 %v2242_v14  ;;  %v2241_v16 = vmul.f32 0.03125, %v2239_v1 }
 0xf15   : > { %v2243_v17 = vadd.f32 1e-05, %v2241_v16 }
 0xf17   : > { %3315 = vrsqrt.f32 %v2243_v17  ;;  %v2868_v17 = vld [vmem:[#allocation28] ss:$0 sm:$0xff] }
 0xf20   : > { %v3314_v34 = vpop.eup %3313 }
 0xf21   : > { %v2246_v18 = vmul.f32 %v3314_v34, %v2230_v4 }
 0xf23   : > { %v2254_v22 = vmul.f32 %v2854_v19, %v2246_v18  ;;  %v2869_v18 = vld [vmem:[#allocation29] ss:$0 sm:$0xff] }
 0xf24   : > { %v3316_v20 = vpop.eup %3315 }
 0xf25   : > { %v2247_v21 = vmul.f32 %v3316_v20, %v2231_v8  ;;  %v2262_v31 = vadd.f32 %v2855_v24, %v2254_v22 }
 0xf27   : > { %v2255_v25 = vmul.f32 %v2854_v19, %v2247_v21 }
 0xf29   : > { %v2263_v26 = vadd.f32 %v2855_v24, %v2255_v25 }
 0xf2b   : > { %v2264_v27 = vpack.c.bf16 %v2263_v26, %v2262_v31 }
 0xf2d   : > { %2982 = vmatmul.mubr.msk.bf16.vlgmr.msra.gmra.mxu0 %vm1218_vm0, %v2264_v27 }
 0xfed   : > { %v2325_v38 = vpop.f32.mrf.mxu0 }
 0xfee   : > { %v2326_v54 = vadd.f32 %v2856_v37, %v2325_v38 }
 0xfef   : > { %v2983_v39 = vpop.f32.mrf.mxu0 }
 0xff0   : > { %v2860_v40 = vmul.f32 -1.442695, %v2326_v54 }
 0xff1   : > { %v2328_v41 = vpop.f32.mrf.mxu0 }
 0xff2   : > { %3317 = vpow2.f32 %v2860_v40  ;;  %v2329_v43 = vadd.f32 %v2856_v37, %v2328_v41 }
 0xff3   : > { %v2984_v44 = vpop.f32.mrf.mxu0 }
 0xff4   : > { %v2861_v47 = vmul.f32 -1.442695, %v2329_v43 }
 0xff6   : > { %3319 = vpow2.f32 %v2861_v47 }
 0xfff   : > { %v3318_v49 = vpop.eup %3317 }
0x1000   : > { %v2338_v42 = vadd.f32 1.0, %v3318_v49 }
0x1002   : > { %3321 = vrcp.f32 %v2338_v42 }
0x1003   : > { %v3320_v7 = vpop.eup %3319 }
0x1004   : > { %v2339_v23 = vadd.f32 1.0, %v3320_v7 }
0x1006   : > { %3323 = vrcp.f32 %v2339_v23 }
0x100f   : > { %v3322_v15 = vpop.eup %3321 }
0x1010   : > { %v2344_v52 = vmul.f32 %v3322_v15, %v2326_v54 }
0x1013   : > { %v3324_v51 = vpop.eup %3323 }
0x1014   : > { %v2345_v30 = vmul.f32 %v3324_v51, %v2329_v43 }
0x1016   : > { %v2346_v32 = vpack.c.bf16 %v2345_v30, %v2344_v52 }
0x1018   : > { %2994 = vmatmul.mubr.msk.bf16.vlgmr.msra.gmra.mxu1 %vm1385_vm3, %v2346_v32 }
0x10d8   : > { %v2423_v53 = vpop.f32.mrf.mxu1 }
0x10d9   : > { %v2424_v55 = vadd.f32 %v2862_v33, %v2423_v53 }
0x10da   : > { %v2995_v48 = vpop.f32.mrf.mxu1 }
0x10db   : > { %v2430_v56 = vmul.f32 0.5, %v2424_v55 }
0x10dc   : > { %v2426_v57 = vpop.f32.mrf.mxu1 }
0x10dd   : > { %v2427_v59 = vadd.f32 %v2862_v33, %v2426_v57  ;;  %v2432_v45 = vadd.f32 %v2430_v56, %v4472_v58 }
0x10de   : > { %v2996_v60 = vpop.f32.mrf.mxu1 }
0x10df   : > { %v2431_v61 = vmul.f32 0.5, %v2427_v59  ;;  %v2436_v2 = vsel %vm1218_vm0, %v2432_v45, 0.0 }
0x10e0   : > { %2437 = vadd.xlane.f32.xlu0 %v2436_v2 }
0x10e1   : > { %v2433_v63 = vadd.f32 %v2431_v61, %v4477_v62 }
0x10e3   : > { %v2439_v3 = vsel %vm1222_vm1, %v2433_v63, 0.0 }
0x10e4   : > { %2440 = vadd.xlane.f32.xlu1 %v2439_v3 }
0x1169   : > { %v2438_v4 = vpop.xlane.xlu0 %2437 }
0x116a   : > { %v2442_v46 = vmul.f32 0.03125, %v2438_v4 }
0x116c   : > { %v2444_v6 = vsub.f32 %v2432_v45, %v2442_v46 }
0x116d   : > { %v2441_v5 = vpop.xlane.xlu1 %2440 }
0x116e   : > { %v2443_v8 = vmul.f32 0.03125, %v2441_v5  ;;  %v2446_v9 = vmul.f32 %v2444_v6, %v2444_v6 }
0x1170   : > { %v2445_v10 = vsub.f32 %v2433_v63, %v2443_v8  ;;  %v2448_v0 = vsel %vm1218_vm0, %v2446_v9, 0.0 }
0x1171   : > { %2449 = vadd.xlane.f32.xlu0 %v2448_v0 }
0x1172   : > { %v2447_v58 = vmul.f32 %v2445_v10, %v2445_v10 }
0x1174   : > { %v2451_v11 = vsel %vm1222_vm1, %v2447_v58, 0.0 }
0x1175   : > { %2452 = vadd.xlane.f32.xlu1 %v2451_v11 }
0x11fa   : > { %v2450_v50 = vpop.xlane.xlu0 %2449 }
0x11fb   : > { %v2454_v62 = vmul.f32 0.03125, %v2450_v50 }
0x11fd   : > { %v2456_v12 = vadd.f32 1e-05, %v2454_v62 }
0x11fe   : > { %v2453_v13 = vpop.xlane.xlu1 %2452 }
0x11ff   : > { %3325 = vrsqrt.f32 %v2456_v12  ;;  %v2455_v14 = vmul.f32 0.03125, %v2453_v13 }
0x1201   : > { %v2457_v1 = vadd.f32 1e-05, %v2455_v14 }
0x1203   : > { %3327 = vrsqrt.f32 %v2457_v1 }
0x120c   : > { %v3326_v16 = vpop.eup %3325 }
0x120d   : > { %v2460_v34 = vmul.f32 %v3326_v16, %v2444_v6 }
0x120f   : > { %v2468_v19 = vmul.f32 %v2868_v17, %v2460_v34 }
0x1210   : > { %v3328_v20 = vpop.eup %3327 }
0x1211   : > { %v2476_v21 = vadd.f32 %v2869_v18, %v2468_v19  ;;  %v2461_v22 = vmul.f32 %v3328_v20, %v2445_v10 }
0x1213   : > { %2478 = vst.msk [vmem:[%s4286_s26] sm:$0xff] %vm1218_vm0, %v2476_v21  ;;  %v2469_v24 = vmul.f32 %v2868_v17, %v2461_v22 }
0x1215   : > { %v2477_v25 = vadd.f32 %v2869_v18, %v2469_v24 }
0x1217   : > { %2479 = vst.msk [vmem:[%s4286_s26 + $0x8] sm:$0x1f] %vm1222_vm1, %v2477_v25 }
0x1218 PF: > { %s85_s28 = sadd.s32 1, %s3855_s28  }
0x1219   : > { %p82_p12 = scmp.ge.s32.totalorder %s85_s28, 4  }
0x121b   :  { %84 = sbr.rel (!%p82_p12) target bundleno = 62 (0x3e), region = 307 }
0x1220   :  { %2501 = vsyncpa [#allocation4], 1 }
0x1221   :  { %2503 = vsyncpa [#allocation4 + $0x1], 1 }
0x1222   :  { %2504 = vsyncpa [#allocation6], 1 }
0x1223   :  { %2505 = vsyncpa [#allocation9], 1 }
0x1224   :  { %2506 = vsyncpa [#allocation12], 1 }
0x1225   :  { %2507 = vsyncpa [#allocation15], 1 }
0x1226   :  { %2508 = vsyncpa [#allocation18], 1 }
0x1227   :  { %2509 = vsyncpa [#allocation21], 1 }
0x1228   :  { %2510 = vsyncpa [#allocation24], 1 }
0x1229   :  { %2511 = vsyncpa [#allocation27], 1 }
0x122a   :  { %2512 = vsyncpa [#allocation30], 1 }

// kernel: conformer_forward.10
= control target key start
LH: loop header
LB: loop body
LE: loop exit
PB: predicated region body
PF: predicated region fallthrough
CT: control target
= control target key end

     0   :  { %s3184_s6 = smov 1   ;;  %s3185_s10 = smov 2   ;;  %s3746_s0 = inlined_call_operand.smem [shape: u32[33], index: -1, kind: input, shape index: {}] }
   0x1   :  { %s3239_s5 = sld [smem:[%s3746_s0]]   ;;  %s3186_s14 = smov 3  }
   0x2   :  { %s3244_s9 = sld [smem:[%s3746_s0 + %s3184_s6]]   ;;  %s3187_s18 = smov 4  }
   0x3   :  { %s3249_s13 = sld [smem:[%s3746_s0 + %s3185_s10]]   ;;  %s3188_s22 = smov 5  }
   0x4   :  { %s3254_s17 = sld [smem:[%s3746_s0 + %s3186_s14]]   ;;  %s3189_s26 = smov 6  }
   0x5   :  { %s3259_s21 = sld [smem:[%s3746_s0 + %s3187_s18]]   ;;  %s3190_s30 = smov 7  }
   0x6   :  { %s3264_s25 = sld [smem:[%s3746_s0 + %s3188_s22]]   ;;  %s3191_s4 = smov 8  }
   0x7   :  { %s3269_s29 = sld [smem:[%s3746_s0 + %s3189_s26]]   ;;  %s3192_s10 = smov 9  }
   0x8   :  { %3754 = sst [smem:[#allocation18_spill]] %s3244_s9  ;;  %s3193_s15 = smov 10  }
   0x9   :  { %s3274_s3 = sld [smem:[%s3746_s0 + %s3190_s30]]   ;;  %s3194_s20 = smov 11  }
   0xa   :  { %s3279_s8 = sld [smem:[%s3746_s0 + %s3191_s4]]   ;;  %s3195_s26 = smov 12  }
   0xb   :  { %s3284_s14 = sld [smem:[%s3746_s0 + %s3192_s10]]   ;;  %s3196_s1 = smov 13  }
   0xc   :  { %s3289_s19 = sld [smem:[%s3746_s0 + %s3193_s15]]   ;;  %s3197_s7 = smov 14  }
   0xd   :  { %s3294_s24 = sld [smem:[%s3746_s0 + %s3194_s20]]   ;;  %s3198_s15 = smov 15  }
   0xe   :  { %s3299_s30 = sld [smem:[%s3746_s0 + %s3195_s26]]   ;;  %s3199_s22 = smov 16  }
   0xf   :  { %s3304_s6 = sld [smem:[%s3746_s0 + %s3196_s1]]   ;;  %s3200_s28 = smov 17  }
  0x10   :  { %s3309_s12 = sld [smem:[%s3746_s0 + %s3197_s7]]   ;;  %s3201_s7 = smov 18  }
  0x11   :  { %s3314_s20 = sld [smem:[%s3746_s0 + %s3198_s15]]   ;;  %s3202_s15 = smov 19  }
  0x12   :  { %s3319_s27 = sld [smem:[%s3746_s0 + %s3199_s22]]   ;;  %s3203_s22 = smov 20  }
  0x13   :  { %3755 = sst [smem:[#allocation19_spill]] %s3294_s24 }
  0x14   :  { %3756 = sst [smem:[#allocation20_spill]] %s3299_s30 }
  0x15   :  { %3757 = sst [smem:[#allocation21_spill]] %s3304_s6 }
  0x16   :  { %3758 = sst [smem:[#allocation22_spill]] %s3309_s12 }
  0x17   :  { %3759 = sst [smem:[#allocation23_spill]] %s3314_s20 }
  0x18   :  { %3760 = sst [smem:[#allocation24_spill]] %s3319_s27 }
  0x19   :  { %s3324_s4 = sld [smem:[%s3746_s0 + %s3200_s28]]   ;;  %s3204_s28 = smov 21  }
  0x1a   :  { %s3329_s12 = sld [smem:[%s3746_s0 + %s3201_s7]]   ;;  %s3205_s7 = smov 22  }
  0x1b   :  { %s3334_s20 = sld [smem:[%s3746_s0 + %s3202_s15]]   ;;  %s3206_s15 = smov 23  }
  0x1c   :  { %s3339_s27 = sld [smem:[%s3746_s0 + %s3203_s22]]   ;;  %s3207_s22 = smov 24  }
  0x1f   :  { %3761 = sst [smem:[#allocation25_spill]] %s3324_s4 }
  0x20   :  { %3762 = sst [smem:[#allocation26_spill]] %s3329_s12 }
  0x21   :  { %3763 = sst [smem:[#allocation27_spill]] %s3334_s20 }
  0x22   :  { %3764 = sst [smem:[#allocation28_spill]] %s3339_s27 }
  0x23   :  { %s3344_s4 = sld [smem:[%s3746_s0 + %s3204_s28]]   ;;  %s3208_s28 = smov 25  }
  0x24   :  { %s3349_s12 = sld [smem:[%s3746_s0 + %s3205_s7]]   ;;  %s3209_s7 = smov 26  }
  0x25   :  { %s3354_s20 = sld [smem:[%s3746_s0 + %s3206_s15]]   ;;  %s3210_s15 = smov 27  }
  0x26   :  { %s3359_s27 = sld [smem:[%s3746_s0 + %s3207_s22]]   ;;  %s3211_s22 = smov 28  }
  0x27   :  { %s3374_s6 = sld [smem:[%s3746_s0 + %s3210_s15]]   ;;  %s3214_s15 = smov 31  }
  0x28   :  { %s3379_s30 = sld [smem:[%s3746_s0 + %s3211_s22]]   ;;  %s3215_s22 = smov 32  }
  0x29   :  { %3765 = sst [smem:[#allocation29_spill]] %s3344_s4 }
  0x2a   :  { %3766 = sst [smem:[#allocation30_spill]] %s3349_s12 }
  0x2b   :  { %s3364_s4 = sld [smem:[%s3746_s0 + %s3208_s28]]   ;;  %s3212_s28 = smov 29  }
  0x2c   :  { %s3369_s12 = sld [smem:[%s3746_s0 + %s3209_s7]]   ;;  %s3213_s7 = smov 30  }
  0x2d   :  { %s3384_s24 = sld [smem:[%s3746_s0 + %s3212_s28]]  }
  0x2e   :  { %3768 = sst [smem:[#allocation32_spill]] %s3379_s30 }
  0x2f   :  { %s3394_s9 = sld [smem:[%s3746_s0 + %s3214_s15]]  }
  0x30   :  { %s3399_s30 = sld [smem:[%s3746_s0 + %s3215_s22]]  }
  0x32   :  { %3767 = sst [smem:[#allocation31_spill]] %s3369_s12 }
  0x33   :  { %s3389_s12 = sld [smem:[%s3746_s0 + %s3213_s7]]  }
  0x34   :  { %70 = vsyncpa [#allocation4], 0 }
  0x35   :  { %71 = vsyncpa [#allocation6], 0 }
  0x36   :  { %72 = vsyncpa [#allocation9], 0 }
  0x37   :  { %73 = vsyncpa [#allocation12], 0  ;;  %s3401_s28 = smov 0  }
  0x38 LB: > { %s3216_s1 = smov [#allocation5]   ;;  %s3407_s7 = sadd.s32 4294967295, %s3170_s28   ;;  %s3170_s28 = sphi %s3401_s28, %s79_s28  }
  0x39   : > { %s877_s2 = sshll.u32 %s3216_s1, 4  ;;  %p2520_p0 = scmp.ge.s32.totalorder %s3170_s28, 1  ;;  %s878_s2 = int_to_ptr.vmem [resolvable:$true] %s877_s2 }
  0x3a   : > { %p787_p1 = scmp.lt.s32.totalorder %s3170_s28, 3  ;;  %p3752_p2 = scmp.eq.s32.totalorder %s3407_s7, 0 }
  0x3b   : > { %s3217_s10 = smov [#allocation8]   ;;  %s3218_s15 = smov [#allocation11]  }
  0x3c   : > { %p3412_p3 = pnand %p2520_p0, %p787_p1  ;;  %s902_s11 = sshll.u32 %s3217_s10, 4  ;;  %s3418_s11 = int_to_ptr.vmem [resolvable:$true] %s902_s11 }
  0x3d   : > { %s927_s16 = sshll.u32 %s3218_s15, 4  ;;  %s3219_s22 = smov [#allocation3]   ;;  %s3426_s16 = int_to_ptr.vmem [resolvable:$true] %s927_s16 }
  0x3e   : > { %s3769_s0 = scalar_select %p3412_p3, 1, 0 }
  0x3f   : > { %p2760_p4 = pneg %p3412_p3  ;;  %s866_s23 = sshll.u32 %s3219_s22, 4  ;;  %s3428_s23 = int_to_ptr.vmem [resolvable:$true] %s866_s23 }
  0x40   : > { %s2965_s1 = scalar_lea.vmem %s878_s2, 16  ;;  %s2972_s10 = scalar_lea.vmem %s878_s2, 32 }
  0x41   : > { %p3422_p5 = pnand %p3752_p2, %p2760_p4  ;;  %p2966_p7 = scmp.ne.s32.totalorder %s878_s2, %s2965_s1 }
  0x42   : > { %p2973_p10 = scmp.lt.s32.totalorder %s878_s2, %s878_s2  ;;  %p2974_p11 = scmp.lt.s32.totalorder %s2972_s10, %s2965_s1 }
  0x43   : > { %p3432_p6 = pneg %p3422_p5 }
  0x44   : > { %p2975_p12 = por %p2974_p11, %p2973_p10 }
  0x45   : > { %p2968_p8 = pnand %p2966_p7, %p3432_p6 }
  0x47   : > { %p2969_p9 = pneg %p2968_p8 }
  0x49   : > { %p2976_p13 = pnand %p2975_p12, %p2969_p9 }
  0x4b   : > { %2979 = shalt.err (!%p2976_p13)
}
  0x4c   : > { %2766 = dma.hbm_to_vmem [thread:$0]  (!%p3422_p5), %s3359_s27, 16, %s878_s2, [#allocation6]  }
  0x4d   : > { %s2991_s15 = scalar_lea.vmem %s3418_s11, 16  ;;  %s2998_s22 = scalar_lea.vmem %s3418_s11, 32 }
  0x4e   : > { %p2992_p0 = scmp.ne.s32.totalorder %s3418_s11, %s2991_s15  ;;  %p2999_p7 = scmp.lt.s32.totalorder %s3418_s11, %s3418_s11 }
  0x4f   : > { %p3000_p8 = scmp.lt.s32.totalorder %s2998_s22, %s2991_s15 }
  0x50   : > { %p2994_p1 = pnand %p2992_p0, %p3432_p6 }
  0x51   : > { %p3001_p9 = por %p3000_p8, %p2999_p7 }
  0x52   : > { %p2995_p4 = pneg %p2994_p1 }
  0x54   : > { %p3002_p10 = pnand %p3001_p9, %p2995_p4 }
  0x56   : > { %3005 = shalt.err (!%p3002_p10)
}
  0x57   : > { %2772 = dma.hbm_to_vmem [thread:$0]  (!%p3422_p5), %s3374_s6, 16, %s3418_s11, [#allocation9]  }
  0x58   : > { %s3017_s2 = scalar_lea.vmem %s3426_s16, 16  ;;  %s3024_s1 = scalar_lea.vmem %s3426_s16, 32 }
  0x59   : > { %p3018_p11 = scmp.ne.s32.totalorder %s3426_s16, %s3017_s2  ;;  %p3025_p0 = scmp.lt.s32.totalorder %s3426_s16, %s3426_s16 }
  0x5a   : > { %p3026_p1 = scmp.lt.s32.totalorder %s3024_s1, %s3017_s2 }
  0x5b   : > { %p3020_p12 = pnand %p3018_p11, %p3432_p6 }
  0x5c   : > { %p3027_p4 = por %p3026_p1, %p3025_p0 }
  0x5d   : > { %p3021_p13 = pneg %p3020_p12 }
  0x5f   : > { %p3028_p7 = pnand %p3027_p4, %p3021_p13 }
  0x61   : > { %3031 = shalt.err (!%p3028_p7)
}
  0x62   : > { %2778 = dma.hbm_to_vmem [thread:$0]  (!%p3422_p5), %s3389_s12, 16, %s3426_s16, [#allocation12]  }
  0x63   : > { %s3043_s11 = scalar_lea.vmem %s3428_s23, 16  ;;  %s3050_s10 = scalar_lea.vmem %s3428_s23, 32 }
  0x64   : > { %p3044_p8 = scmp.ne.s32.totalorder %s3428_s23, %s3043_s11  ;;  %p3051_p11 = scmp.lt.s32.totalorder %s3428_s23, %s3428_s23 }
  0x65   : > { %p3052_p12 = scmp.lt.s32.totalorder %s3050_s10, %s3043_s11 }
  0x66   : > { %p3046_p9 = pnand %p3044_p8, %p3432_p6 }
  0x67   : > { %p3053_p13 = por %p3052_p12, %p3051_p11 }
  0x68   : > { %p3047_p10 = pneg %p3046_p9 }
  0x6a   : > { %p3054_p0 = pnand %p3053_p13, %p3047_p10 }
  0x6c   : > { %3057 = shalt.err (!%p3054_p0)
}
  0x6d   : > { %2763 = dma.hbm_to_vmem [thread:$0]  (!%p3422_p5), %s3354_s20, 16, %s3428_s23, [#allocation4]  }
  0x6e   : > { %s3220_s15 = smov [#allocation7]   ;;  %s3221_s22 = smov [#allocation10]  }
  0x6f   : > { %s888_s16 = sshll.u32 %s3220_s15, 4  ;;  %s916_s2 = sshll.u32 %s3221_s22, 4  ;;  %s889_s16 = int_to_ptr.vmem [resolvable:$true] %s888_s16  ;;  %s917_s2 = int_to_ptr.vmem [resolvable:$true] %s916_s2 }
  0x70   : > { %s3069_s1 = scalar_lea.vmem %s889_s16, 16  ;;  %s3076_s11 = scalar_lea.vmem %s889_s16, 32 }
  0x71   : > { %p3070_p1 = scmp.ne.s32.totalorder %s889_s16, %s3069_s1  ;;  %p3077_p8 = scmp.lt.s32.totalorder %s889_s16, %s889_s16 }
  0x72   : > { %p3078_p9 = scmp.lt.s32.totalorder %s3076_s11, %s3069_s1 }
  0x73   : > { %p3072_p4 = pnand %p3070_p1, %p3432_p6 }
  0x74   : > { %p3079_p10 = por %p3078_p9, %p3077_p8 }
  0x75   : > { %p3073_p7 = pneg %p3072_p4 }
  0x77   : > { %p3080_p11 = pnand %p3079_p10, %p3073_p7 }
  0x79   : > { %3083 = shalt.err (!%p3080_p11)
}
  0x7a   : > { %2769 = dma.hbm_to_vmem [thread:$0]  (!%p3422_p5), %s3364_s4, 16, %s889_s16, [#allocation6]  }
  0x7b   : > { %s3095_s23 = scalar_lea.vmem %s917_s2, 16  ;;  %s3102_s10 = scalar_lea.vmem %s917_s2, 32 }
  0x7c   : > { %p3096_p12 = scmp.ne.s32.totalorder %s917_s2, %s3095_s23  ;;  %p3103_p1 = scmp.lt.s32.totalorder %s917_s2, %s917_s2 }
  0x7d   : > { %p3104_p4 = scmp.lt.s32.totalorder %s3102_s10, %s3095_s23 }
  0x7e   : > { %p3098_p13 = pnand %p3096_p12, %p3432_p6 }
  0x7f   : > { %p3105_p2 = por %p3104_p4, %p3103_p1 }
  0x80   : > { %p3099_p0 = pneg %p3098_p13 }
  0x82   : > { %p3106_p3 = pnand %p3105_p2, %p3099_p0 }
  0x84   : > { %3109 = shalt.err (!%p3106_p3)
}
  0x85   : > { %2775 = dma.hbm_to_vmem [thread:$0]  (!%p3422_p5), %s3384_s24, 16, %s917_s2, [#allocation9]  }
  0x86   : > { %s3222_s15 = smov [#allocation13]  }
  0x87   : > { %s938_s22 = sshll.u32 %s3222_s15, 4  ;;  %s939_s22 = int_to_ptr.vmem [resolvable:$true] %s938_s22 }
  0x88   : > { %s3121_s16 = scalar_lea.vmem %s939_s22, 16  ;;  %s3128_s1 = scalar_lea.vmem %s939_s22, 32 }
  0x89   : > { %p3122_p7 = scmp.ne.s32.totalorder %s939_s22, %s3121_s16  ;;  %p3129_p10 = scmp.lt.s32.totalorder %s939_s22, %s939_s22 }
  0x8a   : > { %p3130_p11 = scmp.lt.s32.totalorder %s3128_s1, %s3121_s16 }
  0x8b   : > { %p3124_p8 = pnand %p3122_p7, %p3432_p6 }
  0x8c   : > { %p3131_p12 = por %p3130_p11, %p3129_p10 }
  0x8d   : > { %p3125_p9 = pneg %p3124_p8 }
  0x8f   : > { %p3132_p13 = pnand %p3131_p12, %p3125_p9 }
  0x91   : > { %3135 = shalt.err (!%p3132_p13)
}
  0x92   : > { %2781 = dma.hbm_to_vmem [thread:$0]  (!%p3422_p5), %s3394_s9, 16, %s939_s22, [#allocation12]  }
  0x93   : > { %p3772_p2 = scmp.ne.s32.totalorder %s3769_s0, 0 }
  0x94   : > { %p3773_p3 = scmp.eq.s32.totalorder (!%p3772_p2), %s3407_s7, 0 }
  0x95   : > { %959 = sbr.rel (%p3772_p2) target bundleno = 4473 (0x1179), region = 148 }
  0x9a   : > { %3153 = dma.done.wait (%p3773_p3), [#allocation4], 16   ;;  %p3774_p0 = pmov %p3773_p3 }
  0x9c   : > { %3155 = vsyncadd (%p3774_p0), [#allocation4], 4294967280  ;;  %p3775_p6 = pmov %p3774_p0 }
  0x9d   : > { %p3776_p1 = pmov %p3774_p0 }
  0x9e   : > { %3157 = dma.done.wait (%p3775_p6), [#allocation6], 32  }
  0x9f   : > { %3159 = vsyncadd (%p3776_p1), [#allocation6], 4294967264  ;;  %p3777_p4 = pmov %p3774_p0 }
  0xa0   : > { %p3778_p5 = pmov %p3774_p0 }
  0xa1   : > { %3161 = dma.done.wait (%p3777_p4), [#allocation9], 32  }
  0xa2   : > { %3163 = vsyncadd (%p3778_p5), [#allocation9], 4294967264  ;;  %p3779_p7 = pmov %p3774_p0 }
  0xa3   : > { %p3780_p8 = pmov %p3774_p0 }
  0xa4   : > { %3165 = dma.done.wait (%p3779_p7), [#allocation12], 32  }
  0xa5   : > { %3167 = vsyncadd (%p3780_p8), [#allocation12], 4294967264  ;;  %p1065_p9 = scmp.lt.s32.totalorder %s3407_s7, 1  ;;  %vm1080_vm0 = vcmask 261120   ;;  %vm1084_vm1 = vcmask 258048   ;;  %v2875_v14 = vld [vmem:[%s3259_s21 + $0x8] sm:$0xff]  }
  0xa6   : > { %v3223_v15 = vmov 0.0   ;;  %vm3224_vm2 = vmmov 0   ;;  %v2876_v16 = vld [vmem:[%s3259_s21] sm:$0xff]   ;;  %v2877_v34 = vld [vmem:[%s3269_s29 + $0x18] sm:$0xff]   ;;  %v2878_v35 = vld [vmem:[%s3269_s29 + $0x10] sm:$0xff]   ;;  %vm1247_vm3 = vcmask 523264  }
  0xa7   : > { %s3799_s7 = smov (!%p1065_p9, %s3407_s7), 1  ;;  %2644 = vmatprep.subr.bf16.mxu0 %v3223_v15  ;;  %2648 = vmatprep.mubr.msk.bf16.mxu0 %vm3224_vm2, %v3223_v15  ;;  %v2541_v25 = vld [vmem:[%s3249_s13] ss:$0 sm:$0xff]  ;;  %v2879_v36 = vld [vmem:[%s3269_s29 + $0x8] sm:$0xff]  }
  0xa8   : > { %s2607_s0 = sshll.u32 %s3799_s7, 4  ;;  %2645 = vmatpush3.bf16.msra.mxu0 %v2875_v14  ;;  %2652 = vmatprep.subr.bf16.mxu1 %v3223_v15  ;;  %v2542_v29 = vld [vmem:[%s3254_s17] ss:$0 sm:$0xff]  ;;  %s3573_s7 = smov 0  }
  0xa9   : > { %s1069_s18 = scalar_lea.vmem %s3239_s5, %s2607_s0  ;;  %s3511_s26 = scalar_lea.vmem %s3399_s30, %s2607_s0  ;;  %2646 = vmatprep.subr.bf16.mxu0 %v3223_v15  ;;  %2660 = vmatprep.mubr.msk.bf16.mxu1 %vm3224_vm2, %v3223_v15  ;;  %v2880_v37 = vld [vmem:[%s3269_s29] sm:$0xff]  }
  0xaa   : > { %v3513_v0 = vld [vmem:[%s1069_s18] sm:$0xff]  ;;  %v3515_v1 = vld [vmem:[%s1069_s18 + $0x8] sm:$0x1f]  ;;  %2653 = vmatpush3.bf16.msra.mxu1 %v2877_v34  ;;  %v3571_v34 = vmov 0.0  }
  0xab   : > { %v1081_v2 = vsel %vm1080_vm0, %v3513_v0, 0.0  ;;  %v1085_v3 = vsel %vm1084_vm1, %v3515_v1, 0.0  ;;  %2654 = vmatprep.subr.bf16.mxu1 %v3223_v15  ;;  %v2543_v38 = vld [vmem:[%s3264_s25] ss:$0 sm:$0xff] }
  0xac   : > { %1082 = vadd.xlane.f32.xlu0 %v1081_v2  ;;  %2647 = vmatpush3.bf16.msra.mxu0 %v2876_v16  ;;  %v2549_v56 = vld [vmem:[%s3274_s3] ss:$0 sm:$0xff] }
  0xae   : > { %2655 = vmatpush3.bf16.msra.mxu1 %v2878_v35 }
  0xaf   : > { %2656 = vmatprep.subr.bf16.mxu1 %v3223_v15 }
  0xb0   : > { %1086 = vadd.xlane.f32.xlu0 %v1085_v3 }
  0xb2   : > { %2657 = vmatpush3.bf16.msra.mxu1 %v2879_v36 }
  0xb3   : > { %2658 = vmatprep.subr.bf16.mxu1 %v3223_v15 }
  0xb6   : > { %2659 = vmatpush3.bf16.msra.mxu1 %v2880_v37 }
 0x135   : > { %v1083_v4 = vpop.xlane.xlu0 %1082 }
 0x136   : > { %v1089_v5 = vmul.f32 0.03125, %v1083_v4 }
 0x138   : > { %v1091_v6 = vsub.f32 %v3513_v0, %v1089_v5 }
 0x139   : > { %v1087_v7 = vpop.xlane.xlu0 %1086 }
 0x13a   : > { %v1090_v8 = vmul.f32 0.03125, %v1087_v7  ;;  %v1093_v9 = vmul.f32 %v1091_v6, %v1091_v6 }
 0x13c   : > { %v1092_v10 = vsub.f32 %v3515_v1, %v1090_v8  ;;  %v1095_v11 = vsel %vm1080_vm0, %v1093_v9, 0.0 }
 0x13d   : > { %1096 = vadd.xlane.f32.xlu1 %v1095_v11 }
 0x13e   : > { %v1094_v12 = vmul.f32 %v1092_v10, %v1092_v10 }
 0x140   : > { %v1098_v13 = vsel %vm1084_vm1, %v1094_v12, 0.0 }
 0x141   : > { %1099 = vadd.xlane.f32.xlu1 %v1098_v13 }
 0x1c6   : > { %v1097_v17 = vpop.xlane.xlu1 %1096 }
 0x1c7   : > { %v1101_v18 = vmul.f32 0.03125, %v1097_v17 }
 0x1c9   : > { %v1103_v19 = vadd.f32 1e-05, %v1101_v18 }
 0x1ca   : > { %v1100_v20 = vpop.xlane.xlu1 %1099 }
 0x1cb   : > { %2881 = vrsqrt.f32 %v1103_v19  ;;  %v1102_v21 = vmul.f32 0.03125, %v1100_v20 }
 0x1cd   : > { %v1104_v22 = vadd.f32 1e-05, %v1102_v21 }
 0x1cf   : > { %2883 = vrsqrt.f32 %v1104_v22 }
 0x1d8   : > { %v2882_v23 = vpop.eup %2881 }
 0x1d9   : > { %v1107_v24 = vmul.f32 %v2882_v23, %v1091_v6 }
 0x1db   : > { %v1115_v28 = vmul.f32 %v2541_v25, %v1107_v24  ;;  %v2555_v24 = vld [vmem:[%s3279_s8] ss:$0 sm:$0xff] }
 0x1dc   : > { %v2884_v26 = vpop.eup %2883 }
 0x1dd   : > { %v1108_v27 = vmul.f32 %v2884_v26, %v1092_v10  ;;  %v1123_v31 = vadd.f32 %v2542_v29, %v1115_v28  ;;  %v2556_v28 = vld [vmem:[%s3284_s14] ss:$0 sm:$0xff] }
 0x1df   : > { %v1116_v30 = vmul.f32 %v2541_v25, %v1108_v27 }
 0x1e1   : > { %v1124_v32 = vadd.f32 %v2542_v29, %v1116_v30 }
 0x1e3   : > { %v1125_v33 = vpack.c.bf16 %v1124_v32, %v1123_v31 }
 0x1e5   : > { %2649 = vmatmul.mubr.msk.bf16.vlgmr.msra.gmra.mxu0 %vm1080_vm0, %v1125_v33  ;;  %v3569_v33 = vmov 0.0  }
 0x2a5   : > { %v1186_v39 = vpop.f32.mrf.mxu0 }
 0x2a6   : > { %v1187_v40 = vadd.f32 %v2543_v38, %v1186_v39 }
 0x2a7   : > { %v2650_v41 = vpop.f32.mrf.mxu0 }
 0x2a8   : > { %v2547_v42 = vmul.f32 -1.442695, %v1187_v40 }
 0x2a9   : > { %v1189_v43 = vpop.f32.mrf.mxu0 }
 0x2aa   : > { %2885 = vpow2.f32 %v2547_v42  ;;  %v1190_v44 = vadd.f32 %v2543_v38, %v1189_v43 }
 0x2ab   : > { %v2651_v45 = vpop.f32.mrf.mxu0 }
 0x2ac   : > { %v2548_v46 = vmul.f32 -1.442695, %v1190_v44 }
 0x2ae   : > { %2887 = vpow2.f32 %v2548_v46 }
 0x2b7   : > { %v2886_v47 = vpop.eup %2885 }
 0x2b8   : > { %v1199_v48 = vadd.f32 1.0, %v2886_v47 }
 0x2ba   : > { %2889 = vrcp.f32 %v1199_v48 }
 0x2bb   : > { %v2888_v49 = vpop.eup %2887 }
 0x2bc   : > { %v1200_v50 = vadd.f32 1.0, %v2888_v49 }
 0x2be   : > { %2891 = vrcp.f32 %v1200_v50 }
 0x2c7   : > { %v2890_v51 = vpop.eup %2889 }
 0x2c8   : > { %v1205_v53 = vmul.f32 %v2890_v51, %v1187_v40 }
 0x2cb   : > { %v2892_v52 = vpop.eup %2891 }
 0x2cc   : > { %v1206_v54 = vmul.f32 %v2892_v52, %v1190_v44 }
 0x2ce   : > { %v1207_v55 = vpack.c.bf16 %v1206_v54, %v1205_v53 }
 0x2d0   : > { %2661 = vmatmul.mubr.msk.bf16.vlgmr.msra.gmra.mxu1 %vm1247_vm3, %v1207_v55 }
 0x390   : > { %v1285_v57 = vpop.f32.mrf.mxu1 }
 0x391   : > { %v1286_v58 = vadd.f32 %v2549_v56, %v1285_v57 }
 0x392   : > { %v2662_v59 = vpop.f32.mrf.mxu1 }
 0x393   : > { %v1292_v60 = vmul.f32 0.5, %v1286_v58 }
 0x394   : > { %v1288_v61 = vpop.f32.mrf.mxu1 }
 0x395   : > { %v1289_v62 = vadd.f32 %v2549_v56, %v1288_v61  ;;  %v3548_v63 = vadd.f32 %v1292_v60, %v3513_v0 }
 0x396   : > { %v2663_v2 = vpop.f32.mrf.mxu1 }
 0x397   : > { %v1293_v3 = vmul.f32 0.5, %v1289_v62  ;;  %v1298_v4 = vsel %vm1080_vm0, %v3548_v63, 0.0 }
 0x398   : > { %1299 = vadd.xlane.f32.xlu0 %v1298_v4 }
 0x399   : > { %v3553_v5 = vadd.f32 %v1293_v3, %v3515_v1 }
 0x39b   : > { %v1301_v6 = vsel %vm1084_vm1, %v3553_v5, 0.0 }
 0x39c   : > { %1302 = vadd.xlane.f32.xlu1 %v1301_v6 }
 0x421   : > { %v1300_v7 = vpop.xlane.xlu0 %1299 }
 0x422   : > { %v1304_v8 = vmul.f32 0.03125, %v1300_v7 }
 0x424   : > { %v1306_v9 = vsub.f32 %v3548_v63, %v1304_v8 }
 0x425   : > { %v1303_v10 = vpop.xlane.xlu1 %1302 }
 0x426   : > { %v1305_v0 = vmul.f32 0.03125, %v1303_v10  ;;  %v1308_v11 = vmul.f32 %v1306_v9, %v1306_v9 }
 0x428   : > { %v1307_v12 = vsub.f32 %v3553_v5, %v1305_v0  ;;  %v1310_v13 = vsel %vm1080_vm0, %v1308_v11, 0.0 }
 0x429   : > { %1311 = vadd.xlane.f32.xlu0 %v1310_v13 }
 0x42a   : > { %v1309_v14 = vmul.f32 %v1307_v12, %v1307_v12 }
 0x42c   : > { %v1313_v1 = vsel %vm1084_vm1, %v1309_v14, 0.0 }
 0x42d   : > { %1314 = vadd.xlane.f32.xlu1 %v1313_v1 }
 0x4b2   : > { %v1312_v16 = vpop.xlane.xlu0 %1311 }
 0x4b3   : > { %v1316_v17 = vmul.f32 0.03125, %v1312_v16 }
 0x4b5   : > { %v1318_v18 = vadd.f32 1e-05, %v1316_v17 }
 0x4b6   : > { %v1315_v19 = vpop.xlane.xlu1 %1314 }
 0x4b7   : > { %2893 = vrsqrt.f32 %v1318_v18  ;;  %v1317_v20 = vmul.f32 0.03125, %v1315_v19 }
 0x4b9   : > { %v1319_v21 = vadd.f32 1e-05, %v1317_v20 }
 0x4bb   : > { %2895 = vrsqrt.f32 %v1319_v21 }
 0x4c4   : > { %v2894_v22 = vpop.eup %2893 }
 0x4c5   : > { %v1322_v23 = vmul.f32 %v2894_v22, %v1306_v9 }
 0x4c7   : > { %v1330_v26 = vmul.f32 %v2555_v24, %v1322_v23 }
 0x4c8   : > { %v2896_v25 = vpop.eup %2895 }
 0x4c9   : > { %v1323_v27 = vmul.f32 %v2896_v25, %v1307_v12  ;;  %v3563_v30 = vadd.f32 %v2556_v28, %v1330_v26 }
 0x4cb   : > { %v1331_v29 = vmul.f32 %v2555_v24, %v1323_v27 }
 0x4cd   : > { %v3565_v31 = vadd.f32 %v2556_v28, %v1331_v29 }
 0x4cf   : > { %v1340_v32 = vpack.c.bf16 %v3565_v31, %v3563_v30 }
 0x4d0 LB: >> { %v3225_v35 = vmov 0.0   ;;  %s3781_s2 = sld [smem:[#allocation18_spill]]  ;;  %vm3226_vm4 = vmmov 0   ;;  %s2609_s11 = sshll.u32 %s3182_s7, 4  ;;  %vm1453_vm5 = vcmask 64512   ;;  %vm1553_vm6 = vcmask 105472   ;;  %s3182_s7 = sphi %s3573_s7, %s1346_s7   ;;  %v3178_v34 = vphi %v3571_v34, %v3787_v34   ;;  %v3174_v33 = vphi %v3569_v33, %v3786_v33  }
 0x4d1   : >> { %2664 = vmatprep.subr.bf16.mxu0 %v3225_v35  ;;  %2668 = vmatprep.mubr.msk.bf16.mxu0 %vm3226_vm4, %v3225_v35  ;;  %s1351_s23 = scalar_lea.vmem %s3289_s19, %s2609_s11  ;;  %s3782_s10 = sld [smem:[#allocation19_spill]]  ;;  %vm1557_vm7 = vcmask 102400   ;;  %vm1583_vm8 = vcmask 1045504   ;;  %vm1584_vm9 = vcmask 1046528   ;;  %v3229_v22 = vmov 65535  }
 0x4d2   : >> { %2672 = vmatprep.subr.bf16.mxu1 %v3225_v35  ;;  %2674 = vmatprep.mubr.msk.bf16.mxu1 %vm3226_vm4, %v3225_v35  ;;  %v2897_v36 = vld [vmem:[%s1351_s23 + $0x8] sm:$0xff]   ;;  %v2898_v37 = vld [vmem:[%s1351_s23] sm:$0xff]   ;;  %s3783_s15 = sld [smem:[#allocation20_spill]]  ;;  %s2610_s16 = sshll.u32 %s3182_s7, 3  ;;  %v1585_v23 = vsel %vm1583_vm8, 4294967295, %v3229_v22  ;;  %vm1638_vm10 = vcmask 1043456  }
 0x4d3   : >> { %2665 = vmatpush3.bf16.msra.mxu0 %v2897_v36  ;;  %s3784_s22 = sld [smem:[#allocation21_spill]]  ;;  %s3228_s23 = smov 112   ;;  %v1586_v25 = vsel %vm1584_vm9, %v1585_v23, 0 }
 0x4d4   : >> { %2666 = vmatprep.subr.bf16.mxu0 %v3225_v35 }
 0x4d6   : >> { %s1445_s1 = scalar_lea.vmem %s3781_s2, %s2610_s16  ;;  %s3227_s2 = smov 120  }
 0x4d7   : >> { %2667 = vmatpush3.bf16.msra.mxu0 %v2898_v37  ;;  %v2899_v38 = vld [vmem:[%s1445_s1] sm:$0x7f]   ;;  %s1356_s0 = scalar_lea.vmem %s3782_s10, %s3182_s7  ;;  %s3785_s10 = sld [smem:[#allocation22_spill]] }
 0x4d8   : >> { %2678 = vmatprep.subr.bf16.mxu0 %v3225_v35  ;;  %v1458_v39 = vsel %vm1453_vm5, %v2899_v38, 0  ;;  %v2559_v40 = vld [vmem:[%s1356_s0] ss:$0 sm:$0xff]  ;;  %s1421_s18 = scalar_lea.vmem %s3783_s15, %s3182_s7  ;;  %s2571_s15 = sshll.u32 %s3182_s7, 2 }
 0x4d9   : >> { %2673 = vmatpush3.bf16.xpose.msra.mxu1 %v1458_v39  ;;  %s1432_s11 = scalar_lea.vmem %s3784_s22, %s3182_s7  ;;  %v2563_v44 = vld [vmem:[%s1421_s18] ss:$0 sm:$0xff]  ;;  %s1346_s7 = sadd.s32 1, %s3182_s7  }
 0x4da   : >> { %2669 = vmatmul.mubr.msk.bf16.vlgmr.msra.gmra.mxu0 %vm1080_vm0, %v1340_v32  ;;  %2684 = vmatprep.subr.bf16.mxu1 %v3225_v35  ;;  %v2564_v45 = vld [vmem:[%s1432_s11] ss:$0 sm:$0xff]  ;;  %p1343_p10 = scmp.ge.s32.totalorder %s1346_s7, 4  }
 0x4db   : >> { %2680 = vmatprep.mubr.msk.bf16.mxu0 %vm3226_vm4, %v3225_v35  ;;  %s3788_s16 = sld [smem:[#allocation23_spill]] (%p1343_p10)  ;;  %1831 = vst.msk [vmem:[#allocation2 + $0x10] sm:$0xff] (%p1343_p10), %vm1080_vm0, %v3223_v15  ;;  %1830 = vst.msk [vmem:[#allocation2] sm:$0xff] (%p1343_p10), %vm1080_vm0, %v3223_v15 }
 0x4dc   : > { %1832 = vst.msk [vmem:[#allocation2 + $0x18] sm:$0x1f] (%p1343_p10), %vm1084_vm1, %v3223_v15  ;;  %s3789_s7 = sld [smem:[#allocation26_spill]] (%p1343_p10) }
 0x4dd   : >> { %s1633_s22 = scalar_lea.vmem %s3785_s10, %s2571_s15  ;;  %s3790_s1 = sld [smem:[#allocation24_spill]] (%p1343_p10) }
 0x4de   : >> { %v1634_v38 = vld [vmem:[%s1633_s22] sm:$0xf]  ;;  %s3791_s0 = sld [smem:[#allocation25_spill]] (%p1343_p10) }
 0x4df   : >> { %v1640_v39 = vsel %vm1638_vm10, %v1634_v38, 0  ;;  %s3792_s18 = sld [smem:[#allocation27_spill]] (%p1343_p10) }
 0x4e0   : > { %s3793_s11 = sld [smem:[#allocation30_spill]] (%p1343_p10) }
 0x4e1   : > { %s3795_s10 = sld [smem:[#allocation29_spill]] (%p1343_p10) }
 0x4e2   : > { %s3796_s15 = sld [smem:[#allocation31_spill]] (%p1343_p10) }
 0x4e3   : > { %s3797_s22 = sld [smem:[#allocation32_spill]] (%p1343_p10) }
 0x4e6   : > { %v2911_v38 = vld [vmem:[%s3793_s11] sm:$0xff] (%p1343_p10)  }
 0x59a   : >> { %v1413_v41 = vpop.f32.mrf.mxu0 }
 0x59b   : >> { %v1414_v42 = vadd.f32 %v2559_v40, %v1413_v41 }
 0x59c   : >> { %v2670_v43 = vpop.f32.mrf.mxu0 }
 0x59d   : >> { %v1429_v48 = vadd.f32 %v2563_v44, %v1414_v42  ;;  %v1440_v50 = vadd.f32 %v2564_v45, %v1414_v42 }
 0x59e   : >> { %v1416_v46 = vpop.f32.mrf.mxu0 }
 0x59f   : >> { %v1417_v47 = vadd.f32 %v2559_v40, %v1416_v46 }
 0x5a0   : >> { %v2671_v49 = vpop.f32.mrf.mxu0 }
 0x5a1   : >> { %v1430_v51 = vadd.f32 %v2563_v44, %v1417_v47  ;;  %v1441_v52 = vadd.f32 %v2564_v45, %v1417_v47  ;;  %v1420_v53 = vpack.c.bf16 %v1417_v47, %v1414_v42 }
 0x5a3   : >> { %v1431_v54 = vpack.c.bf16 %v1430_v51, %v1429_v48  ;;  %v1442_v55 = vpack.c.bf16 %v1441_v52, %v1440_v50  ;;  %1502 = vrot.lane.b32.xlu0 %v1420_v53, %s3227_s2  ;;  %v2573_v52 = vld [vmem:[%s3788_s16] ss:$0 sm:$0xff] (%p1343_p10)  ;;  %s3794_s2 = sld [smem:[#allocation28_spill]] (%p1343_p10) }
 0x5a5   : >> { %2675 = vmatmul.mubr.msk.bf16.vlgmr.msra.gmra.mxu1 %vm1453_vm5, %v1442_v55 }
 0x5a6   : >> { %2686 = vmatprep.mubr.msk.bf16.mxu1 %vm3226_vm4, %v3225_v35 }
 0x615   : >> { %v1503_v56 = vpop.permute.xlu0 %1502 }
 0x616   : >> { %v1508_v57 = vsel %vm1453_vm5, %v1503_v56, 0 }
 0x617   : >> { %2679 = vmatpush3.bf16.xpose.msra.mxu0 %v1508_v57 }
 0x618   : >> { %2690 = vmatprep.subr.bf16.mxu0 %v3225_v35 }
 0x61e   : >> { %2681 = vmatmul.mubr.msk.bf16.vlgmr.msra.gmra.mxu0 %vm1453_vm5, %v1431_v54 }
 0x61f   : >> { %2692 = vmatprep.mubr.msk.bf16.mxu0 %vm3226_vm4, %v3225_v35  ;;  %2691 = vmatpush3.bf16.msra.mxu0 %v1640_v39 }
 0x620   : > { %2696 = vmatprep.subr.bf16.mxu0 (%p1343_p10), %v3223_v15 }
 0x665   : >> { %v1494_v58 = vpop.f32.mrf.mxu1 }
 0x667   : >> { %v2676_v59 = vpop.f32.mrf.mxu1 }
 0x669   : >> { %v1497_v60 = vpop.f32.mrf.mxu1 }
 0x66b   : >> { %v2677_v61 = vpop.f32.mrf.mxu1 }
 0x66c   : > { %v2908_v61 = vld [vmem:[%s3789_s7 + $0x8] sm:$0xff] (%p1343_p10)  }
 0x6de   : >> { %v1544_v62 = vpop.f32.mrf.mxu0 }
 0x6df   : >> { %v1545_v2 = vadd.f32 %v1544_v62, %v1494_v58  ;;  %v2909_v62 = vld [vmem:[%s3789_s7] sm:$0xff] (%p1343_p10)  }
 0x6e0   : >> { %v2682_v3 = vpop.f32.mrf.mxu0 }
 0x6e1   : >> { %v1551_v4 = vmul.f32 0.35355338, %v1545_v2 }
 0x6e2   : >> { %v1547_v6 = vpop.f32.mrf.mxu0 }
 0x6e3   : >> { %v1548_v7 = vadd.f32 %v1547_v6, %v1497_v60  ;;  %v1554_v8 = vsel %vm1553_vm6, %v1551_v4, -inf }
 0x6e4   : >> { %1555 = vmax.xlane.f32.xlu0 %v1554_v8  ;;  %v2683_v9 = vpop.f32.mrf.mxu0 }
 0x6e5   : >> { %v1552_v10 = vmul.f32 0.35355338, %v1548_v7 }
 0x6e7   : >> { %v1558_v0 = vsel %vm1557_vm7, %v1552_v10, -inf }
 0x6e8   : >> { %1559 = vmax.xlane.f32.xlu1 %v1558_v0  ;;  %v2574_v0 = vld [vmem:[%s3790_s1] ss:$0 sm:$0xff] (%p1343_p10) }
 0x76d   : >> { %v1556_v11 = vpop.xlane.xlu0 %1555 }
 0x76e   : >> { %v1561_v12 = vsub.f32 %v1551_v4, %v1556_v11 }
 0x770   : >> { %v1563_v13 = vmul.f32 1.442695, %v1561_v12 }
 0x771   : >> { %v1560_v14 = vpop.xlane.xlu1 %1559 }
 0x772   : >> { %2900 = vpow2.f32 %v1563_v13  ;;  %v1562_v1 = vsub.f32 %v1552_v10, %v1560_v14  ;;  %v2575_v14 = vld [vmem:[%s3791_s0] ss:$0 sm:$0xff] (%p1343_p10) }
 0x774   : >> { %v1565_v16 = vmul.f32 1.442695, %v1562_v1 }
 0x776   : >> { %2902 = vpow2.f32 %v1565_v16 }
 0x77f   : >> { %v2901_v17 = vpop.eup %2900 }
 0x780   : >> { %v1567_v18 = vsel %vm1553_vm6, %v2901_v17, 0.0 }
 0x781   : >> { %1568 = vadd.xlane.f32.xlu1 %v1567_v18 }
 0x783   : >> { %v2903_v19 = vpop.eup %2902 }
 0x784   : >> { %v1570_v20 = vsel %vm1557_vm7, %v2903_v19, 0.0 }
 0x785   : >> { %1571 = vadd.xlane.f32.xlu1 %v1570_v20 }
 0x796   : >> { %1578 = vrot.lane.b32.xlu1 %v1420_v53, %s3228_s23  ;;  %s3230_s23 = smov (%p1343_p10), 96  }
 0x80a   : >> { %v1569_v21 = vpop.xlane.xlu1 %1568 }
 0x80b   : >> { %2904 = vrcp.f32 %v1569_v21 }
 0x80e   : >> { %v1572_v24 = vpop.xlane.xlu1 %1571 }
 0x80f   : >> { %2906 = vrcp.f32 %v1572_v24 }
 0x812   : >> { %v1579_v26 = vpop.permute.xlu1 %1578 }
 0x813   : >> { %v1588_v27 = vand.u32 %v1586_v25, %v1579_v26 }
 0x815   : >> { %2685 = vmatpush3.bf16.msra.mxu1 %v1588_v27 }
 0x816   : > { %2704 = vmatprep.subr.bf16.mxu1 (%p1343_p10), %v3223_v15 }
 0x818   : >> { %v2905_v28 = vpop.eup %2904 }
 0x819   : >> { %v1575_v35 = vmul.f32 %v2905_v28, %v2901_v17 }
 0x81c   : >> { %v2907_v29 = vpop.eup %2906 }
 0x81d   : >> { %v1576_v36 = vmul.f32 %v2907_v29, %v2903_v19  ;;  %v2576_v19 = vld [vmem:[%s3792_s18] ss:$0 sm:$0xff] (%p1343_p10) }
 0x81f   : >> { %v1577_v37 = vpack.c.bf16 %v1576_v36, %v1575_v35 }
 0x821   : >> { %2687 = vmatmul.mubr.msk.bf16.vlgmr.msra.gmra.mxu1 %vm1553_vm6, %v1577_v37  ;;  %v2910_v37 = vld [vmem:[%s3793_s11 + $0x8] sm:$0xff] (%p1343_p10)  }
 0x822   : > { %2708 = vmatprep.mubr.msk.bf16.mxu1 (%p1343_p10), %vm3224_vm2, %v3223_v15  ;;  %2705 = vmatpush3.bf16.msra.mxu1 (%p1343_p10), %v2910_v37 }
 0x823   : > { %2706 = vmatprep.subr.bf16.mxu1 (%p1343_p10), %v3223_v15 }
 0x826   : > { %2707 = vmatpush3.bf16.msra.mxu1 (%p1343_p10), %v2911_v38 }
 0x827   : > { %2720 = vmatprep.subr.bf16.mxu1 (%p1343_p10), %v3223_v15 }
 0x8e1   : >> { %v1624_v40 = vpop.f32.mrf.mxu1 }
 0x8e3   : >> { %v2688_v41 = vpop.f32.mrf.mxu1 }
 0x8e4   : > { %v1839_v41 = vlaneseq (%p1343_p10) }
 0x8e5   : >> { %v1627_v42 = vpop.f32.mrf.mxu1 }
 0x8e6   : >> { %v1631_v43 = vpack.c.bf16 %v1627_v42, %v1624_v40  ;;  %v3665_v42 = vshrl.u32 (%p1343_p10), %v1839_v41, 7 }
 0x8e7   : >> { %v2689_v44 = vpop.f32.mrf.mxu1 }
 0x8e8   : >> { %2693 = vmatmul.mubr.msk.bf16.vlgmr.msra.gmra.mxu0 %vm1453_vm5, %v1631_v43 }
 0x8e9   : > { %2700 = vmatprep.mubr.msk.bf16.mxu0 (%p1343_p10), %vm3224_vm2, %v3223_v15  ;;  %2697 = vmatpush3.bf16.msra.mxu0 (%p1343_p10), %v2908_v61 }
 0x8ea   : > { %2698 = vmatprep.subr.bf16.mxu0 (%p1343_p10), %v3223_v15 }
 0x8ed   : > { %2699 = vmatpush3.bf16.msra.mxu0 (%p1343_p10), %v2909_v62 }
 0x8ee   : > { %2712 = vmatprep.subr.bf16.mxu0 (%p1343_p10), %v3223_v15 }
 0x9a8   : >> { %v1676_v45 = vpop.f32.mrf.mxu0 }
 0x9a9   : >> { %v1683_v46 = vadd.f32 %v3178_v34, %v1676_v45   ;;  %v1841_v45 = vsub.s32 (%p1343_p10), 0, %v3665_v42 }
 0x9aa   : >> { %v2694_v47 = vpop.f32.mrf.mxu0 }
 0x9ab   : >> { %v3787_v34 = vmov %v1683_v46  ;;  %1345 = sbr.rel (!%p1343_p10) target bundleno = 1232 (0x4d0), region = 252  ;;  %v1685_v51 = vadd.f32 (%p1343_p10), %v1683_v46, %v3548_v63  ;;  %v1851_v46 = vsub.s32 (%p1343_p10), 1, %v3665_v42 }
 0x9ac   : >> { %v1679_v48 = vpop.f32.mrf.mxu0 }
 0x9ad   : >> { %v1684_v49 = vadd.f32 %v3174_v33, %v1679_v48   ;;  %v3639_v63 = vadd.f32 (%p1343_p10), %v2573_v52, %v1685_v51  ;;  %v1835_v48 = vld [vmem:[%s3794_s2] sm:$0xff] (%p1343_p10) }
 0x9ae   : >> { %v2695_v50 = vpop.f32.mrf.mxu0  ;;  %v1842_v51 = vrot.slane (%p1343_p10), %v1835_v48, %v1841_v45 }
 0x9af   : >> { %v3786_v33 = vmov %v1684_v49  ;;  %v1686_v34 = vadd.f32 (%p1343_p10), %v1684_v49, %v3553_v5  ;;  %v1698_v30 = vsel (%p1343_p10), %vm1080_vm0, %v3639_v63, 0.0  ;;  %v1861_v50 = vsub.s32 (%p1343_p10), 2, %v3665_v42 }
 0x9b0   : > { %1699 = vadd.xlane.f32.xlu0 %v1698_v30 }
 0x9b1   : > { %v3641_v5 = vadd.f32 %v2573_v52, %v1686_v34  ;;  %v1852_v52 = vrot.slane %v1835_v48, %v1851_v46  ;;  %v1871_v34 = vsub.s32 3, %v3665_v42  ;;  %v1862_v30 = vrot.slane %v1835_v48, %v1861_v50 }
 0x9b3   : > { %v1701_v31 = vsel %vm1084_vm1, %v3641_v5, 0.0  ;;  %v1872_v61 = vrot.slane %v1835_v48, %v1871_v34 }
 0x9b4   : > { %1702 = vadd.xlane.f32.xlu0 %v1701_v31  ;;  %v1881_v31 = vsub.s32 4, %v3665_v42 }
 0xa39   : > { %v1700_v32 = vpop.xlane.xlu0 %1699 }
 0xa3a   : > { %v1704_v33 = vmul.f32 0.03125, %v1700_v32 }
 0xa3c   : > { %v1706_v53 = vsub.f32 %v3639_v63, %v1704_v33 }
 0xa3d   : > { %v1703_v54 = vpop.xlane.xlu0 %1702 }
 0xa3e   : > { %v1705_v55 = vmul.f32 0.03125, %v1703_v54  ;;  %v1708_v56 = vmul.f32 %v1706_v53, %v1706_v53  ;;  %v1891_v54 = vsub.s32 5, %v3665_v42 }
 0xa40   : > { %v1707_v57 = vsub.f32 %v3641_v5, %v1705_v55  ;;  %v1710_v58 = vsel %vm1080_vm0, %v1708_v56, 0.0 }
 0xa41   : > { %1711 = vadd.xlane.f32.xlu1 %v1710_v58 }
 0xa42   : > { %v1709_v59 = vmul.f32 %v1707_v57, %v1707_v57 }
 0xa44   : > { %v1713_v60 = vsel %vm1084_vm1, %v1709_v59, 0.0 }
 0xa45   : > { %1714 = vadd.xlane.f32.xlu1 %v1713_v60 }
 0xaca   : > { %v1712_v2 = vpop.xlane.xlu1 %1711 }
 0xacb   : > { %v1716_v3 = vmul.f32 0.03125, %v1712_v2 }
 0xacd   : > { %v1718_v4 = vadd.f32 1e-05, %v1716_v3 }
 0xace   : > { %v1715_v6 = vpop.xlane.xlu1 %1714 }
 0xacf   : > { %2918 = vrsqrt.f32 %v1718_v4  ;;  %v1717_v7 = vmul.f32 0.03125, %v1715_v6  ;;  %v1882_v6 = vrot.slane %v1835_v48, %v1881_v31 }
 0xad1   : > { %v1719_v8 = vadd.f32 1e-05, %v1717_v7  ;;  %v1901_v7 = vsub.s32 6, %v3665_v42 }
 0xad3   : > { %2920 = vrsqrt.f32 %v1719_v8 }
 0xadc   : > { %v2919_v9 = vpop.eup %2918 }
 0xadd   : > { %v1722_v10 = vmul.f32 %v2919_v9, %v1706_v53 }
 0xadf   : > { %v1730_v13 = vmul.f32 %v2574_v0, %v1722_v10 }
 0xae0   : > { %v2921_v11 = vpop.eup %2920 }
 0xae1   : > { %v1723_v12 = vmul.f32 %v2921_v11, %v1707_v57  ;;  %v1738_v16 = vadd.f32 %v2575_v14, %v1730_v13  ;;  %v1911_v11 = vsub.s32 7, %v3665_v42 }
 0xae3   : > { %v1731_v1 = vmul.f32 %v2574_v0, %v1723_v12 }
 0xae5   : > { %v1739_v17 = vadd.f32 %v2575_v14, %v1731_v1 }
 0xae7   : > { %v1740_v18 = vpack.c.bf16 %v1739_v17, %v1738_v16  ;;  %v1892_v16 = vrot.slane %v1835_v48, %v1891_v54 }
 0xae9   : > { %2701 = vmatmul.mubr.msk.bf16.vlgmr.msra.gmra.mxu0 %vm1080_vm0, %v1740_v18 }
 0xaea   : > { %2716 = vmatprep.mubr.msk.bf16.mxu0 %vm3224_vm2, %v3223_v15 }
 0xba9   : > { %v1801_v20 = vpop.f32.mrf.mxu0 }
 0xbaa   : > { %v1802_v21 = vadd.f32 %v2576_v19, %v1801_v20 }
 0xbab   : > { %v2702_v22 = vpop.f32.mrf.mxu0 }
 0xbac   : > { %v2580_v23 = vmul.f32 -1.442695, %v1802_v21  ;;  %v1902_v22 = vrot.slane %v1835_v48, %v1901_v7 }
 0xbad   : > { %v1804_v24 = vpop.f32.mrf.mxu0 }
 0xbae   : > { %2922 = vpow2.f32 %v2580_v23  ;;  %v1805_v25 = vadd.f32 %v2576_v19, %v1804_v24  ;;  %v1836_v23 = vld [vmem:[%s3794_s2 + $0x8] sm:$0x7f] }
 0xbaf   : > { %v2703_v26 = vpop.f32.mrf.mxu0 }
 0xbb0   : > { %v2581_v27 = vmul.f32 -1.442695, %v1805_v25 }
 0xbb2   : > { %2924 = vpow2.f32 %v2581_v27 }
 0xbbb   : > { %v2923_v28 = vpop.eup %2922 }
 0xbbc   : > { %v1814_v29 = vadd.f32 1.0, %v2923_v28 }
 0xbbe   : > { %2926 = vrcp.f32 %v1814_v29 }
 0xbbf   : > { %v2925_v35 = vpop.eup %2924 }
 0xbc0   : > { %v1815_v36 = vadd.f32 1.0, %v2925_v35  ;;  %v1912_v35 = vrot.slane %v1835_v48, %v1911_v11  ;;  %v1962_v11 = vrot.slane %v1836_v23, %v1881_v31  ;;  %v1982_v31 = vrot.slane %v1836_v23, %v1901_v7 }
 0xbc2   : > { %2928 = vrcp.f32 %v1815_v36 }
 0xbcb   : > { %v2927_v39 = vpop.eup %2926 }
 0xbcc   : > { %1822 = vrot.lane.b32.xlu0 %v2927_v39, %s3230_s23 }
 0xbcf   : > { %v2929_v40 = vpop.eup %2928 }
 0xbd0   : > { %1824 = vrot.lane.b32.xlu1 %v2929_v40, %s3230_s23 }
 0xc3e   : > { %v1823_v43 = vpop.permute.xlu0 %1822 }
 0xc3f   : > { %v1828_v44 = vmul.f32 %v1823_v43, %v1802_v21  ;;  %v1922_v43 = vrot.slane %v1836_v23, %v1841_v45 }
 0xc41   : > { %1833 = vst.msk [vmem:[#allocation2 + $0x8] sm:$0xff] %vm1080_vm0, %v1828_v44 }
 0xc42   : > { %v1825_v47 = vpop.permute.xlu1 %1824 }
 0xc43   : > { %v1829_v49 = vmul.f32 %v1825_v47, %v1805_v25 }
 0xc45   : > { %1834 = vst.msk [vmem:[#allocation2 + $0x10] sm:$0x1f] %vm1084_vm1, %v1829_v49 }
 0xc48   : > { %v1837_v32 = vld [vmem:[#allocation2 + $0x1] sm:$0xff]  ;;  %v1838_v33 = vld [vmem:[#allocation2 + $0x9] sm:$0x1f] }
 0xc49   : > { %v1847_v53 = vld [vmem:[#allocation2 + $0x2] sm:$0xff]  ;;  %v1843_v55 = vmul.f32 %v1842_v51, %v1837_v32  ;;  %v1844_v56 = vmul.f32 %v1842_v51, %v1838_v33  ;;  %v1848_v57 = vld [vmem:[#allocation2 + $0xa] sm:$0x1f]  ;;  %v1932_v32 = vrot.slane %v1836_v23, %v1851_v46 }
 0xc4a   : > { %v1853_v58 = vmul.f32 %v1852_v52, %v1847_v53  ;;  %v1857_v59 = vld [vmem:[#allocation2 + $0x3] sm:$0xff]  ;;  %v1858_v60 = vld [vmem:[#allocation2 + $0xb] sm:$0x1f]  ;;  %v1854_v62 = vmul.f32 %v1852_v52, %v1848_v57 }
 0xc4b   : > { %v1867_v2 = vld [vmem:[#allocation2 + $0x4] sm:$0xff]  ;;  %v1863_v4 = vmul.f32 %v1862_v30, %v1857_v59  ;;  %v1864_v9 = vmul.f32 %v1862_v30, %v1858_v60 }
 0xc4c   : > { %v1855_v3 = vadd.f32 %v1853_v58, %v1843_v55  ;;  %v1856_v8 = vadd.f32 %v1854_v62, %v1844_v56  ;;  %v1868_v10 = vld [vmem:[#allocation2 + $0xc] sm:$0x1f]  ;;  %v1873_v13 = vmul.f32 %v1872_v61, %v1867_v2  ;;  %v1918_v30 = vld [vmem:[#allocation2 + $0x11] sm:$0x1f]  ;;  %v1942_v58 = vrot.slane %v1836_v23, %v1861_v50 }
 0xc4d   : > { %v1877_v0 = vld [vmem:[#allocation2 + $0x5] sm:$0xff]  ;;  %v1874_v14 = vmul.f32 %v1872_v61, %v1868_v10  ;;  %v1878_v1 = vld [vmem:[#allocation2 + $0xd] sm:$0x1f]  ;;  %v1928_v57 = vld [vmem:[#allocation2 + $0x12] sm:$0x1f]  ;;  %v1924_v45 = vmul.f32 %v1922_v43, %v1918_v30 }
 0xc4e   : > { %v1865_v12 = vadd.f32 %v1863_v4, %v1855_v3  ;;  %v1866_v17 = vadd.f32 %v1864_v9, %v1856_v8  ;;  %v1887_v18 = vld [vmem:[#allocation2 + $0x6] sm:$0xff]  ;;  %v1883_v20 = vmul.f32 %v1882_v6, %v1877_v0  ;;  %v1888_v21 = vld [vmem:[#allocation2 + $0xe] sm:$0x1f]  ;;  %v1884_v25 = vmul.f32 %v1882_v6, %v1878_v1  ;;  %v1938_v2 = vld [vmem:[#allocation2 + $0x13] sm:$0x1f] }
 0xc4f   : > { %v1897_v26 = vld [vmem:[#allocation2 + $0x7] sm:$0xff]  ;;  %v1893_v28 = vmul.f32 %v1892_v16, %v1887_v18  ;;  %v1898_v29 = vld [vmem:[#allocation2 + $0xf] sm:$0x1f]  ;;  %v1894_v37 = vmul.f32 %v1892_v16, %v1888_v21  ;;  %v1952_v3 = vrot.slane %v1836_v23, %v1871_v34  ;;  %v1934_v46 = vmul.f32 %v1932_v32, %v1928_v57  ;;  %v1948_v10 = vld [vmem:[#allocation2 + $0x14] sm:$0x1f] }
 0xc50   : > { %v1875_v19 = vadd.f32 %v1873_v13, %v1865_v12  ;;  %v1876_v24 = vadd.f32 %v1874_v14, %v1866_v17  ;;  %v1907_v38 = vld [vmem:[#allocation2 + $0x8] sm:$0xff]  ;;  %v1903_v40 = vmul.f32 %v1902_v22, %v1897_v26  ;;  %v1908_v41 = vld [vmem:[#allocation2 + $0x10] sm:$0x1f]  ;;  %v1904_v47 = vmul.f32 %v1902_v22, %v1898_v29  ;;  %v1958_v0 = vld [vmem:[#allocation2 + $0x15] sm:$0x1f] }
 0xc51   : > { %v1917_v49 = vld [vmem:[#allocation2 + $0x9] sm:$0xff]  ;;  %v1913_v52 = vmul.f32 %v1912_v35, %v1907_v38  ;;  %v1914_v53 = vmul.f32 %v1912_v35, %v1908_v41  ;;  %v1944_v12 = vmul.f32 %v1942_v58, %v1938_v2  ;;  %v1968_v16 = vld [vmem:[#allocation2 + $0x16] sm:$0x1f]  ;;  %v1972_v17 = vrot.slane %v1836_v23, %v1891_v54 }
 0xc52   : > { %v1885_v27 = vadd.f32 %v1883_v20, %v1875_v19  ;;  %v1886_v36 = vadd.f32 %v1884_v25, %v1876_v24  ;;  %v1927_v55 = vld [vmem:[#allocation2 + $0xa] sm:$0xff]  ;;  %v1923_v56 = vmul.f32 %v1922_v43, %v1917_v49  ;;  %v1954_v18 = vmul.f32 %v1952_v3, %v1948_v10  ;;  %v1978_v24 = vld [vmem:[#allocation2 + $0x17] sm:$0x1f] }
 0xc53   : > { %v1937_v60 = vld [vmem:[#allocation2 + $0xb] sm:$0xff]  ;;  %v1933_v62 = vmul.f32 %v1932_v32, %v1927_v55  ;;  %v1964_v19 = vmul.f32 %v1962_v11, %v1958_v0  ;;  %v1974_v26 = vmul.f32 %v1972_v17, %v1968_v16 }
 0xc54   : > { %v1895_v39 = vadd.f32 %v1893_v28, %v1885_v27  ;;  %v1896_v44 = vadd.f32 %v1894_v37, %v1886_v36  ;;  %v1947_v6 = vld [vmem:[#allocation2 + $0xc] sm:$0xff]  ;;  %v1943_v9 = vmul.f32 %v1942_v58, %v1937_v60  ;;  %v1984_v36 = vmul.f32 %v1982_v31, %v1978_v24  ;;  %v2590_v24 = vld [vmem:[#allocation7] ss:$0 sm:$0xff] }
 0xc55   : > { %v1957_v13 = vld [vmem:[#allocation2 + $0xd] sm:$0xff]  ;;  %v1953_v1 = vmul.f32 %v1952_v3, %v1947_v6 }
 0xc56   : > { %v1905_v51 = vadd.f32 %v1903_v40, %v1895_v39  ;;  %v1906_v33 = vadd.f32 %v1904_v47, %v1896_v44  ;;  %v1967_v20 = vld [vmem:[#allocation2 + $0xe] sm:$0xff]  ;;  %v1963_v22 = vmul.f32 %v1962_v11, %v1957_v13  ;;  %v2582_v39 = vld [vmem:[%s3795_s10] ss:$0 sm:$0xff] }
 0xc57   : > { %v1977_v27 = vld [vmem:[#allocation2 + $0xf] sm:$0xff]  ;;  %v1973_v29 = vmul.f32 %v1972_v17, %v1967_v20 }
 0xc58   : > { %v1915_v48 = vadd.f32 %v1913_v52, %v1905_v51  ;;  %v1916_v59 = vadd.f32 %v1914_v53, %v1906_v33  ;;  %v1983_v54 = vmul.f32 %v1982_v31, %v1977_v27  ;;  %v2912_v11 = vld [vmem:[%s3796_s15 + $0x8] sm:$0xff]  }
 0xc59   : > { %2713 = vmatpush3.bf16.msra.mxu0 %v2912_v11 }
 0xc5a   : > { %v1925_v61 = vadd.f32 %v1923_v56, %v1915_v48  ;;  %v1926_v4 = vadd.f32 %v1924_v45, %v1916_v59  ;;  %v2588_v48 = vld [vmem:[#allocation3] ss:$0 sm:$0xff]  ;;  %2714 = vmatprep.subr.bf16.mxu0 %v3223_v15 }
 0xc5c   : > { %v1935_v8 = vadd.f32 %v1933_v62, %v1925_v61  ;;  %v1936_v50 = vadd.f32 %v1934_v46, %v1926_v4 }
 0xc5e   : > { %v1945_v14 = vadd.f32 %v1943_v9, %v1935_v8  ;;  %v1946_v34 = vadd.f32 %v1944_v12, %v1936_v50  ;;  %v2913_v50 = vld [vmem:[%s3796_s15] sm:$0xff]  }
 0xc5f   : > { %2715 = vmatpush3.bf16.msra.mxu0 %v2913_v50 }
 0xc60   : > { %v1955_v21 = vadd.f32 %v1953_v1, %v1945_v14  ;;  %v1956_v25 = vadd.f32 %v1954_v18, %v1946_v34 }
 0xc62   : > { %v1965_v28 = vadd.f32 %v1963_v22, %v1955_v21  ;;  %v1966_v35 = vadd.f32 %v1964_v19, %v1956_v25  ;;  %v2589_v19 = vld [vmem:[#allocation5] ss:$0 sm:$0xff] }
 0xc64   : > { %v1975_v37 = vadd.f32 %v1973_v29, %v1965_v28  ;;  %v1976_v38 = vadd.f32 %v1974_v26, %v1966_v35  ;;  %v2914_v28 = vld [vmem:[%s3797_s22 + $0x18] sm:$0xff]   ;;  %v2915_v29 = vld [vmem:[%s3797_s22 + $0x10] sm:$0xff]   ;;  %v2916_v35 = vld [vmem:[%s3797_s22 + $0x8] sm:$0xff]  }
 0xc66   : > { %v1985_v40 = vadd.f32 %v1983_v54, %v1975_v37  ;;  %v1986_v41 = vadd.f32 %v1984_v36, %v1976_v38  ;;  %v2917_v36 = vld [vmem:[%s3797_s22] sm:$0xff]  }
 0xc67   : > { %v2591_v37 = vld [vmem:[#allocation8] ss:$0 sm:$0xff] }
 0xc68   : > { %v1994_v43 = vadd.f32 %v2582_v39, %v1985_v40  ;;  %v1995_v44 = vadd.f32 %v2582_v39, %v1986_v41 }
 0xc6a   : > { %v2583_v47 = vmul.f32 -1.442695, %v1994_v43  ;;  %v2584_v49 = vmul.f32 -1.442695, %v1995_v44 }
 0xc6c   : > { %2930 = vpow2.f32 %v2583_v47 }
 0xc6d   : > { %2932 = vpow2.f32 %v2584_v49 }
 0xc79   : > { %v2931_v42 = vpop.eup %2930 }
 0xc7a   : > { %v2933_v7 = vpop.eup %2932  ;;  %v2002_v23 = vadd.f32 1.0, %v2931_v42 }
 0xc7b   : > { %v2003_v51 = vadd.f32 1.0, %v2933_v7 }
 0xc7c   : > { %2934 = vrcp.f32 %v2002_v23 }
 0xc7d   : > { %2936 = vrcp.f32 %v2003_v51 }
 0xc89   : > { %v2935_v52 = vpop.eup %2934 }
 0xc8a   : > { %v2937_v30 = vpop.eup %2936  ;;  %v2008_v32 = vmul.f32 %v2935_v52, %v1994_v43 }
 0xc8b   : > { %v2009_v33 = vmul.f32 %v2937_v30, %v1995_v44 }
 0xc8d   : > { %v2010_v53 = vpack.c.bf16 %v2009_v33, %v2008_v32  ;;  %v2597_v33 = vld [vmem:[#allocation10] ss:$0 sm:$0xff] }
 0xc8f   : > { %2709 = vmatmul.mubr.msk.bf16.vlgmr.msra.gmra.mxu1 %vm1080_vm0, %v2010_v53 }
 0xc90   : > { %2728 = vmatprep.mubr.msk.bf16.mxu1 %vm3224_vm2, %v3223_v15  ;;  %2721 = vmatpush3.bf16.msra.mxu1 %v2914_v28 }
 0xc91   : > { %2722 = vmatprep.subr.bf16.mxu1 %v3223_v15 }
 0xc94   : > { %2723 = vmatpush3.bf16.msra.mxu1 %v2915_v29 }
 0xc95   : > { %2724 = vmatprep.subr.bf16.mxu1 %v3223_v15 }
 0xc98   : > { %2725 = vmatpush3.bf16.msra.mxu1 %v2916_v35 }
 0xc99   : > { %2726 = vmatprep.subr.bf16.mxu1 %v3223_v15 }
 0xc9c   : > { %2727 = vmatpush3.bf16.msra.mxu1 %v2917_v36 }
 0xd4f   : > { %v2064_v55 = vpop.f32.mrf.mxu1 }
 0xd50   : > { %v2071_v56 = vadd.f32 %v2064_v55, %v3639_v63 }
 0xd51   : > { %v2710_v57 = vpop.f32.mrf.mxu1 }
 0xd52   : > { %v3708_v58 = vadd.f32 %v2588_v48, %v2071_v56 }
 0xd53   : > { %v2067_v59 = vpop.f32.mrf.mxu1 }
 0xd54   : > { %v2072_v45 = vadd.f32 %v2067_v59, %v3641_v5  ;;  %v2084_v60 = vsel %vm1080_vm0, %v3708_v58, 0.0 }
 0xd55   : > { %2085 = vadd.xlane.f32.xlu1 %v2084_v60  ;;  %v2711_v61 = vpop.f32.mrf.mxu1 }
 0xd56   : > { %v3713_v62 = vadd.f32 %v2588_v48, %v2072_v45 }
 0xd58   : > { %v2087_v2 = vsel %vm1084_vm1, %v3713_v62, 0.0 }
 0xd59   : > { %2088 = vadd.xlane.f32.xlu0 %v2087_v2 }
 0xdde   : > { %v2086_v63 = vpop.xlane.xlu1 %2085 }
 0xddf   : > { %v2090_v3 = vmul.f32 0.03125, %v2086_v63 }
 0xde1   : > { %v2092_v4 = vsub.f32 %v3708_v58, %v2090_v3 }
 0xde2   : > { %v2089_v46 = vpop.xlane.xlu0 %2088 }
 0xde3   : > { %v2091_v6 = vmul.f32 0.03125, %v2089_v46  ;;  %v2094_v5 = vmul.f32 %v2092_v4, %v2092_v4 }
 0xde5   : > { %v2093_v8 = vsub.f32 %v3713_v62, %v2091_v6  ;;  %v2096_v9 = vsel %vm1080_vm0, %v2094_v5, 0.0 }
 0xde6   : > { %2097 = vadd.xlane.f32.xlu0 %v2096_v9 }
 0xde7   : > { %v2095_v10 = vmul.f32 %v2093_v8, %v2093_v8 }
 0xde9   : > { %v2099_v0 = vsel %vm1084_vm1, %v2095_v10, 0.0 }
 0xdea   : > { %2100 = vadd.xlane.f32.xlu1 %v2099_v0 }
 0xe6f   : > { %v2098_v12 = vpop.xlane.xlu0 %2097 }
 0xe70   : > { %v2102_v13 = vmul.f32 0.03125, %v2098_v12 }
 0xe72   : > { %v2104_v14 = vadd.f32 1e-05, %v2102_v13 }
 0xe73   : > { %v2101_v1 = vpop.xlane.xlu1 %2100 }
 0xe74   : > { %2938 = vrsqrt.f32 %v2104_v14  ;;  %v2103_v16 = vmul.f32 0.03125, %v2101_v1 }
 0xe76   : > { %v2105_v17 = vadd.f32 1e-05, %v2103_v16 }
 0xe78   : > { %2940 = vrsqrt.f32 %v2105_v17  ;;  %v2603_v17 = vld [vmem:[#allocation11] ss:$0 sm:$0xff] }
 0xe81   : > { %v2939_v34 = vpop.eup %2938 }
 0xe82   : > { %v2108_v18 = vmul.f32 %v2939_v34, %v2092_v4 }
 0xe84   : > { %v2116_v22 = vmul.f32 %v2589_v19, %v2108_v18  ;;  %v2604_v18 = vld [vmem:[#allocation13] ss:$0 sm:$0xff] }
 0xe85   : > { %v2941_v20 = vpop.eup %2940 }
 0xe86   : > { %v2109_v21 = vmul.f32 %v2941_v20, %v2093_v8  ;;  %v2124_v25 = vadd.f32 %v2590_v24, %v2116_v22 }
 0xe88   : > { %v2117_v31 = vmul.f32 %v2589_v19, %v2109_v21 }
 0xe8a   : > { %v2125_v26 = vadd.f32 %v2590_v24, %v2117_v31 }
 0xe8c   : > { %v2126_v27 = vpack.c.bf16 %v2125_v26, %v2124_v25 }
 0xe8e   : > { %2717 = vmatmul.mubr.msk.bf16.vlgmr.msra.gmra.mxu0 %vm1080_vm0, %v2126_v27 }
 0xf4e   : > { %v2187_v54 = vpop.f32.mrf.mxu0 }
 0xf4f   : > { %v2188_v38 = vadd.f32 %v2591_v37, %v2187_v54 }
 0xf50   : > { %v2718_v39 = vpop.f32.mrf.mxu0 }
 0xf51   : > { %v2595_v40 = vmul.f32 -1.442695, %v2188_v38 }
 0xf52   : > { %v2190_v41 = vpop.f32.mrf.mxu0 }
 0xf53   : > { %2942 = vpow2.f32 %v2595_v40  ;;  %v2191_v43 = vadd.f32 %v2591_v37, %v2190_v41 }
 0xf54   : > { %v2719_v44 = vpop.f32.mrf.mxu0 }
 0xf55   : > { %v2596_v47 = vmul.f32 -1.442695, %v2191_v43 }
 0xf57   : > { %2944 = vpow2.f32 %v2596_v47 }
 0xf60   : > { %v2943_v49 = vpop.eup %2942 }
 0xf61   : > { %v2200_v42 = vadd.f32 1.0, %v2943_v49 }
 0xf63   : > { %2946 = vrcp.f32 %v2200_v42 }
 0xf64   : > { %v2945_v7 = vpop.eup %2944 }
 0xf65   : > { %v2201_v23 = vadd.f32 1.0, %v2945_v7 }
 0xf67   : > { %2948 = vrcp.f32 %v2201_v23 }
 0xf70   : > { %v2947_v15 = vpop.eup %2946 }
 0xf71   : > { %v2206_v52 = vmul.f32 %v2947_v15, %v2188_v38 }
 0xf74   : > { %v2949_v51 = vpop.eup %2948 }
 0xf75   : > { %v2207_v30 = vmul.f32 %v2949_v51, %v2191_v43 }
 0xf77   : > { %v2208_v32 = vpack.c.bf16 %v2207_v30, %v2206_v52 }
 0xf79   : > { %2729 = vmatmul.mubr.msk.bf16.vlgmr.msra.gmra.mxu1 %vm1247_vm3, %v2208_v32 }
0x1039   : > { %v2285_v53 = vpop.f32.mrf.mxu1 }
0x103a   : > { %v2286_v55 = vadd.f32 %v2597_v33, %v2285_v53 }
0x103b   : > { %v2730_v48 = vpop.f32.mrf.mxu1 }
0x103c   : > { %v2292_v56 = vmul.f32 0.5, %v2286_v55 }
0x103d   : > { %v2288_v57 = vpop.f32.mrf.mxu1 }
0x103e   : > { %v2289_v59 = vadd.f32 %v2597_v33, %v2288_v57  ;;  %v2294_v45 = vadd.f32 %v2292_v56, %v3708_v58 }
0x103f   : > { %v2731_v60 = vpop.f32.mrf.mxu1 }
0x1040   : > { %v2293_v61 = vmul.f32 0.5, %v2289_v59  ;;  %v2298_v2 = vsel %vm1080_vm0, %v2294_v45, 0.0 }
0x1041   : > { %2299 = vadd.xlane.f32.xlu0 %v2298_v2 }
0x1042   : > { %v2295_v63 = vadd.f32 %v2293_v61, %v3713_v62 }
0x1044   : > { %v2301_v3 = vsel %vm1084_vm1, %v2295_v63, 0.0 }
0x1045   : > { %2302 = vadd.xlane.f32.xlu1 %v2301_v3 }
0x10ca   : > { %v2300_v4 = vpop.xlane.xlu0 %2299 }
0x10cb   : > { %v2304_v46 = vmul.f32 0.03125, %v2300_v4 }
0x10cd   : > { %v2306_v6 = vsub.f32 %v2294_v45, %v2304_v46 }
0x10ce   : > { %v2303_v5 = vpop.xlane.xlu1 %2302 }
0x10cf   : > { %v2305_v8 = vmul.f32 0.03125, %v2303_v5  ;;  %v2308_v9 = vmul.f32 %v2306_v6, %v2306_v6 }
0x10d1   : > { %v2307_v10 = vsub.f32 %v2295_v63, %v2305_v8  ;;  %v2310_v0 = vsel %vm1080_vm0, %v2308_v9, 0.0 }
0x10d2   : > { %2311 = vadd.xlane.f32.xlu0 %v2310_v0 }
0x10d3   : > { %v2309_v58 = vmul.f32 %v2307_v10, %v2307_v10 }
0x10d5   : > { %v2313_v11 = vsel %vm1084_vm1, %v2309_v58, 0.0 }
0x10d6   : > { %2314 = vadd.xlane.f32.xlu1 %v2313_v11 }
0x115b   : > { %v2312_v50 = vpop.xlane.xlu0 %2311 }
0x115c   : > { %v2316_v62 = vmul.f32 0.03125, %v2312_v50 }
0x115e   : > { %v2318_v12 = vadd.f32 1e-05, %v2316_v62 }
0x115f   : > { %v2315_v13 = vpop.xlane.xlu1 %2314 }
0x1160   : > { %2950 = vrsqrt.f32 %v2318_v12  ;;  %v2317_v14 = vmul.f32 0.03125, %v2315_v13 }
0x1162   : > { %v2319_v1 = vadd.f32 1e-05, %v2317_v14 }
0x1164   : > { %2952 = vrsqrt.f32 %v2319_v1 }
0x116d   : > { %v2951_v16 = vpop.eup %2950 }
0x116e   : > { %v2322_v34 = vmul.f32 %v2951_v16, %v2306_v6 }
0x1170   : > { %v2330_v19 = vmul.f32 %v2603_v17, %v2322_v34 }
0x1171   : > { %v2953_v20 = vpop.eup %2952 }
0x1172   : > { %v2338_v21 = vadd.f32 %v2604_v18, %v2330_v19  ;;  %v2323_v22 = vmul.f32 %v2953_v20, %v2307_v10 }
0x1174   : > { %2340 = vst.msk [vmem:[%s3511_s26] sm:$0xff] %vm1080_vm0, %v2338_v21  ;;  %v2331_v24 = vmul.f32 %v2603_v17, %v2323_v22 }
0x1176   : > { %v2339_v31 = vadd.f32 %v2604_v18, %v2331_v24 }
0x1178   : > { %2341 = vst.msk [vmem:[%s3511_s26 + $0x8] sm:$0x1f] %vm1084_vm1, %v2339_v31 }
0x1179 PF: > { %s79_s28 = sadd.s32 1, %s3170_s28  }
0x117a   : > { %p76_p11 = scmp.ge.s32.totalorder %s79_s28, 4  }
0x117c   :  { %78 = sbr.rel (!%p76_p11) target bundleno = 56 (0x38), region = 263 }
0x1181   :  { %2363 = vsyncpa [#allocation4], 1 }
0x1182   :  { %2365 = vsyncpa [#allocation4 + $0x1], 1 }
0x1183   :  { %2366 = vsyncpa [#allocation6], 1 }
0x1184   :  { %2367 = vsyncpa [#allocation9], 1 }
0x1185   :  { %2368 = vsyncpa [#allocation12], 1 }

</bundles_post_ra>
